<compile_context>
chip_gen: v6e
topology: v6e:2x2x1
jax: 0.10.0
libtpu: 0.0.40
codegen_flags: <defaults>
</compile_context>

<pallas_src>
import functools

import jax
import jax.numpy as jnp
from jax.experimental import pallas as pl
from jax.experimental.pallas import tpu as pltpu


def _round_up(x, m):
    return ((x + m - 1) // m) * m


# ----------------------------- in-kernel helpers -----------------------------

def _relu(x):
    return jnp.maximum(x, 0.0)


def _hardswish(x):
    return x * jnp.clip(x + 3.0, 0.0, 6.0) * (1.0 / 6.0)


def _hardsigmoid(x):
    return jnp.clip(x + 3.0, 0.0, 6.0) * (1.0 / 6.0)


def _cmatmul(x, w):
    """Channel-mixing linear: x (B, L, Cin) @ w (Cin, Cout) -> (B, L, Cout) f32.

    The (B, L, Cin) -> (B*L, Cin) reshape only merges leading dims (L == one
    sublane tile) so it is a free relayout; the MXU sees a B*L-row LHS.
    Activations are cast to the weight dtype (bf16) at the matmul input;
    accumulation stays f32 via preferred_element_type.
    """
    B, L, Ci = x.shape
    y = jnp.dot(x.reshape(B * L, Ci).astype(w.dtype), w,
                preferred_element_type=jnp.float32)
    return y.reshape(B, L, w.shape[1])


def _flat_linear(x, w, b):
    """PyTorch flatten + Linear as ONE K = L*C matmul.

    x: (B, L, C) channel-last.  PyTorch flattens its (B, C, L) tensor with index
    c*L + l; the wrapper already permuted w's rows to l*C + c order, so a plain
    row-major flatten of the channel-last tensor matches exactly.
    The bf16 cast happens BEFORE the reshape: the sublane->lane merge is a
    relayout copy (not a view), so casting first halves the copied bytes.
    """
    B, L, C = x.shape
    y = jnp.dot(x.astype(w.dtype).reshape(B, L * C), w,
                preferred_element_type=jnp.float32)
    return y + b


def _ir_tail(yexp, x_res, p, act, setype):
    """Depthwise + SE + project part of InvertedResidual1d (channel-last).

    yexp : (B, L, Cpad) output of expand (+ folded-BN bias + act), pad channels 0.
    x_res: (B, L, Cin) block input (residual branch).
    """
    B, L, C = yexp.shape

    # depthwise Linear over L (shared across channels) + folded BN + act, as
    # L=8 broadcast multiply-adds on the VPU (contraction length 8 is far too
    # small to feed the MXU usefully).  Wd[k, l, c] == torch_Wd[l, k] * d_scale[c]
    # (per-channel BN scale folded in; pad channels are exact zeros).
    # TODO(synk): if a bundle dump still shows VALU as the binding slot, stage
    # yexp in a VMEM scratch ref and read rows via stride-0 sublane loads.
    wd = p['Wd'][...]                              # (L_in, L_out, Cpad), f32
    z = wd[0][None] * yexp[:, 0:1, :]
    for k in range(1, L):
        z = z + wd[k][None] * yexp[:, k:k + 1, :]
    z = act(z + p['d_bias'][...])

    # squeeze-excitation: pool over L, two channel FCs, hardsigmoid gate.
    if setype == 'avg':
        s = jnp.mean(z, axis=1)                    # (B, Cpad)
    else:
        s = jnp.max(z, axis=1)
    w1 = p['W1'][...]
    s = _relu(jnp.dot(s.astype(w1.dtype), w1,
                      preferred_element_type=jnp.float32) + p['b1'][...])
    w2 = p['W2'][...]
    s = jnp.dot(s.astype(w2.dtype), w2,
                preferred_element_type=jnp.float32) + p['b2'][...]
    s = _hardsigmoid(s)
    z = z * s[:, None, :]                          # pad channels stay 0 (z==0 there)

    # project: Linear over channels (folded BN scale) + bias + residual.
    out = _cmatmul(z, p['Wp'][...]) + p['p_bias'][...]
    if x_res.shape[-1] == out.shape[-1]:           # use_res_connect
        out = out + x_res
    return out


# ------------------------------- the kernel -------------------------------

def _forward_kernel(treedef, setypes, *refs):
    x_ref, va_ref = refs[0], refs[1]
    param_refs = refs[2:-1]
    out_ref = refs[-1]

    # Lazily unflatten the parameter *refs*; each weight is loaded at its use
    # site so vreg pressure stays bounded by one stage of the network.
    P = jax.tree_util.tree_unflatten(treedef, list(param_refs))

    x = x_ref[...]                                 # (Bb, L, nb_vect) f32

    # first layer: Linear(nb_vect -> 64) over channels, BN scale folded into W.
    y = _cmatmul(x, P['fl']['W'][...]) + P['fl']['bias'][...]

    # trunk: ReLU inverted-residual block (expand channels padded to 256 lanes).
    t = P['trunk0']
    e = _relu(_cmatmul(y, t['We'][...]) + t['e_bias'][...])
    y = _ir_tail(e, y, t, _relu, setypes['trunk0'])
    # TODO(synk): F.dropout is training-only; inference mode -> identity.

    # Heads: the two hardswish IR blocks share the same LHS (y), so their
    # expand matmuls are fused into one (B*L, 64) @ (64, 2*256) MXU pass.
    # Each head occupies a full 256-channel (2-lane-tile) slab, so the slices
    # below are 128-aligned views, not relayout copies.
    he = _hardswish(_cmatmul(y, P['heads_We'][...]) + P['heads_e_bias'][...])
    cpad = P['pi_ir']['Wp'].shape[0]
    hp = _ir_tail(he[:, :, :cpad], y, P['pi_ir'], _hardswish, setypes['pi_ir'])
    hv = _ir_tail(he[:, :, cpad:2 * cpad], y, P['v_ir'], _hardswish,
                  setypes['v_ir'])

    # PI head: flatten -> Linear -> ReLU -> Linear.
    pi = _relu(_flat_linear(hp, P['pi_fc1_W'][...], P['pi_fc1_b'][...]))
    w = P['pi_fc2_W'][...]
    pi = jnp.dot(pi.astype(w.dtype), w,
                 preferred_element_type=jnp.float32) + P['pi_fc2_b'][...]

    # V head: flatten -> Linear -> ReLU -> (Np x Np, Np=2) Linear as VPU FMAs
    # (a K=2, N=2 MXU call is nearly pure weight-push/pop latency).
    v1 = _relu(_flat_linear(hv, P['v_fc1_W'][...], P['v_fc1_b'][...]))
    w2 = P['v_fc2_W'][...]                         # (Np, Np) f32
    v = P['v_fc2_b'][...]
    for i in range(w2.shape[0]):
        v = v + v1[:, i:i + 1] * w2[i:i + 1, :]

    # mask invalid actions, log_softmax over actions, tanh(v) -- all f32.
    valid = va_ref[...] != 0
    pi = jnp.where(valid, pi, jnp.float32(-1.0e8))
    m = jnp.max(pi, axis=1, keepdims=True)
    lse = m + jnp.log(jnp.sum(jnp.exp(pi - m), axis=1, keepdims=True))
    log_pi = pi - lse
    v = jnp.tanh(v)

    # single lane-dense output: [log_pi | v | zero pad] -> one unmasked
    # 128-lane store and a single writeback DMA stream.
    Bb, A = log_pi.shape
    npl = v.shape[1]
    padw = out_ref.shape[1] - A - npl
    pieces = [log_pi, v]
    if padw > 0:
        pieces.append(jnp.zeros((Bb, padw), jnp.float32))
    out_ref[...] = jnp.concatenate(pieces, axis=1)


# ----------------------------- parameter setup -----------------------------

def _lin(key, fan_in, fan_out):
    # kaiming-uniform-ish deterministic init; stored as (in, out) so the kernel
    # can do x @ W directly (== PyTorch x @ W_torch.T).
    bound = (6.0 / fan_in) ** 0.5
    return jax.random.uniform(key, (fan_in, fan_out), jnp.float32, -bound, bound)


def _bn_fold(key, c):
    k1, k2, k3, k4 = jax.random.split(key, 4)
    gamma = jax.random.uniform(k1, (c,), jnp.float32, 0.5, 1.5)
    beta = jax.random.uniform(k2, (c,), jnp.float32, -0.5, 0.5)
    mean = jax.random.uniform(k3, (c,), jnp.float32, -0.5, 0.5)
    var = jax.random.uniform(k4, (c,), jnp.float32, 0.5, 1.5)
    scale = gamma / jnp.sqrt(var + 1e-5)
    bias = beta - mean * scale
    return scale.reshape(1, c), bias.reshape(1, c)


def _ir_params(key, cin, cexp, cout, L, csq):
    ks = jax.random.split(key, 8)
    e_scale, e_bias = _bn_fold(ks[5], cexp)
    d_scale, d_bias = _bn_fold(ks[6], cexp)
    p_scale, p_bias = _bn_fold(ks[7], cout)
    return dict(
        We=_lin(ks[0], cin, cexp),
        Wd=jax.random.uniform(ks[1], (L, L), jnp.float32,
                              -(6.0 / L) ** 0.5, (6.0 / L) ** 0.5),  # (out_l, in_l)
        W1=_lin(ks[2], cexp, csq), b1=jnp.zeros((1, csq), jnp.float32),
        W2=_lin(ks[3], csq, cexp), b2=jnp.zeros((1, cexp), jnp.float32),
        Wp=_lin(ks[4], cexp, cout),
        e_scale=e_scale, e_bias=e_bias,
        d_scale=d_scale, d_bias=d_bias,
        p_scale=p_scale, p_bias=p_bias,
    )


def _head_fc(key, C, L, n_out):
    # build a torch-shaped flattened weight (n_out, C*L) with column index
    # c*L + l, then permute rows to the kernel's l*C + c layout, (L*C, n_out).
    k1, k2 = jax.random.split(key)
    bound = (6.0 / (C * L)) ** 0.5
    W_torch = jax.random.uniform(k1, (n_out, C * L), jnp.float32, -bound, bound)
    W_perm = W_torch.reshape(n_out, C, L).transpose(2, 1, 0).reshape(L * C, n_out)
    bound2 = (6.0 / n_out) ** 0.5
    W2 = jax.random.uniform(k2, (n_out, n_out), jnp.float32, -bound2, bound2).T
    return (W_perm, jnp.zeros((1, n_out), jnp.float32),
            W2, jnp.zeros((1, n_out), jnp.float32))


def make_params(key, nb_vect, vect_dim, action_size, num_players):
    C0, Cexp, Csq, L = 64, 192, 48, vect_dim
    ks = jax.random.split(key, 7)
    fl_scale, fl_bias = _bn_fold(ks[1], C0)
    pi_fc1_W, pi_fc1_b, pi_fc2_W, pi_fc2_b = _head_fc(ks[5], C0, L, action_size)
    v_fc1_W, v_fc1_b, v_fc2_W, v_fc2_b = _head_fc(ks[6], C0, L, num_players)
    params = dict(
        fl=dict(W=_lin(ks[0], nb_vect, C0), scale=fl_scale, bias=fl_bias),
        trunk0=_ir_params(ks[2], C0, Cexp, C0, L, Csq),
        pi_ir=_ir_params(ks[3], C0, Cexp, C0, L, Csq),
        v_ir=_ir_params(ks[4], C0, Cexp, C0, L, Csq),
        pi_fc1_W=pi_fc1_W, pi_fc1_b=pi_fc1_b,
        pi_fc2_W=pi_fc2_W, pi_fc2_b=pi_fc2_b,
        v_fc1_W=v_fc1_W, v_fc1_b=v_fc1_b,
        v_fc2_W=v_fc2_W, v_fc2_b=v_fc2_b,
    )
    setypes = dict(trunk0='avg', pi_ir='avg', v_ir='avg')  # version 10
    return params, setypes


def prepare_params(params, weight_dtype=jnp.bfloat16):
    """One-time re-layout of the torch-equivalent params for the kernel.

    * all BN scales folded into the matmul / depthwise weights IN F32, then the
      matmul weights are cast to `weight_dtype` (bf16; f32 accumulation),
    * all three IR tails padded to a 128-multiple (256) of expanded channels
      with exact zeros (pad lanes stay 0 through act / SE gate / project),
    * depthwise weight pre-transposed to (L_in, L_out, Cpad) with the per-channel
      BN scale folded in (the 8-term FMA chain cost is unchanged),
    * pi/v expand weights + biases fused into a single (64, 2*256) slab so both
      post-expand head slices are lane-tile aligned,
    * tiny FC2 head weights kept in f32 (cost nothing; fewer rounding steps).
    """
    cexp = params['trunk0']['We'].shape[1]
    cpad = _round_up(cexp, 128)

    def pad_cols(a):
        return jnp.pad(a, ((0, 0), (0, cpad - a.shape[1])))

    def pad_rows(a):
        return jnp.pad(a, ((0, cpad - a.shape[0]), (0, 0)))

    def expand_w(p):
        # fold BN scale into columns (f32), pad expand channels, then cast.
        return pad_cols(p['We'] * p['e_scale']).astype(weight_dtype)

    def tail(p):
        d_scale = pad_cols(p['d_scale'])[0]                       # (cpad,), pad zeros
        wd = jnp.transpose(p['Wd'])[:, :, None] * d_scale[None, None, :]
        return dict(
            Wd=wd.astype(jnp.float32),                            # (L_in, L_out, cpad)
            d_bias=pad_cols(p['d_bias']),
            W1=pad_rows(p['W1']).astype(weight_dtype), b1=p['b1'],
            W2=pad_cols(p['W2']).astype(weight_dtype), b2=pad_cols(p['b2']),
            Wp=pad_rows(p['Wp'] * p['p_scale']).astype(weight_dtype),
            p_bias=p['p_bias'],
        )

    trunk0 = dict(tail(params['trunk0']),
                  We=expand_w(params['trunk0']),
                  e_bias=pad_cols(params['trunk0']['e_bias']))

    return dict(
        fl=dict(W=(params['fl']['W'] * params['fl']['scale']).astype(weight_dtype),
                bias=params['fl']['bias']),
        trunk0=trunk0,
        heads_We=jnp.concatenate([expand_w(params['pi_ir']),
                                  expand_w(params['v_ir'])], axis=1),
        heads_e_bias=jnp.concatenate([pad_cols(params['pi_ir']['e_bias']),
                                      pad_cols(params['v_ir']['e_bias'])], axis=1),
        pi_ir=tail(params['pi_ir']),
        v_ir=tail(params['v_ir']),
        pi_fc1_W=params['pi_fc1_W'].astype(weight_dtype), pi_fc1_b=params['pi_fc1_b'],
        pi_fc2_W=params['pi_fc2_W'], pi_fc2_b=params['pi_fc2_b'],   # f32 (tiny)
        v_fc1_W=params['v_fc1_W'].astype(weight_dtype), v_fc1_b=params['v_fc1_b'],
        v_fc2_W=params['v_fc2_W'], v_fc2_b=params['v_fc2_b'],       # f32 (tiny)
    )


# -------------------------------- wrapper ---------------------------------

def _tpu_vmem_capacity_bytes():
    try:
        info = pltpu.get_tpu_info()
        cap = getattr(info, 'vmem_capacity_bytes', None)
        if cap:
            return int(cap)
    except Exception:
        pass
    return 64 * 1024 * 1024            # conservative default: v7x per-TC VMEM


def smallworld_forward(prepared, setypes, input_data, valid_actions, *,
                       max_block=None, vmem_limit_bytes=None):
    """input_data: (B, nb_vect, vect_dim) f32 (PyTorch view), valid_actions: (B, A)."""
    B, nb_vect, L = input_data.shape
    x = jnp.transpose(input_data.astype(jnp.float32), (0, 2, 1))  # (B, L, nb_vect)
    va = valid_actions.astype(jnp.int32)

    A = prepared['pi_fc2_W'].shape[1]
    Np = prepared['v_fc2_W'].shape[1]
    out_w = max(128, _round_up(A + Np, 128))      # merged lane-dense output width

    # generation-dependent budgets: v5e/v6e (128 MiB VMEM) -> 512-row blocks and
    # ~77 MiB scoped limit; v7x (64 MiB / TC) -> 256-row blocks and ~38 MiB.
    cap = _tpu_vmem_capacity_bytes()
    if max_block is None:
        max_block = 512 if cap >= 100 * 1024 * 1024 else 256
    if vmem_limit_bytes is None:
        vmem_limit_bytes = min(int(cap * 0.6), 96 * 1024 * 1024)

    # batch tiling: blocks are multiples of 8 rows; once B > 8 we always target
    # >= 2 grid steps so the second TensorCore on v7x gets work (weights stay
    # VMEM-resident per core via constant index_maps, so the extra step is cheap).
    B_blk = min(max_block, max(8, _round_up((B + 1) // 2, 8)))
    B_pad = _round_up(B, B_blk)
    if B_pad != B:
        x = jnp.pad(x, ((0, B_pad - B), (0, 0), (0, 0)))
        va = jnp.pad(va, ((0, B_pad - B), (0, 0)))

    leaves, treedef = jax.tree_util.tree_flatten(prepared)

    def w_spec(leaf):
        # full-shape block + constant index_map -> weight stays VMEM-resident.
        return pl.BlockSpec(leaf.shape, lambda i, _nd=leaf.ndim: (0,) * _nd)

    in_specs = ([pl.BlockSpec((B_blk, L, nb_vect), lambda i: (i, 0, 0)),
                 pl.BlockSpec((B_blk, A), lambda i: (i, 0))]
                + [w_spec(leaf) for leaf in leaves])
    out_specs = pl.BlockSpec((B_blk, out_w), lambda i: (i, 0))

    kernel = functools.partial(_forward_kernel, treedef, setypes)
    out = pl.pallas_call(
        kernel,
        out_shape=jax.ShapeDtypeStruct((B_pad, out_w), jnp.float32),
        grid=(B_pad // B_blk,),
        in_specs=in_specs,
        out_specs=out_specs,
        compiler_params=pltpu.CompilerParams(
            dimension_semantics=("parallel",),          # megacore / v7x 2nd TC
            vmem_limit_bytes=vmem_limit_bytes),
    )(x, va, *leaves)
    return out[:B, :A], out[:B, A:A + Np]


# ---------------------------------- main -----------------------------------

if __name__ == "__main__":
    B, nb_vect, vect_dim = 2, 16, 8      # game.getBoardSize() = (16, 8)
    action_size, num_players = 32, 2

    key = jax.random.PRNGKey(0)
    k_params, k_x, k_va = jax.random.split(key, 3)

    params, setypes = make_params(k_params, nb_vect, vect_dim,
                                  action_size, num_players)
    prepared = prepare_params(params)    # folded BN, 256-wide tails, fused heads

    x = jax.random.normal(k_x, (B, nb_vect, vect_dim), jnp.float32)
    valid_actions = jax.random.bernoulli(k_va, 0.7, (B, action_size))
    valid_actions = valid_actions.at[:, 0].set(True)

    log_pi, v = smallworld_forward(prepared, setypes, x, valid_actions)
    jax.block_until_ready((log_pi, v))

    assert log_pi.shape == (B, action_size) and v.shape == (B, num_players)
    assert bool(jnp.all(jnp.isfinite(log_pi))) and bool(jnp.all(jnp.isfinite(v)))
    # log_softmax rows must sum to 1 in prob space; v is tanh-bounded.
    psum = jnp.sum(jnp.exp(log_pi), axis=1)
    assert bool(jnp.all(jnp.abs(psum - 1.0) < 1e-3))
    assert bool(jnp.all(jnp.abs(v) <= 1.0))
    print("KERNEL_OK")
</pallas_src>

<mosaic_0001>
module attributes {stable_mosaic.version = 11 : i64} {
  func.func @_forward_kernel(%arg0: i32, %arg1: memref<8x8x16xf32, #tpu.memory_space<vmem>>, %arg2: memref<8x32xi32, #tpu.memory_space<vmem>>, %arg3: memref<16x64xbf16, #tpu.memory_space<vmem>>, %arg4: memref<1x64xf32, #tpu.memory_space<vmem>>, %arg5: memref<64x512xbf16, #tpu.memory_space<vmem>>, %arg6: memref<1x512xf32, #tpu.memory_space<vmem>>, %arg7: memref<512x32xbf16, #tpu.memory_space<vmem>>, %arg8: memref<1x32xf32, #tpu.memory_space<vmem>>, %arg9: memref<32x32xf32, #tpu.memory_space<vmem>>, %arg10: memref<1x32xf32, #tpu.memory_space<vmem>>, %arg11: memref<256x48xbf16, #tpu.memory_space<vmem>>, %arg12: memref<48x256xbf16, #tpu.memory_space<vmem>>, %arg13: memref<8x8x256xf32, #tpu.memory_space<vmem>>, %arg14: memref<256x64xbf16, #tpu.memory_space<vmem>>, %arg15: memref<1x48xf32, #tpu.memory_space<vmem>>, %arg16: memref<1x256xf32, #tpu.memory_space<vmem>>, %arg17: memref<1x256xf32, #tpu.memory_space<vmem>>, %arg18: memref<1x64xf32, #tpu.memory_space<vmem>>, %arg19: memref<256x48xbf16, #tpu.memory_space<vmem>>, %arg20: memref<48x256xbf16, #tpu.memory_space<vmem>>, %arg21: memref<8x8x256xf32, #tpu.memory_space<vmem>>, %arg22: memref<64x256xbf16, #tpu.memory_space<vmem>>, %arg23: memref<256x64xbf16, #tpu.memory_space<vmem>>, %arg24: memref<1x48xf32, #tpu.memory_space<vmem>>, %arg25: memref<1x256xf32, #tpu.memory_space<vmem>>, %arg26: memref<1x256xf32, #tpu.memory_space<vmem>>, %arg27: memref<1x256xf32, #tpu.memory_space<vmem>>, %arg28: memref<1x64xf32, #tpu.memory_space<vmem>>, %arg29: memref<512x2xbf16, #tpu.memory_space<vmem>>, %arg30: memref<1x2xf32, #tpu.memory_space<vmem>>, %arg31: memref<2x2xf32, #tpu.memory_space<vmem>>, %arg32: memref<1x2xf32, #tpu.memory_space<vmem>>, %arg33: memref<256x48xbf16, #tpu.memory_space<vmem>>, %arg34: memref<48x256xbf16, #tpu.memory_space<vmem>>, %arg35: memref<8x8x256xf32, #tpu.memory_space<vmem>>, %arg36: memref<256x64xbf16, #tpu.memory_space<vmem>>, %arg37: memref<1x48xf32, #tpu.memory_space<vmem>>, %arg38: memref<1x256xf32, #tpu.memory_space<vmem>>, %arg39: memref<1x256xf32, #tpu.memory_space<vmem>>, %arg40: memref<1x64xf32, #tpu.memory_space<vmem>>, %arg41: memref<8x128xf32, #tpu.memory_space<vmem>>) attributes {dimension_semantics = [#tpu.dimension_semantics<parallel>], iteration_bounds = array<i64: 1>, scalar_prefetch = 0 : i64, scratch_operands = 0 : i64, tpu.core_type = #tpu.core_type<tc>, window_params = [{transform_indices = @transform_0, window_bounds = array<i64: 8, 8, 16>}, {transform_indices = @transform_1, window_bounds = array<i64: 8, 32>}, {pipeline_mode = #tpu.pipeline_mode<synchronous>, transform_indices = @transform_2, window_bounds = array<i64: 16, 64>}, {pipeline_mode = #tpu.pipeline_mode<synchronous>, transform_indices = @transform_3, window_bounds = array<i64: 1, 64>}, {pipeline_mode = #tpu.pipeline_mode<synchronous>, transform_indices = @transform_4, window_bounds = array<i64: 64, 512>}, {pipeline_mode = #tpu.pipeline_mode<synchronous>, transform_indices = @transform_5, window_bounds = array<i64: 1, 512>}, {pipeline_mode = #tpu.pipeline_mode<synchronous>, transform_indices = @transform_6, window_bounds = array<i64: 512, 32>}, {pipeline_mode = #tpu.pipeline_mode<synchronous>, transform_indices = @transform_7, window_bounds = array<i64: 1, 32>}, {pipeline_mode = #tpu.pipeline_mode<synchronous>, transform_indices = @transform_8, window_bounds = array<i64: 32, 32>}, {pipeline_mode = #tpu.pipeline_mode<synchronous>, transform_indices = @transform_9, window_bounds = array<i64: 1, 32>}, {pipeline_mode = #tpu.pipeline_mode<synchronous>, transform_indices = @transform_10, window_bounds = array<i64: 256, 48>}, {pipeline_mode = #tpu.pipeline_mode<synchronous>, transform_indices = @transform_11, window_bounds = array<i64: 48, 256>}, {pipeline_mode = #tpu.pipeline_mode<synchronous>, transform_indices = @transform_12, window_bounds = array<i64: 8, 8, 256>}, {pipeline_mode = #tpu.pipeline_mode<synchronous>, transform_indices = @transform_13, window_bounds = array<i64: 256, 64>}, {pipeline_mode = #tpu.pipeline_mode<synchronous>, transform_indices = @transform_14, window_bounds = array<i64: 1, 48>}, {pipeline_mode = #tpu.pipeline_mode<synchronous>, transform_indices = @transform_15, window_bounds = array<i64: 1, 256>}, {pipeline_mode = #tpu.pipeline_mode<synchronous>, transform_indices = @transform_16, window_bounds = array<i64: 1, 256>}, {pipeline_mode = #tpu.pipeline_mode<synchronous>, transform_indices = @transform_17, window_bounds = array<i64: 1, 64>}, {pipeline_mode = #tpu.pipeline_mode<synchronous>, transform_indices = @transform_18, window_bounds = array<i64: 256, 48>}, {pipeline_mode = #tpu.pipeline_mode<synchronous>, transform_indices = @transform_19, window_bounds = array<i64: 48, 256>}, {pipeline_mode = #tpu.pipeline_mode<synchronous>, transform_indices = @transform_20, window_bounds = array<i64: 8, 8, 256>}, {pipeline_mode = #tpu.pipeline_mode<synchronous>, transform_indices = @transform_21, window_bounds = array<i64: 64, 256>}, {pipeline_mode = #tpu.pipeline_mode<synchronous>, transform_indices = @transform_22, window_bounds = array<i64: 256, 64>}, {pipeline_mode = #tpu.pipeline_mode<synchronous>, transform_indices = @transform_23, window_bounds = array<i64: 1, 48>}, {pipeline_mode = #tpu.pipeline_mode<synchronous>, transform_indices = @transform_24, window_bounds = array<i64: 1, 256>}, {pipeline_mode = #tpu.pipeline_mode<synchronous>, transform_indices = @transform_25, window_bounds = array<i64: 1, 256>}, {pipeline_mode = #tpu.pipeline_mode<synchronous>, transform_indices = @transform_26, window_bounds = array<i64: 1, 256>}, {pipeline_mode = #tpu.pipeline_mode<synchronous>, transform_indices = @transform_27, window_bounds = array<i64: 1, 64>}, {pipeline_mode = #tpu.pipeline_mode<synchronous>, transform_indices = @transform_28, window_bounds = array<i64: 512, 2>}, {pipeline_mode = #tpu.pipeline_mode<synchronous>, transform_indices = @transform_29, window_bounds = array<i64: 1, 2>}, {pipeline_mode = #tpu.pipeline_mode<synchronous>, transform_indices = @transform_30, window_bounds = array<i64: 2, 2>}, {pipeline_mode = #tpu.pipeline_mode<synchronous>, transform_indices = @transform_31, window_bounds = array<i64: 1, 2>}, {pipeline_mode = #tpu.pipeline_mode<synchronous>, transform_indices = @transform_32, window_bounds = array<i64: 256, 48>}, {pipeline_mode = #tpu.pipeline_mode<synchronous>, transform_indices = @transform_33, window_bounds = array<i64: 48, 256>}, {pipeline_mode = #tpu.pipeline_mode<synchronous>, transform_indices = @transform_34, window_bounds = array<i64: 8, 8, 256>}, {pipeline_mode = #tpu.pipeline_mode<synchronous>, transform_indices = @transform_35, window_bounds = array<i64: 256, 64>}, {pipeline_mode = #tpu.pipeline_mode<synchronous>, transform_indices = @transform_36, window_bounds = array<i64: 1, 48>}, {pipeline_mode = #tpu.pipeline_mode<synchronous>, transform_indices = @transform_37, window_bounds = array<i64: 1, 256>}, {pipeline_mode = #tpu.pipeline_mode<synchronous>, transform_indices = @transform_38, window_bounds = array<i64: 1, 256>}, {pipeline_mode = #tpu.pipeline_mode<synchronous>, transform_indices = @transform_39, window_bounds = array<i64: 1, 64>}, {transform_indices = @transform_40, window_bounds = array<i64: 8, 128>}]} {
    %c0 = arith.constant 0 : index
    %c0_0 = arith.constant 0 : index
    %c0_1 = arith.constant 0 : index
    %0 = vector.load %arg1[%c0, %c0_0, %c0_1] : memref<8x8x16xf32, #tpu.memory_space<vmem>>, vector<8x8x16xf32>
    %c0_2 = arith.constant 0 : index
    %c0_3 = arith.constant 0 : index
    %1 = vector.load %arg3[%c0_2, %c0_3] : memref<16x64xbf16, #tpu.memory_space<vmem>>, vector<16x64xbf16>
    %2 = vector.shape_cast %0 : vector<8x8x16xf32> to vector<64x16xf32>
    %3 = arith.truncf %2 : vector<64x16xf32> to vector<64x16xbf16>
    %cst = arith.constant dense<0.000000e+00> : vector<64x64xf32>
    %4 = tpu.matmul %3, %1, %cst {dimension_numbers = #tpu.dot_dimension_numbers<[1], [0], [0], [1], [0, 0, 1, 1], [], []>} : vector<64x16xbf16>, vector<16x64xbf16>, vector<64x64xf32> -> vector<64x64xf32>
    %5 = vector.shape_cast %4 : vector<64x64xf32> to vector<8x8x64xf32>
    %c0_4 = arith.constant 0 : index
    %c0_5 = arith.constant 0 : index
    %6 = vector.load %arg4[%c0_4, %c0_5] : memref<1x64xf32, #tpu.memory_space<vmem>>, vector<1x64xf32>
    %7 = vector.shape_cast %6 : vector<1x64xf32> to vector<1x1x64xf32>
    %8 = vector.broadcast %7 : vector<1x1x64xf32> to vector<8x8x64xf32>
    %9 = arith.addf %5, %8 : vector<8x8x64xf32>
    %c0_6 = arith.constant 0 : index
    %c0_7 = arith.constant 0 : index
    %10 = vector.load %arg22[%c0_6, %c0_7] : memref<64x256xbf16, #tpu.memory_space<vmem>>, vector<64x256xbf16>
    %11 = vector.shape_cast %9 : vector<8x8x64xf32> to vector<64x64xf32>
    %12 = arith.truncf %11 : vector<64x64xf32> to vector<64x64xbf16>
    %cst_8 = arith.constant dense<0.000000e+00> : vector<64x256xf32>
    %13 = tpu.matmul %12, %10, %cst_8 {dimension_numbers = #tpu.dot_dimension_numbers<[1], [0], [0], [1], [0, 0, 1, 1], [], []>} : vector<64x64xbf16>, vector<64x256xbf16>, vector<64x256xf32> -> vector<64x256xf32>
    %14 = vector.shape_cast %13 : vector<64x256xf32> to vector<8x8x256xf32>
    %c0_9 = arith.constant 0 : index
    %c0_10 = arith.constant 0 : index
    %15 = vector.load %arg27[%c0_9, %c0_10] : memref<1x256xf32, #tpu.memory_space<vmem>>, vector<1x256xf32>
    %16 = vector.shape_cast %15 : vector<1x256xf32> to vector<1x1x256xf32>
    %17 = vector.broadcast %16 : vector<1x1x256xf32> to vector<8x8x256xf32>
    %18 = arith.addf %14, %17 : vector<8x8x256xf32>
    %cst_11 = arith.constant 0.000000e+00 : f32
    %19 = vector.broadcast %cst_11 : f32 to vector<8x8x256xf32>
    %20 = arith.maximumf %18, %19 : vector<8x8x256xf32>
    %c0_12 = arith.constant 0 : index
    %c0_13 = arith.constant 0 : index
    %c0_14 = arith.constant 0 : index
    %21 = vector.load %arg21[%c0_12, %c0_13, %c0_14] : memref<8x8x256xf32, #tpu.memory_space<vmem>>, vector<8x8x256xf32>
    %22 = vector.extract_strided_slice %21 {offsets = [0, 0, 0], sizes = [1, 8, 256], strides = [1, 1, 1]} : vector<8x8x256xf32> to vector<1x8x256xf32>
    %23 = vector.shape_cast %22 : vector<1x8x256xf32> to vector<8x256xf32>
    %24 = vector.shape_cast %23 : vector<8x256xf32> to vector<1x8x256xf32>
    %25 = vector.extract_strided_slice %20 {offsets = [0, 0, 0], sizes = [8, 1, 256], strides = [1, 1, 1]} : vector<8x8x256xf32> to vector<8x1x256xf32>
    %26 = vector.broadcast %24 : vector<1x8x256xf32> to vector<8x8x256xf32>
    %27 = vector.broadcast %25 : vector<8x1x256xf32> to vector<8x8x256xf32>
    %28 = arith.mulf %26, %27 : vector<8x8x256xf32>
    %29 = vector.extract_strided_slice %21 {offsets = [1, 0, 0], sizes = [1, 8, 256], strides = [1, 1, 1]} : vector<8x8x256xf32> to vector<1x8x256xf32>
    %30 = vector.shape_cast %29 : vector<1x8x256xf32> to vector<8x256xf32>
    %31 = vector.shape_cast %30 : vector<8x256xf32> to vector<1x8x256xf32>
    %32 = vector.extract_strided_slice %20 {offsets = [0, 1, 0], sizes = [8, 1, 256], strides = [1, 1, 1]} : vector<8x8x256xf32> to vector<8x1x256xf32>
    %33 = vector.broadcast %31 : vector<1x8x256xf32> to vector<8x8x256xf32>
    %34 = vector.broadcast %32 : vector<8x1x256xf32> to vector<8x8x256xf32>
    %35 = arith.mulf %33, %34 : vector<8x8x256xf32>
    %36 = arith.addf %28, %35 : vector<8x8x256xf32>
    %37 = vector.extract_strided_slice %21 {offsets = [2, 0, 0], sizes = [1, 8, 256], strides = [1, 1, 1]} : vector<8x8x256xf32> to vector<1x8x256xf32>
    %38 = vector.shape_cast %37 : vector<1x8x256xf32> to vector<8x256xf32>
    %39 = vector.shape_cast %38 : vector<8x256xf32> to vector<1x8x256xf32>
    %40 = vector.extract_strided_slice %20 {offsets = [0, 2, 0], sizes = [8, 1, 256], strides = [1, 1, 1]} : vector<8x8x256xf32> to vector<8x1x256xf32>
    %41 = vector.broadcast %39 : vector<1x8x256xf32> to vector<8x8x256xf32>
    %42 = vector.broadcast %40 : vector<8x1x256xf32> to vector<8x8x256xf32>
    %43 = arith.mulf %41, %42 : vector<8x8x256xf32>
    %44 = arith.addf %36, %43 : vector<8x8x256xf32>
    %45 = vector.extract_strided_slice %21 {offsets = [3, 0, 0], sizes = [1, 8, 256], strides = [1, 1, 1]} : vector<8x8x256xf32> to vector<1x8x256xf32>
    %46 = vector.shape_cast %45 : vector<1x8x256xf32> to vector<8x256xf32>
    %47 = vector.shape_cast %46 : vector<8x256xf32> to vector<1x8x256xf32>
    %48 = vector.extract_strided_slice %20 {offsets = [0, 3, 0], sizes = [8, 1, 256], strides = [1, 1, 1]} : vector<8x8x256xf32> to vector<8x1x256xf32>
    %49 = vector.broadcast %47 : vector<1x8x256xf32> to vector<8x8x256xf32>
    %50 = vector.broadcast %48 : vector<8x1x256xf32> to vector<8x8x256xf32>
    %51 = arith.mulf %49, %50 : vector<8x8x256xf32>
    %52 = arith.addf %44, %51 : vector<8x8x256xf32>
    %53 = vector.extract_strided_slice %21 {offsets = [4, 0, 0], sizes = [1, 8, 256], strides = [1, 1, 1]} : vector<8x8x256xf32> to vector<1x8x256xf32>
    %54 = vector.shape_cast %53 : vector<1x8x256xf32> to vector<8x256xf32>
    %55 = vector.shape_cast %54 : vector<8x256xf32> to vector<1x8x256xf32>
    %56 = vector.extract_strided_slice %20 {offsets = [0, 4, 0], sizes = [8, 1, 256], strides = [1, 1, 1]} : vector<8x8x256xf32> to vector<8x1x256xf32>
    %57 = vector.broadcast %55 : vector<1x8x256xf32> to vector<8x8x256xf32>
    %58 = vector.broadcast %56 : vector<8x1x256xf32> to vector<8x8x256xf32>
    %59 = arith.mulf %57, %58 : vector<8x8x256xf32>
    %60 = arith.addf %52, %59 : vector<8x8x256xf32>
    %61 = vector.extract_strided_slice %21 {offsets = [5, 0, 0], sizes = [1, 8, 256], strides = [1, 1, 1]} : vector<8x8x256xf32> to vector<1x8x256xf32>
    %62 = vector.shape_cast %61 : vector<1x8x256xf32> to vector<8x256xf32>
    %63 = vector.shape_cast %62 : vector<8x256xf32> to vector<1x8x256xf32>
    %64 = vector.extract_strided_slice %20 {offsets = [0, 5, 0], sizes = [8, 1, 256], strides = [1, 1, 1]} : vector<8x8x256xf32> to vector<8x1x256xf32>
    %65 = vector.broadcast %63 : vector<1x8x256xf32> to vector<8x8x256xf32>
    %66 = vector.broadcast %64 : vector<8x1x256xf32> to vector<8x8x256xf32>
    %67 = arith.mulf %65, %66 : vector<8x8x256xf32>
    %68 = arith.addf %60, %67 : vector<8x8x256xf32>
    %69 = vector.extract_strided_slice %21 {offsets = [6, 0, 0], sizes = [1, 8, 256], strides = [1, 1, 1]} : vector<8x8x256xf32> to vector<1x8x256xf32>
    %70 = vector.shape_cast %69 : vector<1x8x256xf32> to vector<8x256xf32>
    %71 = vector.shape_cast %70 : vector<8x256xf32> to vector<1x8x256xf32>
    %72 = vector.extract_strided_slice %20 {offsets = [0, 6, 0], sizes = [8, 1, 256], strides = [1, 1, 1]} : vector<8x8x256xf32> to vector<8x1x256xf32>
    %73 = vector.broadcast %71 : vector<1x8x256xf32> to vector<8x8x256xf32>
    %74 = vector.broadcast %72 : vector<8x1x256xf32> to vector<8x8x256xf32>
    %75 = arith.mulf %73, %74 : vector<8x8x256xf32>
    %76 = arith.addf %68, %75 : vector<8x8x256xf32>
    %77 = vector.extract_strided_slice %21 {offsets = [7, 0, 0], sizes = [1, 8, 256], strides = [1, 1, 1]} : vector<8x8x256xf32> to vector<1x8x256xf32>
    %78 = vector.shape_cast %77 : vector<1x8x256xf32> to vector<8x256xf32>
    %79 = vector.shape_cast %78 : vector<8x256xf32> to vector<1x8x256xf32>
    %80 = vector.extract_strided_slice %20 {offsets = [0, 7, 0], sizes = [8, 1, 256], strides = [1, 1, 1]} : vector<8x8x256xf32> to vector<8x1x256xf32>
    %81 = vector.broadcast %79 : vector<1x8x256xf32> to vector<8x8x256xf32>
    %82 = vector.broadcast %80 : vector<8x1x256xf32> to vector<8x8x256xf32>
    %83 = arith.mulf %81, %82 : vector<8x8x256xf32>
    %84 = arith.addf %76, %83 : vector<8x8x256xf32>
    %c0_15 = arith.constant 0 : index
    %c0_16 = arith.constant 0 : index
    %85 = vector.load %arg26[%c0_15, %c0_16] : memref<1x256xf32, #tpu.memory_space<vmem>>, vector<1x256xf32>
    %86 = vector.shape_cast %85 : vector<1x256xf32> to vector<1x1x256xf32>
    %87 = vector.broadcast %86 : vector<1x1x256xf32> to vector<8x8x256xf32>
    %88 = arith.addf %84, %87 : vector<8x8x256xf32>
    %cst_17 = arith.constant 0.000000e+00 : f32
    %89 = vector.broadcast %cst_17 : f32 to vector<8x8x256xf32>
    %90 = arith.maximumf %88, %89 : vector<8x8x256xf32>
    %cst_18 = arith.constant dense<0.000000e+00> : vector<8x256xf32>
    %91 = vector.multi_reduction <add>, %90, %cst_18 [1] : vector<8x8x256xf32> to vector<8x256xf32>
    %cst_19 = arith.constant 8.000000e+00 : f32
    %92 = vector.broadcast %cst_19 : f32 to vector<8x256xf32>
    %93 = arith.divf %91, %92 : vector<8x256xf32>
    %c0_20 = arith.constant 0 : index
    %c0_21 = arith.constant 0 : index
    %94 = vector.load %arg19[%c0_20, %c0_21] : memref<256x48xbf16, #tpu.memory_space<vmem>>, vector<256x48xbf16>
    %95 = arith.truncf %93 : vector<8x256xf32> to vector<8x256xbf16>
    %cst_22 = arith.constant dense<0.000000e+00> : vector<8x48xf32>
    %96 = tpu.matmul %95, %94, %cst_22 {dimension_numbers = #tpu.dot_dimension_numbers<[1], [0], [0], [1], [0, 0, 1, 1], [], []>} : vector<8x256xbf16>, vector<256x48xbf16>, vector<8x48xf32> -> vector<8x48xf32>
    %c0_23 = arith.constant 0 : index
    %c0_24 = arith.constant 0 : index
    %97 = vector.load %arg24[%c0_23, %c0_24] : memref<1x48xf32, #tpu.memory_space<vmem>>, vector<1x48xf32>
    %98 = vector.broadcast %97 : vector<1x48xf32> to vector<8x48xf32>
    %99 = arith.addf %96, %98 : vector<8x48xf32>
    %cst_25 = arith.constant 0.000000e+00 : f32
    %100 = vector.broadcast %cst_25 : f32 to vector<8x48xf32>
    %101 = arith.maximumf %99, %100 : vector<8x48xf32>
    %c0_26 = arith.constant 0 : index
    %c0_27 = arith.constant 0 : index
    %102 = vector.load %arg20[%c0_26, %c0_27] : memref<48x256xbf16, #tpu.memory_space<vmem>>, vector<48x256xbf16>
    %103 = arith.truncf %101 : vector<8x48xf32> to vector<8x48xbf16>
    %cst_28 = arith.constant dense<0.000000e+00> : vector<8x256xf32>
    %104 = tpu.matmul %103, %102, %cst_28 {dimension_numbers = #tpu.dot_dimension_numbers<[1], [0], [0], [1], [0, 0, 1, 1], [], []>} : vector<8x48xbf16>, vector<48x256xbf16>, vector<8x256xf32> -> vector<8x256xf32>
    %c0_29 = arith.constant 0 : index
    %c0_30 = arith.constant 0 : index
    %105 = vector.load %arg25[%c0_29, %c0_30] : memref<1x256xf32, #tpu.memory_space<vmem>>, vector<1x256xf32>
    %106 = vector.broadcast %105 : vector<1x256xf32> to vector<8x256xf32>
    %107 = arith.addf %104, %106 : vector<8x256xf32>
    %cst_31 = arith.constant 3.000000e+00 : f32
    %108 = vector.broadcast %cst_31 : f32 to vector<8x256xf32>
    %109 = arith.addf %107, %108 : vector<8x256xf32>
    %cst_32 = arith.constant 0.000000e+00 : f32
    %cst_33 = arith.constant 6.000000e+00 : f32
    %110 = vector.broadcast %cst_32 : f32 to vector<8x256xf32>
    %111 = arith.maximumf %110, %109 : vector<8x256xf32>
    %112 = vector.broadcast %cst_33 : f32 to vector<8x256xf32>
    %113 = arith.minimumf %112, %111 : vector<8x256xf32>
    %cst_34 = arith.constant 0.166666672 : f32
    %114 = vector.broadcast %cst_34 : f32 to vector<8x256xf32>
    %115 = arith.mulf %113, %114 : vector<8x256xf32>
    %116 = vector.shape_cast %115 : vector<8x256xf32> to vector<8x1x256xf32>
    %117 = vector.broadcast %116 : vector<8x1x256xf32> to vector<8x8x256xf32>
    %118 = arith.mulf %90, %117 : vector<8x8x256xf32>
    %c0_35 = arith.constant 0 : index
    %c0_36 = arith.constant 0 : index
    %119 = vector.load %arg23[%c0_35, %c0_36] : memref<256x64xbf16, #tpu.memory_space<vmem>>, vector<256x64xbf16>
    %120 = vector.shape_cast %118 : vector<8x8x256xf32> to vector<64x256xf32>
    %121 = arith.truncf %120 : vector<64x256xf32> to vector<64x256xbf16>
    %cst_37 = arith.constant dense<0.000000e+00> : vector<64x64xf32>
    %122 = tpu.matmul %121, %119, %cst_37 {dimension_numbers = #tpu.dot_dimension_numbers<[1], [0], [0], [1], [0, 0, 1, 1], [], []>} : vector<64x256xbf16>, vector<256x64xbf16>, vector<64x64xf32> -> vector<64x64xf32>
    %123 = vector.shape_cast %122 : vector<64x64xf32> to vector<8x8x64xf32>
    %c0_38 = arith.constant 0 : index
    %c0_39 = arith.constant 0 : index
    %124 = vector.load %arg28[%c0_38, %c0_39] : memref<1x64xf32, #tpu.memory_space<vmem>>, vector<1x64xf32>
    %125 = vector.shape_cast %124 : vector<1x64xf32> to vector<1x1x64xf32>
    %126 = vector.broadcast %125 : vector<1x1x64xf32> to vector<8x8x64xf32>
    %127 = arith.addf %123, %126 : vector<8x8x64xf32>
    %128 = arith.addf %127, %9 : vector<8x8x64xf32>
    %c0_40 = arith.constant 0 : index
    %c0_41 = arith.constant 0 : index
    %129 = vector.load %arg5[%c0_40, %c0_41] : memref<64x512xbf16, #tpu.memory_space<vmem>>, vector<64x512xbf16>
    %130 = vector.shape_cast %128 : vector<8x8x64xf32> to vector<64x64xf32>
    %131 = arith.truncf %130 : vector<64x64xf32> to vector<64x64xbf16>
    %cst_42 = arith.constant dense<0.000000e+00> : vector<64x512xf32>
    %132 = tpu.matmul %131, %129, %cst_42 {dimension_numbers = #tpu.dot_dimension_numbers<[1], [0], [0], [1], [0, 0, 1, 1], [], []>} : vector<64x64xbf16>, vector<64x512xbf16>, vector<64x512xf32> -> vector<64x512xf32>
    %133 = vector.shape_cast %132 : vector<64x512xf32> to vector<8x8x512xf32>
    %c0_43 = arith.constant 0 : index
    %c0_44 = arith.constant 0 : index
    %134 = vector.load %arg6[%c0_43, %c0_44] : memref<1x512xf32, #tpu.memory_space<vmem>>, vector<1x512xf32>
    %135 = vector.shape_cast %134 : vector<1x512xf32> to vector<1x1x512xf32>
    %136 = vector.broadcast %135 : vector<1x1x512xf32> to vector<8x8x512xf32>
    %137 = arith.addf %133, %136 : vector<8x8x512xf32>
    %cst_45 = arith.constant 3.000000e+00 : f32
    %138 = vector.broadcast %cst_45 : f32 to vector<8x8x512xf32>
    %139 = arith.addf %137, %138 : vector<8x8x512xf32>
    %cst_46 = arith.constant 0.000000e+00 : f32
    %cst_47 = arith.constant 6.000000e+00 : f32
    %140 = vector.broadcast %cst_46 : f32 to vector<8x8x512xf32>
    %141 = arith.maximumf %140, %139 : vector<8x8x512xf32>
    %142 = vector.broadcast %cst_47 : f32 to vector<8x8x512xf32>
    %143 = arith.minimumf %142, %141 : vector<8x8x512xf32>
    %144 = arith.mulf %137, %143 : vector<8x8x512xf32>
    %cst_48 = arith.constant 0.166666672 : f32
    %145 = vector.broadcast %cst_48 : f32 to vector<8x8x512xf32>
    %146 = arith.mulf %144, %145 : vector<8x8x512xf32>
    %147 = vector.extract_strided_slice %146 {offsets = [0, 0, 0], sizes = [8, 8, 256], strides = [1, 1, 1]} : vector<8x8x512xf32> to vector<8x8x256xf32>
    %c0_49 = arith.constant 0 : index
    %c0_50 = arith.constant 0 : index
    %c0_51 = arith.constant 0 : index
    %148 = vector.load %arg13[%c0_49, %c0_50, %c0_51] : memref<8x8x256xf32, #tpu.memory_space<vmem>>, vector<8x8x256xf32>
    %149 = vector.extract_strided_slice %148 {offsets = [0, 0, 0], sizes = [1, 8, 256], strides = [1, 1, 1]} : vector<8x8x256xf32> to vector<1x8x256xf32>
    %150 = vector.shape_cast %149 : vector<1x8x256xf32> to vector<8x256xf32>
    %151 = vector.shape_cast %150 : vector<8x256xf32> to vector<1x8x256xf32>
    %152 = vector.extract_strided_slice %147 {offsets = [0, 0, 0], sizes = [8, 1, 256], strides = [1, 1, 1]} : vector<8x8x256xf32> to vector<8x1x256xf32>
    %153 = vector.broadcast %151 : vector<1x8x256xf32> to vector<8x8x256xf32>
    %154 = vector.broadcast %152 : vector<8x1x256xf32> to vector<8x8x256xf32>
    %155 = arith.mulf %153, %154 : vector<8x8x256xf32>
    %156 = vector.extract_strided_slice %148 {offsets = [1, 0, 0], sizes = [1, 8, 256], strides = [1, 1, 1]} : vector<8x8x256xf32> to vector<1x8x256xf32>
    %157 = vector.shape_cast %156 : vector<1x8x256xf32> to vector<8x256xf32>
    %158 = vector.shape_cast %157 : vector<8x256xf32> to vector<1x8x256xf32>
    %159 = vector.extract_strided_slice %147 {offsets = [0, 1, 0], sizes = [8, 1, 256], strides = [1, 1, 1]} : vector<8x8x256xf32> to vector<8x1x256xf32>
    %160 = vector.broadcast %158 : vector<1x8x256xf32> to vector<8x8x256xf32>
    %161 = vector.broadcast %159 : vector<8x1x256xf32> to vector<8x8x256xf32>
    %162 = arith.mulf %160, %161 : vector<8x8x256xf32>
    %163 = arith.addf %155, %162 : vector<8x8x256xf32>
    %164 = vector.extract_strided_slice %148 {offsets = [2, 0, 0], sizes = [1, 8, 256], strides = [1, 1, 1]} : vector<8x8x256xf32> to vector<1x8x256xf32>
    %165 = vector.shape_cast %164 : vector<1x8x256xf32> to vector<8x256xf32>
    %166 = vector.shape_cast %165 : vector<8x256xf32> to vector<1x8x256xf32>
    %167 = vector.extract_strided_slice %147 {offsets = [0, 2, 0], sizes = [8, 1, 256], strides = [1, 1, 1]} : vector<8x8x256xf32> to vector<8x1x256xf32>
    %168 = vector.broadcast %166 : vector<1x8x256xf32> to vector<8x8x256xf32>
    %169 = vector.broadcast %167 : vector<8x1x256xf32> to vector<8x8x256xf32>
    %170 = arith.mulf %168, %169 : vector<8x8x256xf32>
    %171 = arith.addf %163, %170 : vector<8x8x256xf32>
    %172 = vector.extract_strided_slice %148 {offsets = [3, 0, 0], sizes = [1, 8, 256], strides = [1, 1, 1]} : vector<8x8x256xf32> to vector<1x8x256xf32>
    %173 = vector.shape_cast %172 : vector<1x8x256xf32> to vector<8x256xf32>
    %174 = vector.shape_cast %173 : vector<8x256xf32> to vector<1x8x256xf32>
    %175 = vector.extract_strided_slice %147 {offsets = [0, 3, 0], sizes = [8, 1, 256], strides = [1, 1, 1]} : vector<8x8x256xf32> to vector<8x1x256xf32>
    %176 = vector.broadcast %174 : vector<1x8x256xf32> to vector<8x8x256xf32>
    %177 = vector.broadcast %175 : vector<8x1x256xf32> to vector<8x8x256xf32>
    %178 = arith.mulf %176, %177 : vector<8x8x256xf32>
    %179 = arith.addf %171, %178 : vector<8x8x256xf32>
    %180 = vector.extract_strided_slice %148 {offsets = [4, 0, 0], sizes = [1, 8, 256], strides = [1, 1, 1]} : vector<8x8x256xf32> to vector<1x8x256xf32>
    %181 = vector.shape_cast %180 : vector<1x8x256xf32> to vector<8x256xf32>
    %182 = vector.shape_cast %181 : vector<8x256xf32> to vector<1x8x256xf32>
    %183 = vector.extract_strided_slice %147 {offsets = [0, 4, 0], sizes = [8, 1, 256], strides = [1, 1, 1]} : vector<8x8x256xf32> to vector<8x1x256xf32>
    %184 = vector.broadcast %182 : vector<1x8x256xf32> to vector<8x8x256xf32>
    %185 = vector.broadcast %183 : vector<8x1x256xf32> to vector<8x8x256xf32>
    %186 = arith.mulf %184, %185 : vector<8x8x256xf32>
    %187 = arith.addf %179, %186 : vector<8x8x256xf32>
    %188 = vector.extract_strided_slice %148 {offsets = [5, 0, 0], sizes = [1, 8, 256], strides = [1, 1, 1]} : vector<8x8x256xf32> to vector<1x8x256xf32>
    %189 = vector.shape_cast %188 : vector<1x8x256xf32> to vector<8x256xf32>
    %190 = vector.shape_cast %189 : vector<8x256xf32> to vector<1x8x256xf32>
    %191 = vector.extract_strided_slice %147 {offsets = [0, 5, 0], sizes = [8, 1, 256], strides = [1, 1, 1]} : vector<8x8x256xf32> to vector<8x1x256xf32>
    %192 = vector.broadcast %190 : vector<1x8x256xf32> to vector<8x8x256xf32>
    %193 = vector.broadcast %191 : vector<8x1x256xf32> to vector<8x8x256xf32>
    %194 = arith.mulf %192, %193 : vector<8x8x256xf32>
    %195 = arith.addf %187, %194 : vector<8x8x256xf32>
    %196 = vector.extract_strided_slice %148 {offsets = [6, 0, 0], sizes = [1, 8, 256], strides = [1, 1, 1]} : vector<8x8x256xf32> to vector<1x8x256xf32>
    %197 = vector.shape_cast %196 : vector<1x8x256xf32> to vector<8x256xf32>
    %198 = vector.shape_cast %197 : vector<8x256xf32> to vector<1x8x256xf32>
    %199 = vector.extract_strided_slice %147 {offsets = [0, 6, 0], sizes = [8, 1, 256], strides = [1, 1, 1]} : vector<8x8x256xf32> to vector<8x1x256xf32>
    %200 = vector.broadcast %198 : vector<1x8x256xf32> to vector<8x8x256xf32>
    %201 = vector.broadcast %199 : vector<8x1x256xf32> to vector<8x8x256xf32>
    %202 = arith.mulf %200, %201 : vector<8x8x256xf32>
    %203 = arith.addf %195, %202 : vector<8x8x256xf32>
    %204 = vector.extract_strided_slice %148 {offsets = [7, 0, 0], sizes = [1, 8, 256], strides = [1, 1, 1]} : vector<8x8x256xf32> to vector<1x8x256xf32>
    %205 = vector.shape_cast %204 : vector<1x8x256xf32> to vector<8x256xf32>
    %206 = vector.shape_cast %205 : vector<8x256xf32> to vector<1x8x256xf32>
    %207 = vector.extract_strided_slice %147 {offsets = [0, 7, 0], sizes = [8, 1, 256], strides = [1, 1, 1]} : vector<8x8x256xf32> to vector<8x1x256xf32>
    %208 = vector.broadcast %206 : vector<1x8x256xf32> to vector<8x8x256xf32>
    %209 = vector.broadcast %207 : vector<8x1x256xf32> to vector<8x8x256xf32>
    %210 = arith.mulf %208, %209 : vector<8x8x256xf32>
    %211 = arith.addf %203, %210 : vector<8x8x256xf32>
    %c0_52 = arith.constant 0 : index
    %c0_53 = arith.constant 0 : index
    %212 = vector.load %arg17[%c0_52, %c0_53] : memref<1x256xf32, #tpu.memory_space<vmem>>, vector<1x256xf32>
    %213 = vector.shape_cast %212 : vector<1x256xf32> to vector<1x1x256xf32>
    %214 = vector.broadcast %213 : vector<1x1x256xf32> to vector<8x8x256xf32>
    %215 = arith.addf %211, %214 : vector<8x8x256xf32>
    %cst_54 = arith.constant 3.000000e+00 : f32
    %216 = vector.broadcast %cst_54 : f32 to vector<8x8x256xf32>
    %217 = arith.addf %215, %216 : vector<8x8x256xf32>
    %cst_55 = arith.constant 0.000000e+00 : f32
    %cst_56 = arith.constant 6.000000e+00 : f32
    %218 = vector.broadcast %cst_55 : f32 to vector<8x8x256xf32>
    %219 = arith.maximumf %218, %217 : vector<8x8x256xf32>
    %220 = vector.broadcast %cst_56 : f32 to vector<8x8x256xf32>
    %221 = arith.minimumf %220, %219 : vector<8x8x256xf32>
    %222 = arith.mulf %215, %221 : vector<8x8x256xf32>
    %cst_57 = arith.constant 0.166666672 : f32
    %223 = vector.broadcast %cst_57 : f32 to vector<8x8x256xf32>
    %224 = arith.mulf %222, %223 : vector<8x8x256xf32>
    %cst_58 = arith.constant dense<0.000000e+00> : vector<8x256xf32>
    %225 = vector.multi_reduction <add>, %224, %cst_58 [1] : vector<8x8x256xf32> to vector<8x256xf32>
    %cst_59 = arith.constant 8.000000e+00 : f32
    %226 = vector.broadcast %cst_59 : f32 to vector<8x256xf32>
    %227 = arith.divf %225, %226 : vector<8x256xf32>
    %c0_60 = arith.constant 0 : index
    %c0_61 = arith.constant 0 : index
    %228 = vector.load %arg11[%c0_60, %c0_61] : memref<256x48xbf16, #tpu.memory_space<vmem>>, vector<256x48xbf16>
    %229 = arith.truncf %227 : vector<8x256xf32> to vector<8x256xbf16>
    %cst_62 = arith.constant dense<0.000000e+00> : vector<8x48xf32>
    %230 = tpu.matmul %229, %228, %cst_62 {dimension_numbers = #tpu.dot_dimension_numbers<[1], [0], [0], [1], [0, 0, 1, 1], [], []>} : vector<8x256xbf16>, vector<256x48xbf16>, vector<8x48xf32> -> vector<8x48xf32>
    %c0_63 = arith.constant 0 : index
    %c0_64 = arith.constant 0 : index
    %231 = vector.load %arg15[%c0_63, %c0_64] : memref<1x48xf32, #tpu.memory_space<vmem>>, vector<1x48xf32>
    %232 = vector.broadcast %231 : vector<1x48xf32> to vector<8x48xf32>
    %233 = arith.addf %230, %232 : vector<8x48xf32>
    %cst_65 = arith.constant 0.000000e+00 : f32
    %234 = vector.broadcast %cst_65 : f32 to vector<8x48xf32>
    %235 = arith.maximumf %233, %234 : vector<8x48xf32>
    %c0_66 = arith.constant 0 : index
    %c0_67 = arith.constant 0 : index
    %236 = vector.load %arg12[%c0_66, %c0_67] : memref<48x256xbf16, #tpu.memory_space<vmem>>, vector<48x256xbf16>
    %237 = arith.truncf %235 : vector<8x48xf32> to vector<8x48xbf16>
    %cst_68 = arith.constant dense<0.000000e+00> : vector<8x256xf32>
    %238 = tpu.matmul %237, %236, %cst_68 {dimension_numbers = #tpu.dot_dimension_numbers<[1], [0], [0], [1], [0, 0, 1, 1], [], []>} : vector<8x48xbf16>, vector<48x256xbf16>, vector<8x256xf32> -> vector<8x256xf32>
    %c0_69 = arith.constant 0 : index
    %c0_70 = arith.constant 0 : index
    %239 = vector.load %arg16[%c0_69, %c0_70] : memref<1x256xf32, #tpu.memory_space<vmem>>, vector<1x256xf32>
    %240 = vector.broadcast %239 : vector<1x256xf32> to vector<8x256xf32>
    %241 = arith.addf %238, %240 : vector<8x256xf32>
    %cst_71 = arith.constant 3.000000e+00 : f32
    %242 = vector.broadcast %cst_71 : f32 to vector<8x256xf32>
    %243 = arith.addf %241, %242 : vector<8x256xf32>
    %cst_72 = arith.constant 0.000000e+00 : f32
    %cst_73 = arith.constant 6.000000e+00 : f32
    %244 = vector.broadcast %cst_72 : f32 to vector<8x256xf32>
    %245 = arith.maximumf %244, %243 : vector<8x256xf32>
    %246 = vector.broadcast %cst_73 : f32 to vector<8x256xf32>
    %247 = arith.minimumf %246, %245 : vector<8x256xf32>
    %cst_74 = arith.constant 0.166666672 : f32
    %248 = vector.broadcast %cst_74 : f32 to vector<8x256xf32>
    %249 = arith.mulf %247, %248 : vector<8x256xf32>
    %250 = vector.shape_cast %249 : vector<8x256xf32> to vector<8x1x256xf32>
    %251 = vector.broadcast %250 : vector<8x1x256xf32> to vector<8x8x256xf32>
    %252 = arith.mulf %224, %251 : vector<8x8x256xf32>
    %c0_75 = arith.constant 0 : index
    %c0_76 = arith.constant 0 : index
    %253 = vector.load %arg14[%c0_75, %c0_76] : memref<256x64xbf16, #tpu.memory_space<vmem>>, vector<256x64xbf16>
    %254 = vector.shape_cast %252 : vector<8x8x256xf32> to vector<64x256xf32>
    %255 = arith.truncf %254 : vector<64x256xf32> to vector<64x256xbf16>
    %cst_77 = arith.constant dense<0.000000e+00> : vector<64x64xf32>
    %256 = tpu.matmul %255, %253, %cst_77 {dimension_numbers = #tpu.dot_dimension_numbers<[1], [0], [0], [1], [0, 0, 1, 1], [], []>} : vector<64x256xbf16>, vector<256x64xbf16>, vector<64x64xf32> -> vector<64x64xf32>
    %257 = vector.shape_cast %256 : vector<64x64xf32> to vector<8x8x64xf32>
    %c0_78 = arith.constant 0 : index
    %c0_79 = arith.constant 0 : index
    %258 = vector.load %arg18[%c0_78, %c0_79] : memref<1x64xf32, #tpu.memory_space<vmem>>, vector<1x64xf32>
    %259 = vector.shape_cast %258 : vector<1x64xf32> to vector<1x1x64xf32>
    %260 = vector.broadcast %259 : vector<1x1x64xf32> to vector<8x8x64xf32>
    %261 = arith.addf %257, %260 : vector<8x8x64xf32>
    %262 = arith.addf %261, %128 : vector<8x8x64xf32>
    %263 = vector.extract_strided_slice %146 {offsets = [0, 0, 256], sizes = [8, 8, 256], strides = [1, 1, 1]} : vector<8x8x512xf32> to vector<8x8x256xf32>
    %c0_80 = arith.constant 0 : index
    %c0_81 = arith.constant 0 : index
    %c0_82 = arith.constant 0 : index
    %264 = vector.load %arg35[%c0_80, %c0_81, %c0_82] : memref<8x8x256xf32, #tpu.memory_space<vmem>>, vector<8x8x256xf32>
    %265 = vector.extract_strided_slice %264 {offsets = [0, 0, 0], sizes = [1, 8, 256], strides = [1, 1, 1]} : vector<8x8x256xf32> to vector<1x8x256xf32>
    %266 = vector.shape_cast %265 : vector<1x8x256xf32> to vector<8x256xf32>
    %267 = vector.shape_cast %266 : vector<8x256xf32> to vector<1x8x256xf32>
    %268 = vector.extract_strided_slice %263 {offsets = [0, 0, 0], sizes = [8, 1, 256], strides = [1, 1, 1]} : vector<8x8x256xf32> to vector<8x1x256xf32>
    %269 = vector.broadcast %267 : vector<1x8x256xf32> to vector<8x8x256xf32>
    %270 = vector.broadcast %268 : vector<8x1x256xf32> to vector<8x8x256xf32>
    %271 = arith.mulf %269, %270 : vector<8x8x256xf32>
    %272 = vector.extract_strided_slice %264 {offsets = [1, 0, 0], sizes = [1, 8, 256], strides = [1, 1, 1]} : vector<8x8x256xf32> to vector<1x8x256xf32>
    %273 = vector.shape_cast %272 : vector<1x8x256xf32> to vector<8x256xf32>
    %274 = vector.shape_cast %273 : vector<8x256xf32> to vector<1x8x256xf32>
    %275 = vector.extract_strided_slice %263 {offsets = [0, 1, 0], sizes = [8, 1, 256], strides = [1, 1, 1]} : vector<8x8x256xf32> to vector<8x1x256xf32>
    %276 = vector.broadcast %274 : vector<1x8x256xf32> to vector<8x8x256xf32>
    %277 = vector.broadcast %275 : vector<8x1x256xf32> to vector<8x8x256xf32>
    %278 = arith.mulf %276, %277 : vector<8x8x256xf32>
    %279 = arith.addf %271, %278 : vector<8x8x256xf32>
    %280 = vector.extract_strided_slice %264 {offsets = [2, 0, 0], sizes = [1, 8, 256], strides = [1, 1, 1]} : vector<8x8x256xf32> to vector<1x8x256xf32>
    %281 = vector.shape_cast %280 : vector<1x8x256xf32> to vector<8x256xf32>
    %282 = vector.shape_cast %281 : vector<8x256xf32> to vector<1x8x256xf32>
    %283 = vector.extract_strided_slice %263 {offsets = [0, 2, 0], sizes = [8, 1, 256], strides = [1, 1, 1]} : vector<8x8x256xf32> to vector<8x1x256xf32>
    %284 = vector.broadcast %282 : vector<1x8x256xf32> to vector<8x8x256xf32>
    %285 = vector.broadcast %283 : vector<8x1x256xf32> to vector<8x8x256xf32>
    %286 = arith.mulf %284, %285 : vector<8x8x256xf32>
    %287 = arith.addf %279, %286 : vector<8x8x256xf32>
    %288 = vector.extract_strided_slice %264 {offsets = [3, 0, 0], sizes = [1, 8, 256], strides = [1, 1, 1]} : vector<8x8x256xf32> to vector<1x8x256xf32>
    %289 = vector.shape_cast %288 : vector<1x8x256xf32> to vector<8x256xf32>
    %290 = vector.shape_cast %289 : vector<8x256xf32> to vector<1x8x256xf32>
    %291 = vector.extract_strided_slice %263 {offsets = [0, 3, 0], sizes = [8, 1, 256], strides = [1, 1, 1]} : vector<8x8x256xf32> to vector<8x1x256xf32>
    %292 = vector.broadcast %290 : vector<1x8x256xf32> to vector<8x8x256xf32>
    %293 = vector.broadcast %291 : vector<8x1x256xf32> to vector<8x8x256xf32>
    %294 = arith.mulf %292, %293 : vector<8x8x256xf32>
    %295 = arith.addf %287, %294 : vector<8x8x256xf32>
    %296 = vector.extract_strided_slice %264 {offsets = [4, 0, 0], sizes = [1, 8, 256], strides = [1, 1, 1]} : vector<8x8x256xf32> to vector<1x8x256xf32>
    %297 = vector.shape_cast %296 : vector<1x8x256xf32> to vector<8x256xf32>
    %298 = vector.shape_cast %297 : vector<8x256xf32> to vector<1x8x256xf32>
    %299 = vector.extract_strided_slice %263 {offsets = [0, 4, 0], sizes = [8, 1, 256], strides = [1, 1, 1]} : vector<8x8x256xf32> to vector<8x1x256xf32>
    %300 = vector.broadcast %298 : vector<1x8x256xf32> to vector<8x8x256xf32>
    %301 = vector.broadcast %299 : vector<8x1x256xf32> to vector<8x8x256xf32>
    %302 = arith.mulf %300, %301 : vector<8x8x256xf32>
    %303 = arith.addf %295, %302 : vector<8x8x256xf32>
    %304 = vector.extract_strided_slice %264 {offsets = [5, 0, 0], sizes = [1, 8, 256], strides = [1, 1, 1]} : vector<8x8x256xf32> to vector<1x8x256xf32>
    %305 = vector.shape_cast %304 : vector<1x8x256xf32> to vector<8x256xf32>
    %306 = vector.shape_cast %305 : vector<8x256xf32> to vector<1x8x256xf32>
    %307 = vector.extract_strided_slice %263 {offsets = [0, 5, 0], sizes = [8, 1, 256], strides = [1, 1, 1]} : vector<8x8x256xf32> to vector<8x1x256xf32>
    %308 = vector.broadcast %306 : vector<1x8x256xf32> to vector<8x8x256xf32>
    %309 = vector.broadcast %307 : vector<8x1x256xf32> to vector<8x8x256xf32>
    %310 = arith.mulf %308, %309 : vector<8x8x256xf32>
    %311 = arith.addf %303, %310 : vector<8x8x256xf32>
    %312 = vector.extract_strided_slice %264 {offsets = [6, 0, 0], sizes = [1, 8, 256], strides = [1, 1, 1]} : vector<8x8x256xf32> to vector<1x8x256xf32>
    %313 = vector.shape_cast %312 : vector<1x8x256xf32> to vector<8x256xf32>
    %314 = vector.shape_cast %313 : vector<8x256xf32> to vector<1x8x256xf32>
    %315 = vector.extract_strided_slice %263 {offsets = [0, 6, 0], sizes = [8, 1, 256], strides = [1, 1, 1]} : vector<8x8x256xf32> to vector<8x1x256xf32>
    %316 = vector.broadcast %314 : vector<1x8x256xf32> to vector<8x8x256xf32>
    %317 = vector.broadcast %315 : vector<8x1x256xf32> to vector<8x8x256xf32>
    %318 = arith.mulf %316, %317 : vector<8x8x256xf32>
    %319 = arith.addf %311, %318 : vector<8x8x256xf32>
    %320 = vector.extract_strided_slice %264 {offsets = [7, 0, 0], sizes = [1, 8, 256], strides = [1, 1, 1]} : vector<8x8x256xf32> to vector<1x8x256xf32>
    %321 = vector.shape_cast %320 : vector<1x8x256xf32> to vector<8x256xf32>
    %322 = vector.shape_cast %321 : vector<8x256xf32> to vector<1x8x256xf32>
    %323 = vector.extract_strided_slice %263 {offsets = [0, 7, 0], sizes = [8, 1, 256], strides = [1, 1, 1]} : vector<8x8x256xf32> to vector<8x1x256xf32>
    %324 = vector.broadcast %322 : vector<1x8x256xf32> to vector<8x8x256xf32>
    %325 = vector.broadcast %323 : vector<8x1x256xf32> to vector<8x8x256xf32>
    %326 = arith.mulf %324, %325 : vector<8x8x256xf32>
    %327 = arith.addf %319, %326 : vector<8x8x256xf32>
    %c0_83 = arith.constant 0 : index
    %c0_84 = arith.constant 0 : index
    %328 = vector.load %arg39[%c0_83, %c0_84] : memref<1x256xf32, #tpu.memory_space<vmem>>, vector<1x256xf32>
    %329 = vector.shape_cast %328 : vector<1x256xf32> to vector<1x1x256xf32>
    %330 = vector.broadcast %329 : vector<1x1x256xf32> to vector<8x8x256xf32>
    %331 = arith.addf %327, %330 : vector<8x8x256xf32>
    %cst_85 = arith.constant 3.000000e+00 : f32
    %332 = vector.broadcast %cst_85 : f32 to vector<8x8x256xf32>
    %333 = arith.addf %331, %332 : vector<8x8x256xf32>
    %cst_86 = arith.constant 0.000000e+00 : f32
    %cst_87 = arith.constant 6.000000e+00 : f32
    %334 = vector.broadcast %cst_86 : f32 to vector<8x8x256xf32>
    %335 = arith.maximumf %334, %333 : vector<8x8x256xf32>
    %336 = vector.broadcast %cst_87 : f32 to vector<8x8x256xf32>
    %337 = arith.minimumf %336, %335 : vector<8x8x256xf32>
    %338 = arith.mulf %331, %337 : vector<8x8x256xf32>
    %cst_88 = arith.constant 0.166666672 : f32
    %339 = vector.broadcast %cst_88 : f32 to vector<8x8x256xf32>
    %340 = arith.mulf %338, %339 : vector<8x8x256xf32>
    %cst_89 = arith.constant dense<0.000000e+00> : vector<8x256xf32>
    %341 = vector.multi_reduction <add>, %340, %cst_89 [1] : vector<8x8x256xf32> to vector<8x256xf32>
    %cst_90 = arith.constant 8.000000e+00 : f32
    %342 = vector.broadcast %cst_90 : f32 to vector<8x256xf32>
    %343 = arith.divf %341, %342 : vector<8x256xf32>
    %c0_91 = arith.constant 0 : index
    %c0_92 = arith.constant 0 : index
    %344 = vector.load %arg33[%c0_91, %c0_92] : memref<256x48xbf16, #tpu.memory_space<vmem>>, vector<256x48xbf16>
    %345 = arith.truncf %343 : vector<8x256xf32> to vector<8x256xbf16>
    %cst_93 = arith.constant dense<0.000000e+00> : vector<8x48xf32>
    %346 = tpu.matmul %345, %344, %cst_93 {dimension_numbers = #tpu.dot_dimension_numbers<[1], [0], [0], [1], [0, 0, 1, 1], [], []>} : vector<8x256xbf16>, vector<256x48xbf16>, vector<8x48xf32> -> vector<8x48xf32>
    %c0_94 = arith.constant 0 : index
    %c0_95 = arith.constant 0 : index
    %347 = vector.load %arg37[%c0_94, %c0_95] : memref<1x48xf32, #tpu.memory_space<vmem>>, vector<1x48xf32>
    %348 = vector.broadcast %347 : vector<1x48xf32> to vector<8x48xf32>
    %349 = arith.addf %346, %348 : vector<8x48xf32>
    %cst_96 = arith.constant 0.000000e+00 : f32
    %350 = vector.broadcast %cst_96 : f32 to vector<8x48xf32>
    %351 = arith.maximumf %349, %350 : vector<8x48xf32>
    %c0_97 = arith.constant 0 : index
    %c0_98 = arith.constant 0 : index
    %352 = vector.load %arg34[%c0_97, %c0_98] : memref<48x256xbf16, #tpu.memory_space<vmem>>, vector<48x256xbf16>
    %353 = arith.truncf %351 : vector<8x48xf32> to vector<8x48xbf16>
    %cst_99 = arith.constant dense<0.000000e+00> : vector<8x256xf32>
    %354 = tpu.matmul %353, %352, %cst_99 {dimension_numbers = #tpu.dot_dimension_numbers<[1], [0], [0], [1], [0, 0, 1, 1], [], []>} : vector<8x48xbf16>, vector<48x256xbf16>, vector<8x256xf32> -> vector<8x256xf32>
    %c0_100 = arith.constant 0 : index
    %c0_101 = arith.constant 0 : index
    %355 = vector.load %arg38[%c0_100, %c0_101] : memref<1x256xf32, #tpu.memory_space<vmem>>, vector<1x256xf32>
    %356 = vector.broadcast %355 : vector<1x256xf32> to vector<8x256xf32>
    %357 = arith.addf %354, %356 : vector<8x256xf32>
    %cst_102 = arith.constant 3.000000e+00 : f32
    %358 = vector.broadcast %cst_102 : f32 to vector<8x256xf32>
    %359 = arith.addf %357, %358 : vector<8x256xf32>
    %cst_103 = arith.constant 0.000000e+00 : f32
    %cst_104 = arith.constant 6.000000e+00 : f32
    %360 = vector.broadcast %cst_103 : f32 to vector<8x256xf32>
    %361 = arith.maximumf %360, %359 : vector<8x256xf32>
    %362 = vector.broadcast %cst_104 : f32 to vector<8x256xf32>
    %363 = arith.minimumf %362, %361 : vector<8x256xf32>
    %cst_105 = arith.constant 0.166666672 : f32
    %364 = vector.broadcast %cst_105 : f32 to vector<8x256xf32>
    %365 = arith.mulf %363, %364 : vector<8x256xf32>
    %366 = vector.shape_cast %365 : vector<8x256xf32> to vector<8x1x256xf32>
    %367 = vector.broadcast %366 : vector<8x1x256xf32> to vector<8x8x256xf32>
    %368 = arith.mulf %340, %367 : vector<8x8x256xf32>
    %c0_106 = arith.constant 0 : index
    %c0_107 = arith.constant 0 : index
    %369 = vector.load %arg36[%c0_106, %c0_107] : memref<256x64xbf16, #tpu.memory_space<vmem>>, vector<256x64xbf16>
    %370 = vector.shape_cast %368 : vector<8x8x256xf32> to vector<64x256xf32>
    %371 = arith.truncf %370 : vector<64x256xf32> to vector<64x256xbf16>
    %cst_108 = arith.constant dense<0.000000e+00> : vector<64x64xf32>
    %372 = tpu.matmul %371, %369, %cst_108 {dimension_numbers = #tpu.dot_dimension_numbers<[1], [0], [0], [1], [0, 0, 1, 1], [], []>} : vector<64x256xbf16>, vector<256x64xbf16>, vector<64x64xf32> -> vector<64x64xf32>
    %373 = vector.shape_cast %372 : vector<64x64xf32> to vector<8x8x64xf32>
    %c0_109 = arith.constant 0 : index
    %c0_110 = arith.constant 0 : index
    %374 = vector.load %arg40[%c0_109, %c0_110] : memref<1x64xf32, #tpu.memory_space<vmem>>, vector<1x64xf32>
    %375 = vector.shape_cast %374 : vector<1x64xf32> to vector<1x1x64xf32>
    %376 = vector.broadcast %375 : vector<1x1x64xf32> to vector<8x8x64xf32>
    %377 = arith.addf %373, %376 : vector<8x8x64xf32>
    %378 = arith.addf %377, %128 : vector<8x8x64xf32>
    %c0_111 = arith.constant 0 : index
    %c0_112 = arith.constant 0 : index
    %379 = vector.load %arg7[%c0_111, %c0_112] : memref<512x32xbf16, #tpu.memory_space<vmem>>, vector<512x32xbf16>
    %c0_113 = arith.constant 0 : index
    %c0_114 = arith.constant 0 : index
    %380 = vector.load %arg8[%c0_113, %c0_114] : memref<1x32xf32, #tpu.memory_space<vmem>>, vector<1x32xf32>
    %381 = arith.truncf %262 : vector<8x8x64xf32> to vector<8x8x64xbf16>
    %382 = vector.shape_cast %381 : vector<8x8x64xbf16> to vector<8x512xbf16>
    %cst_115 = arith.constant dense<0.000000e+00> : vector<8x32xf32>
    %383 = tpu.matmul %382, %379, %cst_115 {dimension_numbers = #tpu.dot_dimension_numbers<[1], [0], [0], [1], [0, 0, 1, 1], [], []>} : vector<8x512xbf16>, vector<512x32xbf16>, vector<8x32xf32> -> vector<8x32xf32>
    %384 = vector.broadcast %380 : vector<1x32xf32> to vector<8x32xf32>
    %385 = arith.addf %383, %384 : vector<8x32xf32>
    %cst_116 = arith.constant 0.000000e+00 : f32
    %386 = vector.broadcast %cst_116 : f32 to vector<8x32xf32>
    %387 = arith.maximumf %385, %386 : vector<8x32xf32>
    %c0_117 = arith.constant 0 : index
    %c0_118 = arith.constant 0 : index
    %388 = vector.load %arg9[%c0_117, %c0_118] : memref<32x32xf32, #tpu.memory_space<vmem>>, vector<32x32xf32>
    %cst_119 = arith.constant dense<0.000000e+00> : vector<8x32xf32>
    %389 = tpu.matmul %387, %388, %cst_119 {dimension_numbers = #tpu.dot_dimension_numbers<[1], [0], [0], [1], [0, 0, 1, 1], [], []>} : vector<8x32xf32>, vector<32x32xf32>, vector<8x32xf32> -> vector<8x32xf32>
    %c0_120 = arith.constant 0 : index
    %c0_121 = arith.constant 0 : index
    %390 = vector.load %arg10[%c0_120, %c0_121] : memref<1x32xf32, #tpu.memory_space<vmem>>, vector<1x32xf32>
    %391 = vector.broadcast %390 : vector<1x32xf32> to vector<8x32xf32>
    %392 = arith.addf %389, %391 : vector<8x32xf32>
    %c0_122 = arith.constant 0 : index
    %c0_123 = arith.constant 0 : index
    %393 = vector.load %arg29[%c0_122, %c0_123] : memref<512x2xbf16, #tpu.memory_space<vmem>>, vector<512x2xbf16>
    %c0_124 = arith.constant 0 : index
    %c0_125 = arith.constant 0 : index
    %394 = vector.load %arg30[%c0_124, %c0_125] : memref<1x2xf32, #tpu.memory_space<vmem>>, vector<1x2xf32>
    %395 = arith.truncf %378 : vector<8x8x64xf32> to vector<8x8x64xbf16>
    %396 = vector.shape_cast %395 : vector<8x8x64xbf16> to vector<8x512xbf16>
    %cst_126 = arith.constant dense<0.000000e+00> : vector<8x2xf32>
    %397 = tpu.matmul %396, %393, %cst_126 {dimension_numbers = #tpu.dot_dimension_numbers<[1], [0], [0], [1], [0, 0, 1, 1], [], []>} : vector<8x512xbf16>, vector<512x2xbf16>, vector<8x2xf32> -> vector<8x2xf32>
    %398 = vector.broadcast %394 : vector<1x2xf32> to vector<8x2xf32>
    %399 = arith.addf %397, %398 : vector<8x2xf32>
    %cst_127 = arith.constant 0.000000e+00 : f32
    %400 = vector.broadcast %cst_127 : f32 to vector<8x2xf32>
    %401 = arith.maximumf %399, %400 : vector<8x2xf32>
    %c0_128 = arith.constant 0 : index
    %c0_129 = arith.constant 0 : index
    %402 = vector.load %arg31[%c0_128, %c0_129] : memref<2x2xf32, #tpu.memory_space<vmem>>, vector<2x2xf32>
    %c0_130 = arith.constant 0 : index
    %c0_131 = arith.constant 0 : index
    %403 = vector.load %arg32[%c0_130, %c0_131] : memref<1x2xf32, #tpu.memory_space<vmem>>, vector<1x2xf32>
    %404 = vector.extract_strided_slice %401 {offsets = [0, 0], sizes = [8, 1], strides = [1, 1]} : vector<8x2xf32> to vector<8x1xf32>
    %405 = vector.extract_strided_slice %402 {offsets = [0, 0], sizes = [1, 2], strides = [1, 1]} : vector<2x2xf32> to vector<1x2xf32>
    %406 = vector.broadcast %404 : vector<8x1xf32> to vector<8x2xf32>
    %407 = vector.broadcast %405 : vector<1x2xf32> to vector<8x2xf32>
    %408 = arith.mulf %406, %407 : vector<8x2xf32>
    %409 = vector.broadcast %403 : vector<1x2xf32> to vector<8x2xf32>
    %410 = arith.addf %409, %408 : vector<8x2xf32>
    %411 = vector.extract_strided_slice %401 {offsets = [0, 1], sizes = [8, 1], strides = [1, 1]} : vector<8x2xf32> to vector<8x1xf32>
    %412 = vector.extract_strided_slice %402 {offsets = [1, 0], sizes = [1, 2], strides = [1, 1]} : vector<2x2xf32> to vector<1x2xf32>
    %413 = vector.broadcast %411 : vector<8x1xf32> to vector<8x2xf32>
    %414 = vector.broadcast %412 : vector<1x2xf32> to vector<8x2xf32>
    %415 = arith.mulf %413, %414 : vector<8x2xf32>
    %416 = arith.addf %410, %415 : vector<8x2xf32>
    %c0_132 = arith.constant 0 : index
    %c0_133 = arith.constant 0 : index
    %417 = vector.load %arg2[%c0_132, %c0_133] : memref<8x32xi32, #tpu.memory_space<vmem>>, vector<8x32xi32>
    %c0_i32 = arith.constant 0 : i32
    %418 = vector.broadcast %c0_i32 : i32 to vector<8x32xi32>
    %419 = arith.cmpi ne, %417, %418 : vector<8x32xi32>
    %cst_134 = arith.constant -1.000000e+08 : f32
    %420 = vector.broadcast %cst_134 : f32 to vector<8x32xf32>
    %421 = arith.select %419, %392, %420 : vector<8x32xi1>, vector<8x32xf32>
    %cst_135 = arith.constant dense<0xFF800000> : vector<8xf32>
    %422 = vector.multi_reduction <maximumf>, %421, %cst_135 [1] : vector<8x32xf32> to vector<8xf32>
    %423 = vector.shape_cast %422 : vector<8xf32> to vector<8x1xf32>
    %424 = vector.broadcast %423 : vector<8x1xf32> to vector<8x32xf32>
    %425 = arith.subf %421, %424 : vector<8x32xf32>
    %426 = math.exp %425 : vector<8x32xf32>
    %cst_136 = arith.constant dense<0.000000e+00> : vector<8xf32>
    %427 = vector.multi_reduction <add>, %426, %cst_136 [1] : vector<8x32xf32> to vector<8xf32>
    %428 = vector.shape_cast %427 : vector<8xf32> to vector<8x1xf32>
    %429 = math.log %428 : vector<8x1xf32>
    %430 = arith.addf %423, %429 : vector<8x1xf32>
    %431 = vector.broadcast %430 : vector<8x1xf32> to vector<8x32xf32>
    %432 = arith.subf %421, %431 : vector<8x32xf32>
    %433 = math.tanh %416 : vector<8x2xf32>
    %cst_137 = arith.constant 0.000000e+00 : f32
    %434 = vector.broadcast %cst_137 : f32 to vector<8x94xf32>
    %435 = tpu.concatenate %432, %433, %434 in 1 : vector<8x32xf32>, vector<8x2xf32>, vector<8x94xf32> -> vector<8x128xf32>
    %c0_138 = arith.constant 0 : index
    %c0_139 = arith.constant 0 : index
    %436 = vector.load %arg41[%c0_138, %c0_139] : memref<8x128xf32, #tpu.memory_space<vmem>>, vector<8x128xf32>
    tpu.vector_store %arg41[%c0_138, %c0_139], %435 {strides = array<i32>} : memref<8x128xf32, #tpu.memory_space<vmem>>, vector<8x128xf32>,
    return
  }
  func.func @transform_0(%arg0: i32) -> (i32, i32, i32) {
    %c0_i32 = arith.constant 0 : i32
    %c0_i32_0 = arith.constant 0 : i32
    %c0_i32_1 = arith.constant 0 : i32
    return %arg0, %c0_i32, %c0_i32_0 : i32, i32, i32
  }
  func.func @transform_1(%arg0: i32) -> (i32, i32) {
    %c0_i32 = arith.constant 0 : i32
    %c0_i32_0 = arith.constant 0 : i32
    return %arg0, %c0_i32 : i32, i32
  }
  func.func @transform_2(%arg0: i32) -> (i32, i32) {
    %c0_i32 = arith.constant 0 : i32
    %c0_i32_0 = arith.constant 0 : i32
    %c0_i32_1 = arith.constant 0 : i32
    return %c0_i32, %c0_i32_0 : i32, i32
  }
  func.func @transform_3(%arg0: i32) -> (i32, i32) {
    %c0_i32 = arith.constant 0 : i32
    %c0_i32_0 = arith.constant 0 : i32
    %c0_i32_1 = arith.constant 0 : i32
    return %c0_i32, %c0_i32_0 : i32, i32
  }
  func.func @transform_4(%arg0: i32) -> (i32, i32) {
    %c0_i32 = arith.constant 0 : i32
    %c0_i32_0 = arith.constant 0 : i32
    %c0_i32_1 = arith.constant 0 : i32
    return %c0_i32, %c0_i32_0 : i32, i32
  }
  func.func @transform_5(%arg0: i32) -> (i32, i32) {
    %c0_i32 = arith.constant 0 : i32
    %c0_i32_0 = arith.constant 0 : i32
    %c0_i32_1 = arith.constant 0 : i32
    return %c0_i32, %c0_i32_0 : i32, i32
  }
  func.func @transform_6(%arg0: i32) -> (i32, i32) {
    %c0_i32 = arith.constant 0 : i32
    %c0_i32_0 = arith.constant 0 : i32
    %c0_i32_1 = arith.constant 0 : i32
    return %c0_i32, %c0_i32_0 : i32, i32
  }
  func.func @transform_7(%arg0: i32) -> (i32, i32) {
    %c0_i32 = arith.constant 0 : i32
    %c0_i32_0 = arith.constant 0 : i32
    %c0_i32_1 = arith.constant 0 : i32
    return %c0_i32, %c0_i32_0 : i32, i32
  }
  func.func @transform_8(%arg0: i32) -> (i32, i32) {
    %c0_i32 = arith.constant 0 : i32
    %c0_i32_0 = arith.constant 0 : i32
    %c0_i32_1 = arith.constant 0 : i32
    return %c0_i32, %c0_i32_0 : i32, i32
  }
  func.func @transform_9(%arg0: i32) -> (i32, i32) {
    %c0_i32 = arith.constant 0 : i32
    %c0_i32_0 = arith.constant 0 : i32
    %c0_i32_1 = arith.constant 0 : i32
    return %c0_i32, %c0_i32_0 : i32, i32
  }
  func.func @transform_10(%arg0: i32) -> (i32, i32) {
    %c0_i32 = arith.constant 0 : i32
    %c0_i32_0 = arith.constant 0 : i32
    %c0_i32_1 = arith.constant 0 : i32
    return %c0_i32, %c0_i32_0 : i32, i32
  }
  func.func @transform_11(%arg0: i32) -> (i32, i32) {
    %c0_i32 = arith.constant 0 : i32
    %c0_i32_0 = arith.constant 0 : i32
    %c0_i32_1 = arith.constant 0 : i32
    return %c0_i32, %c0_i32_0 : i32, i32
  }
  func.func @transform_12(%arg0: i32) -> (i32, i32, i32) {
    %c0_i32 = arith.constant 0 : i32
    %c0_i32_0 = arith.constant 0 : i32
    %c0_i32_1 = arith.constant 0 : i32
    %c0_i32_2 = arith.constant 0 : i32
    return %c0_i32, %c0_i32_0, %c0_i32_1 : i32, i32, i32
  }
  func.func @transform_13(%arg0: i32) -> (i32, i32) {
    %c0_i32 = arith.constant 0 : i32
    %c0_i32_0 = arith.constant 0 : i32
    %c0_i32_1 = arith.constant 0 : i32
    return %c0_i32, %c0_i32_0 : i32, i32
  }
  func.func @transform_14(%arg0: i32) -> (i32, i32) {
    %c0_i32 = arith.constant 0 : i32
    %c0_i32_0 = arith.constant 0 : i32
    %c0_i32_1 = arith.constant 0 : i32
    return %c0_i32, %c0_i32_0 : i32, i32
  }
  func.func @transform_15(%arg0: i32) -> (i32, i32) {
    %c0_i32 = arith.constant 0 : i32
    %c0_i32_0 = arith.constant 0 : i32
    %c0_i32_1 = arith.constant 0 : i32
    return %c0_i32, %c0_i32_0 : i32, i32
  }
  func.func @transform_16(%arg0: i32) -> (i32, i32) {
    %c0_i32 = arith.constant 0 : i32
    %c0_i32_0 = arith.constant 0 : i32
    %c0_i32_1 = arith.constant 0 : i32
    return %c0_i32, %c0_i32_0 : i32, i32
  }
  func.func @transform_17(%arg0: i32) -> (i32, i32) {
    %c0_i32 = arith.constant 0 : i32
    %c0_i32_0 = arith.constant 0 : i32
    %c0_i32_1 = arith.constant 0 : i32
    return %c0_i32, %c0_i32_0 : i32, i32
  }
  func.func @transform_18(%arg0: i32) -> (i32, i32) {
    %c0_i32 = arith.constant 0 : i32
    %c0_i32_0 = arith.constant 0 : i32
    %c0_i32_1 = arith.constant 0 : i32
    return %c0_i32, %c0_i32_0 : i32, i32
  }
  func.func @transform_19(%arg0: i32) -> (i32, i32) {
    %c0_i32 = arith.constant 0 : i32
    %c0_i32_0 = arith.constant 0 : i32
    %c0_i32_1 = arith.constant 0 : i32
    return %c0_i32, %c0_i32_0 : i32, i32
  }
  func.func @transform_20(%arg0: i32) -> (i32, i32, i32) {
    %c0_i32 = arith.constant 0 : i32
    %c0_i32_0 = arith.constant 0 : i32
    %c0_i32_1 = arith.constant 0 : i32
    %c0_i32_2 = arith.constant 0 : i32
    return %c0_i32, %c0_i32_0, %c0_i32_1 : i32, i32, i32
  }
  func.func @transform_21(%arg0: i32) -> (i32, i32) {
    %c0_i32 = arith.constant 0 : i32
    %c0_i32_0 = arith.constant 0 : i32
    %c0_i32_1 = arith.constant 0 : i32
    return %c0_i32, %c0_i32_0 : i32, i32
  }
  func.func @transform_22(%arg0: i32) -> (i32, i32) {
    %c0_i32 = arith.constant 0 : i32
    %c0_i32_0 = arith.constant 0 : i32
    %c0_i32_1 = arith.constant 0 : i32
    return %c0_i32, %c0_i32_0 : i32, i32
  }
  func.func @transform_23(%arg0: i32) -> (i32, i32) {
    %c0_i32 = arith.constant 0 : i32
    %c0_i32_0 = arith.constant 0 : i32
    %c0_i32_1 = arith.constant 0 : i32
    return %c0_i32, %c0_i32_0 : i32, i32
  }
  func.func @transform_24(%arg0: i32) -> (i32, i32) {
    %c0_i32 = arith.constant 0 : i32
    %c0_i32_0 = arith.constant 0 : i32
    %c0_i32_1 = arith.constant 0 : i32
    return %c0_i32, %c0_i32_0 : i32, i32
  }
  func.func @transform_25(%arg0: i32) -> (i32, i32) {
    %c0_i32 = arith.constant 0 : i32
    %c0_i32_0 = arith.constant 0 : i32
    %c0_i32_1 = arith.constant 0 : i32
    return %c0_i32, %c0_i32_0 : i32, i32
  }
  func.func @transform_26(%arg0: i32) -> (i32, i32) {
    %c0_i32 = arith.constant 0 : i32
    %c0_i32_0 = arith.constant 0 : i32
    %c0_i32_1 = arith.constant 0 : i32
    return %c0_i32, %c0_i32_0 : i32, i32
  }
  func.func @transform_27(%arg0: i32) -> (i32, i32) {
    %c0_i32 = arith.constant 0 : i32
    %c0_i32_0 = arith.constant 0 : i32
    %c0_i32_1 = arith.constant 0 : i32
    return %c0_i32, %c0_i32_0 : i32, i32
  }
  func.func @transform_28(%arg0: i32) -> (i32, i32) {
    %c0_i32 = arith.constant 0 : i32
    %c0_i32_0 = arith.constant 0 : i32
    %c0_i32_1 = arith.constant 0 : i32
    return %c0_i32, %c0_i32_0 : i32, i32
  }
  func.func @transform_29(%arg0: i32) -> (i32, i32) {
    %c0_i32 = arith.constant 0 : i32
    %c0_i32_0 = arith.constant 0 : i32
    %c0_i32_1 = arith.constant 0 : i32
    return %c0_i32, %c0_i32_0 : i32, i32
  }
  func.func @transform_30(%arg0: i32) -> (i32, i32) {
    %c0_i32 = arith.constant 0 : i32
    %c0_i32_0 = arith.constant 0 : i32
    %c0_i32_1 = arith.constant 0 : i32
    return %c0_i32, %c0_i32_0 : i32, i32
  }
  func.func @transform_31(%arg0: i32) -> (i32, i32) {
    %c0_i32 = arith.constant 0 : i32
    %c0_i32_0 = arith.constant 0 : i32
    %c0_i32_1 = arith.constant 0 : i32
    return %c0_i32, %c0_i32_0 : i32, i32
  }
  func.func @transform_32(%arg0: i32) -> (i32, i32) {
    %c0_i32 = arith.constant 0 : i32
    %c0_i32_0 = arith.constant 0 : i32
    %c0_i32_1 = arith.constant 0 : i32
    return %c0_i32, %c0_i32_0 : i32, i32
  }
  func.func @transform_33(%arg0: i32) -> (i32, i32) {
    %c0_i32 = arith.constant 0 : i32
    %c0_i32_0 = arith.constant 0 : i32
    %c0_i32_1 = arith.constant 0 : i32
    return %c0_i32, %c0_i32_0 : i32, i32
  }
  func.func @transform_34(%arg0: i32) -> (i32, i32, i32) {
    %c0_i32 = arith.constant 0 : i32
    %c0_i32_0 = arith.constant 0 : i32
    %c0_i32_1 = arith.constant 0 : i32
    %c0_i32_2 = arith.constant 0 : i32
    return %c0_i32, %c0_i32_0, %c0_i32_1 : i32, i32, i32
  }
  func.func @transform_35(%arg0: i32) -> (i32, i32) {
    %c0_i32 = arith.constant 0 : i32
    %c0_i32_0 = arith.constant 0 : i32
    %c0_i32_1 = arith.constant 0 : i32
    return %c0_i32, %c0_i32_0 : i32, i32
  }
  func.func @transform_36(%arg0: i32) -> (i32, i32) {
    %c0_i32 = arith.constant 0 : i32
    %c0_i32_0 = arith.constant 0 : i32
    %c0_i32_1 = arith.constant 0 : i32
    return %c0_i32, %c0_i32_0 : i32, i32
  }
  func.func @transform_37(%arg0: i32) -> (i32, i32) {
    %c0_i32 = arith.constant 0 : i32
    %c0_i32_0 = arith.constant 0 : i32
    %c0_i32_1 = arith.constant 0 : i32
    return %c0_i32, %c0_i32_0 : i32, i32
  }
  func.func @transform_38(%arg0: i32) -> (i32, i32) {
    %c0_i32 = arith.constant 0 : i32
    %c0_i32_0 = arith.constant 0 : i32
    %c0_i32_1 = arith.constant 0 : i32
    return %c0_i32, %c0_i32_0 : i32, i32
  }
  func.func @transform_39(%arg0: i32) -> (i32, i32) {
    %c0_i32 = arith.constant 0 : i32
    %c0_i32_0 = arith.constant 0 : i32
    %c0_i32_1 = arith.constant 0 : i32
    return %c0_i32, %c0_i32_0 : i32, i32
  }
  func.func @transform_40(%arg0: i32) -> (i32, i32) {
    %c0_i32 = arith.constant 0 : i32
    %c0_i32_0 = arith.constant 0 : i32
    return %arg0, %c0_i32 : i32, i32
  }
}

</mosaic_0001>

<bundles_post_ra>
// kernel: tpu_custom_call.1
= control target key start
LH: loop header
LB: loop body
LE: loop exit
PB: predicated region body
PF: predicated region fallthrough
CT: control target
= control target key end

     0   :  { %s7973_s6 = smov 1   ;;  %s7974_s10 = smov 2   ;;  %s11047_s0 = inlined_call_operand.smem [shape: u32[41], index: -1, kind: input, shape index: {}] }
   0x1   :  { %s8031_s5 = sld [smem:[%s11047_s0]]   ;;  %s7975_s14 = smov 3  }
   0x2   :  { %s8036_s9 = sld [smem:[%s11047_s0 + %s7973_s6]]   ;;  %s7976_s18 = smov 4  }
   0x3   :  { %s8041_s13 = sld [smem:[%s11047_s0 + %s7974_s10]]   ;;  %s7977_s22 = smov 5  }
   0x4   :  { %s8046_s17 = sld [smem:[%s11047_s0 + %s7975_s14]]   ;;  %s7978_s26 = smov 6  }
   0x5   :  { %s8051_s21 = sld [smem:[%s11047_s0 + %s7976_s18]]   ;;  %s7979_s30 = smov 7  }
   0x6   :  { %s8056_s25 = sld [smem:[%s11047_s0 + %s7977_s22]]   ;;  %s7980_s4 = smov 8  }
   0x7   :  { %s8061_s29 = sld [smem:[%s11047_s0 + %s7978_s26]]   ;;  %s7981_s10 = smov 9  }
   0x8   :  { %11141 = sst [smem:[#allocation5_spill]] %s8036_s9  ;;  %s7982_s15 = smov 10  }
   0x9   :  { %s8066_s3 = sld [smem:[%s11047_s0 + %s7979_s30]]   ;;  %s7983_s20 = smov 11  }
   0xa   :  { %s8071_s8 = sld [smem:[%s11047_s0 + %s7980_s4]]   ;;  %s7984_s26 = smov 12  }
   0xb   :  { %s8076_s14 = sld [smem:[%s11047_s0 + %s7981_s10]]   ;;  %s7985_s1 = smov 13  }
   0xc   :  { %11142 = sst [smem:[#allocation6_spill]] %s8056_s25  ;;  %s7986_s7 = smov 14  }
   0xd   :  { %11143 = sst [smem:[#allocation7_spill]] %s8061_s29  ;;  %s7988_s22 = smov 16  }
   0xe   :  { %s8081_s19 = sld [smem:[%s11047_s0 + %s7982_s15]]   ;;  %s7987_s15 = smov 15  }
   0xf   :  { %11144 = sst [smem:[#allocation8_spill]] %s8066_s3  ;;  %s7989_s28 = smov 17  }
  0x10   :  { %11145 = sst [smem:[#allocation9_spill]] %s8071_s8 }
  0x11   :  { %11146 = sst [smem:[#allocation10_spill]] %s8076_s14 }
  0x12   :  { %s8086_s24 = sld [smem:[%s11047_s0 + %s7983_s20]]  }
  0x13   :  { %s8091_s30 = sld [smem:[%s11047_s0 + %s7984_s26]]  }
  0x14   :  { %11147 = sst [smem:[#allocation11_spill]] %s8081_s19 }
  0x15   :  { %s8096_s6 = sld [smem:[%s11047_s0 + %s7985_s1]]  }
  0x16   :  { %s8101_s12 = sld [smem:[%s11047_s0 + %s7986_s7]]   ;;  %s7990_s7 = smov 18  }
  0x17   :  { %s8106_s20 = sld [smem:[%s11047_s0 + %s7987_s15]]   ;;  %s7991_s15 = smov 19  }
  0x18   :  { %11148 = sst [smem:[#allocation12_spill]] %s8086_s24 }
  0x19   :  { %11149 = sst [smem:[#allocation13_spill]] %s8091_s30 }
  0x1a   :  { %s8111_s27 = sld [smem:[%s11047_s0 + %s7988_s22]]   ;;  %s7992_s22 = smov 20  }
  0x1b   :  { %11150 = sst [smem:[#allocation14_spill]] %s8096_s6 }
  0x1c   :  { %11151 = sst [smem:[#allocation15_spill]] %s8101_s12 }
  0x1d   :  { %11152 = sst [smem:[#allocation16_spill]] %s8106_s20 }
  0x1e   :  { %s8116_s4 = sld [smem:[%s11047_s0 + %s7989_s28]]   ;;  %s7993_s28 = smov 21  }
  0x1f   :  { %s8121_s14 = sld [smem:[%s11047_s0 + %s7990_s7]]   ;;  %s7994_s7 = smov 22  }
  0x20   :  { %11153 = sst [smem:[#allocation17_spill]] %s8111_s27 }
  0x21   :  { %s8126_s9 = sld [smem:[%s11047_s0 + %s7991_s15]]   ;;  %s7995_s15 = smov 23  }
  0x22   :  { %s8131_s3 = sld [smem:[%s11047_s0 + %s7992_s22]]   ;;  %s7996_s22 = smov 24  }
  0x23   :  { %s8136_s8 = sld [smem:[%s11047_s0 + %s7993_s28]]   ;;  %s7997_s28 = smov 25  }
  0x24   :  { %11154 = sst [smem:[#allocation18_spill]] %s8116_s4 }
  0x25   :  { %s8141_s4 = sld [smem:[%s11047_s0 + %s7994_s7]]   ;;  %s7998_s7 = smov 26  }
  0x26   :  { %s8146_s29 = sld [smem:[%s11047_s0 + %s7995_s15]]   ;;  %s7999_s15 = smov 27  }
  0x27   :  { %s8151_s20 = sld [smem:[%s11047_s0 + %s7996_s22]]   ;;  %s8000_s22 = smov 28  }
  0x28   :  { %s8156_s12 = sld [smem:[%s11047_s0 + %s7997_s28]]   ;;  %s8001_s28 = smov 29  }
  0x29   :  { %s8161_s6 = sld [smem:[%s11047_s0 + %s7998_s7]]   ;;  %s8002_s7 = smov 30  }
  0x2a   :  { %s8166_s24 = sld [smem:[%s11047_s0 + %s7999_s15]]   ;;  %s8003_s15 = smov 31  }
  0x2b   :  { %s8171_s27 = sld [smem:[%s11047_s0 + %s8000_s22]]   ;;  %s8004_s22 = smov 32  }
  0x2c   :  { %s8176_s30 = sld [smem:[%s11047_s0 + %s8001_s28]]   ;;  %s8005_s28 = smov 33  }
  0x2d   :  { %s8181_s19 = sld [smem:[%s11047_s0 + %s8002_s7]]   ;;  %s8006_s7 = smov 34  }
  0x2e   :  { %s8186_s25 = sld [smem:[%s11047_s0 + %s8003_s15]]   ;;  %s8007_s15 = smov 35  }
  0x31   :  { %11155 = sst [smem:[#allocation19_spill]] %s8171_s27 }
  0x32   :  { %11156 = sst [smem:[#allocation20_spill]] %s8176_s30 }
  0x33   :  { %11157 = sst [smem:[#allocation21_spill]] %s8181_s19 }
  0x34   :  { %11158 = sst [smem:[#allocation22_spill]] %s8186_s25 }
  0x35   :  { %s8191_s27 = sld [smem:[%s11047_s0 + %s8004_s22]]   ;;  %s8008_s22 = smov 36  }
  0x36   :  { %s8196_s30 = sld [smem:[%s11047_s0 + %s8005_s28]]   ;;  %s8009_s28 = smov 37  }
  0x37   :  { %s8201_s19 = sld [smem:[%s11047_s0 + %s8006_s7]]   ;;  %s8010_s7 = smov 38  }
  0x38   :  { %s8206_s25 = sld [smem:[%s11047_s0 + %s8007_s15]]   ;;  %s8011_s15 = smov 39  }
  0x3b   :  { %11159 = sst [smem:[#allocation23_spill]] %s8191_s27 }
  0x3c   :  { %11160 = sst [smem:[#allocation24_spill]] %s8196_s30 }
  0x3d   :  { %11161 = sst [smem:[#allocation25_spill]] %s8201_s19 }
  0x3e   :  { %11162 = sst [smem:[#allocation26_spill]] %s8206_s25 }
  0x3f   :  { %s8211_s27 = sld [smem:[%s11047_s0 + %s8008_s22]]   ;;  %s8012_s22 = smov 40  }
  0x40   :  { %s8216_s30 = sld [smem:[%s11047_s0 + %s8009_s28]]  }
  0x41   :  { %s8221_s19 = sld [smem:[%s11047_s0 + %s8010_s7]]  }
  0x42   :  { %s8226_s25 = sld [smem:[%s11047_s0 + %s8011_s15]]  }
  0x45   :  { %11163 = sst [smem:[#allocation27_spill]] %s8211_s27 }
  0x46   :  { %s8231_s27 = sld [smem:[%s11047_s0 + %s8012_s22]]  }
  0x47   :  { %v7718_v0 = vld [vmem:[%s8041_s13] sm:$0xff]   ;;  %v169_v2 = vld [vmem:[%s8031_s5 + $0x8] sm:$0xff]  ;;  %vm188_vm0 = vcmask 130048   ;;  %v170_v3 = vld [vmem:[%s8031_s5 + $0x10] sm:$0xff]  ;;  %v11060_v21 = vmov 0  }
  0x48   :  { %v168_v1 = vld [vmem:[%s8031_s5] sm:$0xff]  ;;  %7644 = vmatprep.subr.bf16.mxu0 %v7718_v0  ;;  %v171_v5 = vld [vmem:[%s8031_s5 + $0x18] sm:$0xff]  ;;  %v173_v7 = vld [vmem:[%s8031_s5 + $0x28] sm:$0xff]  ;;  %378 = vmatprep.mubr.bf16.mxu1 %v11060_v21 }
  0x49   :  { %v178_v4 = vpack.c.bf16 %v169_v2, %v168_v1  ;;  %v172_v6 = vld [vmem:[%s8031_s5 + $0x20] sm:$0xff]  ;;  %7645 = vmatpush3.bf16.msra.mxu0 %v7718_v0  ;;  %v179_v8 = vpack.c.bf16 %v171_v5, %v170_v3  ;;  %v7719_v10 = vld [vmem:[%s8136_s8 + $0x34] ss:$8 sps:$4 sm:$0xff]   ;;  %v7721_v11 = vld [vmem:[%s8136_s8 + $0x30] ss:$8 sps:$4 sm:$0xff]   ;;  %7715 = vset.pattern.permute.xlu1 %v11060_v21 }
  0x4a   :  { %v180_v9 = vpack.c.bf16 %v173_v7, %v172_v6  ;;  %v174_v12 = vld [vmem:[%s8031_s5 + $0x30] sm:$0xff]  ;;  %v175_v13 = vld [vmem:[%s8031_s5 + $0x38] sm:$0xff]  ;;  %v7722_v14 = vld [vmem:[%s8136_s8 + $0x24] ss:$8 sps:$4 sm:$0xff]   ;;  %354 = vmatprep.subr.bf16.mxu1 %v7719_v10 }
  0x4b   :  { %7646 = vmatprep.mubr.msk.bf16.mxu0 %vm188_vm0, %v178_v4  ;;  %355 = vmatpush1.bf16.msra.mxu1 %v7721_v11  ;;  %v181_v15 = vpack.c.bf16 %v175_v13, %v174_v12  ;;  %v7724_v16 = vld [vmem:[%s8136_s8 + $0x20] ss:$8 sps:$4 sm:$0xff]   ;;  %v7725_v17 = vld [vmem:[%s8136_s8 + $0x14] ss:$8 sps:$4 sm:$0xff]   ;;  %v7727_v18 = vld [vmem:[%s8136_s8 + $0x10] ss:$8 sps:$4 sm:$0xff]  }
  0x4c   :  { %7647 = vmatmul.mubr.msk.bf16.vlgmr.msra.gmra.mxu0 %vm188_vm0, %v179_v8  ;;  %356 = vmatprep.subr.bf16.mxu1 %v7722_v14  ;;  %v7728_v19 = vld [vmem:[%s8136_s8 + $0x4] ss:$8 sps:$4 sm:$0xff]   ;;  %v7730_v20 = vld [vmem:[%s8136_s8] ss:$8 sps:$4 sm:$0xff]  }
  0x4d   :  { %7650 = vmatprep.mubr.msk.bf16.mxu0 %vm188_vm0, %v180_v9 }
  0x4f   :  { %357 = vmatpush1.bf16.msra.mxu1 %v7724_v16 }
  0x50   :  { %358 = vmatprep.subr.bf16.mxu1 %v7725_v17 }
  0x53   :  { %359 = vmatpush1.bf16.msra.mxu1 %v7727_v18 }
  0x54   :  { %7651 = vmatmul.mubr.msk.bf16.gmra.mxu0 %vm188_vm0, %v181_v15  ;;  %360 = vmatprep.subr.bf16.mxu1 %v7728_v19 }
  0x57   :  { %361 = vmatpush1.bf16.msra.mxu1 %v7730_v20 }
  0x58   :  { %86 = vsyncpa [#allocation3], 0  ;;  %v7123_v25 = vld [vmem:[%s8046_s17] ss:$0 sm:$0xff]  ;;  %vm333_vm1 = vcmask 523264   ;;  %v7731_v43 = vld [vmem:[%s8121_s14 + $0x78] sm:$0xff]   ;;  %v421_v58 = vlaneseq }
  0x59   :  { %v7732_v44 = vld [vmem:[%s8121_s14 + $0x38] sm:$0xff]   ;;  %v7733_v45 = vld [vmem:[%s8121_s14 + $0x70] sm:$0xff]   ;;  %7365 = vmatprep.subr.bf16.mxu0 %v7731_v43  ;;  %v7735_v47 = vld [vmem:[%s8121_s14 + $0x68] sm:$0xff]   ;;  %vm1475_vm2 = vcmask 1041409   ;;  %vm1477_vm3 = vcmask 1042434   ;;  %vm1479_vm4 = vcmask 1043459  }
  0x5a   :  { %7366 = vmatpush3.bf16.msra.mxu0 %v7732_v44  ;;  %v7734_v46 = vld [vmem:[%s8121_s14 + $0x30] sm:$0xff]   ;;  %v7736_v48 = vld [vmem:[%s8121_s14 + $0x28] sm:$0xff]   ;;  %v7737_v49 = vld [vmem:[%s8121_s14 + $0x60] sm:$0xff]   ;;  %v8304_v60 = vshrl.u32 %v421_v58, 7  ;;  %vm1481_vm5 = vcmask 1044484   ;;  %vm1483_vm6 = vcmask 1045509  }
  0x5b   :  { %7367 = vmatprep.subr.bf16.mxu0 %v7733_v45  ;;  %v7738_v50 = vld [vmem:[%s8121_s14 + $0x20] sm:$0xff]   ;;  %v7739_v51 = vld [vmem:[%s8121_s14 + $0x58] sm:$0xff]   ;;  %v7741_v53 = vld [vmem:[%s8121_s14 + $0x50] sm:$0xff]   ;;  %vm1485_vm7 = vcmask 1046534   ;;  %vm1487_vm8 = vcmask 1047559   ;;  %vm1686_vm9 = vcmask 392192  }
  0x5c   :  { %v7740_v52 = vld [vmem:[%s8121_s14 + $0x18] sm:$0xff]   ;;  %v7742_v54 = vld [vmem:[%s8121_s14 + $0x10] sm:$0xff]   ;;  %v7743_v55 = vld [vmem:[%s8121_s14 + $0x48] sm:$0xff]   ;;  %11172 = vst [vmem:[#allocation36_spill] sm:$0xff] %v8304_v60  ;;  %v8307_v61 = vsub.s32 0, %v8304_v60  ;;  %v8311_v63 = vsub.s32 1, %v8304_v60 }
  0x5d   :  { %v7744_v56 = vld [vmem:[%s8121_s14 + $0x8] sm:$0xff]   ;;  %v7745_v57 = vld [vmem:[%s8121_s14 + $0x40] sm:$0xff]   ;;  %v8321_v4 = vsub.s32 2, %v8304_v60  ;;  %v8324_v5 = vsub.s32 3, %v8304_v60  ;;  %v8327_v6 = vsub.s32 4, %v8304_v60  ;;  %v8330_v7 = vsub.s32 5, %v8304_v60 }
  0x5e   :  { %7368 = vmatpush3.bf16.msra.mxu0 %v7734_v46  ;;  %v7746_v59 = vld [vmem:[%s8121_s14] sm:$0xff]   ;;  %v8333_v8 = vsub.s32 6, %v8304_v60  ;;  %v8336_v9 = vsub.s32 7, %v8304_v60  ;;  %v8342_v13 = vld [vmem:[%s8131_s3 + $0x10] sm:$0xff]  ;;  %s11232_s0 = sld [smem:[#allocation6_spill]]  ;;  %vm8019_vm10 = vmmov 0  }
  0x5f   :  { %7369 = vmatprep.subr.bf16.mxu0 %v7735_v47  ;;  %v419_v62 = vld [vmem:[%s8161_s6] sm:$0x3]  ;;  %v8350_v18 = vld [vmem:[%s8131_s3 + $0x30] sm:$0xff]  ;;  %s11233_s5 = sld [smem:[#allocation11_spill]]  ;;  %vm6468_vm11 = vcmask 261120   ;;  %s8021_s15 = smov 32  }
  0x60   :  { %v8314_v0 = vrot.slane %v419_v62, %v8307_v61  ;;  %v8317_v2 = vrot.slane %v419_v62, %v8311_v63  ;;  %v8339_v12 = vld [vmem:[%s8131_s3] sm:$0xff]  ;;  %s11239_s13 = sld [smem:[#allocation17_spill]]  ;;  %s8022_s16 = smov [#allocation2]   ;;  %vm7061_vm13 = vcmask 277504  }
  0x61   :  { %v1231_v14 = vld [vmem:[%s8156_s12] sm:$0x3]  ;;  %s11253_s17 = sld [smem:[#allocation12_spill]]  ;;  %s7070_s18 = sshll.u32 %s8022_s16, 4  ;;  %s7071_s18 = int_to_ptr.vmem [resolvable:$true] %s7070_s18 }
  0x62   :  { %7370 = vmatpush3.bf16.msra.mxu0 %v7736_v48  ;;  %v8347_v17 = vld [vmem:[%s8131_s3 + $0x20] sm:$0xff]  ;;  %v8375_v43 = vrot.slane %v1231_v14, %v8307_v61  ;;  %v8381_v48 = vrot.slane %v1231_v14, %v8311_v63  ;;  %v8408_v14 = vld [vmem:[%s8131_s3 + $0x68] sm:$0xff]  ;;  %s11319_s8 = sld [smem:[#allocation23_spill]]  ;;  %s7951_s22 = scalar_lea.vmem %s7071_s18, 128 }
  0x63   :  { %7371 = vmatprep.subr.bf16.mxu0 %v7737_v49  ;;  %v8353_v19 = vld [vmem:[%s8131_s3 + $0x40] sm:$0xff]  ;;  %s11344_s14 = sld [smem:[#allocation16_spill]]  ;;  %p7952_p0 = scmp.ne.s32.totalorder %s7071_s18, %s7951_s22 }
  0x64   :  { %11174 = vst [vmem:[#allocation38_spill] sm:$0xff] %v8375_v43  ;;  %11175 = vst [vmem:[#allocation39_spill] sm:$0xff] %v8381_v48  ;;  %s11373_s6 = sld [smem:[#allocation18_spill]]  ;;  %p7956_p1 = scmp.lt.s32.totalorder %s7071_s18, %s7071_s18 }
  0x65   :  { %s11376_s12 = sld [smem:[#allocation27_spill]]  ;;  %p7957_p2 = scmp.lt.s32.totalorder %s7951_s22, %s7951_s22 }
  0x66   :  { %7372 = vmatpush3.bf16.msra.mxu0 %v7738_v50  ;;  %s11390_s28 = sld [smem:[#allocation19_spill]] }
  0x67   :  { %7373 = vmatprep.subr.bf16.mxu0 %v7739_v51  ;;  %s11391_s1 = sld [smem:[#allocation8_spill]]  ;;  %p7958_p3 = por %p7957_p2, %p7956_p1 }
  0x68   :  { %s11393_s2 = sld [smem:[#allocation10_spill]] }
  0x69   :  { %s11394_s7 = sld [smem:[#allocation20_spill]]  ;;  %p7959_p4 = pnand %p7958_p3, %p7952_p0 }
  0x6a   :  { %7374 = vmatpush3.bf16.msra.mxu0 %v7740_v52  ;;  %s11395_s10 = sld [smem:[#allocation21_spill]] }
  0x6b   :  { %7375 = vmatprep.subr.bf16.mxu0 %v7741_v53  ;;  %v8386_v53 = vld [vmem:[%s8131_s3 + $0x8] sm:$0xff]  ;;  %s11396_s11 = sld [smem:[#allocation22_spill]] }
  0x6e   :  { %7376 = vmatpush3.bf16.msra.mxu0 %v7742_v54 }
  0x6f   :  { %7377 = vmatprep.subr.bf16.mxu0 %v7743_v55  ;;  %v8390_v55 = vld [vmem:[%s8131_s3 + $0x18] sm:$0xff] }
  0x72   :  { %7378 = vmatpush3.bf16.msra.mxu0 %v7744_v56  ;;  %v8393_v56 = vld [vmem:[%s8131_s3 + $0x28] sm:$0xff] }
  0x73   :  { %7379 = vmatprep.subr.bf16.mxu0 %v7745_v57  ;;  %v8396_v57 = vld [vmem:[%s8131_s3 + $0x38] sm:$0xff] }
  0x76   :  { %7380 = vmatpush3.bf16.msra.mxu0 %v7746_v59 }
 0x10c   :  { %v7648_v22 = vpop.f32.mrf.mxu0 }
 0x10d   :  { %v8267_v34 = vadd.f32 %v7648_v22, %v7123_v25 }
 0x10e   :  { %v235_v23 = vpop.f32.mrf.mxu0 }
 0x10f   :  { %v8257_v27 = vadd.f32 %v7123_v25, %v235_v23  ;;  %11167 = vst [vmem:[#allocation31_spill] sm:$0xff] %v8267_v34 }
 0x110   :  { %v7649_v24 = vpop.f32.mrf.mxu0 }
 0x111   :  { %11164 = vst [vmem:[#allocation28_spill] sm:$0xff] %v8257_v27  ;;  %v8265_v32 = vadd.f32 %v7649_v24, %v7123_v25 }
 0x112   :  { %v238_v26 = vpop.f32.mrf.mxu0 }
 0x113   :  { %v8259_v28 = vadd.f32 %v7123_v25, %v238_v26  ;;  %11166 = vst [vmem:[#allocation30_spill] sm:$0xff] %v8265_v32  ;;  %v290_v35 = vpack.c.bf16 %v8265_v32, %v8267_v34  ;;  %v8363_v26 = vld [vmem:[%s8131_s3 + $0x60] sm:$0xff] }
 0x114   :  { %v7652_v29 = vpop.f32.mrf.mxu0 }
 0x115   :  { %11165 = vst [vmem:[#allocation29_spill] sm:$0xff] %v8259_v28  ;;  %v289_v30 = vpack.c.bf16 %v8259_v28, %v8257_v27  ;;  %v8281_v40 = vadd.f32 %v7652_v29, %v7123_v25 }
 0x116   :  { %v251_v31 = vpop.f32.mrf.mxu0 }
 0x117   :  { %7132 = vmatmul.mubr.msk.bf16.vlgmr.msra.gmra.mxu1 %vm333_vm1, %v289_v30  ;;  %v8273_v37 = vadd.f32 %v7123_v25, %v251_v31  ;;  %11170 = vst [vmem:[#allocation34_spill] sm:$0xff] %v8281_v40 }
 0x118   :  { %388 = vmatprep.mubr.bf16.mxu1 %v11060_v21  ;;  %v7653_v33 = vpop.f32.mrf.mxu0 }
 0x119   :  { %11168 = vst [vmem:[#allocation32_spill] sm:$0xff] %v8273_v37  ;;  %v8283_v41 = vadd.f32 %v7653_v33, %v7123_v25 }
 0x11a   :  { %v254_v36 = vpop.f32.mrf.mxu0 }
 0x11b   :  { %v8275_v38 = vadd.f32 %v7123_v25, %v254_v36  ;;  %11171 = vst [vmem:[#allocation35_spill] sm:$0xff] %v8283_v41  ;;  %v292_v42 = vpack.c.bf16 %v8283_v41, %v8281_v40  ;;  %v8360_v25 = vld [vmem:[%s8131_s3 + $0x50] sm:$0xff] }
 0x11c   :  { %v8370_v36 = vld [vmem:[%s8131_s3 + $0x70] sm:$0xff] }
 0x11d   :  { %11169 = vst [vmem:[#allocation33_spill] sm:$0xff] %v8275_v38  ;;  %v291_v39 = vpack.c.bf16 %v8275_v38, %v8273_v37  ;;  %11173 = vst [vmem:[#allocation37_spill] sm:$0xff] %v8370_v36 }
 0x11f   :  { %7133 = vmatmul.mubr.msk.bf16.gmra.mxu1 %vm333_vm1, %v290_v35 }
 0x120   :  { %398 = vmatprep.mubr.bf16.mxu1 %v11060_v21 }
 0x127   :  { %7134 = vmatmul.mubr.msk.bf16.gmra.mxu1 %vm333_vm1, %v291_v39 }
 0x128   :  { %408 = vmatprep.mubr.bf16.mxu1 %v11060_v21 }
 0x12f   :  { %7135 = vmatmul.mubr.msk.bf16.gmra.mxu1 %vm333_vm1, %v292_v42 }
 0x1d7   :  { %v380_v1 = vpop.f32.mrf.mxu1 }
 0x1d8   :  { %v431_v3 = vadd.f32 %v8314_v0, %v380_v1 }
 0x1d9   :  { %v382_v10 = vpop.f32.mrf.mxu1 }
 0x1da   :  { %v447_v11 = vmax.f32 %v431_v3, 0.0  ;;  %v432_v15 = vadd.f32 %v8317_v2, %v382_v10  ;;  %v8402_v10 = vld [vmem:[%s8131_s3 + $0x48] sm:$0xff] }
 0x1db   :  { %v384_v16 = vpop.f32.mrf.mxu1 }
 0x1dc   :  { %v482_v20 = vrot.slane %v447_v11, %v8307_v61  ;;  %v562_v22 = vrot.slane %v447_v11, %v8311_v63  ;;  %v658_v23 = vrot.slane %v447_v11, %v8321_v4  ;;  %v754_v24 = vrot.slane %v447_v11, %v8324_v5 }
 0x1dd   :  { %v850_v29 = vrot.slane %v447_v11, %v8327_v6  ;;  %v946_v30 = vrot.slane %v447_v11, %v8330_v7  ;;  %v1042_v31 = vrot.slane %v447_v11, %v8333_v8  ;;  %v1138_v33 = vrot.slane %v447_v11, %v8336_v9  ;;  %v386_v35 = vpop.f32.mrf.mxu1  ;;  %v8405_v11 = vld [vmem:[%s8131_s3 + $0x58] sm:$0xff] }
 0x1de   :  { %v543_v39 = vmul.f32 %v482_v20, %v8339_v12  ;;  %v623_v42 = vmul.f32 %v562_v22, %v8342_v13  ;;  %v719_v44 = vmul.f32 %v658_v23, %v8347_v17  ;;  %v815_v45 = vmul.f32 %v754_v24, %v8350_v18 }
 0x1df   :  { %v911_v46 = vmul.f32 %v850_v29, %v8353_v19  ;;  %v390_v47 = vpop.f32.mrf.mxu1  ;;  %v1007_v50 = vmul.f32 %v946_v30, %v8360_v25  ;;  %v1103_v51 = vmul.f32 %v1042_v31, %v8363_v26  ;;  %v448_v52 = vmax.f32 %v432_v15, 0.0 }
 0x1e0   :  { %v639_v49 = vadd.f32 %v623_v42, %v543_v39  ;;  %v1199_v54 = vmul.f32 %v1138_v33, %v8370_v36  ;;  %v433_v58 = vadd.f32 %v8314_v0, %v384_v16  ;;  %v434_v59 = vadd.f32 %v8317_v2, %v386_v35  ;;  %v8421_v42 = vld [vmem:[%s8131_s3 + $0x78] sm:$0xff]  ;;  %s11303_s3 = sld [smem:[#allocation25_spill]] }
 0x1e1   :  { %v435_v62 = vadd.f32 %v8314_v0, %v390_v47  ;;  %v392_v1 = vpop.f32.mrf.mxu1  ;;  %v486_v15 = vrot.slane %v448_v52, %v8307_v61  ;;  %v566_v20 = vrot.slane %v448_v52, %v8311_v63  ;;  %v662_v22 = vrot.slane %v448_v52, %v8321_v4  ;;  %11176 = vst [vmem:[#allocation40_spill] sm:$0xff] %v8421_v42 }
 0x1e2   :  { %v735_v3 = vadd.f32 %v719_v44, %v639_v49  ;;  %v758_v16 = vrot.slane %v448_v52, %v8324_v5  ;;  %v854_v23 = vrot.slane %v448_v52, %v8327_v6  ;;  %v950_v24 = vrot.slane %v448_v52, %v8330_v7 }
 0x1e3   :  { %v1046_v29 = vrot.slane %v448_v52, %v8333_v8  ;;  %v544_v31 = vmul.f32 %v486_v15, %v8386_v53  ;;  %v624_v33 = vmul.f32 %v566_v20, %v8390_v55  ;;  %v720_v35 = vmul.f32 %v662_v22, %v8393_v56  ;;  %v394_v39 = vpop.f32.mrf.mxu1 }
 0x1e4   :  { %v831_v30 = vadd.f32 %v815_v45, %v735_v3  ;;  %v816_v44 = vmul.f32 %v758_v16, %v8396_v57  ;;  %v912_v47 = vmul.f32 %v854_v23, %v8402_v10  ;;  %v1008_v49 = vmul.f32 %v950_v24, %v8405_v11 }
 0x1e5   :  { %v8427_v21 = vmul.f32 %v1046_v29, %v8408_v14  ;;  %v640_v45 = vadd.f32 %v624_v33, %v544_v31  ;;  %v1142_v3 = vrot.slane %v448_v52, %v8336_v9  ;;  %v449_v15 = vmax.f32 %v433_v58, 0.0 }
 0x1e6   :  { %v927_v41 = vadd.f32 %v911_v46, %v831_v30  ;;  %v450_v20 = vmax.f32 %v434_v59, 0.0  ;;  %v8430_v40 = vmax.f32 %v435_v62, 0.0  ;;  %v8433_v22 = vadd.f32 %v8317_v2, %v392_v1 }
 0x1e7   :  { %v8436_v16 = vadd.f32 %v8314_v0, %v394_v39  ;;  %v736_v38 = vadd.f32 %v720_v35, %v640_v45  ;;  %v8439_v24 = vmul.f32 %v1142_v3, %v8421_v42  ;;  %v490_v46 = vrot.slane %v449_v15, %v8307_v61 }
 0x1e8   :  { %v1023_v23 = vadd.f32 %v1007_v50, %v927_v41  ;;  %v570_v29 = vrot.slane %v449_v15, %v8311_v63  ;;  %v666_v52 = vrot.slane %v449_v15, %v8321_v4  ;;  %v762_v58 = vrot.slane %v449_v15, %v8324_v5 }
 0x1e9   :  { %11177 = vst [vmem:[#allocation41_spill] sm:$0xff] %v8439_v24  ;;  %v858_v59 = vrot.slane %v449_v15, %v8327_v6  ;;  %v832_v1 = vadd.f32 %v816_v44, %v736_v38  ;;  %v545_v30 = vmul.f32 %v490_v46, %v8339_v12  ;;  %v954_v41 = vrot.slane %v449_v15, %v8330_v7 }
 0x1ea   :  { %v1119_v62 = vadd.f32 %v1103_v51, %v1023_v23  ;;  %v625_v50 = vmul.f32 %v570_v29, %v8342_v13  ;;  %v721_v31 = vmul.f32 %v666_v52, %v8347_v17  ;;  %v817_v33 = vmul.f32 %v762_v58, %v8350_v18 }
 0x1eb   :  { %v913_v35 = vmul.f32 %v858_v59, %v8353_v19  ;;  %v928_v45 = vadd.f32 %v912_v47, %v832_v1  ;;  %v1009_v3 = vmul.f32 %v954_v41, %v8360_v25  ;;  %v1050_v37 = vrot.slane %v449_v15, %v8333_v8 }
 0x1ec   :  { %v1215_v39 = vadd.f32 %v1199_v54, %v1119_v62  ;;  %v641_v51 = vadd.f32 %v625_v50, %v545_v30  ;;  %v1146_v38 = vrot.slane %v449_v15, %v8336_v9  ;;  %v494_v44 = vrot.slane %v450_v20, %v8307_v61 }
 0x1ed   :  { %v574_v23 = vrot.slane %v450_v20, %v8311_v63  ;;  %v8458_v29 = vadd.f32 %v1008_v49, %v928_v45  ;;  %v1105_v52 = vmul.f32 %v1050_v37, %v8363_v26  ;;  %v670_v54 = vrot.slane %v450_v20, %v8321_v4 }
 0x1ee   :  { %v1243_v46 = vadd.f32 %v8375_v43, %v1215_v39  ;;  %v737_v47 = vadd.f32 %v721_v31, %v641_v51  ;;  %v1201_v58 = vmul.f32 %v1146_v38, %v8370_v36  ;;  %v546_v59 = vmul.f32 %v494_v44, %v8386_v53 }
 0x1ef   :  { %v626_v62 = vmul.f32 %v574_v23, %v8390_v55  ;;  %v722_v1 = vmul.f32 %v670_v54, %v8393_v56  ;;  %v766_v30 = vrot.slane %v450_v20, %v8324_v5  ;;  %v862_v49 = vrot.slane %v450_v20, %v8327_v6  ;;  %v396_v54 = vpop.f32.mrf.mxu1 }
 0x1f0   :  { %v8465_v15 = vmax.f32 %v1243_v46, 0.0  ;;  %v833_v41 = vadd.f32 %v817_v33, %v737_v47  ;;  %v958_v37 = vrot.slane %v450_v20, %v8330_v7  ;;  %v1054_v31 = vrot.slane %v450_v20, %v8333_v8 }
 0x1f1   :  { %v642_v50 = vadd.f32 %v626_v62, %v546_v59  ;;  %v818_v39 = vmul.f32 %v766_v30, %v8396_v57  ;;  %v914_v45 = vmul.f32 %v862_v49, %v8402_v10  ;;  %v1150_v51 = vrot.slane %v450_v20, %v8336_v9 }
 0x1f2   :  { %11178 = vst [vmem:[#allocation42_spill] sm:$0xff] %v8465_v15  ;;  %v498_v38 = vrot.slane %v8430_v40, %v8307_v61  ;;  %v929_v44 = vadd.f32 %v913_v35, %v833_v41  ;;  %v1010_v46 = vmul.f32 %v958_v37, %v8405_v11  ;;  %v8479_v33 = vmul.f32 %v1054_v31, %v8408_v14 }
 0x1f3   :  { %v738_v23 = vadd.f32 %v722_v1, %v642_v50  ;;  %v8482_v47 = vmul.f32 %v1150_v51, %v8421_v42  ;;  %v578_v20 = vrot.slane %v8430_v40, %v8311_v63  ;;  %v674_v62 = vrot.slane %v8430_v40, %v8321_v4  ;;  %v7749_v51 = vld [vmem:[%s8126_s9 + $0x24] ss:$8 sps:$4 sm:$0xff]  }
 0x1f4   :  { %v547_v59 = vmul.f32 %v498_v38, %v8339_v12  ;;  %v1025_v35 = vadd.f32 %v1009_v3, %v929_v44  ;;  %v770_v30 = vrot.slane %v8430_v40, %v8324_v5  ;;  %v866_v49 = vrot.slane %v8430_v40, %v8327_v6  ;;  %1700 = vmatprep.subr.bf16.mxu0 %v7749_v51 }
 0x1f5   :  { %11179 = vst [vmem:[#allocation43_spill] sm:$0xff] %v8482_v47  ;;  %v834_v1 = vadd.f32 %v818_v39, %v738_v23  ;;  %v627_v41 = vmul.f32 %v578_v20, %v8342_v13  ;;  %v723_v50 = vmul.f32 %v674_v62, %v8347_v17  ;;  %v962_v37 = vrot.slane %v8430_v40, %v8330_v7  ;;  %v400_v23 = vpop.f32.mrf.mxu1 }
 0x1f6   :  { %v1058_v31 = vrot.slane %v8430_v40, %v8333_v8  ;;  %v1121_v38 = vadd.f32 %v1105_v52, %v1025_v35  ;;  %v819_v39 = vmul.f32 %v770_v30, %v8350_v18  ;;  %v915_v44 = vmul.f32 %v866_v49, %v8353_v19 }
 0x1f7   :  { %v930_v3 = vadd.f32 %v914_v45, %v834_v1  ;;  %v643_v32 = vadd.f32 %v627_v41, %v547_v59  ;;  %v1011_v34 = vmul.f32 %v962_v37, %v8360_v25  ;;  %v1154_v62 = vrot.slane %v8430_v40, %v8336_v9 }
 0x1f8   :  { %v1107_v20 = vmul.f32 %v1058_v31, %v8363_v26  ;;  %v1217_v28 = vadd.f32 %v1201_v58, %v1121_v38  ;;  %v8509_v52 = vmax.f32 %v8433_v22, 0.0  ;;  %v453_v45 = vmax.f32 %v8436_v16, 0.0 }
 0x1f9   :  { %v8506_v27 = vadd.f32 %v1010_v46, %v930_v3  ;;  %v739_v35 = vadd.f32 %v723_v50, %v643_v32  ;;  %v1203_v1 = vmul.f32 %v1154_v62, %v8370_v36  ;;  %v438_v59 = vadd.f32 %v8317_v2, %v396_v54  ;;  %v8522_v46 = vpop.f32.mrf.mxu1 }
 0x1fa   :  { %11180 = vst [vmem:[#allocation44_spill] sm:$0xff] %v8509_v52  ;;  %v439_v30 = vadd.f32 %v8314_v0, %v400_v23  ;;  %v1245_v49 = vadd.f32 %v8375_v43, %v1217_v28  ;;  %v502_v40 = vrot.slane %v8509_v52, %v8307_v61  ;;  %v582_v58 = vrot.slane %v8509_v52, %v8311_v63 }
 0x1fb   :  { %v678_v22 = vrot.slane %v8509_v52, %v8321_v4  ;;  %v835_v32 = vadd.f32 %v819_v39, %v739_v35  ;;  %v774_v16 = vrot.slane %v8509_v52, %v8324_v5  ;;  %v870_v54 = vrot.slane %v8509_v52, %v8327_v6 }
 0x1fc   :  { %v966_v28 = vrot.slane %v8509_v52, %v8330_v7  ;;  %v8530_v41 = vmax.f32 %v1245_v49, 0.0  ;;  %v548_v50 = vmul.f32 %v502_v40, %v8386_v53  ;;  %v628_v37 = vmul.f32 %v582_v58, %v8390_v55  ;;  %v8545_v40 = vpop.f32.mrf.mxu1 }
 0x1fd   :  { %v724_v31 = vmul.f32 %v678_v22, %v8393_v56  ;;  %v931_v51 = vadd.f32 %v915_v44, %v835_v32  ;;  %v820_v38 = vmul.f32 %v774_v16, %v8396_v57  ;;  %v916_v3 = vmul.f32 %v870_v54, %v8402_v10 }
 0x1fe   :  { %11181 = vst [vmem:[#allocation45_spill] sm:$0xff] %v8530_v41  ;;  %v8538_v39 = vmul.f32 %v966_v28, %v8405_v11  ;;  %v644_v23 = vadd.f32 %v628_v37, %v548_v50  ;;  %v1062_v62 = vrot.slane %v8509_v52, %v8333_v8  ;;  %v506_v49 = vrot.slane %v453_v45, %v8307_v61 }
 0x1ff   :  { %v1027_v58 = vadd.f32 %v1011_v34, %v931_v51  ;;  %v586_v44 = vrot.slane %v453_v45, %v8311_v63  ;;  %v682_v22 = vrot.slane %v453_v45, %v8321_v4  ;;  %v778_v32 = vrot.slane %v453_v45, %v8324_v5 }
 0x200   :  { %v740_v16 = vadd.f32 %v724_v31, %v644_v23  ;;  %v8551_v54 = vmul.f32 %v1062_v62, %v8408_v14  ;;  %v549_v28 = vmul.f32 %v506_v49, %v8339_v12  ;;  %v874_v50 = vrot.slane %v453_v45, %v8327_v6  ;;  %v406_v23 = vpop.f32.mrf.mxu1 }
 0x201   :  { %v1123_v37 = vadd.f32 %v1107_v20, %v1027_v58  ;;  %v629_v35 = vmul.f32 %v586_v44, %v8342_v13  ;;  %v725_v60 = vmul.f32 %v682_v22, %v8347_v17  ;;  %v821_v34 = vmul.f32 %v778_v32, %v8350_v18 }
 0x202   :  { %v836_v51 = vadd.f32 %v820_v38, %v740_v16  ;;  %v917_v41 = vmul.f32 %v874_v50, %v8353_v19  ;;  %v970_v15 = vrot.slane %v453_v45, %v8330_v7  ;;  %v1066_v31 = vrot.slane %v453_v45, %v8333_v8 }
 0x203   :  { %v8561_v62 = vadd.f32 %v1203_v1, %v1123_v37  ;;  %v645_v49 = vadd.f32 %v629_v35, %v549_v28  ;;  %v1162_v43 = vrot.slane %v453_v45, %v8336_v9  ;;  %v8564_v20 = vmax.f32 %v438_v59, 0.0 }
 0x204   :  { %v8566_v58 = vadd.f32 %v916_v3, %v836_v51  ;;  %v1013_v44 = vmul.f32 %v970_v15, %v8360_v25  ;;  %v1109_v38 = vmul.f32 %v1066_v31, %v8363_v26  ;;  %v455_v22 = vmax.f32 %v439_v30, 0.0  ;;  %v410_v30 = vpop.f32.mrf.mxu1 }
 0x205   :  { %11182 = vst [vmem:[#allocation46_spill] sm:$0xff] %v8561_v62  ;;  %v741_v32 = vadd.f32 %v725_v60, %v645_v49  ;;  %v1205_v16 = vmul.f32 %v1162_v43, %v8370_v36  ;;  %v510_v50 = vrot.slane %v8564_v20, %v8307_v61  ;;  %v590_v1 = vrot.slane %v8564_v20, %v8311_v63 }
 0x206   :  { %v686_v45 = vrot.slane %v8564_v20, %v8321_v4  ;;  %v782_v59 = vrot.slane %v8564_v20, %v8324_v5  ;;  %v878_v15 = vrot.slane %v8564_v20, %v8327_v6  ;;  %v974_v60 = vrot.slane %v8564_v20, %v8330_v7 }
 0x207   :  { %v837_v43 = vadd.f32 %v821_v34, %v741_v32  ;;  %v550_v3 = vmul.f32 %v510_v50, %v8386_v53  ;;  %v630_v35 = vmul.f32 %v590_v1, %v8390_v55  ;;  %v514_v32 = vrot.slane %v455_v22, %v8307_v61 }
 0x208   :  { %v726_v37 = vmul.f32 %v686_v45, %v8393_v56  ;;  %v822_v51 = vmul.f32 %v782_v59, %v8396_v57  ;;  %v8590_v31 = vmul.f32 %v878_v15, %v8402_v10  ;;  %v8593_v49 = vmul.f32 %v974_v60, %v8405_v11  ;;  %v412_v15 = vpop.f32.mrf.mxu1 }
 0x209   :  { %v933_v62 = vadd.f32 %v917_v41, %v837_v43  ;;  %v646_v48 = vadd.f32 %v630_v35, %v550_v3  ;;  %v594_v50 = vrot.slane %v455_v22, %v8311_v63  ;;  %v690_v1 = vrot.slane %v455_v22, %v8321_v4 }
 0x20a   :  { %v786_v45 = vrot.slane %v455_v22, %v8324_v5  ;;  %v882_v59 = vrot.slane %v455_v22, %v8327_v6  ;;  %v551_v60 = vmul.f32 %v514_v32, %v8339_v12  ;;  %v978_v41 = vrot.slane %v455_v22, %v8330_v7 }
 0x20b   :  { %v1029_v28 = vadd.f32 %v1013_v44, %v933_v62  ;;  %v742_v47 = vadd.f32 %v726_v37, %v646_v48  ;;  %v631_v43 = vmul.f32 %v594_v50, %v8342_v13  ;;  %v727_v3 = vmul.f32 %v690_v1, %v8347_v17  ;;  %v414_v50 = vpop.f32.mrf.mxu1 }
 0x20c   :  { %v823_v35 = vmul.f32 %v786_v45, %v8350_v18  ;;  %v919_v34 = vmul.f32 %v882_v59, %v8353_v19  ;;  %v1015_v42 = vmul.f32 %v978_v41, %v8360_v25  ;;  %v1074_v62 = vrot.slane %v455_v22, %v8333_v8 }
 0x20d   :  { %v1125_v24 = vadd.f32 %v1109_v38, %v1029_v28  ;;  %v8608_v52 = vadd.f32 %v822_v51, %v742_v47  ;;  %v647_v48 = vadd.f32 %v631_v43, %v551_v60  ;;  %v1170_v44 = vrot.slane %v455_v22, %v8336_v9 }
 0x20e   :  { %v440_v37 = vadd.f32 %v8317_v2, %v8522_v46  ;;  %v441_v32 = vadd.f32 %v8314_v0, %v8545_v40  ;;  %v1111_v38 = vmul.f32 %v1074_v62, %v8363_v26  ;;  %v442_v47 = vadd.f32 %v8317_v2, %v406_v23 }
 0x20f   :  { %v8617_v1 = vadd.f32 %v1205_v16, %v1125_v24  ;;  %v443_v28 = vadd.f32 %v8314_v0, %v410_v30  ;;  %v743_v51 = vadd.f32 %v727_v3, %v647_v48  ;;  %v8623_v45 = vmul.f32 %v1170_v44, %v8370_v36 }
 0x210   :  { %v8625_v22 = vmax.f32 %v440_v37, 0.0  ;;  %v457_v59 = vmax.f32 %v441_v32, 0.0  ;;  %v8627_v46 = vmax.f32 %v442_v47, 0.0  ;;  %v8632_v24 = vadd.f32 %v8317_v2, %v412_v15 }
 0x211   :  { %11183 = vst [vmem:[#allocation47_spill] sm:$0xff] %v8617_v1  ;;  %11184 = vst [vmem:[#allocation48_spill] sm:$0xff] %v8623_v45  ;;  %v8629_v60 = vmax.f32 %v443_v28, 0.0  ;;  %v8635_v40 = vadd.f32 %v8314_v0, %v414_v50  ;;  %v839_v23 = vadd.f32 %v823_v35, %v743_v51 }
 0x212   :  { %v518_v16 = vrot.slane %v8625_v22, %v8307_v61  ;;  %v598_v30 = vrot.slane %v8625_v22, %v8311_v63  ;;  %v694_v41 = vrot.slane %v8625_v22, %v8321_v4  ;;  %v790_v43 = vrot.slane %v8625_v22, %v8324_v5 }
 0x213   :  { %11185 = vst [vmem:[#allocation49_spill] sm:$0xff] %v8629_v60  ;;  %v886_v15 = vrot.slane %v8625_v22, %v8327_v6  ;;  %v935_v35 = vadd.f32 %v919_v34, %v839_v23  ;;  %v522_v50 = vrot.slane %v457_v59, %v8307_v61  ;;  %v602_v47 = vrot.slane %v457_v59, %v8311_v63 }
 0x214   :  { %v552_v62 = vmul.f32 %v518_v16, %v8386_v53  ;;  %v632_v48 = vmul.f32 %v598_v30, %v8390_v55  ;;  %v728_v44 = vmul.f32 %v694_v41, %v8393_v56  ;;  %v824_v37 = vmul.f32 %v790_v43, %v8396_v57 }
 0x215   :  { %v8656_v32 = vmul.f32 %v886_v15, %v8402_v10  ;;  %v1031_v28 = vadd.f32 %v1015_v42, %v935_v35  ;;  %v698_v3 = vrot.slane %v457_v59, %v8321_v4  ;;  %v794_v34 = vrot.slane %v457_v59, %v8324_v5 }
 0x216   :  { %v648_v51 = vadd.f32 %v632_v48, %v552_v62  ;;  %v553_v23 = vmul.f32 %v522_v50, %v8339_v12  ;;  %v633_v16 = vmul.f32 %v602_v47, %v8342_v13  ;;  %v890_v30 = vrot.slane %v457_v59, %v8327_v6 }
 0x217   :  { %v986_v41 = vrot.slane %v457_v59, %v8330_v7  ;;  %v8666_v43 = vadd.f32 %v1111_v38, %v1031_v28  ;;  %v729_v0 = vmul.f32 %v698_v3, %v8347_v17  ;;  %v825_v42 = vmul.f32 %v794_v34, %v8350_v18 }
 0x218   :  { %v744_v15 = vadd.f32 %v728_v44, %v648_v51  ;;  %v649_v35 = vadd.f32 %v633_v16, %v553_v23  ;;  %v921_v62 = vmul.f32 %v890_v30, %v8353_v19  ;;  %v1082_v50 = vrot.slane %v457_v59, %v8333_v8 }
 0x219   :  { %11186 = vst [vmem:[#allocation50_spill] sm:$0xff] %v8666_v43  ;;  %v1017_v48 = vmul.f32 %v986_v41, %v8360_v25  ;;  %v1178_v47 = vrot.slane %v457_v59, %v8336_v9  ;;  %v526_v1 = vrot.slane %v8627_v46, %v8307_v61  ;;  %v606_v38 = vrot.slane %v8627_v46, %v8311_v63  ;;  %v416_v43 = vpop.f32.mrf.mxu1 }
 0x21a   :  { %v702_v3 = vrot.slane %v8627_v46, %v8321_v4  ;;  %v745_v44 = vadd.f32 %v729_v0, %v649_v35  ;;  %v8681_v28 = vmul.f32 %v1082_v50, %v8363_v26  ;;  %v798_v51 = vrot.slane %v8627_v46, %v8324_v5 }
 0x21b   :  { %v894_v34 = vrot.slane %v8627_v46, %v8327_v6  ;;  %v8688_v59 = vmul.f32 %v1178_v47, %v8370_v36  ;;  %v554_v23 = vmul.f32 %v526_v1, %v8386_v53  ;;  %v634_v16 = vmul.f32 %v606_v38, %v8390_v55 }
 0x21c   :  { %11187 = vst [vmem:[#allocation51_spill] sm:$0xff] %v8681_v28  ;;  %v730_v30 = vmul.f32 %v702_v3, %v8393_v56  ;;  %v841_v41 = vadd.f32 %v825_v42, %v745_v44  ;;  %v826_v0 = vmul.f32 %v798_v51, %v8396_v57  ;;  %v530_v50 = vrot.slane %v8629_v60, %v8307_v61 }
 0x21d   :  { %11188 = vst [vmem:[#allocation52_spill] sm:$0xff] %v8688_v59  ;;  %v650_v45 = vadd.f32 %v634_v16, %v554_v23  ;;  %v610_v47 = vrot.slane %v8629_v60, %v8311_v63  ;;  %v706_v1 = vrot.slane %v8629_v60, %v8321_v4  ;;  %v802_v38 = vrot.slane %v8629_v60, %v8324_v5 }
 0x21e   :  { %v937_v3 = vadd.f32 %v921_v62, %v841_v41  ;;  %v555_v42 = vmul.f32 %v530_v50, %v8339_v12  ;;  %v898_v44 = vrot.slane %v8629_v60, %v8327_v6  ;;  %v994_v51 = vrot.slane %v8629_v60, %v8330_v7 }
 0x21f   :  { %v635_v23 = vmul.f32 %v610_v47, %v8342_v13  ;;  %v731_v16 = vmul.f32 %v706_v1, %v8347_v17  ;;  %v827_v35 = vmul.f32 %v802_v38, %v8350_v18  ;;  %v1090_v59 = vrot.slane %v8629_v60, %v8333_v8 }
 0x220   :  { %v8714_v36 = vadd.f32 %v1017_v48, %v937_v3  ;;  %v923_v62 = vmul.f32 %v898_v44, %v8353_v19  ;;  %v8718_v41 = vmul.f32 %v994_v51, %v8360_v25  ;;  %v8726_v1 = vmax.f32 %v8632_v24, 0.0 }
 0x221   :  { %v651_v28 = vadd.f32 %v635_v23, %v555_v42  ;;  %v8723_v47 = vmul.f32 %v1090_v59, %v8363_v26  ;;  %v8729_v38 = vmax.f32 %v8635_v40, 0.0  ;;  %v446_v48 = vadd.f32 %v8317_v2, %v416_v43 }
 0x222   :  { %11189 = vst [vmem:[#allocation53_spill] sm:$0xff] %v8714_v36  ;;  %v746_v3 = vadd.f32 %v730_v30, %v650_v45  ;;  %v840_v44 = vadd.f32 %v824_v37, %v744_v15  ;;  %v922_v51 = vmul.f32 %v894_v34, %v8402_v10  ;;  %v534_v50 = vrot.slane %v8726_v1, %v8307_v61 }
 0x223   :  { %11190 = vst [vmem:[#allocation54_spill] sm:$0xff] %v8723_v47  ;;  %v747_v36 = vadd.f32 %v731_v16, %v651_v28  ;;  %v614_v59 = vrot.slane %v8726_v1, %v8311_v63  ;;  %v710_v24 = vrot.slane %v8726_v1, %v8321_v4  ;;  %v806_v40 = vrot.slane %v8726_v1, %v8324_v5 }
 0x224   :  { %v902_v2 = vrot.slane %v8726_v1, %v8327_v6  ;;  %v538_v45 = vrot.slane %v8729_v38, %v8307_v61  ;;  %v618_v37 = vrot.slane %v8729_v38, %v8311_v63  ;;  %v556_v15 = vmul.f32 %v534_v50, %v8386_v53 }
 0x225   :  { %v843_v43 = vadd.f32 %v827_v35, %v747_v36  ;;  %v636_v28 = vmul.f32 %v614_v59, %v8390_v55  ;;  %v732_v34 = vmul.f32 %v710_v24, %v8393_v56  ;;  %v714_v23 = vrot.slane %v8729_v38, %v8321_v4 }
 0x226   :  { %v557_v30 = vmul.f32 %v538_v45, %v8339_v12  ;;  %v637_v42 = vmul.f32 %v618_v37, %v8342_v13  ;;  %v810_v16 = vrot.slane %v8729_v38, %v8324_v5  ;;  %v906_v36 = vrot.slane %v8729_v38, %v8327_v6 }
 0x227   :  { %v8756_v47 = vadd.f32 %v923_v62, %v843_v43  ;;  %v1002_v35 = vrot.slane %v8729_v38, %v8330_v7  ;;  %v733_v13 = vmul.f32 %v714_v23, %v8347_v17  ;;  %v1194_v24 = vrot.slane %v8729_v38, %v8336_v9 }
 0x228   :  { %v653_v12 = vadd.f32 %v637_v42, %v557_v30  ;;  %v829_v59 = vmul.f32 %v810_v16, %v8350_v18  ;;  %v8769_v62 = vmul.f32 %v906_v36, %v8353_v19  ;;  %v8774_v37 = vmax.f32 %v446_v48, 0.0 }
 0x229   :  { %v8772_v45 = vmul.f32 %v1002_v35, %v8360_v25  ;;  %v652_v43 = vadd.f32 %v636_v28, %v556_v15  ;;  %v828_v50 = vmul.f32 %v806_v40, %v8396_v57  ;;  %v842_v30 = vadd.f32 %v826_v0, %v746_v3 }
 0x22a   :  { %v749_v60 = vadd.f32 %v733_v13, %v653_v12  ;;  %v924_v17 = vmul.f32 %v902_v2, %v8402_v10  ;;  %v542_v18 = vrot.slane %v8774_v37, %v8307_v61  ;;  %v622_v42 = vrot.slane %v8774_v37, %v8311_v63 }
 0x22b   :  { %v718_v19 = vrot.slane %v8774_v37, %v8321_v4  ;;  %v814_v25 = vrot.slane %v8774_v37, %v8324_v5  ;;  %v748_v15 = vadd.f32 %v732_v34, %v652_v43  ;;  %v910_v0 = vrot.slane %v8774_v37, %v8327_v6 }
 0x22c   :  { %v8786_v48 = vadd.f32 %v829_v59, %v749_v60  ;;  %v934_v3 = vadd.f32 %v8590_v31, %v8608_v52  ;;  %v558_v40 = vmul.f32 %v542_v18, %v8386_v53  ;;  %v638_v2 = vmul.f32 %v622_v42, %v8390_v55 }
 0x22d   :  { %v734_v28 = vmul.f32 %v718_v19, %v8393_v56  ;;  %v830_v23 = vmul.f32 %v814_v25, %v8396_v57  ;;  %v844_v16 = vadd.f32 %v828_v50, %v748_v15  ;;  %v926_v36 = vmul.f32 %v910_v0, %v8402_v10 }
 0x22e   :  { %v936_v60 = vadd.f32 %v8656_v32, %v840_v44  ;;  %v938_v34 = vadd.f32 %v922_v51, %v842_v30  ;;  %v654_v35 = vadd.f32 %v638_v2, %v558_v40  ;;  %v998_v12 = vrot.slane %v8726_v1, %v8330_v7 }
 0x22f   :  { %v1006_v52 = vrot.slane %v8774_v37, %v8330_v7  ;;  %v11191_v53 = vrot.slane %v8625_v22, %v8330_v7  ;;  %v940_v56 = vadd.f32 %v924_v17, %v844_v16  ;;  %v11192_v57 = vrot.slane %v8627_v46, %v8330_v7 }
 0x230   :  { %v1028_v31 = vadd.f32 %v8538_v39, %v8566_v58  ;;  %v1030_v32 = vadd.f32 %v8593_v49, %v934_v3  ;;  %v750_v44 = vadd.f32 %v734_v28, %v654_v35  ;;  %v1020_v51 = vmul.f32 %v998_v12, %v8405_v11 }
 0x231   :  { %v1016_v55 = vmul.f32 %v11191_v53, %v8405_v11  ;;  %v1018_v10 = vmul.f32 %v11192_v57, %v8405_v11  ;;  %v1022_v50 = vmul.f32 %v1006_v52, %v8405_v11  ;;  %v1086_v43 = vrot.slane %v8627_v46, %v8333_v8  ;;  %v11199_v53 = vld [vmem:[#allocation41_spill] sm:$0xff]  ;;  %v11200_v57 = vld [vmem:[#allocation43_spill] sm:$0xff] }
 0x232   :  { %v1094_v30 = vrot.slane %v8726_v1, %v8333_v8  ;;  %v1102_v17 = vrot.slane %v8774_v37, %v8333_v8  ;;  %v846_v18 = vadd.f32 %v830_v23, %v750_v44  ;;  %v1036_v39 = vadd.f32 %v1020_v51, %v940_v56 }
 0x233   :  { %v1032_v13 = vadd.f32 %v1016_v55, %v936_v60  ;;  %v1034_v59 = vadd.f32 %v1018_v10, %v938_v34  ;;  %v11193_v58 = vrot.slane %v8564_v20, %v8333_v8  ;;  %v11194_v11 = vrot.slane %v8625_v22, %v8333_v8 }
 0x234   :  { %v1114_v19 = vmul.f32 %v1086_v43, %v8408_v14  ;;  %v1116_v25 = vmul.f32 %v1094_v30, %v8408_v14  ;;  %v1118_v15 = vmul.f32 %v1102_v17, %v8408_v14  ;;  %v1120_v0 = vadd.f32 %v8427_v21, %v8458_v29 }
 0x235   :  { %v1110_v49 = vmul.f32 %v11193_v58, %v8408_v14  ;;  %v1112_v42 = vmul.f32 %v11194_v11, %v8408_v14  ;;  %v942_v3 = vadd.f32 %v926_v36, %v846_v18  ;;  %v1122_v40 = vadd.f32 %v8479_v33, %v8506_v27  ;;  %v11195_v27 = vld [vmem:[#allocation40_spill] sm:$0xff] }
 0x236   :  { %v1124_v2 = vadd.f32 %v8551_v54, %v1028_v31  ;;  %v1130_v16 = vadd.f32 %v1114_v19, %v1034_v59  ;;  %v1132_v60 = vadd.f32 %v1116_v25, %v1036_v39  ;;  %v1174_v34 = vrot.slane %v8625_v22, %v8336_v9  ;;  %v11196_v33 = vld [vmem:[#allocation44_spill] sm:$0xff] }
 0x237   :  { %v1126_v28 = vadd.f32 %v1110_v49, %v1030_v32  ;;  %v1128_v23 = vadd.f32 %v1112_v42, %v1032_v13  ;;  %v1038_v35 = vadd.f32 %v1022_v50, %v942_v3  ;;  %v1182_v14 = vrot.slane %v8627_v46, %v8336_v9  ;;  %v11201_v13 = vld [vmem:[#allocation39_spill] sm:$0xff] }
 0x238   :  { %v1190_v21 = vrot.slane %v8726_v1, %v8336_v9  ;;  %v1198_v29 = vrot.slane %v8774_v37, %v8336_v9  ;;  %v11197_v54 = vrot.slane %v11196_v33, %v8336_v9  ;;  %v11198_v12 = vrot.slane %v8564_v20, %v8336_v9 }
 0x239   :  { %v1208_v52 = vmul.f32 %v1174_v34, %v11195_v27  ;;  %v1216_v46 = vadd.f32 %v11199_v53, %v1120_v0  ;;  %v1134_v55 = vadd.f32 %v1118_v15, %v1038_v35  ;;  %v1210_v1 = vmul.f32 %v1182_v14, %v11195_v27 }
 0x23a   :  { %v1204_v36 = vmul.f32 %v11197_v54, %v11195_v27  ;;  %v1206_v22 = vmul.f32 %v11198_v12, %v11195_v27  ;;  %v1212_v56 = vmul.f32 %v1190_v21, %v11195_v27  ;;  %v1214_v37 = vmul.f32 %v1198_v29, %v11195_v27 }
 0x23b   :  { %v1218_v10 = vadd.f32 %v11200_v57, %v1122_v40  ;;  %v1224_v44 = vadd.f32 %v1208_v52, %v1128_v23  ;;  %v1226_v51 = vadd.f32 %v1210_v1, %v1130_v16  ;;  %v1244_v59 = vadd.f32 %v11201_v13, %v1216_v46 }
 0x23c   :  { %v1220_v31 = vadd.f32 %v1204_v36, %v1124_v2  ;;  %v1222_v32 = vadd.f32 %v1206_v22, %v1126_v28  ;;  %v1228_v50 = vadd.f32 %v1212_v56, %v1132_v60  ;;  %v1230_v20 = vadd.f32 %v1214_v37, %v1134_v55 }
 0x23d   :  { %v1246_v43 = vadd.f32 %v11201_v13, %v1218_v10  ;;  %v1252_v18 = vadd.f32 %v11201_v13, %v1224_v44  ;;  %v1254_v39 = vadd.f32 %v11201_v13, %v1226_v51  ;;  %v8867_v11 = vmax.f32 %v1244_v59, 0.0 }
 0x23e   :  { %v1248_v30 = vadd.f32 %v11201_v13, %v1220_v31  ;;  %v1250_v17 = vadd.f32 %v11201_v13, %v1222_v32  ;;  %v1256_v58 = vadd.f32 %v11201_v13, %v1228_v50  ;;  %v1258_v49 = vadd.f32 %v11201_v13, %v1230_v20 }
 0x23f   :  { %v8869_v42 = vmax.f32 %v1246_v43, 0.0  ;;  %v8875_v15 = vmax.f32 %v1252_v18, 0.0  ;;  %v8877_v0 = vmax.f32 %v1254_v39, 0.0  ;;  %v1281_v2 = vrot.slane %v8867_v11, 4 }
 0x240   :  { %v8871_v19 = vmax.f32 %v1248_v30, 0.0  ;;  %v8873_v25 = vmax.f32 %v1250_v17, 0.0  ;;  %v8879_v3 = vmax.f32 %v1256_v58, 0.0  ;;  %v8881_v40 = vmax.f32 %v1258_v49, 0.0 }
 0x241   :  { %v1293_v28 = vrot.slane %v8869_v42, 4  ;;  %v1329_v60 = vrot.slane %v8875_v15, 4  ;;  %v1282_v34 = vadd.f32 %v1281_v2, %v8867_v11  ;;  %v1341_v35 = vrot.slane %v8877_v0, 4 }
 0x242   :  { %v1305_v23 = vrot.slane %v8871_v19, 4  ;;  %v1317_v16 = vrot.slane %v8873_v25, 4  ;;  %v1353_v14 = vrot.slane %v8879_v3, 4  ;;  %v1365_v21 = vrot.slane %v8881_v40, 4 }
 0x243   :  { %v1294_v29 = vadd.f32 %v1293_v28, %v8869_v42  ;;  %v1330_v54 = vadd.f32 %v1329_v60, %v8875_v15  ;;  %v1283_v36 = vrot.slane %v1282_v34, 2  ;;  %v1342_v12 = vadd.f32 %v1341_v35, %v8877_v0 }
 0x244   :  { %v1306_v27 = vadd.f32 %v1305_v23, %v8871_v19  ;;  %v1318_v33 = vadd.f32 %v1317_v16, %v8873_v25  ;;  %v1354_v22 = vadd.f32 %v1353_v14, %v8879_v3  ;;  %v1366_v52 = vadd.f32 %v1365_v21, %v8881_v40 }
 0x245   :  { %v1295_v53 = vrot.slane %v1294_v29, 2  ;;  %v1331_v1 = vrot.slane %v1330_v54, 2  ;;  %v1284_v56 = vadd.f32 %v1283_v36, %v1282_v34  ;;  %v1343_v37 = vrot.slane %v1342_v12, 2 }
 0x246   :  { %v1307_v46 = vrot.slane %v1306_v27, 2  ;;  %v1319_v55 = vrot.slane %v1318_v33, 2  ;;  %v1355_v57 = vrot.slane %v1354_v22, 2  ;;  %v1367_v10 = vrot.slane %v1366_v52, 2 }
 0x247   :  { %v1296_v31 = vadd.f32 %v1295_v53, %v1294_v29  ;;  %v1332_v51 = vadd.f32 %v1331_v1, %v1330_v54  ;;  %v1285_v50 = vrot.slane %v1284_v56, 1  ;;  %v1344_v20 = vadd.f32 %v1343_v37, %v1342_v12 }
 0x248   :  { %v1308_v32 = vadd.f32 %v1307_v46, %v1306_v27  ;;  %v1320_v44 = vadd.f32 %v1319_v55, %v1318_v33  ;;  %v1356_v13 = vadd.f32 %v1355_v57, %v1354_v22  ;;  %v1368_v59 = vadd.f32 %v1367_v10, %v1366_v52 }
 0x249   :  { %v1297_v43 = vrot.slane %v1296_v31, 1  ;;  %v1333_v18 = vrot.slane %v1332_v51, 1  ;;  %v1286_v39 = vadd.f32 %v1285_v50, %v1284_v56  ;;  %v1345_v58 = vrot.slane %v1344_v20, 1 }
 0x24a   :  { %v1309_v30 = vrot.slane %v1308_v32, 1  ;;  %v1321_v17 = vrot.slane %v1320_v44, 1  ;;  %v1357_v49 = vrot.slane %v1356_v13, 1  ;;  %v1369_v2 = vrot.slane %v1368_v59, 1 }
 0x24b   :  { %v1298_v28 = vadd.f32 %v1297_v43, %v1296_v31  ;;  %v1334_v60 = vadd.f32 %v1333_v18, %v1332_v51  ;;  %v1346_v34 = vadd.f32 %v1345_v58, %v1344_v20  ;;  %v1373_v21 = vmul.f32 0.125, %v1286_v39  ;;  %v11203_v39 = vld [vmem:[#allocation53_spill] sm:$0xff]  ;;  %v11204_v58 = vld [vmem:[#allocation51_spill] sm:$0xff] }
 0x24c   :  { %v1310_v23 = vadd.f32 %v1309_v30, %v1308_v32  ;;  %v1322_v16 = vadd.f32 %v1321_v17, %v1320_v44  ;;  %v1358_v35 = vadd.f32 %v1357_v49, %v1356_v13  ;;  %v1370_v14 = vadd.f32 %v1369_v2, %v1368_v59 }
 0x24d   :  { %v1375_v29 = vmul.f32 0.125, %v1298_v28  ;;  %v1381_v54 = vmul.f32 0.125, %v1334_v60  ;;  %v1383_v36 = vmul.f32 0.125, %v1346_v34  ;;  %v1421_v52 = vpack.c.bf16 %v1373_v21, %v1373_v21  ;;  %v11209_v34 = vld [vmem:[#allocation50_spill] sm:$0xff]  ;;  %v11211_v21 = vld [vmem:[#allocation52_spill] sm:$0xff] }
 0x24e   :  { %v1377_v27 = vmul.f32 0.125, %v1310_v23  ;;  %v1379_v33 = vmul.f32 0.125, %v1322_v16  ;;  %v1385_v12 = vmul.f32 0.125, %v1358_v35  ;;  %v1387_v22 = vmul.f32 0.125, %v1370_v14  ;;  %v11205_v23 = vld [vmem:[#allocation37_spill] sm:$0xff]  ;;  %v11210_v35 = vld [vmem:[#allocation48_spill] sm:$0xff] }
 0x24f   :  { %v1423_v53 = vpack.c.bf16 %v1375_v29, %v1375_v29  ;;  %v1429_v1 = vpack.c.bf16 %v1381_v54, %v1381_v54  ;;  %v1431_v56 = vpack.c.bf16 %v1383_v36, %v1383_v36  ;;  %v1460_v10 = vunpack.c.l.b16 %v1421_v52  ;;  %v11206_v16 = vld [vmem:[#allocation49_spill] sm:$0xff]  ;;  %v11213_v54 = vld [vmem:[#allocation38_spill] sm:$0xff] }
 0x250   :  { %v1425_v46 = vpack.c.bf16 %v1377_v27, %v1377_v27  ;;  %v1427_v55 = vpack.c.bf16 %v1379_v33, %v1379_v33  ;;  %v1433_v37 = vpack.c.bf16 %v1385_v12, %v1385_v12  ;;  %v1435_v57 = vpack.c.bf16 %v1387_v22, %v1387_v22  ;;  %v11212_v33 = vld [vmem:[#allocation46_spill] sm:$0xff]  ;;  %v11214_v12 = vld [vmem:[#allocation47_spill] sm:$0xff] }
 0x251   :  { %v1462_v31 = vunpack.c.l.b16 %v1423_v53  ;;  %v1468_v51 = vunpack.c.l.b16 %v1429_v1  ;;  %v1470_v50 = vunpack.c.l.b16 %v1431_v56  ;;  %v941_v59 = vadd.f32 %v8769_v62, %v8786_v48 }
 0x252   :  { %v1464_v32 = vunpack.c.l.b16 %v1425_v46  ;;  %v1466_v44 = vunpack.c.l.b16 %v1427_v55  ;;  %v1472_v20 = vunpack.c.l.b16 %v1433_v37  ;;  %v1474_v13 = vunpack.c.l.b16 %v1435_v57 }
 0x253   :  { %v1489_v43 = vsel %vm1475_vm2, %v1462_v31, %v1460_v10  ;;  %v1035_v30 = vadd.f32 %v8718_v41, %v8756_v47  ;;  %v11202_v17 = vrot.slane %v8729_v38, %v8333_v8  ;;  %v1129_v49 = vadd.f32 %v11204_v58, %v11203_v39 }
 0x254   :  { %v1490_v2 = vsel %vm1477_vm3, %v1464_v32, %v1489_v43  ;;  %v1037_v28 = vadd.f32 %v8772_v45, %v941_v59  ;;  %v11207_v62 = vrot.slane %v11206_v16, %v8336_v9  ;;  %v1213_v41 = vmul.f32 %v1194_v24, %v11205_v23  ;;  %v11216_v59 = vld [vmem:[#allocation45_spill] sm:$0xff] }
 0x255   :  { %v1117_v18 = vmul.f32 %v11202_v17, %v8363_v26  ;;  %v1491_v47 = vsel %vm1479_vm4, %v1466_v44, %v1490_v2  ;;  %v11208_v26 = vld [vmem:[#allocation54_spill] sm:$0xff]  ;;  %v1223_v14 = vadd.f32 %v11210_v35, %v11209_v34  ;;  %v1225_v29 = vadd.f32 %v11211_v21, %v1129_v49 }
 0x256   :  { %v1211_v48 = vmul.f32 %v11207_v62, %v11205_v23  ;;  %v1131_v60 = vadd.f32 %v11208_v26, %v1035_v30  ;;  %v1492_v45 = vsel %vm1481_vm5, %v1468_v51, %v1491_v47  ;;  %v1247_v36 = vadd.f32 %v11213_v54, %v11212_v33  ;;  %v11215_v51 = vld [vmem:[#allocation42_spill] sm:$0xff] }
 0x257   :  { %v1133_v27 = vadd.f32 %v1117_v18, %v1037_v28  ;;  %v1249_v22 = vadd.f32 %v11213_v54, %v11214_v12  ;;  %v1493_v38 = vsel %vm1483_vm6, %v1470_v50, %v1492_v45  ;;  %v1251_v52 = vadd.f32 %v11213_v54, %v1223_v14 }
 0x258   :  { %v1227_v24 = vadd.f32 %v1211_v48, %v1131_v60  ;;  %v1253_v53 = vadd.f32 %v11213_v54, %v1225_v29  ;;  %v1494_v46 = vsel %vm1485_vm7, %v1472_v20, %v1493_v38  ;;  %v8934_v1 = vmax.f32 %v1247_v36, 0.0 }
 0x259   :  { %v1229_v55 = vadd.f32 %v1213_v41, %v1133_v27  ;;  %v8936_v56 = vmax.f32 %v1249_v22, 0.0  ;;  %v1495_v37 = vsel %vm1487_vm8, %v1474_v13, %v1494_v46  ;;  %v8940_v10 = vmax.f32 %v1251_v52, 0.0 }
 0x25a   :  { %v1255_v57 = vadd.f32 %v11213_v54, %v1227_v24  ;;  %v8942_v31 = vmax.f32 %v1253_v53, 0.0  ;;  %v1497_v32 = vpack.c.b16 %v1495_v37, %v1495_v37  ;;  %v1275_v50 = vrot.slane %v11215_v51, 4 }
 0x25b   :  { %v1257_v44 = vadd.f32 %v11213_v54, %v1229_v55  ;;  %v1287_v20 = vrot.slane %v11216_v59, 4  ;;  %v1299_v30 = vrot.slane %v8934_v1, 4  ;;  %v1311_v17 = vrot.slane %v8936_v56, 4 }
 0x25c   :  { %v8947_v43 = vmax.f32 %v1255_v57, 0.0  ;;  %v1323_v13 = vrot.slane %v8940_v10, 4  ;;  %1628 = vmatprep.mubr.bf16.mxu0 %v1497_v32  ;;  %v1276_v39 = vadd.f32 %v1275_v50, %v11215_v51  ;;  %v1335_v49 = vrot.slane %v8942_v31, 4 }
 0x25d   :  { %v8952_v18 = vmax.f32 %v1257_v44, 0.0  ;;  %v1288_v58 = vadd.f32 %v1287_v20, %v11216_v59  ;;  %v1300_v2 = vadd.f32 %v1299_v30, %v8934_v1  ;;  %v1312_v28 = vadd.f32 %v1311_v17, %v8936_v56 }
 0x25e   :  { %v1324_v23 = vadd.f32 %v1323_v13, %v8940_v10  ;;  %v1347_v16 = vrot.slane %v8947_v43, 4  ;;  %v1277_v62 = vrot.slane %v1276_v39, 2  ;;  %v1336_v41 = vadd.f32 %v1335_v49, %v8942_v31 }
 0x25f   :  { %v1289_v48 = vrot.slane %v1288_v58, 2  ;;  %v1359_v47 = vrot.slane %v8952_v18, 4  ;;  %v1301_v26 = vrot.slane %v1300_v2, 2  ;;  %v1313_v60 = vrot.slane %v1312_v28, 2 }
 0x260   :  { %v1325_v34 = vrot.slane %v1324_v23, 2  ;;  %v1348_v35 = vadd.f32 %v1347_v16, %v8947_v43  ;;  %v1278_v14 = vadd.f32 %v1277_v62, %v1276_v39  ;;  %v1337_v29 = vrot.slane %v1336_v41, 2 }
 0x261   :  { %v1290_v21 = vadd.f32 %v1289_v48, %v1288_v58  ;;  %v1360_v45 = vadd.f32 %v1359_v47, %v8952_v18  ;;  %v1302_v27 = vadd.f32 %v1301_v26, %v1300_v2  ;;  %v1314_v33 = vadd.f32 %v1313_v60, %v1312_v28 }
 0x262   :  { %v1326_v54 = vadd.f32 %v1325_v34, %v1324_v23  ;;  %v1349_v36 = vrot.slane %v1348_v35, 2  ;;  %v1279_v12 = vrot.slane %v1278_v14, 1  ;;  %v1338_v38 = vadd.f32 %v1337_v29, %v1336_v41 }
 0x263   :  { %v1291_v22 = vrot.slane %v1290_v21, 1  ;;  %v1361_v24 = vrot.slane %v1360_v45, 2  ;;  %v1303_v52 = vrot.slane %v1302_v27, 1  ;;  %v1315_v53 = vrot.slane %v1314_v33, 1 }
 0x264   :  { %v1327_v46 = vrot.slane %v1326_v54, 1  ;;  %v1350_v55 = vadd.f32 %v1349_v36, %v1348_v35  ;;  %v1280_v37 = vadd.f32 %v1279_v12, %v1278_v14  ;;  %v1339_v32 = vrot.slane %v1338_v38, 1 }
 0x265   :  { %v1292_v57 = vadd.f32 %v1291_v22, %v1290_v21  ;;  %v1362_v44 = vadd.f32 %v1361_v24, %v1360_v45  ;;  %v1304_v50 = vadd.f32 %v1303_v52, %v1302_v27  ;;  %v1316_v20 = vadd.f32 %v1315_v53, %v1314_v33 }
 0x266   :  { %v1328_v30 = vadd.f32 %v1327_v46, %v1326_v54  ;;  %v1351_v17 = vrot.slane %v1350_v55, 1  ;;  %v1340_v13 = vadd.f32 %v1339_v32, %v1338_v38  ;;  %v1372_v58 = vmul.f32 0.125, %v1280_v37 }
 0x267   :  { %v1363_v39 = vrot.slane %v1362_v44, 1  ;;  %v1374_v49 = vmul.f32 0.125, %v1292_v57  ;;  %v1376_v28 = vmul.f32 0.125, %v1304_v50  ;;  %v1378_v23 = vmul.f32 0.125, %v1316_v20 }
 0x268   :  { %v1352_v2 = vadd.f32 %v1351_v17, %v1350_v55  ;;  %v1380_v16 = vmul.f32 0.125, %v1328_v30  ;;  %v1382_v48 = vmul.f32 0.125, %v1340_v13  ;;  %v1420_v41 = vpack.c.bf16 %v1372_v58, %v1372_v58  ;;  %v7750_v30 = vld [vmem:[%s8126_s9 + $0x10] ss:$8 sps:$4 sm:$0xff]   ;;  %v7752_v17 = vld [vmem:[%s8126_s9 + $0x14] ss:$8 sps:$4 sm:$0xff]  }
 0x269   :  { %v1364_v62 = vadd.f32 %v1363_v39, %v1362_v44  ;;  %v1422_v47 = vpack.c.bf16 %v1374_v49, %v1374_v49  ;;  %v1424_v60 = vpack.c.bf16 %v1376_v28, %v1376_v28  ;;  %v1426_v34 = vpack.c.bf16 %v1378_v23, %v1378_v23  ;;  %v7747_v44 = vld [vmem:[%s8126_s9 + $0x20] ss:$8 sps:$4 sm:$0xff]   ;;  %v7755_v13 = vld [vmem:[%s8126_s9 + $0x4] ss:$8 sps:$4 sm:$0xff]   ;;  %v7756_v39 = vld [vmem:[%s8141_s4 + $0x78] sm:$0xff]  }
 0x26a   :  { %v1384_v26 = vmul.f32 0.125, %v1352_v2  ;;  %v1428_v35 = vpack.c.bf16 %v1380_v16, %v1380_v16  ;;  %v1430_v21 = vpack.c.bf16 %v1382_v48, %v1382_v48  ;;  %v1459_v29 = vunpack.c.l.b16 %v1420_v41  ;;  %v7757_v58 = vld [vmem:[%s8141_s4 + $0x38] sm:$0xff]   ;;  %v7758_v49 = vld [vmem:[%s8141_s4 + $0x70] sm:$0xff]   ;;  %v7753_v2 = vld [vmem:[%s8126_s9] ss:$8 sps:$4 sm:$0xff]   ;;  %7387 = vmatprep.subr.bf16.mxu1 %v7756_v39  ;;  %s11238_s9 = sld [smem:[#allocation13_spill]] }
 0x26b   :  { %v1386_v14 = vmul.f32 0.125, %v1364_v62  ;;  %v1461_v45 = vunpack.c.l.b16 %v1422_v47  ;;  %v1463_v33 = vunpack.c.l.b16 %v1424_v60  ;;  %v1465_v54 = vunpack.c.l.b16 %v1426_v34  ;;  %7388 = vmatpush3.bf16.msra.mxu1 %v7757_v58  ;;  %v7136_v23 = vld [vmem:[%s8146_s29] ss:$0 sm:$0xff]  ;;  %v7759_v34 = vld [vmem:[%s8141_s4 + $0x30] sm:$0xff]   ;;  %s11302_s29 = sld [smem:[#allocation15_spill]] }
 0x26c   :  { %v1432_v27 = vpack.c.bf16 %v1384_v26, %v1384_v26  ;;  %v1467_v36 = vunpack.c.l.b16 %v1428_v35  ;;  %v1469_v22 = vunpack.c.l.b16 %v1430_v21  ;;  %v11217_v20 = vmov 0   ;;  %7389 = vmatprep.subr.bf16.mxu1 %v7758_v49  ;;  %v7760_v35 = vld [vmem:[%s8141_s4 + $0x68] sm:$0xff]   ;;  %v7762_v21 = vld [vmem:[%s8141_s4 + $0x60] sm:$0xff]  }
 0x26d   :  { %v1434_v12 = vpack.c.bf16 %v1386_v14, %v1386_v14  ;;  %v1476_v38 = vsel %vm1475_vm2, %v1461_v45, %v1459_v29  ;;  %v7761_v14 = vld [vmem:[%s8141_s4 + $0x28] sm:$0xff]   ;;  %v7763_v29 = vld [vmem:[%s8141_s4 + $0x20] sm:$0xff]   ;;  %v7764_v45 = vld [vmem:[%s8141_s4 + $0x58] sm:$0xff]  }
 0x26e   :  { %v1471_v24 = vunpack.c.l.b16 %v1432_v27  ;;  %v1478_v52 = vsel %vm1477_vm3, %v1463_v33, %v1476_v38  ;;  %v7765_v27 = vld [vmem:[%s8141_s4 + $0x18] sm:$0xff]   ;;  %v7766_v33 = vld [vmem:[%s8141_s4 + $0x50] sm:$0xff]   ;;  %v7771_v38 = vld [vmem:[%s8141_s4] sm:$0xff]  }
 0x26f   :  { %v1473_v53 = vunpack.c.l.b16 %v1434_v12  ;;  %v1480_v46 = vsel %vm1479_vm4, %v1465_v54, %v1478_v52  ;;  %7390 = vmatpush3.bf16.msra.mxu1 %v7759_v34  ;;  %v7767_v54 = vld [vmem:[%s8141_s4 + $0x10] sm:$0xff]   ;;  %v7769_v12 = vld [vmem:[%s8141_s4 + $0x8] sm:$0xff]  }
 0x270   :  { %v1482_v55 = vsel %vm1481_vm5, %v1467_v36, %v1480_v46  ;;  %7391 = vmatprep.subr.bf16.mxu1 %v7760_v35  ;;  %v7768_v36 = vld [vmem:[%s8141_s4 + $0x48] sm:$0xff]   ;;  %v7774_v52 = vld [vmem:[%s8051_s21 + $0x64] ss:$16 sps:$4 sm:$0xff]   ;;  %v1644_v46 = vld [vmem:[%s8151_s20] sm:$0x3]  ;;  %s11384_s20 = sld [smem:[#allocation26_spill]] }
 0x271   :  { %v1484_v37 = vsel %vm1483_vm6, %v1469_v22, %v1482_v55  ;;  %v7770_v22 = vld [vmem:[%s8141_s4 + $0x40] sm:$0xff]   ;;  %v1649_v55 = vrot.slane %v1644_v46, %v8307_v61  ;;  %s8017_s4 = smov 64  }
 0x272   :  { %v1486_v57 = vsel %vm1485_vm7, %v1471_v24, %v1484_v37  ;;  %v7772_v24 = vld [vmem:[%s8051_s21 + $0x60] ss:$16 sps:$4 sm:$0xff]   ;;  %v1653_v37 = vrot.slane %v1644_v46, %v8311_v63 }
 0x273   :  { %v1488_v32 = vsel %vm1487_vm8, %v1473_v53, %v1486_v57  ;;  %7392 = vmatpush3.bf16.msra.mxu1 %v7761_v14  ;;  %v7777_v53 = vld [vmem:[%s8051_s21 + $0x6c] ss:$16 sps:$4 sm:$0xff]  }
 0x274   :  { %v1496_v50 = vpack.c.b16 %v1488_v32, %v1488_v32  ;;  %7393 = vmatprep.subr.bf16.mxu1 %v7762_v21 }
 0x276   :  { %1629 = vmatmul.mubr.bf16.vlgmr.msra.gmra.mxu0 %v1496_v50 }
 0x277   :  { %1701 = vmatpush1.bf16.msra.mxu0 %v7747_v44  ;;  %1722 = vmatprep.mubr.bf16.mxu0 %v11217_v20 }
 0x278   :  { %1702 = vmatprep.subr.bf16.mxu0 %v7752_v17  ;;  %7394 = vmatpush3.bf16.msra.mxu1 %v7763_v29  ;;  %v8014_v17 = vmov 1966171168  }
 0x279   :  { %7395 = vmatprep.subr.bf16.mxu1 %v7764_v45 }
 0x27b   :  { %1703 = vmatpush1.bf16.msra.mxu0 %v7750_v30 }
 0x27c   :  { %1704 = vmatprep.subr.bf16.mxu0 %v7755_v13  ;;  %7396 = vmatpush3.bf16.msra.mxu1 %v7765_v27  ;;  %v1744_v13 = vunpack.c.l.s4 %v8014_v17 }
 0x27d   :  { %7397 = vmatprep.subr.bf16.mxu1 %v7766_v33 }
 0x27f   :  { %1705 = vmatpush1.bf16.msra.mxu0 %v7753_v2 }
 0x280   :  { %7398 = vmatpush3.bf16.msra.mxu1 %v7767_v54  ;;  %2231 = vmatprep.subr.bf16.mxu0 %v7774_v52 }
 0x281   :  { %7399 = vmatprep.subr.bf16.mxu1 %v7768_v36 }
 0x284   :  { %7400 = vmatpush3.bf16.msra.mxu1 %v7769_v12 }
 0x285   :  { %7401 = vmatprep.subr.bf16.mxu1 %v7770_v22 }
 0x288   :  { %7402 = vmatpush3.bf16.msra.mxu1 %v7771_v38 }
 0x289   :  { %2304 = vmatprep.subr.bf16.mxu1 %v7777_v53 }
 0x336   :  { %v7381_v28 = vpop.f32.mrf.mxu0 }
 0x338   :  { %v7382_v16 = vpop.f32.mrf.mxu0 }
 0x339   :  { %v7383_v62 = vadd.f32 %v7382_v16, %v7381_v28  ;;  %v1745_v16 = vunpack.c.0.s8 %v1744_v13 }
 0x33a   :  { %v7384_v48 = vpop.f32.mrf.mxu0 }
 0x33b   :  { %v1631_v41 = vadd.f32 %v7383_v62, %v7136_v23 }
 0x33c   :  { %v7385_v47 = vpop.f32.mrf.mxu0 }
 0x33d   :  { %v1636_v26 = vmax.f32 %v1631_v41, 0.0  ;;  %v11218_v47 = vld [vmem:[#allocation36_spill] sm:$0xff] }
 0x33f   :  { %v1643_v60 = vpack.c.bf16 %v1636_v26, %v1636_v26  ;;  %v9004_v26 = vsub.s32 %v1745_v16, %v11218_v47  ;;  %v9290_v47 = vld [vmem:[%s11238_s9 + $0x78] sm:$0xff] }
 0x340   :  { %11243 = vst [vmem:[#allocation52_spill] sm:$0xff] %v9290_v47 }
 0x341   :  { %7159 = vmatmul.mubr.msk.bf16.vlgmr.msra.gmra.mxu0 %vm1686_vm9, %v1643_v60  ;;  %11219 = vst [vmem:[#allocation40_spill] sm:$0xff] %v9004_v26 }
 0x342   :  { %2255 = vmatprep.mubr.bf16.mxu0 %v11217_v20  ;;  %2232 = vmatpush1.bf16.msra.mxu0 %v7772_v24 }
 0x401   :  { %v1724_v57 = vpop.f32.mrf.mxu0 }
 0x402   :  { %v1725_v32 = vadd.f32 %v1724_v57, %v1649_v55 }
 0x403   :  { %v1726_v44 = vpop.f32.mrf.mxu0 }
 0x404   :  { %v1731_v50 = vadd.f32 3.0, %v1725_v32  ;;  %v1727_v30 = vadd.f32 %v1726_v44, %v1653_v37 }
 0x405   :  { %v1728_v39 = vpop.f32.mrf.mxu0 }
 0x406   :  { %v1733_v58 = vmax.f32 %v1731_v50, 0.0  ;;  %v1732_v49 = vadd.f32 3.0, %v1727_v30  ;;  %v7775_v30 = vld [vmem:[%s8051_s21 + $0x68] ss:$16 sps:$4 sm:$0xff]  }
 0x407   :  { %v1729_v2 = vpop.f32.mrf.mxu0 }
 0x408   :  { %v1735_v28 = vmin.f32 %v1733_v58, 6.0  ;;  %v1734_v23 = vmax.f32 %v1732_v49, 0.0 }
 0x40a   :  { %v1736_v62 = vmin.f32 %v1734_v23, 6.0  ;;  %v1737_v48 = vmul.f32 0.16666667, %v1735_v28 }
 0x40c   :  { %v1738_v41 = vmul.f32 0.16666667, %v1736_v62 }
 0x40e   :  { %v1741_v60 = vcombine.low %v1737_v48, %v1738_v41  ;;  %v1742_v34 = vcombine.high %v1737_v48, %v1738_v41 }
 0x410   :  { %v1749_v35 = vrot.slane %v1741_v60, %v9004_v26  ;;  %v1756_v14 = vrot.slane %v1742_v34, %v9004_v26 }
 0x412   :  { %v1757_v21 = vcombine.high %v1749_v35, %v1749_v35  ;;  %v1765_v29 = vrot.slane %v1749_v35, %v9004_v26  ;;  %v1758_v45 = vcombine.high %v1756_v14, %v1756_v14  ;;  %v1772_v32 = vrot.slane %v1756_v14, %v9004_v26 }
 0x414   :  { %v1779_v27 = vrot.slane %v1757_v21, %v9004_v26  ;;  %v1794_v33 = vrot.slane %v1765_v29, %v8307_v61  ;;  %v1798_v54 = vrot.slane %v1765_v29, %v8311_v63  ;;  %v1787_v36 = vcombine.high %v1765_v29, %v1765_v29  ;;  %v7780_v29 = vld [vmem:[%s8051_s21 + $0x44] ss:$16 sps:$4 sm:$0xff]  }
 0x415   :  { %v1786_v38 = vrot.slane %v1758_v45, %v9004_v26  ;;  %v1788_v28 = vcombine.high %v1772_v32, %v1772_v32  ;;  %v1826_v41 = vrot.slane %v1772_v32, %v8307_v61  ;;  %v7781_v45 = vld [vmem:[%s8051_s21 + $0x48] ss:$16 sps:$4 sm:$0xff]   ;;  %2233 = vmatprep.subr.bf16.mxu0 %v7780_v29 }
 0x416   :  { %v1802_v12 = vrot.slane %v1779_v27, %v8307_v61  ;;  %v1806_v22 = vrot.slane %v1779_v27, %v8311_v63  ;;  %v1789_v24 = vcombine.high %v1779_v27, %v1779_v27  ;;  %v1814_v52 = vrot.slane %v1787_v36, %v8311_v63  ;;  %v7783_v27 = vld [vmem:[%s8051_s21 + $0x4c] ss:$16 sps:$4 sm:$0xff]  }
 0x417   :  { %v1872_v53 = vmul.f32 %v1798_v54, %v8867_v11  ;;  %v1871_v55 = vmul.f32 %v1794_v33, %v11215_v51  ;;  %v1838_v11 = vrot.slane %v1786_v38, %v8311_v63  ;;  %v1810_v51 = vrot.slane %v1787_v36, %v8307_v61  ;;  %v7786_v33 = vld [vmem:[%s8051_s21 + $0x24] ss:$16 sps:$4 sm:$0xff]   ;;  %v7787_v54 = vld [vmem:[%s8051_s21 + $0x28] ss:$16 sps:$4 sm:$0xff]  }
 0x418   :  { %v1874_v46 = vmul.f32 %v1806_v22, %v8869_v42  ;;  %v1873_v37 = vmul.f32 %v1802_v12, %v11216_v59  ;;  %v1822_v57 = vrot.slane %v1789_v24, %v8311_v63  ;;  %v1876_v17 = vmul.f32 %v1814_v52, %v8871_v19  ;;  %v7792_v36 = vld [vmem:[%s8051_s21 + $0x4] ss:$16 sps:$4 sm:$0xff]   ;;  %v7790_v12 = vld [vmem:[%s8051_s21] ss:$16 sps:$4 sm:$0xff]   ;;  %v7795_v22 = vld [vmem:[%s8051_s21 + $0xc] ss:$16 sps:$4 sm:$0xff]  }
 0x419   :  { %v1818_v39 = vrot.slane %v1789_v24, %v8307_v61  ;;  %v1830_v59 = vrot.slane %v1772_v32, %v8311_v63  ;;  %v1882_v49 = vmul.f32 %v1838_v11, %v8877_v0  ;;  %v1790_v19 = vcombine.high %v1786_v38, %v1786_v38 }
 0x41a   :  { %v1920_v44 = vpack.c.bf16 %v1874_v46, %v1872_v53  ;;  %v1919_v50 = vpack.c.bf16 %v1873_v37, %v1871_v55  ;;  %v1878_v13 = vmul.f32 %v1822_v57, %v8873_v25  ;;  %v1875_v25 = vmul.f32 %v1810_v51, %v8934_v1  ;;  %v7176_v46 = vld [vmem:[%s8166_s24] ss:$0 sm:$0xff]  ;;  %s11372_s24 = sld [smem:[#allocation7_spill]] }
 0x41b   :  { %v1877_v58 = vmul.f32 %v1818_v39, %v8936_v56  ;;  %v1880_v2 = vmul.f32 %v1830_v59, %v8875_v15  ;;  %v1834_v16 = vrot.slane %v1786_v38, %v8307_v61  ;;  %v1854_v48 = vrot.slane %v1790_v19, %v8311_v63  ;;  %v7793_v38 = vld [vmem:[%s8051_s21 + $0x8] ss:$16 sps:$4 sm:$0xff]   ;;  %v11222_v39 = vld [vmem:[#allocation29_spill] sm:$0xff] }
 0x41c   :  { %2055 = vmatprep.mubr.bf16.mxu1 %v1920_v44  ;;  %v1922_v42 = vpack.c.bf16 %v1878_v13, %v1876_v17  ;;  %v1846_v56 = vrot.slane %v1788_v28, %v8311_v63  ;;  %v1879_v15 = vmul.f32 %v1826_v41, %v8940_v10  ;;  %v1850_v35 = vrot.slane %v1790_v19, %v8307_v61  ;;  %v11220_v17 = vld [vmem:[#allocation28_spill] sm:$0xff] }
 0x41d   :  { %2056 = vmatmul.mubr.bf16.vlgmr.msra.gmra.mxu1 %v1919_v50  ;;  %v1921_v23 = vpack.c.bf16 %v1877_v58, %v1875_v25  ;;  %v1924_v62 = vpack.c.bf16 %v1882_v49, %v1880_v2  ;;  %v1881_v0 = vmul.f32 %v1834_v16, %v8942_v31  ;;  %v1886_v1 = vmul.f32 %v1854_v48, %v8881_v40 }
 0x41e   :  { %2305 = vmatpush1.bf16.msra.mxu1 %v7775_v30  ;;  %2063 = vmatprep.mubr.bf16.mxu1 %v1922_v42  ;;  %v1884_v60 = vmul.f32 %v1846_v56, %v8879_v3  ;;  %v1842_v21 = vrot.slane %v1788_v28, %v8307_v61  ;;  %v1885_v31 = vmul.f32 %v1850_v35, %v8952_v18  ;;  %v7778_v3 = vld [vmem:[%s8051_s21 + $0x40] ss:$16 sps:$4 sm:$0xff]  }
 0x41f   :  { %v1923_v34 = vpack.c.bf16 %v1881_v0, %v1879_v15  ;;  %2306 = vmatprep.subr.bf16.mxu1 %v7783_v27  ;;  %2234 = vmatpush1.bf16.msra.mxu0 %v7778_v3  ;;  %v7784_v18 = vld [vmem:[%s8051_s21 + $0x20] ss:$16 sps:$4 sm:$0xff]  }
 0x420   :  { %v1926_v14 = vpack.c.bf16 %v1886_v1, %v1884_v60  ;;  %v1883_v40 = vmul.f32 %v1842_v21, %v8947_v43  ;;  %v7789_v43 = vld [vmem:[%s8051_s21 + $0x2c] ss:$16 sps:$4 sm:$0xff]   ;;  %2235 = vmatprep.subr.bf16.mxu0 %v7786_v33  ;;  %s11300_s21 = sld [smem:[#allocation14_spill]] }
 0x421   :  { %v11228_v21 = vld [vmem:[#allocation32_spill] sm:$0xff] }
 0x422   :  { %v1925_v10 = vpack.c.bf16 %v1885_v31, %v1883_v40  ;;  %2307 = vmatpush1.bf16.msra.mxu1 %v7781_v45  ;;  %v11230_v40 = vld [vmem:[#allocation33_spill] sm:$0xff] }
 0x423   :  { %2308 = vmatprep.subr.bf16.mxu1 %v7789_v43  ;;  %2236 = vmatpush1.bf16.msra.mxu0 %v7784_v18  ;;  %v11234_v43 = vld [vmem:[#allocation34_spill] sm:$0xff] }
 0x424   :  { %2237 = vmatprep.subr.bf16.mxu0 %v7792_v36 }
 0x425   :  { %2064 = vmatmul.mubr.bf16.gmra.mxu1 %v1921_v23  ;;  %v11224_v23 = vld [vmem:[#allocation31_spill] sm:$0xff] }
 0x426   :  { %2071 = vmatprep.mubr.bf16.mxu1 %v1924_v62  ;;  %2309 = vmatpush1.bf16.msra.mxu1 %v7787_v54  ;;  %v11226_v62 = vld [vmem:[#allocation30_spill] sm:$0xff] }
 0x427   :  { %2310 = vmatprep.subr.bf16.mxu1 %v7795_v22  ;;  %2238 = vmatpush1.bf16.msra.mxu0 %v7790_v12  ;;  %v11236_v12 = vld [vmem:[#allocation35_spill] sm:$0xff] }
 0x42a   :  { %2311 = vmatpush1.bf16.msra.mxu1 %v7793_v38 }
 0x42d   :  { %2072 = vmatmul.mubr.bf16.gmra.mxu1 %v1923_v34 }
 0x42e   :  { %2079 = vmatprep.mubr.bf16.mxu1 %v1926_v14 }
 0x435   :  { %2080 = vmatmul.mubr.bf16.gmra.mxu1 %v1925_v10 }
 0x436   :  { %2328 = vmatprep.mubr.bf16.mxu1 %v11217_v20 }
 0x4dd   :  { %v7403_v24 = vpop.f32.mrf.mxu1 }
 0x4df   :  { %v7404_v52 = vpop.f32.mrf.mxu1 }
 0x4e0   :  { %v7405_v53 = vadd.f32 %v7404_v52, %v7403_v24  ;;  %v2369_v24 = vld [vmem:[%s11232_s0] sm:$0xf] }
 0x4e1   :  { %v7406_v55 = vpop.f32.mrf.mxu1  ;;  %v9107_v52 = vrot.slane %v2369_v24, %v8307_v61 }
 0x4e2   :  { %v2095_v57 = vadd.f32 %v7405_v53, %v7176_v46 }
 0x4e3   :  { %v7407_v37 = vpop.f32.mrf.mxu1 }
 0x4e4   :  { %v7408_v32 = vadd.f32 %v7407_v37, %v7406_v55  ;;  %v9060_v13 = vadd.f32 %v2095_v57, %v11220_v17  ;;  %v7799_v17 = vld [vmem:[%s11233_s5 + $0x30] sm:$0xff]  }
 0x4e5   :  { %v7409_v44 = vpop.f32.mrf.mxu1 }
 0x4e6   :  { %v2096_v50 = vadd.f32 %v7408_v32, %v7176_v46  ;;  %11221 = vst [vmem:[#allocation44_spill] sm:$0xff] %v9060_v13  ;;  %v7796_v32 = vld [vmem:[%s11233_s5 + $0x78] sm:$0xff]  }
 0x4e7   :  { %v7410_v30 = vpop.f32.mrf.mxu1  ;;  %7427 = vmatprep.subr.bf16.mxu0 %v7796_v32 }
 0x4e8   :  { %v9063_v11 = vadd.f32 %v2096_v50, %v11222_v39  ;;  %v7411_v42 = vadd.f32 %v7410_v30, %v7409_v44  ;;  %v7797_v44 = vld [vmem:[%s11233_s5 + $0x38] sm:$0xff]   ;;  %v7798_v50 = vld [vmem:[%s11233_s5 + $0x70] sm:$0xff]  }
 0x4e9   :  { %v7412_v51 = vpop.f32.mrf.mxu1 }
 0x4ea   :  { %11223 = vst [vmem:[#allocation41_spill] sm:$0xff] %v9063_v11  ;;  %v2127_v59 = vpack.c.bf16 %v9063_v11, %v9060_v13  ;;  %v2097_v49 = vadd.f32 %v7411_v42, %v7176_v46  ;;  %v7800_v42 = vld [vmem:[%s11233_s5 + $0x68] sm:$0xff]  }
 0x4eb   :  { %v7413_v58 = vpop.f32.mrf.mxu1 }
 0x4ec   :  { %v7414_v19 = vadd.f32 %v7413_v58, %v7412_v51  ;;  %7193 = vmatmul.mubr.msk.bf16.vlgmr.msra.gmra.mxu0 %vm333_vm1, %v2127_v59  ;;  %7197 = vmatmul.mubr.msk.bf16.vlgmr.msra.gmra.mxu1 %vm333_vm1, %v2127_v59  ;;  %v9072_v16 = vadd.f32 %v2097_v49, %v11224_v23  ;;  %v7801_v59 = vld [vmem:[%s11233_s5 + $0x28] sm:$0xff]   ;;  %v7802_v49 = vld [vmem:[%s11233_s5 + $0x60] sm:$0xff]   ;;  %v7804_v23 = vld [vmem:[%s11233_s5 + $0x58] sm:$0xff]  }
 0x4ed   :  { %v7415_v25 = vpop.f32.mrf.mxu1  ;;  %2265 = vmatprep.mubr.bf16.mxu0 %v11217_v20  ;;  %2338 = vmatprep.mubr.bf16.mxu1 %v11217_v20 }
 0x4ee   :  { %v2098_v2 = vadd.f32 %v7414_v19, %v7176_v46  ;;  %11225 = vst [vmem:[#allocation43_spill] sm:$0xff] %v9072_v16  ;;  %7428 = vmatpush3.bf16.msra.mxu0 %v7797_v44  ;;  %v9119_v19 = vrot.slane %v2369_v24, %v8311_v63 }
 0x4ef   :  { %v7416_v28 = vpop.f32.mrf.mxu1  ;;  %7429 = vmatprep.subr.bf16.mxu0 %v7798_v50  ;;  %v9157_v50 = vld [vmem:[%s11238_s9 + $0x30] sm:$0xff] }
 0x4f0   :  { %v9075_v48 = vadd.f32 %v2098_v2, %v11226_v62  ;;  %v7417_v41 = vadd.f32 %v7416_v28, %v7415_v25  ;;  %v7803_v2 = vld [vmem:[%s11233_s5 + $0x20] sm:$0xff]  }
 0x4f1   :  { %v7418_v56 = vpop.f32.mrf.mxu1 }
 0x4f2   :  { %11227 = vst [vmem:[#allocation39_spill] sm:$0xff] %v9075_v48  ;;  %v2128_v0 = vpack.c.bf16 %v9075_v48, %v9072_v16  ;;  %v2099_v15 = vadd.f32 %v7417_v41, %v7176_v46  ;;  %7430 = vmatpush3.bf16.msra.mxu0 %v7799_v17 }
 0x4f3   :  { %v7419_v1 = vpop.f32.mrf.mxu1  ;;  %7431 = vmatprep.subr.bf16.mxu0 %v7800_v42 }
 0x4f4   :  { %v7420_v60 = vadd.f32 %v7419_v1, %v7418_v56  ;;  %7194 = vmatmul.mubr.msk.bf16.gmra.mxu0 %vm333_vm1, %v2128_v0  ;;  %7198 = vmatmul.mubr.msk.bf16.gmra.mxu1 %vm333_vm1, %v2128_v0  ;;  %v9084_v31 = vadd.f32 %v2099_v15, %v11228_v21  ;;  %v7805_v0 = vld [vmem:[%s11233_s5 + $0x18] sm:$0xff]  }
 0x4f5   :  { %v7421_v34 = vpop.f32.mrf.mxu1  ;;  %2275 = vmatprep.mubr.bf16.mxu0 %v11217_v20  ;;  %2348 = vmatprep.mubr.bf16.mxu1 %v11217_v20 }
 0x4f6   :  { %v2100_v35 = vadd.f32 %v7420_v60, %v7176_v46  ;;  %11229 = vst [vmem:[#allocation53_spill] sm:$0xff] %v9084_v31  ;;  %7432 = vmatpush3.bf16.msra.mxu0 %v7801_v59  ;;  %v7806_v60 = vld [vmem:[%s11233_s5 + $0x50] sm:$0xff]  }
 0x4f7   :  { %v7422_v14 = vpop.f32.mrf.mxu1  ;;  %7433 = vmatprep.subr.bf16.mxu0 %v7802_v49 }
 0x4f8   :  { %v9087_v10 = vadd.f32 %v2100_v35, %v11230_v40  ;;  %v7423_v3 = vadd.f32 %v7422_v14, %v7421_v34  ;;  %v9133_v34 = vld [vmem:[%s11238_s9] sm:$0xff]  ;;  %v9136_v35 = vld [vmem:[%s11238_s9 + $0x10] sm:$0xff] }
 0x4f9   :  { %v7424_v29 = vpop.f32.mrf.mxu1 }
 0x4fa   :  { %11231 = vst [vmem:[#allocation51_spill] sm:$0xff] %v9087_v10  ;;  %v2129_v45 = vpack.c.bf16 %v9087_v10, %v9084_v31  ;;  %v2101_v18 = vadd.f32 %v7423_v3, %v7176_v46  ;;  %7434 = vmatpush3.bf16.msra.mxu0 %v7803_v2  ;;  %v7807_v3 = vld [vmem:[%s11233_s5 + $0x10] sm:$0xff]   ;;  %v9168_v2 = vld [vmem:[%s11238_s9 + $0x40] sm:$0xff] }
 0x4fb   :  { %v7425_v27 = vpop.f32.mrf.mxu1  ;;  %7435 = vmatprep.subr.bf16.mxu0 %v7804_v23 }
 0x4fc   :  { %v7426_v33 = vadd.f32 %v7425_v27, %v7424_v29  ;;  %7195 = vmatmul.mubr.msk.bf16.gmra.mxu0 %vm333_vm1, %v2129_v45  ;;  %7199 = vmatmul.mubr.msk.bf16.gmra.mxu1 %vm333_vm1, %v2129_v45  ;;  %v9096_v36 = vadd.f32 %v2101_v18, %v11234_v43  ;;  %v7808_v27 = vld [vmem:[%s11233_s5 + $0x48] sm:$0xff]  }
 0x4fd   :  { %2285 = vmatprep.mubr.bf16.mxu0 %v11217_v20  ;;  %2358 = vmatprep.mubr.bf16.mxu1 %v11217_v20 }
 0x4fe   :  { %v2102_v54 = vadd.f32 %v7426_v33, %v7176_v46  ;;  %11235 = vst [vmem:[#allocation37_spill] sm:$0xff] %v9096_v36  ;;  %7436 = vmatpush3.bf16.msra.mxu0 %v7805_v0 }
 0x4ff   :  { %7437 = vmatprep.subr.bf16.mxu0 %v7806_v60 }
 0x500   :  { %v9099_v22 = vadd.f32 %v2102_v54, %v11236_v12  ;;  %v9146_v12 = vld [vmem:[%s11238_s9 + $0x20] sm:$0xff] }
 0x502   :  { %11237 = vst [vmem:[#allocation49_spill] sm:$0xff] %v9099_v22  ;;  %v2130_v38 = vpack.c.bf16 %v9099_v22, %v9096_v36  ;;  %7438 = vmatpush3.bf16.msra.mxu0 %v7807_v3 }
 0x503   :  { %7439 = vmatprep.subr.bf16.mxu0 %v7808_v27 }
 0x504   :  { %7196 = vmatmul.mubr.msk.bf16.gmra.mxu0 %vm333_vm1, %v2130_v38  ;;  %7200 = vmatmul.mubr.msk.bf16.gmra.mxu1 %vm333_vm1, %v2130_v38  ;;  %v7809_v38 = vld [vmem:[%s11233_s5 + $0x8] sm:$0xff]  }
 0x506   :  { %7440 = vmatpush3.bf16.msra.mxu0 %v7809_v38 }
 0x5ac   :  { %v2257_v53 = vpop.f32.mrf.mxu0 }
 0x5ad   :  { %v2391_v46 = vadd.f32 %v9107_v52, %v2257_v53  ;;  %v7810_v53 = vld [vmem:[%s11233_s5 + $0x40] sm:$0xff]  }
 0x5ae   :  { %v2259_v37 = vpop.f32.mrf.mxu0  ;;  %7441 = vmatprep.subr.bf16.mxu0 %v7810_v53  ;;  %v9193_v53 = vld [vmem:[%s11238_s9 + $0x18] sm:$0xff] }
 0x5af   :  { %v2423_v55 = vadd.f32 3.0, %v2391_v46  ;;  %v2392_v62 = vadd.f32 %v9119_v19, %v2259_v37 }
 0x5b0   :  { %v2261_v30 = vpop.f32.mrf.mxu0 }
 0x5b1   :  { %v2455_v57 = vmax.f32 %v2423_v55, 0.0  ;;  %v2395_v51 = vadd.f32 %v9107_v52, %v2261_v30  ;;  %v2424_v14 = vadd.f32 3.0, %v2392_v62  ;;  %v7811_v30 = vld [vmem:[%s11233_s5] sm:$0xff]  }
 0x5b2   :  { %v2263_v56 = vpop.f32.mrf.mxu0  ;;  %7442 = vmatpush3.bf16.msra.mxu0 %v7811_v30 }
 0x5b3   :  { %v2487_v39 = vmin.f32 %v2455_v57, 6.0  ;;  %v2427_v25 = vadd.f32 3.0, %v2395_v51  ;;  %v2456_v18 = vmax.f32 %v2424_v14, 0.0  ;;  %v2396_v37 = vadd.f32 %v9119_v19, %v2263_v56 }
 0x5b4   :  { %v2267_v40 = vpop.f32.mrf.mxu0 }
 0x5b5   :  { %v2519_v58 = vmul.f32 %v2487_v39, %v2391_v46  ;;  %v2459_v41 = vmax.f32 %v2427_v25, 0.0  ;;  %v2399_v43 = vadd.f32 %v9107_v52, %v2267_v40  ;;  %v2488_v46 = vmin.f32 %v2456_v18, 6.0 }
 0x5b6   :  { %v2428_v59 = vadd.f32 3.0, %v2396_v37 }
 0x5b7   :  { %v9122_v28 = vmul.f32 0.16666667, %v2519_v58  ;;  %v2491_v21 = vmin.f32 %v2459_v41, 6.0  ;;  %v2431_v44 = vadd.f32 3.0, %v2399_v43  ;;  %v2520_v39 = vmul.f32 %v2488_v46, %v2392_v62  ;;  %v2269_v41 = vpop.f32.mrf.mxu0 }
 0x5b8   :  { %v9202_v30 = vadd.f32 %v9119_v19, %v2269_v41  ;;  %v9217_v41 = vld [vmem:[%s11238_s9 + $0x70] sm:$0xff] }
 0x5b9   :  { %v2602_v1 = vrot.slane %v9122_v28, %v8307_v61  ;;  %v2682_v15 = vrot.slane %v9122_v28, %v8311_v63  ;;  %v2523_v33 = vmul.f32 %v2491_v21, %v2395_v51  ;;  %v2778_v54 = vrot.slane %v9122_v28, %v8321_v4  ;;  %v9178_v21 = vld [vmem:[%s11238_s9 + $0x50] sm:$0xff] }
 0x5ba   :  { %v2874_v32 = vrot.slane %v9122_v28, %v8324_v5  ;;  %v2970_v49 = vrot.slane %v9122_v28, %v8327_v6  ;;  %v2463_v25 = vmax.f32 %v2431_v44, 0.0  ;;  %v9170_v62 = vmul.f32 0.16666667, %v2520_v39 }
 0x5bb   :  { %v2663_v29 = vmul.f32 %v2602_v1, %v9133_v34  ;;  %v2743_v45 = vmul.f32 %v2682_v15, %v9136_v35  ;;  %v9150_v55 = vmul.f32 0.16666667, %v2523_v33  ;;  %v2839_v57 = vmul.f32 %v2778_v54, %v9146_v12 }
 0x5bc   :  { %v2935_v58 = vmul.f32 %v2874_v32, %v9157_v50  ;;  %v2460_v1 = vmax.f32 %v2428_v59, 0.0  ;;  %v3031_v15 = vmul.f32 %v2970_v49, %v9168_v2  ;;  %v3066_v60 = vrot.slane %v9122_v28, %v8330_v7 }
 0x5bd   :  { %v2759_v24 = vadd.f32 %v2743_v45, %v2663_v29  ;;  %v2610_v42 = vrot.slane %v9150_v55, %v8307_v61  ;;  %v2690_v51 = vrot.slane %v9150_v55, %v8311_v63  ;;  %v2495_v14 = vmin.f32 %v2463_v25, 6.0  ;;  %v2271_v29 = vpop.f32.mrf.mxu0 }
 0x5be   :  { %v2786_v40 = vrot.slane %v9150_v55, %v8321_v4  ;;  %v2606_v45 = vrot.slane %v9170_v62, %v8307_v61  ;;  %v2686_v27 = vrot.slane %v9170_v62, %v8311_v63  ;;  %v2492_v33 = vmin.f32 %v2460_v1, 6.0 }
 0x5bf   :  { %v2855_v17 = vadd.f32 %v2839_v57, %v2759_v24  ;;  %v2665_v56 = vmul.f32 %v2610_v42, %v9133_v34  ;;  %v2745_v0 = vmul.f32 %v2690_v51, %v9136_v35  ;;  %v3127_v54 = vmul.f32 %v3066_v60, %v9178_v21  ;;  %v9190_v24 = vld [vmem:[%s11238_s9 + $0x8] sm:$0xff]  ;;  %v9196_v57 = vld [vmem:[%s11238_s9 + $0x60] sm:$0xff]  ;;  %v2273_v60 = vpop.f32.mrf.mxu0 }
 0x5c0   :  { %v3162_v38 = vrot.slane %v9122_v28, %v8333_v8  ;;  %v2527_v46 = vmul.f32 %v2495_v14, %v2399_v43  ;;  %v2841_v32 = vmul.f32 %v2786_v40, %v9146_v12  ;;  %v2882_v44 = vrot.slane %v9150_v55, %v8324_v5  ;;  %v9230_v40 = vld [vmem:[%s11239_s13] sm:$0x3] }
 0x5c1   :  { %v2951_v23 = vadd.f32 %v2935_v58, %v2855_v17  ;;  %v2761_v18 = vadd.f32 %v2745_v0, %v2665_v56  ;;  %v9205_v17 = vadd.f32 %v9107_v52, %v2271_v29  ;;  %v2664_v42 = vmul.f32 %v2606_v45, %v9190_v24  ;;  %v9220_v56 = vld [vmem:[%s11238_s9 + $0x28] sm:$0xff]  ;;  %11240 = vst [vmem:[#allocation54_spill] sm:$0xff] %v9230_v40 }
 0x5c2   :  { %v2744_v51 = vmul.f32 %v2686_v27, %v9193_v53  ;;  %v2524_v59 = vmul.f32 %v2492_v33, %v2396_v37  ;;  %v3223_v58 = vmul.f32 %v3162_v38, %v9196_v57  ;;  %v3258_v49 = vrot.slane %v9122_v28, %v8336_v9 }
 0x5c3   :  { %v3047_v3 = vadd.f32 %v3031_v15, %v2951_v23  ;;  %v2857_v43 = vadd.f32 %v2841_v32, %v2761_v18  ;;  %v2782_v25 = vrot.slane %v9170_v62, %v8321_v4  ;;  %v9214_v23 = vmul.f32 0.16666667, %v2527_v46 }
 0x5c4   :  { %v2937_v0 = vmul.f32 %v2882_v44, %v9157_v50  ;;  %v2978_v1 = vrot.slane %v9150_v55, %v8327_v6  ;;  %v2432_v37 = vadd.f32 3.0, %v9202_v30  ;;  %v2435_v15 = vadd.f32 3.0, %v9205_v17 }
 0x5c5   :  { %v3143_v39 = vadd.f32 %v3127_v54, %v3047_v3  ;;  %v2878_v28 = vrot.slane %v9170_v62, %v8324_v5  ;;  %v9233_v3 = vld [vmem:[%s11238_s9 + $0x38] sm:$0xff]  ;;  %v2760_v29 = vadd.f32 %v2744_v51, %v2664_v42  ;;  %v9235_v27 = vmul.f32 0.16666667, %v2524_v59  ;;  %v2277_v42 = vpop.f32.mrf.mxu0 }
 0x5c6   :  { %v2953_v45 = vadd.f32 %v2937_v0, %v2857_v43  ;;  %v3319_v18 = vmul.f32 %v3258_v49, %v9217_v41  ;;  %v2840_v33 = vmul.f32 %v2782_v25, %v9220_v56  ;;  %v2618_v54 = vrot.slane %v9214_v23, %v8307_v61  ;;  %v9254_v49 = vld [vmem:[%s11238_s9 + $0x48] sm:$0xff] }
 0x5c7   :  { %v3239_v14 = vadd.f32 %v3223_v58, %v3143_v39  ;;  %v2698_v38 = vrot.slane %v9214_v23, %v8311_v63  ;;  %v3033_v46 = vmul.f32 %v2978_v1, %v9168_v2  ;;  %v3074_v32 = vrot.slane %v9150_v55, %v8330_v7 }
 0x5c8   :  { %v2464_v44 = vmax.f32 %v2432_v37, 0.0  ;;  %v2467_v39 = vmax.f32 %v2435_v15, 0.0  ;;  %v9248_v51 = vrot.slane %v9230_v40, %v8307_v61  ;;  %v2936_v43 = vmul.f32 %v2878_v28, %v9233_v3 }
 0x5c9   :  { %v2974_v59 = vrot.slane %v9170_v62, %v8327_v6  ;;  %v3335_v58 = vadd.f32 %v3319_v18, %v3239_v14  ;;  %v2856_v25 = vadd.f32 %v2840_v33, %v2760_v29  ;;  %v3049_v0 = vadd.f32 %v3033_v46, %v2953_v45 }
 0x5ca   :  { %11241 = vst [vmem:[#allocation50_spill] sm:$0xff] %v9248_v51  ;;  %v2614_v1 = vrot.slane %v9235_v27, %v8307_v61  ;;  %v2694_v37 = vrot.slane %v9235_v27, %v8311_v63  ;;  %v2667_v15 = vmul.f32 %v2618_v54, %v9133_v34  ;;  %v2747_v28 = vmul.f32 %v2698_v38, %v9136_v35 }
 0x5cb   :  { %v9263_v22 = vadd.f32 %v9107_v52, %v2277_v42  ;;  %v3129_v14 = vmul.f32 %v3074_v32, %v9178_v21  ;;  %v3170_v29 = vrot.slane %v9150_v55, %v8333_v8  ;;  %v2496_v45 = vmin.f32 %v2464_v44, 6.0  ;;  %v9279_v32 = vld [vmem:[%s11238_s9 + $0x58] sm:$0xff] }
 0x5cc   :  { %v2499_v18 = vmin.f32 %v2467_v39, 6.0  ;;  %v3032_v33 = vmul.f32 %v2974_v59, %v9254_v49  ;;  %v3070_v46 = vrot.slane %v9170_v62, %v8330_v7  ;;  %v3166_v54 = vrot.slane %v9170_v62, %v8333_v8  ;;  %v9284_v59 = vld [vmem:[%s11238_s9 + $0x68] sm:$0xff] }
 0x5cd   :  { %v2794_v38 = vrot.slane %v9214_v23, %v8321_v4  ;;  %v9276_v42 = vadd.f32 %v9248_v51, %v3335_v58  ;;  %v2952_v48 = vadd.f32 %v2936_v43, %v2856_v25  ;;  %v3262_v44 = vrot.slane %v9170_v62, %v8336_v9 }
 0x5ce   :  { %v3145_v39 = vadd.f32 %v3129_v14, %v3049_v0  ;;  %v2666_v11 = vmul.f32 %v2614_v1, %v9190_v24  ;;  %v2746_v36 = vmul.f32 %v2694_v37, %v9193_v53  ;;  %v2763_v16 = vadd.f32 %v2747_v28, %v2667_v15 }
 0x5cf   :  { %11242 = vst [vmem:[#allocation48_spill] sm:$0xff] %v9276_v42  ;;  %v2439_v10 = vadd.f32 3.0, %v9263_v22  ;;  %v3225_v58 = vmul.f32 %v3170_v29, %v9196_v57  ;;  %v3266_v43 = vrot.slane %v9150_v55, %v8336_v9  ;;  %v2528_v25 = vmul.f32 %v2496_v45, %v9202_v30  ;;  %v2279_v30 = vpop.f32.mrf.mxu0 }
 0x5d0   :  { %v2531_v62 = vmul.f32 %v2499_v18, %v9205_v17  ;;  %v3128_v0 = vmul.f32 %v3070_v46, %v9279_v32  ;;  %v2790_v1 = vrot.slane %v9235_v27, %v8321_v4  ;;  %v2843_v37 = vmul.f32 %v2794_v38, %v9146_v12 }
 0x5d1   :  { %v2890_v15 = vrot.slane %v9214_v23, %v8324_v5  ;;  %v3048_v28 = vadd.f32 %v3032_v33, %v2952_v48  ;;  %v9304_v14 = vmul.f32 %v3166_v54, %v9284_v59  ;;  %v3241_v29 = vadd.f32 %v3225_v58, %v3145_v39  ;;  %v2281_v58 = vpop.f32.mrf.mxu0 }
 0x5d2   :  { %v9307_v55 = vadd.f32 %v9119_v19, %v2273_v60  ;;  %v9310_v17 = vmul.f32 %v3262_v44, %v9290_v47  ;;  %v2762_v45 = vadd.f32 %v2746_v36, %v2666_v11  ;;  %v2859_v18 = vadd.f32 %v2843_v37, %v2763_v16 }
 0x5d3   :  { %v2471_v46 = vmax.f32 %v2439_v10, 0.0  ;;  %v9313_v38 = vadd.f32 3.0, %v9276_v42  ;;  %v3321_v13 = vmul.f32 %v3266_v43, %v9217_v41  ;;  %v9316_v48 = vmul.f32 0.16666667, %v2528_v25 }
 0x5d4   :  { %11244 = vst [vmem:[#allocation46_spill] sm:$0xff] %v9310_v17  ;;  %v9318_v33 = vmul.f32 0.16666667, %v2531_v62  ;;  %v2842_v54 = vmul.f32 %v2790_v1, %v9220_v56  ;;  %v2886_v60 = vrot.slane %v9235_v27, %v8324_v5  ;;  %v2939_v44 = vmul.f32 %v2890_v15, %v9157_v50 }
 0x5d5   :  { %11245 = vst [vmem:[#allocation38_spill] sm:$0xff] %v9313_v38  ;;  %11246 = vst [vmem:[#allocation47_spill] sm:$0xff] %v9316_v48  ;;  %v2986_v11 = vrot.slane %v9214_v23, %v8327_v6  ;;  %v9326_v16 = vadd.f32 %v3128_v0, %v3048_v28  ;;  %v3337_v10 = vadd.f32 %v3321_v13, %v3241_v29  ;;  %v2436_v39 = vadd.f32 3.0, %v9307_v55 }
 0x5d6   :  { %v2982_v36 = vrot.slane %v9235_v27, %v8327_v6  ;;  %v2858_v43 = vadd.f32 %v2842_v54, %v2762_v45  ;;  %v3078_v25 = vrot.slane %v9235_v27, %v8330_v7  ;;  %v2955_v62 = vadd.f32 %v2939_v44, %v2859_v18 }
 0x5d7   :  { %v2503_v1 = vmin.f32 %v2471_v46, 6.0  ;;  %v2622_v37 = vrot.slane %v9316_v48, %v8307_v61  ;;  %v2702_v0 = vrot.slane %v9316_v48, %v8311_v63  ;;  %v2626_v13 = vrot.slane %v9318_v33, %v8307_v61 }
 0x5d8   :  { %v2706_v15 = vrot.slane %v9318_v33, %v8311_v63  ;;  %v2938_v28 = vmul.f32 %v2886_v60, %v9233_v3  ;;  %v3174_v29 = vrot.slane %v9235_v27, %v8333_v8  ;;  %v3035_v45 = vmul.f32 %v2986_v11, %v9168_v2 }
 0x5d9   :  { %v9346_v18 = vadd.f32 %v9107_v52, %v2281_v58  ;;  %v9349_v46 = vadd.f32 %v9248_v51, %v3337_v10  ;;  %v3270_v54 = vrot.slane %v9235_v27, %v8336_v9  ;;  %v3082_v44 = vrot.slane %v9214_v23, %v8330_v7 }
 0x5da   :  { %v2468_v31 = vmax.f32 %v2436_v39, 0.0  ;;  %v2954_v26 = vadd.f32 %v2938_v28, %v2858_v43  ;;  %v3051_v60 = vadd.f32 %v3035_v45, %v2955_v62  ;;  %v3178_v20 = vrot.slane %v9214_v23, %v8333_v8 }
 0x5db   :  { %11247 = vst [vmem:[#allocation42_spill] sm:$0xff] %v9349_v46  ;;  %v2535_v11 = vmul.f32 %v2503_v1, %v9263_v22  ;;  %v2668_v58 = vmul.f32 %v2622_v37, %v9190_v24  ;;  %v2748_v42 = vmul.f32 %v2702_v0, %v9193_v53  ;;  %v2669_v10 = vmul.f32 %v2626_v13, %v9133_v34  ;;  %v2283_v0 = vpop.f32.mrf.mxu0 }
 0x5dc   :  { %v2749_v38 = vmul.f32 %v2706_v15, %v9136_v35  ;;  %v3034_v27 = vmul.f32 %v2982_v36, %v9254_v49  ;;  %v3130_v51 = vmul.f32 %v3078_v25, %v9279_v32  ;;  %v9365_v39 = vmul.f32 %v3174_v29, %v9284_v59 }
 0x5dd   :  { %v2443_v43 = vadd.f32 3.0, %v9346_v18  ;;  %v3131_v62 = vmul.f32 %v3082_v44, %v9178_v21  ;;  %v2798_v22 = vrot.slane %v9316_v48, %v8321_v4  ;;  %v2802_v1 = vrot.slane %v9318_v33, %v8321_v4 }
 0x5de   :  { %11248 = vst [vmem:[#allocation45_spill] sm:$0xff] %v9365_v39  ;;  %v2500_v37 = vmin.f32 %v2468_v31, 6.0  ;;  %v9374_v13 = vadd.f32 3.0, %v9349_v46  ;;  %v3050_v36 = vadd.f32 %v3034_v27, %v2954_v26  ;;  %v9377_v25 = vmul.f32 %v3270_v54, %v9290_v47 }
 0x5df   :  { %v9379_v15 = vmul.f32 0.16666667, %v2535_v11  ;;  %v3147_v28 = vadd.f32 %v3131_v62, %v3051_v60  ;;  %v3227_v29 = vmul.f32 %v3178_v20, %v9196_v57  ;;  %v2764_v45 = vadd.f32 %v2748_v42, %v2668_v58  ;;  %v2287_v42 = vpop.f32.mrf.mxu0 }
 0x5e0   :  { %11249 = vst [vmem:[#allocation28_spill] sm:$0xff] %v9374_v13  ;;  %11250 = vst [vmem:[#allocation29_spill] sm:$0xff] %v9377_v25  ;;  %v2765_v44 = vadd.f32 %v2749_v38, %v2669_v10  ;;  %v3274_v40 = vrot.slane %v9214_v23, %v8336_v9  ;;  %v2894_v31 = vrot.slane %v9316_v48, %v8324_v5  ;;  %v2475_v26 = vmax.f32 %v2443_v43, 0.0 }
 0x5e1   :  { %v9387_v46 = vadd.f32 %v9119_v19, %v2279_v30  ;;  %v2844_v54 = vmul.f32 %v2798_v22, %v9220_v56  ;;  %v2845_v11 = vmul.f32 %v2802_v1, %v9146_v12  ;;  %v2898_v60 = vrot.slane %v9318_v33, %v8324_v5 }
 0x5e2   :  { %v2532_v20 = vmul.f32 %v2500_v37, %v9307_v55  ;;  %v9394_v38 = vadd.f32 %v3130_v51, %v3050_v36  ;;  %v2990_v23 = vrot.slane %v9316_v48, %v8327_v6  ;;  %v2634_v30 = vrot.slane %v9379_v15, %v8307_v61 }
 0x5e3   :  { %v2714_v58 = vrot.slane %v9379_v15, %v8311_v63  ;;  %v3243_v10 = vadd.f32 %v3227_v29, %v3147_v28  ;;  %v2860_v27 = vadd.f32 %v2844_v54, %v2764_v45  ;;  %v3086_v43 = vrot.slane %v9316_v48, %v8330_v7 }
 0x5e4   :  { %v2861_v62 = vadd.f32 %v2845_v11, %v2765_v44  ;;  %v3323_v55 = vmul.f32 %v3274_v40, %v9217_v41  ;;  %v2440_v51 = vadd.f32 3.0, %v9387_v46  ;;  %v2507_v22 = vmin.f32 %v2475_v26, 6.0 }
 0x5e5   :  { %v9407_v1 = vadd.f32 %v9107_v52, %v2287_v42  ;;  %v2940_v37 = vmul.f32 %v2894_v31, %v9233_v3  ;;  %v2941_v36 = vmul.f32 %v2898_v60, %v9157_v50  ;;  %v2994_v28 = vrot.slane %v9318_v33, %v8327_v6 }
 0x5e6   :  { %v9413_v29 = vmul.f32 0.16666667, %v2532_v20  ;;  %v3036_v45 = vmul.f32 %v2990_v23, %v9254_v49  ;;  %v3182_v40 = vrot.slane %v9316_v48, %v8333_v8  ;;  %v2671_v44 = vmul.f32 %v2634_v30, %v9133_v34 }
 0x5e7   :  { %v2751_v26 = vmul.f32 %v2714_v58, %v9136_v35  ;;  %v9420_v54 = vadd.f32 %v3323_v55, %v3243_v10  ;;  %v2956_v11 = vadd.f32 %v2940_v37, %v2860_v27  ;;  %v9423_v31 = vmul.f32 %v3086_v43, %v9279_v32  ;;  %v2289_v55 = vpop.f32.mrf.mxu0 }
 0x5e8   :  { %v2957_v60 = vadd.f32 %v2941_v36, %v2861_v62  ;;  %v2810_v20 = vrot.slane %v9379_v15, %v8321_v4  ;;  %v2472_v42 = vmax.f32 %v2440_v51, 0.0  ;;  %v2539_v23 = vmul.f32 %v2507_v22, %v9346_v18 }
 0x5e9   :  { %11251 = vst [vmem:[#allocation31_spill] sm:$0xff] %v9420_v54  ;;  %v2447_v13 = vadd.f32 3.0, %v9407_v1  ;;  %v3037_v25 = vmul.f32 %v2994_v28, %v9168_v2  ;;  %v3090_v30 = vrot.slane %v9318_v33, %v8330_v7  ;;  %v2630_v58 = vrot.slane %v9413_v29, %v8307_v61 }
 0x5ea   :  { %v2710_v10 = vrot.slane %v9413_v29, %v8311_v63  ;;  %v9437_v27 = vmul.f32 %v3182_v40, %v9284_v59  ;;  %v3186_v18 = vrot.slane %v9318_v33, %v8333_v8  ;;  %v2767_v62 = vadd.f32 %v2751_v26, %v2671_v44 }
 0x5eb   :  { %v9443_v51 = vadd.f32 %v3036_v45, %v2956_v11  ;;  %v3053_v22 = vadd.f32 %v3037_v25, %v2957_v60  ;;  %v2906_v37 = vrot.slane %v9379_v15, %v8324_v5  ;;  %v9448_v36 = vadd.f32 %v9119_v19, %v2283_v0 }
 0x5ec   :  { %11252 = vst [vmem:[#allocation30_spill] sm:$0xff] %v9437_v27  ;;  %v2847_v28 = vmul.f32 %v2810_v20, %v9146_v12  ;;  %v2504_v40 = vmin.f32 %v2472_v42, 6.0  ;;  %v9451_v54 = vmul.f32 0.16666667, %v2539_v23  ;;  %v2479_v43 = vmax.f32 %v2447_v13, 0.0 }
 0x5ed   :  { %v3133_v17 = vmul.f32 %v3090_v30, %v9178_v21  ;;  %v2670_v44 = vmul.f32 %v2630_v58, %v9190_v24  ;;  %v2750_v45 = vmul.f32 %v2710_v10, %v9193_v53  ;;  %v9457_v25 = vadd.f32 %v9119_v19, %v2289_v55  ;;  %v7814_v30 = vld [vmem:[%s11253_s17 + $0x24] ss:$8 sps:$4 sm:$0xff]  }
 0x5ee   :  { %v3229_v26 = vmul.f32 %v3186_v18, %v9196_v57  ;;  %v3282_v0 = vrot.slane %v9318_v33, %v8336_v9  ;;  %v2806_v11 = vrot.slane %v9413_v29, %v8321_v4  ;;  %v2863_v60 = vadd.f32 %v2847_v28, %v2767_v62  ;;  %3875 = vmatprep.subr.bf16.mxu0 %v7814_v30 }
 0x5ef   :  { %v3149_v20 = vadd.f32 %v3133_v17, %v3053_v22  ;;  %v2943_v13 = vmul.f32 %v2906_v37, %v9157_v50  ;;  %v3002_v42 = vrot.slane %v9379_v15, %v8327_v6  ;;  %v2444_v23 = vadd.f32 3.0, %v9448_v36 }
 0x5f0   :  { %v2536_v58 = vmul.f32 %v2504_v40, %v9387_v46  ;;  %v2642_v10 = vrot.slane %v9451_v54, %v8307_v61  ;;  %v2722_v33 = vrot.slane %v9451_v54, %v8311_v63  ;;  %v2511_v18 = vmin.f32 %v2479_v43, 6.0 }
 0x5f1   :  { %v2766_v55 = vadd.f32 %v2750_v45, %v2670_v44  ;;  %v2902_v17 = vrot.slane %v9413_v29, %v8324_v5  ;;  %v2998_v62 = vrot.slane %v9413_v29, %v8327_v6  ;;  %v2448_v22 = vadd.f32 3.0, %v9457_v25 }
 0x5f2   :  { %v3325_v37 = vmul.f32 %v3282_v0, %v9217_v41  ;;  %v2846_v46 = vmul.f32 %v2806_v11, %v9220_v56  ;;  %v3094_v28 = vrot.slane %v9413_v29, %v8330_v7  ;;  %v2959_v40 = vadd.f32 %v2943_v13, %v2863_v60 }
 0x5f3   :  { %v3245_v48 = vadd.f32 %v3229_v26, %v3149_v20  ;;  %v3039_v43 = vmul.f32 %v3002_v42, %v9168_v2  ;;  %v3098_v44 = vrot.slane %v9379_v15, %v8330_v7  ;;  %v2476_v45 = vmax.f32 %v2444_v23, 0.0 }
 0x5f4   :  { %v9486_v47 = vmul.f32 0.16666667, %v2536_v58  ;;  %v2673_v27 = vmul.f32 %v2642_v10, %v9133_v34  ;;  %v2753_v30 = vmul.f32 %v2722_v33, %v9136_v35  ;;  %v2543_v0 = vmul.f32 %v2511_v18, %v9407_v1  ;;  %v2291_v58 = vpop.f32.mrf.mxu0 }
 0x5f5   :  { %v2862_v11 = vadd.f32 %v2846_v46, %v2766_v55  ;;  %v2942_v39 = vmul.f32 %v2902_v17, %v9233_v3  ;;  %v9493_v60 = vmul.f32 %v2998_v62, %v9254_v49  ;;  %v2480_v26 = vmax.f32 %v2448_v22, 0.0 }
 0x5f6   :  { %v9496_v20 = vmul.f32 %v3094_v28, %v9279_v32  ;;  %v3055_v13 = vadd.f32 %v3039_v43, %v2959_v40  ;;  %v3194_v42 = vrot.slane %v9379_v15, %v8333_v8  ;;  %v2818_v23 = vrot.slane %v9451_v54, %v8321_v4  ;;  %v2293_v1 = vpop.f32.mrf.mxu0 }
 0x5f7   :  { %v3290_v33 = vrot.slane %v9379_v15, %v8336_v9  ;;  %v2508_v18 = vmin.f32 %v2476_v45, 6.0  ;;  %v3135_v55 = vmul.f32 %v3098_v44, %v9178_v21  ;;  %v2638_v17 = vrot.slane %v9486_v47, %v8307_v61 }
 0x5f8   :  { %v2769_v62 = vadd.f32 %v2753_v30, %v2673_v27  ;;  %v9511_v22 = vmul.f32 0.16666667, %v2543_v0  ;;  %v9513_v46 = vadd.f32 %v3325_v37, %v3245_v48  ;;  %v9515_v28 = vadd.f32 %v2942_v39, %v2862_v11 }
 0x5f9   :  { %v2718_v40 = vrot.slane %v9486_v47, %v8311_v63  ;;  %v2512_v43 = vmin.f32 %v2480_v26, 6.0  ;;  %v3151_v10 = vadd.f32 %v3135_v55, %v3055_v13  ;;  %v3231_v15 = vmul.f32 %v3194_v42, %v9196_v57 }
 0x5fa   :  { %11254 = vst [vmem:[#allocation32_spill] sm:$0xff] %v9513_v46  ;;  %v2849_v45 = vmul.f32 %v2818_v23, %v9146_v12  ;;  %v2914_v44 = vrot.slane %v9451_v54, %v8324_v5  ;;  %v9524_v27 = vmul.f32 %v3290_v33, %v9217_v41  ;;  %v2814_v48 = vrot.slane %v9486_v47, %v8321_v4 }
 0x5fb   :  { %v2910_v39 = vrot.slane %v9486_v47, %v8324_v5  ;;  %v2540_v37 = vmul.f32 %v2508_v18, %v9448_v36  ;;  %v2672_v30 = vmul.f32 %v2638_v17, %v9190_v24  ;;  %v2650_v11 = vrot.slane %v9511_v22, %v8307_v61 }
 0x5fc   :  { %11255 = vst [vmem:[#allocation33_spill] sm:$0xff] %v9524_v27  ;;  %v2865_v0 = vadd.f32 %v2849_v45, %v2769_v62  ;;  %v2730_v26 = vrot.slane %v9511_v22, %v8311_v63  ;;  %v2752_v13 = vmul.f32 %v2718_v40, %v9193_v53  ;;  %v2544_v42 = vmul.f32 %v2512_v43, %v9457_v25 }
 0x5fd   :  { %v2419_v23 = vadd.f32 %v9107_v52, %v2291_v58  ;;  %v2420_v33 = vadd.f32 %v9119_v19, %v2293_v1  ;;  %v9540_v55 = vadd.f32 %v3231_v15, %v3151_v10  ;;  %v3006_v36 = vrot.slane %v9486_v47, %v8327_v6 }
 0x5fe   :  { %v2945_v18 = vmul.f32 %v2914_v44, %v9157_v50  ;;  %v3010_v17 = vrot.slane %v9451_v54, %v8327_v6  ;;  %v9549_v40 = vmul.f32 0.16666667, %v2540_v37  ;;  %v2848_v52 = vmul.f32 %v2814_v48, %v9220_v56 }
 0x5ff   :  { %11256 = vst [vmem:[#allocation34_spill] sm:$0xff] %v9540_v55  ;;  %v2451_v25 = vadd.f32 3.0, %v2419_v23  ;;  %v2452_v43 = vadd.f32 3.0, %v2420_v33  ;;  %v2675_v58 = vmul.f32 %v2650_v11, %v9133_v34  ;;  %v2755_v1 = vmul.f32 %v2730_v26, %v9136_v35 }
 0x600   :  { %v2961_v19 = vadd.f32 %v2945_v18, %v2865_v0  ;;  %v2768_v10 = vadd.f32 %v2752_v13, %v2672_v30  ;;  %v9555_v15 = vmul.f32 %v2910_v39, %v9233_v3  ;;  %v9557_v45 = vmul.f32 0.16666667, %v2544_v42 }
 0x601   :  { %v2483_v44 = vmax.f32 %v2451_v25, 0.0  ;;  %v3041_v62 = vmul.f32 %v3010_v17, %v9168_v2  ;;  %v3106_v37 = vrot.slane %v9451_v54, %v8330_v7  ;;  %v3202_v48 = vrot.slane %v9451_v54, %v8333_v8 }
 0x602   :  { %v2826_v0 = vrot.slane %v9511_v22, %v8321_v4  ;;  %v2646_v30 = vrot.slane %v9549_v40, %v8307_v61  ;;  %v2726_v39 = vrot.slane %v9549_v40, %v8311_v63  ;;  %v2484_v26 = vmax.f32 %v2452_v43, 0.0 }
 0x603   :  { %v2515_v11 = vmin.f32 %v2483_v44, 6.0  ;;  %v9571_v13 = vmul.f32 %v3006_v36, %v9254_v49  ;;  %v3057_v42 = vadd.f32 %v3041_v62, %v2961_v19  ;;  %v3298_v18 = vrot.slane %v9451_v54, %v8336_v9 }
 0x604   :  { %v2771_v17 = vadd.f32 %v2755_v1, %v2675_v58  ;;  %v2654_v46 = vrot.slane %v9557_v45, %v8307_v61  ;;  %v2734_v27 = vrot.slane %v9557_v45, %v8311_v63  ;;  %v2864_v44 = vadd.f32 %v2848_v52, %v2768_v10 }
 0x605   :  { %v2547_v55 = vmul.f32 %v2515_v11, %v2419_v23  ;;  %v3137_v43 = vmul.f32 %v3106_v37, %v9178_v21  ;;  %v2851_v36 = vmul.f32 %v2826_v0, %v9146_v12  ;;  %v2922_v62 = vrot.slane %v9511_v22, %v8324_v5 }
 0x606   :  { %v9586_v54 = vmul.f32 %v3202_v48, %v9196_v57  ;;  %v2674_v19 = vmul.f32 %v2646_v30, %v9190_v24  ;;  %v2754_v58 = vmul.f32 %v2726_v39, %v9193_v53  ;;  %v2516_v1 = vmin.f32 %v2484_v26, 6.0 }
 0x607   :  { %v9590_v25 = vadd.f32 %v3137_v43, %v3057_v42  ;;  %v9593_v23 = vmul.f32 %v3298_v18, %v9217_v41  ;;  %v2867_v52 = vadd.f32 %v2851_v36, %v2771_v17  ;;  %v9595_v10 = vmul.f32 0.16666667, %v2547_v55 }
 0x608   :  { %11257 = vst [vmem:[#allocation35_spill] sm:$0xff] %v9586_v54  ;;  %v2822_v37 = vrot.slane %v9549_v40, %v8321_v4  ;;  %v2918_v48 = vrot.slane %v9549_v40, %v8324_v5  ;;  %v2676_v0 = vmul.f32 %v2654_v46, %v9190_v24  ;;  %v2756_v30 = vmul.f32 %v2734_v27, %v9193_v53 }
 0x609   :  { %11258 = vst [vmem:[#allocation55_spill] sm:$0xff] %v9593_v23  ;;  %v2947_v39 = vmul.f32 %v2922_v62, %v9157_v50  ;;  %v3018_v11 = vrot.slane %v9511_v22, %v8327_v6  ;;  %v2658_v41 = vrot.slane %v9595_v10, %v8307_v61  ;;  %v2738_v55 = vrot.slane %v9595_v10, %v8311_v63 }
 0x60a   :  { %v2770_v26 = vadd.f32 %v2754_v58, %v2674_v19  ;;  %v3114_v42 = vrot.slane %v9511_v22, %v8330_v7  ;;  %v2830_v46 = vrot.slane %v9557_v45, %v8321_v4  ;;  %v2548_v18 = vmul.f32 %v2516_v1, %v2420_v33 }
 0x60b   :  { %v2963_v27 = vadd.f32 %v2947_v39, %v2867_v52  ;;  %v3210_v17 = vrot.slane %v9511_v22, %v8333_v8  ;;  %v2677_v43 = vmul.f32 %v2658_v41, %v9133_v34  ;;  %v2757_v36 = vmul.f32 %v2738_v55, %v9136_v35 }
 0x60c   :  { %v3014_v62 = vrot.slane %v9549_v40, %v8327_v6  ;;  %v3110_v19 = vrot.slane %v9549_v40, %v8330_v7  ;;  %v2834_v58 = vrot.slane %v9595_v10, %v8321_v4  ;;  %v2772_v23 = vadd.f32 %v2756_v30, %v2676_v0 }
 0x60d   :  { %v2850_v33 = vmul.f32 %v2822_v37, %v9220_v56  ;;  %v2946_v1 = vmul.f32 %v2918_v48, %v9233_v3  ;;  %v3043_v52 = vmul.f32 %v3018_v11, %v9168_v2  ;;  %v2926_v34 = vrot.slane %v9557_v45, %v8324_v5 }
 0x60e   :  { %v9630_v35 = vmul.f32 %v3114_v42, %v9178_v21  ;;  %v2852_v39 = vmul.f32 %v2830_v46, %v9220_v56  ;;  %v2773_v41 = vadd.f32 %v2757_v36, %v2677_v43  ;;  %v9633_v55 = vmul.f32 0.16666667, %v2548_v18 }
 0x60f   :  { %v9635_v54 = vadd.f32 %v3043_v52, %v2963_v27  ;;  %v9638_v0 = vmul.f32 %v3210_v17, %v9196_v57  ;;  %v2866_v48 = vadd.f32 %v2850_v33, %v2770_v26  ;;  %v3022_v30 = vrot.slane %v9557_v45, %v8327_v6 }
 0x610   :  { %v2853_v11 = vmul.f32 %v2834_v58, %v9146_v12  ;;  %v2930_v42 = vrot.slane %v9595_v10, %v8324_v5  ;;  %v2868_v46 = vadd.f32 %v2852_v39, %v2772_v23  ;;  %v3026_v18 = vrot.slane %v9595_v10, %v8327_v6 }
 0x611   :  { %v3122_v57 = vrot.slane %v9595_v10, %v8330_v7  ;;  %v2948_v27 = vmul.f32 %v2926_v34, %v9233_v3  ;;  %v2960_v17 = vadd.f32 %v9555_v15, %v2864_v44  ;;  %v2662_v43 = vrot.slane %v9633_v55, %v8307_v61 }
 0x612   :  { %v2869_v26 = vadd.f32 %v2853_v11, %v2773_v41  ;;  %v2742_v12 = vrot.slane %v9633_v55, %v8311_v63  ;;  %v2838_v23 = vrot.slane %v9633_v55, %v8321_v4  ;;  %v2934_v58 = vrot.slane %v9633_v55, %v8324_v5 }
 0x613   :  { %v2962_v33 = vadd.f32 %v2946_v1, %v2866_v48  ;;  %v3030_v15 = vrot.slane %v9633_v55, %v8327_v6  ;;  %v2949_v44 = vmul.f32 %v2930_v42, %v9157_v50  ;;  %v2678_v52 = vmul.f32 %v2662_v43, %v9190_v24 }
 0x614   :  { %v2758_v34 = vmul.f32 %v2742_v12, %v9193_v53  ;;  %v2964_v39 = vadd.f32 %v2948_v27, %v2868_v46  ;;  %v9669_v41 = vmul.f32 %v3026_v18, %v9168_v2  ;;  %v9672_v11 = vmul.f32 %v3122_v57, %v9178_v21 }
 0x615   :  { %v3314_v37 = vrot.slane %v9595_v10, %v8336_v9  ;;  %v3042_v1 = vmul.f32 %v3014_v62, %v9254_v49  ;;  %v2965_v48 = vadd.f32 %v2949_v44, %v2869_v26  ;;  %v2854_v50 = vmul.f32 %v2838_v23, %v9220_v56 }
 0x616   :  { %v2774_v36 = vadd.f32 %v2758_v34, %v2678_v52  ;;  %v3044_v24 = vmul.f32 %v3022_v30, %v9254_v49  ;;  %v2950_v53 = vmul.f32 %v2934_v58, %v9233_v3  ;;  %v3046_v42 = vmul.f32 %v3030_v15, %v9254_v49 }
 0x617   :  { %v3054_v2 = vadd.f32 %v9493_v60, %v9515_v28  ;;  %v3056_v21 = vadd.f32 %v9571_v13, %v2960_v17  ;;  %v3058_v18 = vadd.f32 %v3042_v1, %v2962_v33  ;;  %v3118_v62 = vrot.slane %v9557_v45, %v8330_v7 }
 0x618   :  { %v2870_v46 = vadd.f32 %v2854_v50, %v2774_v36  ;;  %v3060_v57 = vadd.f32 %v3044_v24, %v2964_v39  ;;  %v3126_v56 = vrot.slane %v9633_v55, %v8330_v7  ;;  %v11259_v3 = vrot.slane %v9486_v47, %v8330_v7  ;;  %v11262_v39 = vld [vmem:[#allocation45_spill] sm:$0xff]  ;;  %v11263_v50 = vld [vmem:[#allocation30_spill] sm:$0xff] }
 0x619   :  { %v3138_v49 = vmul.f32 %v3110_v19, %v9279_v32  ;;  %v3148_v60 = vadd.f32 %v9423_v31, %v9443_v51  ;;  %v3140_v13 = vmul.f32 %v3118_v62, %v9279_v32  ;;  %v3150_v27 = vadd.f32 %v9496_v20, %v3054_v2 }
 0x61a   :  { %v3136_v30 = vmul.f32 %v11259_v3, %v9279_v32  ;;  %v2966_v28 = vadd.f32 %v2950_v53, %v2870_v46  ;;  %v3206_v17 = vrot.slane %v9549_v40, %v8333_v8  ;;  %v3142_v26 = vmul.f32 %v3126_v56, %v9279_v32 }
 0x61b   :  { %v3154_v12 = vadd.f32 %v3138_v49, %v3058_v18  ;;  %v3214_v23 = vrot.slane %v9557_v45, %v8333_v8  ;;  %v3156_v19 = vadd.f32 %v3140_v13, %v3060_v57  ;;  %v3222_v31 = vrot.slane %v9633_v55, %v8333_v8 }
 0x61c   :  { %v3152_v43 = vadd.f32 %v3136_v30, %v3056_v21  ;;  %v3062_v36 = vadd.f32 %v3046_v42, %v2966_v28  ;;  %v11260_v51 = vrot.slane %v9413_v29, %v8333_v8  ;;  %v11261_v58 = vrot.slane %v9486_v47, %v8333_v8  ;;  %v11269_v28 = vld [vmem:[#allocation29_spill] sm:$0xff] }
 0x61d   :  { %v3234_v33 = vmul.f32 %v3206_v17, %v9284_v59  ;;  %v3236_v15 = vmul.f32 %v3214_v23, %v9284_v59  ;;  %v3240_v44 = vadd.f32 %v9304_v14, %v9326_v16  ;;  %v3238_v34 = vmul.f32 %v3222_v31, %v9284_v59  ;;  %v11264_v16 = vld [vmem:[#allocation52_spill] sm:$0xff] }
 0x61e   :  { %v3230_v20 = vmul.f32 %v11260_v51, %v9284_v59  ;;  %v3232_v32 = vmul.f32 %v11261_v58, %v9284_v59  ;;  %v3158_v52 = vadd.f32 %v3142_v26, %v3062_v36  ;;  %v3242_v1 = vadd.f32 %v11262_v39, %v9394_v38  ;;  %v11265_v38 = vld [vmem:[#allocation47_spill] sm:$0xff]  ;;  %v11270_v26 = vld [vmem:[#allocation54_spill] sm:$0xff] }
 0x61f   :  { %v3244_v24 = vadd.f32 %v11263_v50, %v3148_v60  ;;  %v3250_v2 = vadd.f32 %v3234_v33, %v3154_v12  ;;  %v3252_v21 = vadd.f32 %v3236_v15, %v3156_v19  ;;  %v3294_v18 = vrot.slane %v9486_v47, %v8336_v9  ;;  %v11268_v47 = vld [vmem:[#allocation46_spill] sm:$0xff] }
 0x620   :  { %v3246_v53 = vadd.f32 %v3230_v20, %v3150_v27  ;;  %v3248_v42 = vadd.f32 %v3232_v32, %v3152_v43  ;;  %v3254_v46 = vadd.f32 %v3238_v34, %v3158_v52  ;;  %v3302_v57 = vrot.slane %v9549_v40, %v8336_v9 }
 0x621   :  { %v3310_v14 = vrot.slane %v9557_v45, %v8336_v9  ;;  %v3318_v59 = vrot.slane %v9633_v55, %v8336_v9  ;;  %v11266_v62 = vrot.slane %v11265_v38, %v8336_v9  ;;  %v11267_v3 = vrot.slane %v9413_v29, %v8336_v9 }
 0x622   :  { %v3336_v49 = vadd.f32 %v11268_v47, %v3240_v44  ;;  %v3328_v40 = vmul.f32 %v3294_v18, %v11264_v16  ;;  %v3330_v60 = vmul.f32 %v3302_v57, %v11264_v16  ;;  %v3338_v55 = vadd.f32 %v11269_v28, %v3242_v1 }
 0x623   :  { %v3324_v56 = vmul.f32 %v11266_v62, %v11264_v16  ;;  %v3326_v30 = vmul.f32 %v11267_v3, %v11264_v16  ;;  %v3332_v45 = vmul.f32 %v3310_v14, %v11264_v16  ;;  %v3334_v13 = vmul.f32 %v3318_v59, %v11264_v16 }
 0x624   :  { %v3360_v43 = vrot.slane %v11270_v26, %v8311_v63  ;;  %v3344_v12 = vadd.f32 %v3328_v40, %v3248_v42  ;;  %v3346_v29 = vadd.f32 %v3330_v60, %v3250_v2  ;;  %v9745_v36 = vadd.f32 %v9669_v41, %v2965_v48 }
 0x625   :  { %v3340_v27 = vadd.f32 %v3324_v56, %v3244_v24  ;;  %v3342_v17 = vadd.f32 %v3326_v30, %v3246_v53  ;;  %v3348_v23 = vadd.f32 %v3332_v45, %v3252_v21  ;;  %v3350_v19 = vadd.f32 %v3334_v13, %v3254_v46 }
 0x626   :  { %v3364_v31 = vadd.f32 %v3360_v43, %v3336_v49  ;;  %v3366_v51 = vadd.f32 %v3360_v43, %v3338_v55  ;;  %v3372_v32 = vadd.f32 %v3360_v43, %v3344_v12  ;;  %v3374_v33 = vadd.f32 %v3360_v43, %v3346_v29 }
 0x627   :  { %v3368_v20 = vadd.f32 %v3360_v43, %v3340_v27  ;;  %v3370_v58 = vadd.f32 %v3360_v43, %v3342_v17  ;;  %v3376_v15 = vadd.f32 %v3360_v43, %v3348_v23  ;;  %v3378_v44 = vadd.f32 %v3360_v43, %v3350_v19 }
 0x628   :  { %v3380_v52 = vadd.f32 3.0, %v3364_v31  ;;  %v3382_v34 = vadd.f32 3.0, %v3366_v51  ;;  %v3388_v50 = vadd.f32 3.0, %v3372_v32  ;;  %v3390_v24 = vadd.f32 3.0, %v3374_v33 }
 0x629   :  { %v3384_v39 = vadd.f32 3.0, %v3368_v20  ;;  %v3386_v1 = vadd.f32 3.0, %v3370_v58  ;;  %v3392_v53 = vadd.f32 3.0, %v3376_v15  ;;  %v3394_v42 = vadd.f32 3.0, %v3378_v44 }
 0x62a   :  { %v3396_v2 = vmax.f32 %v3380_v52, 0.0  ;;  %v3398_v41 = vmax.f32 %v3382_v34, 0.0  ;;  %v3404_v46 = vmax.f32 %v3388_v50, 0.0  ;;  %v3406_v18 = vmax.f32 %v3390_v24, 0.0 }
 0x62b   :  { %v3400_v48 = vmax.f32 %v3384_v39, 0.0  ;;  %v3402_v21 = vmax.f32 %v3386_v1, 0.0  ;;  %v3408_v57 = vmax.f32 %v3392_v53, 0.0  ;;  %v3410_v14 = vmax.f32 %v3394_v42, 0.0 }
 0x62c   :  { %v3412_v59 = vmin.f32 %v3396_v2, 6.0  ;;  %v3414_v16 = vmin.f32 %v3398_v41, 6.0  ;;  %v3420_v56 = vmin.f32 %v3404_v46, 6.0  ;;  %v3422_v3 = vmin.f32 %v3406_v18, 6.0 }
 0x62d   :  { %v3416_v38 = vmin.f32 %v3400_v48, 6.0  ;;  %v3418_v62 = vmin.f32 %v3402_v21, 6.0  ;;  %v3424_v30 = vmin.f32 %v3408_v57, 6.0  ;;  %v3426_v47 = vmin.f32 %v3410_v14, 6.0 }
 0x62e   :  { %v3428_v49 = vmul.f32 %v3412_v59, %v3364_v31  ;;  %v3430_v40 = vmul.f32 %v3414_v16, %v3366_v51  ;;  %v3436_v28 = vmul.f32 %v3420_v56, %v3372_v32  ;;  %v3438_v55 = vmul.f32 %v3422_v3, %v3374_v33 }
 0x62f   :  { %v3432_v60 = vmul.f32 %v3416_v38, %v3368_v20  ;;  %v3434_v45 = vmul.f32 %v3418_v62, %v3370_v58  ;;  %v3440_v13 = vmul.f32 %v3424_v30, %v3376_v15  ;;  %v3442_v27 = vmul.f32 %v3426_v47, %v3378_v44 }
 0x630   :  { %v9747_v17 = vmul.f32 0.16666667, %v3428_v49  ;;  %v9749_v26 = vmul.f32 0.16666667, %v3430_v40  ;;  %v9755_v29 = vmul.f32 0.16666667, %v3436_v28  ;;  %v9761_v19 = vadd.f32 %v9630_v35, %v9635_v54 }
 0x631   :  { %v9751_v43 = vmul.f32 0.16666667, %v3432_v60  ;;  %v9753_v12 = vmul.f32 0.16666667, %v3434_v45  ;;  %v9757_v23 = vmul.f32 0.16666667, %v3438_v55 }
 0x632   :  { %11271 = vst [vmem:[#allocation45_spill] sm:$0xff] %v9747_v17  ;;  %11272 = vst [vmem:[#allocation30_spill] sm:$0xff] %v9749_v26  ;;  %v9763_v31 = vmul.f32 0.16666667, %v3440_v13  ;;  %v9765_v51 = vmul.f32 0.16666667, %v3442_v27 }
 0x633   :  { %11273 = vst [vmem:[#allocation52_spill] sm:$0xff] %v9751_v43  ;;  %11274 = vst [vmem:[#allocation47_spill] sm:$0xff] %v9753_v12  ;;  %v3465_v20 = vrot.slane %v9747_v17, 4  ;;  %v3477_v58 = vrot.slane %v9749_v26, 4  ;;  %v3489_v32 = vrot.slane %v9751_v43, 4  ;;  %v3501_v33 = vrot.slane %v9753_v12, 4 }
 0x634   :  { %11275 = vst [vmem:[#allocation46_spill] sm:$0xff] %v9755_v29  ;;  %11276 = vst [vmem:[#allocation29_spill] sm:$0xff] %v9757_v23  ;;  %v3513_v15 = vrot.slane %v9755_v29, 4  ;;  %v3525_v44 = vrot.slane %v9757_v23, 4  ;;  %v3537_v35 = vrot.slane %v9763_v31, 4  ;;  %v3549_v34 = vrot.slane %v9765_v51, 4 }
 0x635   :  { %11277 = vst [vmem:[#allocation54_spill] sm:$0xff] %v9763_v31  ;;  %11278 = vst [vmem:[#allocation56_spill] sm:$0xff] %v9765_v51  ;;  %v3466_v52 = vadd.f32 %v3465_v20, %v9747_v17  ;;  %v3478_v54 = vadd.f32 %v3477_v58, %v9749_v26  ;;  %v3490_v39 = vadd.f32 %v3489_v32, %v9751_v43 }
 0x636   :  { %v3502_v1 = vadd.f32 %v3501_v33, %v9753_v12  ;;  %v3514_v50 = vadd.f32 %v3513_v15, %v9755_v29  ;;  %v3526_v24 = vadd.f32 %v3525_v44, %v9757_v23  ;;  %v3538_v2 = vadd.f32 %v3537_v35, %v9763_v31  ;;  %v10012_v29 = vld [vmem:[%s11303_s3 + $0x38] sm:$0xff] }
 0x637   :  { %v3467_v53 = vrot.slane %v3466_v52, 2  ;;  %v3479_v42 = vrot.slane %v3478_v54, 2  ;;  %v3550_v41 = vadd.f32 %v3549_v34, %v9765_v51  ;;  %v3491_v48 = vrot.slane %v3490_v39, 2 }
 0x638   :  { %v3503_v21 = vrot.slane %v3502_v1, 2  ;;  %v3515_v46 = vrot.slane %v3514_v50, 2  ;;  %v3527_v18 = vrot.slane %v3526_v24, 2  ;;  %v3539_v59 = vrot.slane %v3538_v2, 2 }
 0x639   :  { %v3468_v57 = vadd.f32 %v3467_v53, %v3466_v52  ;;  %v3480_v14 = vadd.f32 %v3479_v42, %v3478_v54  ;;  %v3551_v16 = vrot.slane %v3550_v41, 2  ;;  %v3492_v38 = vadd.f32 %v3491_v48, %v3490_v39 }
 0x63a   :  { %v3504_v62 = vadd.f32 %v3503_v21, %v3502_v1  ;;  %v3516_v56 = vadd.f32 %v3515_v46, %v3514_v50  ;;  %v3528_v3 = vadd.f32 %v3527_v18, %v3526_v24  ;;  %v3540_v49 = vadd.f32 %v3539_v59, %v3538_v2 }
 0x63b   :  { %v3469_v30 = vrot.slane %v3468_v57, 1  ;;  %v3481_v47 = vrot.slane %v3480_v14, 1  ;;  %v3552_v40 = vadd.f32 %v3551_v16, %v3550_v41  ;;  %v3493_v60 = vrot.slane %v3492_v38, 1 }
 0x63c   :  { %v3505_v45 = vrot.slane %v3504_v62, 1  ;;  %v3517_v28 = vrot.slane %v3516_v56, 1  ;;  %v3529_v55 = vrot.slane %v3528_v3, 1  ;;  %v3541_v20 = vrot.slane %v3540_v49, 1 }
 0x63d   :  { %v3470_v13 = vadd.f32 %v3469_v30, %v3468_v57  ;;  %v3482_v27 = vadd.f32 %v3481_v47, %v3480_v14  ;;  %v3553_v58 = vrot.slane %v3552_v40, 1  ;;  %v3494_v32 = vadd.f32 %v3493_v60, %v3492_v38 }
 0x63e   :  { %v3506_v33 = vadd.f32 %v3505_v45, %v3504_v62  ;;  %v3518_v15 = vadd.f32 %v3517_v28, %v3516_v56  ;;  %v3530_v44 = vadd.f32 %v3529_v55, %v3528_v3  ;;  %v3542_v52 = vadd.f32 %v3541_v20, %v3540_v49  ;;  %v7948_v45 = vld [vmem:[%s11238_s9 + $0x60] sm:$0xff] }
 0x63f   :  { %v3554_v54 = vadd.f32 %v3553_v58, %v3552_v40  ;;  %v3556_v35 = vmul.f32 0.125, %v3470_v13  ;;  %v3558_v34 = vmul.f32 0.125, %v3482_v27  ;;  %v3560_v39 = vmul.f32 0.125, %v3494_v32  ;;  %v11280_v13 = vld [vmem:[#allocation35_spill] sm:$0xff]  ;;  %v7949_v32 = vld [vmem:[%s11238_s9 + $0x70] sm:$0xff] }
 0x640   :  { %v3562_v1 = vmul.f32 0.125, %v3506_v33  ;;  %v3564_v50 = vmul.f32 0.125, %v3518_v15  ;;  %v3566_v24 = vmul.f32 0.125, %v3530_v44  ;;  %v3568_v53 = vmul.f32 0.125, %v3542_v52  ;;  %v11282_v15 = vld [vmem:[#allocation34_spill] sm:$0xff]  ;;  %v11283_v44 = vld [vmem:[#allocation33_spill] sm:$0xff] }
 0x641   :  { %v3570_v42 = vmul.f32 0.125, %v3554_v54  ;;  %v3604_v2 = vpack.c.bf16 %v3556_v35, %v3556_v35  ;;  %v3606_v41 = vpack.c.bf16 %v3558_v34, %v3558_v34  ;;  %v3608_v48 = vpack.c.bf16 %v3560_v39, %v3560_v39  ;;  %v11284_v35 = vld [vmem:[#allocation55_spill] sm:$0xff] }
 0x642   :  { %v3610_v21 = vpack.c.bf16 %v3562_v1, %v3562_v1  ;;  %v3612_v46 = vpack.c.bf16 %v3564_v50, %v3564_v50  ;;  %v3614_v18 = vpack.c.bf16 %v3566_v24, %v3566_v24  ;;  %v3616_v57 = vpack.c.bf16 %v3568_v53, %v3568_v53 }
 0x643   :  { %v3618_v14 = vpack.c.bf16 %v3570_v42, %v3570_v42  ;;  %v3643_v59 = vunpack.c.l.b16 %v3604_v2  ;;  %v3645_v16 = vunpack.c.l.b16 %v3606_v41  ;;  %v3647_v38 = vunpack.c.l.b16 %v3608_v48 }
 0x644   :  { %v3649_v62 = vunpack.c.l.b16 %v3610_v21  ;;  %v3651_v56 = vunpack.c.l.b16 %v3612_v46  ;;  %v3653_v3 = vunpack.c.l.b16 %v3614_v18  ;;  %v3655_v30 = vunpack.c.l.b16 %v3616_v57 }
 0x645   :  { %v3657_v47 = vunpack.c.l.b16 %v3618_v14  ;;  %v3665_v49 = vsel %vm1475_vm2, %v3645_v16, %v3643_v59  ;;  %v3157_v40 = vadd.f32 %v9672_v11, %v9745_v36  ;;  %v11279_v28 = vrot.slane %v9595_v10, %v8333_v8  ;;  %v11288_v59 = vld [vmem:[#allocation38_spill] sm:$0xff] }
 0x646   :  { %v3666_v60 = vsel %vm1477_vm3, %v3647_v38, %v3665_v49  ;;  %v3249_v27 = vadd.f32 %v11280_v13, %v9590_v25  ;;  %v3251_v20 = vadd.f32 %v9638_v0, %v9761_v19  ;;  %v11281_v33 = vrot.slane %v9511_v22, %v8336_v9  ;;  %v11285_v0 = vld [vmem:[#allocation31_spill] sm:$0xff]  ;;  %v11286_v19 = vld [vmem:[#allocation50_spill] sm:$0xff]  ;;  %v11287_v22 = vld [vmem:[#allocation32_spill] sm:$0xff] }
 0x647   :  { %v3237_v55 = vmul.f32 %v7948_v45, %v11279_v28  ;;  %v3667_v58 = vsel %vm1479_vm4, %v3649_v62, %v3666_v60  ;;  %v3333_v36 = vmul.f32 %v7949_v32, %v3314_v37  ;;  %v3343_v52 = vadd.f32 %v11283_v44, %v11282_v15  ;;  %v11289_v62 = vld [vmem:[#allocation28_spill] sm:$0xff] }
 0x648   :  { %v3331_v11 = vmul.f32 %v7949_v32, %v11281_v33  ;;  %v3668_v54 = vsel %vm1481_vm5, %v3651_v56, %v3667_v58  ;;  %v3345_v34 = vadd.f32 %v11284_v35, %v3249_v27  ;;  %v3367_v39 = vadd.f32 %v11286_v19, %v11285_v0  ;;  %v11290_v32 = vld [vmem:[#allocation48_spill] sm:$0xff] }
 0x649   :  { %v3253_v25 = vadd.f32 %v3237_v55, %v3157_v40  ;;  %v3669_v1 = vsel %vm1483_vm6, %v3653_v3, %v3668_v54  ;;  %v3369_v24 = vadd.f32 %v11286_v19, %v11287_v22  ;;  %v3371_v10 = vadd.f32 %v11286_v19, %v3343_v52 }
 0x64a   :  { %v3347_v50 = vadd.f32 %v3331_v11, %v3251_v20  ;;  %v3670_v37 = vsel %vm1485_vm7, %v3655_v30, %v3669_v1  ;;  %v3373_v42 = vadd.f32 %v11286_v19, %v3345_v34  ;;  %v3383_v2 = vadd.f32 3.0, %v3367_v39 }
 0x64b   :  { %v3349_v53 = vadd.f32 %v3333_v36, %v3253_v25  ;;  %v3671_v41 = vsel %vm1487_vm8, %v3657_v47, %v3670_v37  ;;  %v3385_v21 = vadd.f32 3.0, %v3369_v24  ;;  %v3387_v46 = vadd.f32 3.0, %v3371_v10  ;;  %v11291_v36 = vld [vmem:[#allocation42_spill] sm:$0xff] }
 0x64c   :  { %v3375_v48 = vadd.f32 %v11286_v19, %v3347_v50  ;;  %v3673_v18 = vpack.c.b16 %v3671_v41, %v3671_v41  ;;  %v3389_v14 = vadd.f32 3.0, %v3373_v42  ;;  %v3395_v16 = vmax.f32 %v11288_v59, 0.0 }
 0x64d   :  { %v3377_v57 = vadd.f32 %v11286_v19, %v3349_v53  ;;  %v3397_v56 = vmax.f32 %v11289_v62, 0.0  ;;  %v3399_v3 = vmax.f32 %v3383_v2, 0.0  ;;  %v3401_v30 = vmax.f32 %v3385_v21, 0.0 }
 0x64e   :  { %v3391_v38 = vadd.f32 3.0, %v3375_v48  ;;  %3804 = vmatprep.mubr.bf16.mxu0 %v3673_v18  ;;  %v3403_v40 = vmax.f32 %v3387_v46, 0.0  ;;  %v3405_v60 = vmax.f32 %v3389_v14, 0.0  ;;  %v3411_v47 = vmin.f32 %v3395_v16, 6.0 }
 0x64f   :  { %v3393_v49 = vadd.f32 3.0, %v3377_v57  ;;  %v3413_v28 = vmin.f32 %v3397_v56, 6.0  ;;  %v3415_v55 = vmin.f32 %v3399_v3, 6.0  ;;  %v3417_v13 = vmin.f32 %v3401_v30, 6.0 }
 0x650   :  { %v3407_v45 = vmax.f32 %v3391_v38, 0.0  ;;  %v3419_v20 = vmin.f32 %v3403_v40, 6.0  ;;  %v3421_v58 = vmin.f32 %v3405_v60, 6.0  ;;  %v3427_v33 = vmul.f32 %v3411_v47, %v11290_v32 }
 0x651   :  { %v3409_v27 = vmax.f32 %v3393_v49, 0.0  ;;  %v3429_v15 = vmul.f32 %v3413_v28, %v11291_v36  ;;  %v3431_v44 = vmul.f32 %v3415_v55, %v3367_v39  ;;  %v3433_v52 = vmul.f32 %v3417_v13, %v3369_v24 }
 0x652   :  { %v3423_v11 = vmin.f32 %v3407_v45, 6.0  ;;  %v3435_v25 = vmul.f32 %v3419_v20, %v3371_v10  ;;  %v3437_v35 = vmul.f32 %v3421_v58, %v3373_v42  ;;  %v9822_v34 = vmul.f32 0.16666667, %v3427_v33 }
 0x653   :  { %v3425_v54 = vmin.f32 %v3409_v27, 6.0  ;;  %v9824_v19 = vmul.f32 0.16666667, %v3429_v15  ;;  %v9826_v1 = vmul.f32 0.16666667, %v3431_v44 }
 0x654   :  { %11292 = vst [vmem:[#allocation35_spill] sm:$0xff] %v9822_v34  ;;  %v3439_v0 = vmul.f32 %v3423_v11, %v3375_v48  ;;  %v9828_v50 = vmul.f32 0.16666667, %v3433_v52  ;;  %v9830_v37 = vmul.f32 0.16666667, %v3435_v25  ;;  %v3459_v39 = vrot.slane %v9822_v34, 4 }
 0x655   :  { %11293 = vst [vmem:[#allocation34_spill] sm:$0xff] %v9824_v19  ;;  %11294 = vst [vmem:[#allocation33_spill] sm:$0xff] %v9826_v1  ;;  %v3441_v22 = vmul.f32 %v3425_v54, %v3377_v57  ;;  %v9832_v53 = vmul.f32 0.16666667, %v3437_v35  ;;  %v3471_v10 = vrot.slane %v9824_v19, 4  ;;  %v3483_v42 = vrot.slane %v9826_v1, 4 }
 0x656   :  { %11295 = vst [vmem:[#allocation55_spill] sm:$0xff] %v9828_v50  ;;  %11296 = vst [vmem:[#allocation31_spill] sm:$0xff] %v9830_v37  ;;  %v9835_v24 = vmul.f32 0.16666667, %v3439_v0  ;;  %v3495_v2 = vrot.slane %v9828_v50, 4  ;;  %v3460_v48 = vadd.f32 %v3459_v39, %v9822_v34  ;;  %v3507_v21 = vrot.slane %v9830_v37, 4 }
 0x657   :  { %11297 = vst [vmem:[#allocation50_spill] sm:$0xff] %v9832_v53  ;;  %v9840_v41 = vmul.f32 0.16666667, %v3441_v22  ;;  %v3519_v46 = vrot.slane %v9832_v53, 4  ;;  %v3472_v18 = vadd.f32 %v3471_v10, %v9824_v19  ;;  %v3484_v57 = vadd.f32 %v3483_v42, %v9826_v1  ;;  %v10024_v1 = vld [vmem:[%s11303_s3 + $0x48] sm:$0xff]  ;;  %v10031_v19 = vld [vmem:[%s11303_s3 + $0x58] sm:$0xff] }
 0x658   :  { %11298 = vst [vmem:[#allocation32_spill] sm:$0xff] %v9835_v24  ;;  %v3496_v14 = vadd.f32 %v3495_v2, %v9828_v50  ;;  %v3531_v59 = vrot.slane %v9835_v24, 4  ;;  %v3461_v16 = vrot.slane %v3460_v48, 2  ;;  %v3508_v38 = vadd.f32 %v3507_v21, %v9830_v37 }
 0x659   :  { %11299 = vst [vmem:[#allocation38_spill] sm:$0xff] %v9840_v41  ;;  %v3520_v62 = vadd.f32 %v3519_v46, %v9832_v53  ;;  %v3543_v56 = vrot.slane %v9840_v41, 4  ;;  %v3473_v3 = vrot.slane %v3472_v18, 2  ;;  %v3485_v30 = vrot.slane %v3484_v57, 2 }
 0x65a   :  { %v3497_v49 = vrot.slane %v3496_v14, 2  ;;  %v3532_v40 = vadd.f32 %v3531_v59, %v9835_v24  ;;  %v3462_v60 = vadd.f32 %v3461_v16, %v3460_v48  ;;  %v3509_v47 = vrot.slane %v3508_v38, 2 }
 0x65b   :  { %v3521_v45 = vrot.slane %v3520_v62, 2  ;;  %v3544_v28 = vadd.f32 %v3543_v56, %v9840_v41  ;;  %v3474_v55 = vadd.f32 %v3473_v3, %v3472_v18  ;;  %v3486_v13 = vadd.f32 %v3485_v30, %v3484_v57 }
 0x65c   :  { %v3498_v27 = vadd.f32 %v3497_v49, %v3496_v14  ;;  %v3533_v20 = vrot.slane %v3532_v40, 2  ;;  %v3463_v58 = vrot.slane %v3462_v60, 1  ;;  %v3510_v32 = vadd.f32 %v3509_v47, %v3508_v38 }
 0x65d   :  { %v3522_v33 = vadd.f32 %v3521_v45, %v3520_v62  ;;  %v3545_v11 = vrot.slane %v3544_v28, 2  ;;  %v3475_v36 = vrot.slane %v3474_v55, 1  ;;  %v3487_v15 = vrot.slane %v3486_v13, 1 }
 0x65e   :  { %v3499_v44 = vrot.slane %v3498_v27, 1  ;;  %v3534_v52 = vadd.f32 %v3533_v20, %v3532_v40  ;;  %v3464_v54 = vadd.f32 %v3463_v58, %v3462_v60  ;;  %v3511_v25 = vrot.slane %v3510_v32, 1 }
 0x65f   :  { %v3523_v35 = vrot.slane %v3522_v33, 1  ;;  %v3546_v0 = vadd.f32 %v3545_v11, %v3544_v28  ;;  %v3476_v22 = vadd.f32 %v3475_v36, %v3474_v55  ;;  %v3488_v39 = vadd.f32 %v3487_v15, %v3486_v13 }
 0x660   :  { %v3500_v10 = vadd.f32 %v3499_v44, %v3498_v27  ;;  %v3535_v42 = vrot.slane %v3534_v52, 1  ;;  %v3512_v2 = vadd.f32 %v3511_v25, %v3510_v32  ;;  %v3555_v46 = vmul.f32 0.125, %v3464_v54 }
 0x661   :  { %v3524_v48 = vadd.f32 %v3523_v35, %v3522_v33  ;;  %v3547_v21 = vrot.slane %v3546_v0, 1  ;;  %v3557_v57 = vmul.f32 0.125, %v3476_v22  ;;  %v3559_v14 = vmul.f32 0.125, %v3488_v39  ;;  %v7812_v22 = vld [vmem:[%s11253_s17 + $0x20] ss:$8 sps:$4 sm:$0xff]  }
 0x662   :  { %v3536_v18 = vadd.f32 %v3535_v42, %v3534_v52  ;;  %v3561_v59 = vmul.f32 0.125, %v3500_v10  ;;  %v3563_v38 = vmul.f32 0.125, %v3512_v2  ;;  %v3603_v56 = vpack.c.bf16 %v3555_v46, %v3555_v46  ;;  %v7815_v42 = vld [vmem:[%s11253_s17 + $0x10] ss:$8 sps:$4 sm:$0xff]   ;;  %v7817_v2 = vld [vmem:[%s11253_s17 + $0x14] ss:$8 sps:$4 sm:$0xff]  }
 0x663   :  { %v3548_v16 = vadd.f32 %v3547_v21, %v3546_v0  ;;  %v3565_v62 = vmul.f32 0.125, %v3524_v48  ;;  %v3605_v30 = vpack.c.bf16 %v3557_v57, %v3557_v57  ;;  %v3607_v49 = vpack.c.bf16 %v3559_v14, %v3559_v14  ;;  %v7820_v48 = vld [vmem:[%s11253_s17 + $0x4] ss:$8 sps:$4 sm:$0xff]   ;;  %v7821_v21 = vld [vmem:[%s11300_s21 + $0x78] sm:$0xff]   ;;  %v7818_v57 = vld [vmem:[%s11253_s17] ss:$8 sps:$4 sm:$0xff]  }
 0x664   :  { %v3567_v3 = vmul.f32 0.125, %v3536_v18  ;;  %v3609_v40 = vpack.c.bf16 %v3561_v59, %v3561_v59  ;;  %v3611_v47 = vpack.c.bf16 %v3563_v38, %v3563_v38  ;;  %v3642_v28 = vunpack.c.l.b16 %v3603_v56  ;;  %v7822_v46 = vld [vmem:[%s11300_s21 + $0x38] sm:$0xff]   ;;  %v7823_v18 = vld [vmem:[%s11300_s21 + $0x70] sm:$0xff]   ;;  %7449 = vmatprep.subr.bf16.mxu1 %v7821_v21  ;;  %v7201_v59 = vld [vmem:[%s11302_s29] ss:$0 sm:$0xff] }
 0x665   :  { %v3569_v60 = vmul.f32 0.125, %v3548_v16  ;;  %v3613_v45 = vpack.c.bf16 %v3565_v62, %v3565_v62  ;;  %v3644_v13 = vunpack.c.l.b16 %v3605_v30  ;;  %v3646_v27 = vunpack.c.l.b16 %v3607_v49  ;;  %7450 = vmatpush3.bf16.msra.mxu1 %v7822_v46 }
 0x666   :  { %v3615_v55 = vpack.c.bf16 %v3567_v3, %v3567_v3  ;;  %v3648_v20 = vunpack.c.l.b16 %v3609_v40  ;;  %v3650_v32 = vunpack.c.l.b16 %v3611_v47  ;;  %v11301_v10 = vmov 0   ;;  %7451 = vmatprep.subr.bf16.mxu1 %v7823_v18  ;;  %v2330_v40 = vpop.f32.mrf.mxu1 }
 0x667   :  { %v3617_v58 = vpack.c.bf16 %v3569_v60, %v3569_v60  ;;  %v3652_v33 = vunpack.c.l.b16 %v3613_v45  ;;  %v3658_v11 = vsel %vm1475_vm2, %v3644_v13, %v3642_v28  ;;  %v7950_v60 = vld [vmem:[%s11232_s0] sm:$0xf] }
 0x668   :  { %v3654_v36 = vunpack.c.l.b16 %v3615_v55  ;;  %v3659_v15 = vsel %vm1477_vm3, %v3646_v27, %v3658_v11  ;;  %v9875_v47 = vrot.slane %v7950_v60, %v8321_v4  ;;  %v2332_v28 = vpop.f32.mrf.mxu1 }
 0x669   :  { %v3656_v44 = vunpack.c.l.b16 %v3617_v58  ;;  %v3660_v52 = vsel %vm1479_vm4, %v3648_v20, %v3659_v15 }
 0x66a   :  { %v3661_v54 = vsel %vm1481_vm5, %v3650_v32, %v3660_v52  ;;  %v2393_v45 = vadd.f32 %v9875_v47, %v2330_v40  ;;  %v2334_v13 = vpop.f32.mrf.mxu1 }
 0x66b   :  { %v3662_v25 = vsel %vm1483_vm6, %v3652_v33, %v3661_v54  ;;  %v2397_v27 = vadd.f32 %v9875_v47, %v2334_v13  ;;  %v9880_v33 = vrot.slane %v7950_v60, %v8324_v5 }
 0x66c   :  { %v3663_v35 = vsel %vm1485_vm7, %v3654_v36, %v3662_v25  ;;  %v2425_v55 = vadd.f32 3.0, %v2393_v45  ;;  %v2336_v52 = vpop.f32.mrf.mxu1 }
 0x66d   :  { %v3664_v0 = vsel %vm1487_vm8, %v3656_v44, %v3663_v35  ;;  %v2429_v58 = vadd.f32 3.0, %v2397_v27  ;;  %v2394_v15 = vadd.f32 %v9880_v33, %v2332_v28  ;;  %v2398_v18 = vadd.f32 %v9880_v33, %v2336_v52 }
 0x66e   :  { %v3672_v39 = vpack.c.b16 %v3664_v0, %v3664_v0  ;;  %v2457_v20 = vmax.f32 %v2425_v55, 0.0  ;;  %v2340_v0 = vpop.f32.mrf.mxu1  ;;  %v9914_v55 = vld [vmem:[%s11303_s3 + $0x30] sm:$0xff] }
 0x66f   :  { %v2461_v11 = vmax.f32 %v2429_v58, 0.0  ;;  %v2426_v25 = vadd.f32 3.0, %v2394_v15 }
 0x670   :  { %3805 = vmatmul.mubr.bf16.vlgmr.msra.gmra.mxu0 %v3672_v39  ;;  %v2489_v32 = vmin.f32 %v2457_v20, 6.0 }
 0x671   :  { %3876 = vmatpush1.bf16.msra.mxu0 %v7812_v22  ;;  %3897 = vmatprep.mubr.bf16.mxu0 %v11301_v10  ;;  %v2493_v44 = vmin.f32 %v2461_v11, 6.0  ;;  %v2458_v21 = vmax.f32 %v2426_v25, 0.0 }
 0x672   :  { %3877 = vmatprep.subr.bf16.mxu0 %v7817_v2  ;;  %v2521_v36 = vmul.f32 %v2489_v32, %v2393_v45  ;;  %v9893_v2 = vld [vmem:[%s11303_s3 + $0x10] sm:$0xff] }
 0x673   :  { %v2525_v35 = vmul.f32 %v2493_v44, %v2397_v27 }
 0x674   :  { %v9883_v54 = vmul.f32 0.16666667, %v2521_v36 }
 0x675   :  { %3878 = vmatpush1.bf16.msra.mxu0 %v7815_v42  ;;  %v9890_v42 = vld [vmem:[%s11303_s3] sm:$0xff]  ;;  %v9896_v46 = vmul.f32 0.16666667, %v2525_v35 }
 0x676   :  { %3879 = vmatprep.subr.bf16.mxu0 %v7820_v48  ;;  %v4305_v22 = vrot.slane %v9883_v54, %v8307_v61  ;;  %v4385_v39 = vrot.slane %v9883_v54, %v8311_v63  ;;  %v2401_v48 = vadd.f32 %v9875_v47, %v2340_v0  ;;  %v4577_v45 = vrot.slane %v9883_v54, %v8324_v5  ;;  %v9924_v35 = vld [vmem:[%s11303_s3 + $0x40] sm:$0xff] }
 0x677   :  { %v4489_v36 = vrot.slane %v9896_v46, %v8321_v4  ;;  %v4673_v52 = vrot.slane %v9883_v54, %v8327_v6 }
 0x678   :  { %v4638_v44 = vmul.f32 %v4577_v45, %v9914_v55 }
 0x679   :  { %3880 = vmatpush1.bf16.msra.mxu0 %v7818_v57  ;;  %v4366_v57 = vmul.f32 %v4305_v22, %v9890_v42 }
 0x730   :  { %v7443_v14 = vpop.f32.mrf.mxu0 }
 0x732   :  { %v7444_v16 = vpop.f32.mrf.mxu0 }
 0x733   :  { %v7445_v38 = vadd.f32 %v7444_v16, %v7443_v14  ;;  %v4446_v14 = vmul.f32 %v4385_v39, %v9893_v2  ;;  %v2433_v16 = vadd.f32 3.0, %v2401_v48 }
 0x734   :  { %v7446_v62 = vpop.f32.mrf.mxu0 }
 0x735   :  { %v3807_v56 = vadd.f32 %v7445_v38, %v7201_v59  ;;  %v4481_v59 = vrot.slane %v9883_v54, %v8321_v4  ;;  %v9904_v38 = vld [vmem:[%s11303_s3 + $0x20] sm:$0xff]  ;;  %v2490_v62 = vmin.f32 %v2458_v21, 6.0  ;;  %v4462_v40 = vadd.f32 %v4446_v14, %v4366_v57 }
 0x736   :  { %v7447_v3 = vpop.f32.mrf.mxu0  ;;  %v2465_v28 = vmax.f32 %v2433_v16, 0.0  ;;  %v4544_v57 = vmul.f32 %v4489_v36, %v9904_v38  ;;  %v4585_v14 = vrot.slane %v9896_v46, %v8324_v5  ;;  %v4734_v16 = vmul.f32 %v4673_v52, %v9924_v35  ;;  %v9962_v36 = vld [vmem:[%s8221_s19] sm:$0x3]  ;;  %s11371_s19 = sld [smem:[#allocation24_spill]] }
 0x737   :  { %v3812_v30 = vmax.f32 %v3807_v56, 0.0  ;;  %v4313_v56 = vrot.slane %v9896_v46, %v8307_v61  ;;  %v4393_v3 = vrot.slane %v9896_v46, %v8311_v63  ;;  %v4542_v60 = vmul.f32 %v4481_v59, %v9904_v38  ;;  %11305 = vst [vmem:[#allocation48_spill] sm:$0xff] %v9962_v36 }
 0x738   :  { %v2522_v13 = vmul.f32 %v2490_v62, %v2394_v15  ;;  %v2497_v25 = vmin.f32 %v2465_v28, 6.0  ;;  %v4769_v62 = vrot.slane %v9883_v54, %v8330_v7 }
 0x739   :  { %v3819_v49 = vpack.c.bf16 %v3812_v30, %v3812_v30  ;;  %v2430_v30 = vadd.f32 3.0, %v2398_v18  ;;  %v4368_v27 = vmul.f32 %v4313_v56, %v9890_v42  ;;  %v4448_v20 = vmul.f32 %v4393_v3, %v9893_v2  ;;  %v9940_v3 = vld [vmem:[%s11303_s3 + $0x50] sm:$0xff] }
 0x73a   :  { %v4558_v11 = vadd.f32 %v4542_v60, %v4462_v40  ;;  %v9926_v15 = vmul.f32 0.16666667, %v2522_v13  ;;  %v2529_v56 = vmul.f32 %v2497_v25, %v2401_v48  ;;  %11304 = vst [vmem:[#allocation28_spill] sm:$0xff] %v9940_v3  ;;  %v4640_v48 = vmul.f32 %v4585_v14, %v9914_v55  ;;  %v9970_v25 = vld [vmem:[%s11303_s3 + $0x60] sm:$0xff] }
 0x73b   :  { %7224 = vmatmul.mubr.msk.bf16.vlgmr.msra.gmra.mxu0 %vm1686_vm9, %v3819_v49  ;;  %v2342_v49 = vpop.f32.mrf.mxu1  ;;  %v2462_v58 = vmax.f32 %v2430_v30, 0.0  ;;  %v4464_v0 = vadd.f32 %v4448_v20, %v4368_v27  ;;  %v9949_v27 = vld [vmem:[%s11303_s3 + $0x8] sm:$0xff]  ;;  %v9952_v20 = vld [vmem:[%s11303_s3 + $0x18] sm:$0xff] }
 0x73c   :  { %5600 = vmatprep.mubr.bf16.mxu0 %v11301_v10  ;;  %v4654_v21 = vadd.f32 %v4638_v44, %v4558_v11  ;;  %v4309_v30 = vrot.slane %v9926_v15, %v8307_v61  ;;  %v4389_v40 = vrot.slane %v9926_v15, %v8311_v63  ;;  %v4830_v11 = vmul.f32 %v4769_v62, %v9940_v3 }
 0x73d   :  { %v2344_v32 = vpop.f32.mrf.mxu1  ;;  %v2494_v22 = vmin.f32 %v2462_v58, 6.0  ;;  %v4560_v60 = vadd.f32 %v4544_v57, %v4464_v0  ;;  %v4681_v58 = vrot.slane %v9896_v46, %v8327_v6  ;;  %v9964_v44 = vmul.f32 0.16666667, %v2529_v56 }
 0x73e   :  { %v9934_v59 = vadd.f32 %v9875_v47, %v2344_v32  ;;  %v4750_v13 = vadd.f32 %v4734_v16, %v4654_v21  ;;  %v9967_v52 = vadd.f32 %v9880_v33, %v2342_v49  ;;  %v4367_v0 = vmul.f32 %v4309_v30, %v9949_v27  ;;  %v9983_v49 = vld [vmem:[%s11303_s3 + $0x70] sm:$0xff]  ;;  %v9990_v30 = vld [vmem:[%s11303_s3 + $0x28] sm:$0xff] }
 0x73f   :  { %v9928_v39 = vpop.f32.mrf.mxu1  ;;  %v2526_v45 = vmul.f32 %v2494_v22, %v2398_v18  ;;  %v4865_v18 = vrot.slane %v9883_v54, %v8333_v8  ;;  %v4447_v22 = vmul.f32 %v4389_v40, %v9952_v20  ;;  %v4656_v21 = vadd.f32 %v4640_v48, %v4560_v60  ;;  %11306 = vst [vmem:[#allocation42_spill] sm:$0xff] %v9983_v49 }
 0x740   :  { %v2437_v32 = vadd.f32 3.0, %v9934_v59  ;;  %v4846_v16 = vadd.f32 %v4830_v11, %v4750_v13  ;;  %v4961_v62 = vrot.slane %v9883_v54, %v8336_v9  ;;  %v4485_v56 = vrot.slane %v9926_v15, %v8321_v4 }
 0x741   :  { %v9946_v28 = vpop.f32.mrf.mxu1  ;;  %v9974_v57 = vmul.f32 0.16666667, %v2526_v45  ;;  %v9987_v10 = vrot.slane %v9962_v36, %v8307_v61  ;;  %v4736_v40 = vmul.f32 %v4681_v58, %v9924_v35  ;;  %v4777_v60 = vrot.slane %v9896_v46, %v8330_v7 }
 0x742   :  { %v2469_v45 = vmax.f32 %v2437_v32, 0.0  ;;  %v4926_v54 = vmul.f32 %v4865_v18, %v9970_v25  ;;  %v4321_v13 = vrot.slane %v9964_v44, %v8307_v61  ;;  %v4401_v48 = vrot.slane %v9964_v44, %v8311_v63 }
 0x743   :  { %v9976_v14 = vpop.f32.mrf.mxu1  ;;  %11307 = vst [vmem:[#allocation57_spill] sm:$0xff] %v9987_v10  ;;  %v2434_v11 = vadd.f32 3.0, %v9967_v52  ;;  %v4463_v24 = vadd.f32 %v4447_v22, %v4367_v0  ;;  %v4752_v41 = vadd.f32 %v4736_v40, %v4656_v21  ;;  %v4317_v58 = vrot.slane %v9974_v57, %v8307_v61 }
 0x744   :  { %v4397_v31 = vrot.slane %v9974_v57, %v8311_v63  ;;  %v4942_v18 = vadd.f32 %v4926_v54, %v4846_v16  ;;  %v5022_v37 = vmul.f32 %v4961_v62, %v9983_v49  ;;  %v4543_v51 = vmul.f32 %v4485_v56, %v9990_v30 }
 0x745   :  { %v10005_v32 = vpop.f32.mrf.mxu1  ;;  %v4581_v53 = vrot.slane %v9926_v15, %v8324_v5  ;;  %v4677_v0 = vrot.slane %v9926_v15, %v8327_v6  ;;  %v4832_v22 = vmul.f32 %v4777_v60, %v9940_v3  ;;  %v4873_v21 = vrot.slane %v9896_v46, %v8333_v8 }
 0x746   :  { %v2501_v40 = vmin.f32 %v2469_v45, 6.0  ;;  %v4773_v16 = vrot.slane %v9926_v15, %v8330_v7  ;;  %v4370_v62 = vmul.f32 %v4321_v13, %v9890_v42  ;;  %v4450_v56 = vmul.f32 %v4401_v48, %v9893_v2 }
 0x747   :  { %v2466_v54 = vmax.f32 %v2434_v11, 0.0  ;;  %v4559_v23 = vadd.f32 %v4543_v51, %v4463_v24  ;;  %v4848_v50 = vadd.f32 %v4832_v22, %v4752_v41  ;;  %v4369_v12 = vmul.f32 %v4317_v58, %v9949_v27  ;;  %v10028_v43 = vpop.f32.mrf.mxu1  ;;  %v7824_v22 = vld [vmem:[%s11300_s21 + $0x30] sm:$0xff]  }
 0x748   :  { %v4449_v60 = vmul.f32 %v4397_v31, %v9952_v20  ;;  %v5038_v45 = vadd.f32 %v5022_v37, %v4942_v18  ;;  %v4639_v13 = vmul.f32 %v4581_v53, %v10012_v29  ;;  %v4497_v48 = vrot.slane %v9964_v44, %v8321_v4  ;;  %7452 = vmatpush3.bf16.msra.mxu1 %v7824_v22 }
 0x749   :  { %v10038_v51 = vadd.f32 %v9880_v33, %v9928_v39  ;;  %v4928_v24 = vmul.f32 %v4873_v21, %v9970_v25  ;;  %v4969_v31 = vrot.slane %v9896_v46, %v8336_v9  ;;  %v4493_v41 = vrot.slane %v9974_v57, %v8321_v4  ;;  %v10051_v39 = vld [vmem:[%s11303_s3 + $0x68] sm:$0xff]  ;;  %v10054_v17 = vpop.f32.mrf.mxu1 }
 0x74a   :  { %v2533_v37 = vmul.f32 %v2501_v40, %v9934_v59  ;;  %v4735_v11 = vmul.f32 %v4677_v0, %v10024_v1  ;;  %v4869_v53 = vrot.slane %v9926_v15, %v8333_v8  ;;  %v4466_v58 = vadd.f32 %v4450_v56, %v4370_v62 }
 0x74b   :  { %v2498_v18 = vmin.f32 %v2466_v54, 6.0  ;;  %v4655_v34 = vadd.f32 %v4639_v13, %v4559_v23  ;;  %v4831_v21 = vmul.f32 %v4773_v16, %v10031_v19  ;;  %v4944_v26 = vadd.f32 %v4928_v24, %v4848_v50  ;;  %v10076_v13 = vld [vmem:[%s11303_s3 + $0x78] sm:$0xff]  ;;  %v2362_v22 = vpop.f32.mrf.mxu1 }
 0x74c   :  { %v4465_v46 = vadd.f32 %v4449_v60, %v4369_v12  ;;  %v10057_v59 = vadd.f32 %v9987_v10, %v5038_v45  ;;  %v4546_v0 = vmul.f32 %v4497_v48, %v9904_v38  ;;  %v4593_v40 = vrot.slane %v9964_v44, %v8324_v5  ;;  %11310 = vst [vmem:[#allocation60_spill] sm:$0xff] %v10076_v13 }
 0x74d   :  { %v2438_v62 = vadd.f32 3.0, %v10038_v51  ;;  %v5024_v23 = vmul.f32 %v4969_v31, %v9983_v49  ;;  %v4545_v16 = vmul.f32 %v4493_v41, %v9990_v30  ;;  %v4589_v12 = vrot.slane %v9974_v57, %v8324_v5 }
 0x74e   :  { %11308 = vst [vmem:[#allocation58_spill] sm:$0xff] %v10057_v59  ;;  %v10067_v50 = vmul.f32 0.16666667, %v2533_v37  ;;  %v10070_v56 = vmul.f32 %v4869_v53, %v10051_v39  ;;  %v4965_v54 = vrot.slane %v9926_v15, %v8336_v9  ;;  %v4562_v60 = vadd.f32 %v4546_v0, %v4466_v58 }
 0x74f   :  { %v2530_v45 = vmul.f32 %v2498_v18, %v9967_v52  ;;  %v4751_v48 = vadd.f32 %v4735_v11, %v4655_v34  ;;  %v5040_v24 = vadd.f32 %v5024_v23, %v4944_v26  ;;  %v4561_v31 = vadd.f32 %v4545_v16, %v4465_v46  ;;  %v10107_v16 = vpop.f32.mrf.mxu1 }
 0x750   :  { %11309 = vst [vmem:[#allocation59_spill] sm:$0xff] %v10070_v56  ;;  %v4685_v41 = vrot.slane %v9974_v57, %v8327_v6  ;;  %v4642_v37 = vmul.f32 %v4593_v40, %v9914_v55  ;;  %v4689_v53 = vrot.slane %v9964_v44, %v8327_v6  ;;  %v2470_v59 = vmax.f32 %v2438_v62, 0.0  ;;  %11313 = vst [vmem:[#allocation63_spill] sm:$0xff] %v10107_v16  ;;  %v7833_v16 = vld [vmem:[%s11300_s21 + $0x48] sm:$0xff]  }
 0x751   :  { %v10085_v15 = vadd.f32 %v9875_v47, %v9946_v28  ;;  %v4641_v52 = vmul.f32 %v4589_v12, %v10012_v29  ;;  %v4781_v26 = vrot.slane %v9974_v57, %v8330_v7  ;;  %v4329_v34 = vrot.slane %v10067_v50, %v8307_v61 }
 0x752   :  { %v4409_v11 = vrot.slane %v10067_v50, %v8311_v63  ;;  %v10095_v58 = vmul.f32 %v4965_v54, %v10076_v13  ;;  %v4877_v18 = vrot.slane %v9974_v57, %v8333_v8  ;;  %v4658_v46 = vadd.f32 %v4642_v37, %v4562_v60 }
 0x753   :  { %v10099_v28 = vmul.f32 0.16666667, %v2530_v45  ;;  %v10101_v0 = vadd.f32 %v4831_v21, %v4751_v48  ;;  %v4657_v40 = vadd.f32 %v4641_v52, %v4561_v31  ;;  %v4973_v62 = vrot.slane %v9974_v57, %v8336_v9 }
 0x754   :  { %11311 = vst [vmem:[#allocation61_spill] sm:$0xff] %v10095_v58  ;;  %v4785_v23 = vrot.slane %v9964_v44, %v8330_v7  ;;  %v10110_v12 = vadd.f32 %v9987_v10, %v5040_v24  ;;  %v4738_v54 = vmul.f32 %v4689_v53, %v9924_v35  ;;  %v2502_v60 = vmin.f32 %v2470_v59, 6.0  ;;  %v7825_v53 = vld [vmem:[%s11300_s21 + $0x68] sm:$0xff]   ;;  %v7827_v10 = vld [vmem:[%s11300_s21 + $0x60] sm:$0xff]  }
 0x755   :  { %11312 = vst [vmem:[#allocation62_spill] sm:$0xff] %v10101_v0  ;;  %v2441_v21 = vadd.f32 3.0, %v10085_v15  ;;  %v4737_v45 = vmul.f32 %v4685_v41, %v10024_v1  ;;  %v4833_v48 = vmul.f32 %v4781_v26, %v10031_v19  ;;  %v4372_v57 = vmul.f32 %v4329_v34, %v9890_v42  ;;  %7453 = vmatprep.subr.bf16.mxu1 %v7825_v53 }
 0x756   :  { %11314 = vst [vmem:[#allocation64_spill] sm:$0xff] %v10110_v12  ;;  %v4452_v31 = vmul.f32 %v4409_v11, %v9893_v2  ;;  %v10119_v37 = vmul.f32 %v4877_v18, %v10051_v39  ;;  %v4754_v52 = vadd.f32 %v4738_v54, %v4658_v46  ;;  %v4325_v24 = vrot.slane %v10099_v28, %v8307_v61  ;;  %v7826_v12 = vld [vmem:[%s11300_s21 + $0x28] sm:$0xff]   ;;  %v2366_v18 = vpop.f32.mrf.mxu1 }
 0x757   :  { %v4405_v59 = vrot.slane %v10099_v28, %v8311_v63  ;;  %v4753_v41 = vadd.f32 %v4737_v45, %v4657_v40  ;;  %v10129_v26 = vmul.f32 %v4973_v62, %v10076_v13  ;;  %v4834_v34 = vmul.f32 %v4785_v23, %v9940_v3  ;;  %7454 = vmatpush3.bf16.msra.mxu1 %v7826_v12 }
 0x758   :  { %11315 = vst [vmem:[#allocation65_spill] sm:$0xff] %v10119_v37  ;;  %v4505_v11 = vrot.slane %v10067_v50, %v8321_v4  ;;  %v4881_v46 = vrot.slane %v9964_v44, %v8333_v8  ;;  %v2534_v54 = vmul.f32 %v2502_v60, %v10038_v51  ;;  %v2473_v36 = vmax.f32 %v2441_v21, 0.0  ;;  %7455 = vmatprep.subr.bf16.mxu1 %v7827_v10 }
 0x759   :  { %11316 = vst [vmem:[#allocation66_spill] sm:$0xff] %v10129_v26  ;;  %v10139_v58 = vadd.f32 %v9880_v33, %v9976_v14  ;;  %v4977_v40 = vrot.slane %v9964_v44, %v8336_v9  ;;  %v4468_v62 = vadd.f32 %v4452_v31, %v4372_v57  ;;  %v10145_v23 = vadd.f32 %v9880_v33, %v10028_v43  ;;  %v7828_v26 = vld [vmem:[%s11300_s21 + $0x20] sm:$0xff]   ;;  %v7829_v44 = vld [vmem:[%s11300_s21 + $0x58] sm:$0xff]  }
 0x75a   :  { %v10148_v45 = vadd.f32 %v9880_v33, %v2362_v22  ;;  %v4850_v51 = vadd.f32 %v4834_v34, %v4754_v52  ;;  %v4371_v60 = vmul.f32 %v4325_v24, %v9949_v27  ;;  %v4451_v14 = vmul.f32 %v4405_v59, %v9952_v20 }
 0x75b   :  { %v10154_v21 = vadd.f32 %v9880_v33, %v2366_v18  ;;  %v10157_v57 = vadd.f32 %v4833_v48, %v4753_v41  ;;  %v4501_v43 = vrot.slane %v10099_v28, %v8321_v4  ;;  %v4548_v22 = vmul.f32 %v4505_v11, %v9904_v38  ;;  %7456 = vmatpush3.bf16.msra.mxu1 %v7828_v26  ;;  %v7830_v41 = vld [vmem:[%s11300_s21 + $0x18] sm:$0xff]  }
 0x75c   :  { %v4601_v12 = vrot.slane %v10067_v50, %v8324_v5  ;;  %v4930_v31 = vmul.f32 %v4881_v46, %v9970_v25  ;;  %v10165_v52 = vmul.f32 0.16666667, %v2534_v54  ;;  %v2505_v33 = vmin.f32 %v2473_v36, 6.0  ;;  %7457 = vmatprep.subr.bf16.mxu1 %v7829_v44  ;;  %v7831_v36 = vld [vmem:[%s11300_s21 + $0x50] sm:$0xff]  }
 0x75d   :  { %11317 = vst [vmem:[#allocation67_spill] sm:$0xff] %v10157_v57  ;;  %v2442_v24 = vadd.f32 3.0, %v10139_v58  ;;  %v5026_v10 = vmul.f32 %v4977_v40, %v9983_v49  ;;  %v4564_v48 = vadd.f32 %v4548_v22, %v4468_v62  ;;  %v2446_v59 = vadd.f32 3.0, %v10145_v23 }
 0x75e   :  { %v2450_v53 = vadd.f32 3.0, %v10148_v45  ;;  %v4946_v34 = vadd.f32 %v4930_v31, %v4850_v51  ;;  %v4467_v11 = vadd.f32 %v4451_v14, %v4371_v60  ;;  %v4597_v18 = vrot.slane %v10099_v28, %v8324_v5 }
 0x75f   :  { %v2454_v46 = vadd.f32 3.0, %v10154_v21  ;;  %v4547_v54 = vmul.f32 %v4501_v43, %v9990_v30  ;;  %v4693_v40 = vrot.slane %v10099_v28, %v8327_v6  ;;  %v4644_v62 = vmul.f32 %v4601_v12, %v9914_v55  ;;  %7458 = vmatpush3.bf16.msra.mxu1 %v7830_v41  ;;  %v7832_v12 = vld [vmem:[%s11300_s21 + $0x10] sm:$0xff]  }
 0x760   :  { %v4697_v26 = vrot.slane %v10067_v50, %v8327_v6  ;;  %v4333_v51 = vrot.slane %v10165_v52, %v8307_v61  ;;  %v4413_v60 = vrot.slane %v10165_v52, %v8311_v63  ;;  %v2537_v14 = vmul.f32 %v2505_v33, %v10085_v15  ;;  %7459 = vmatprep.subr.bf16.mxu1 %v7831_v36  ;;  %v7834_v36 = vld [vmem:[%s11300_s21 + $0x8] sm:$0xff]  }
 0x761   :  { %v2474_v44 = vmax.f32 %v2442_v24, 0.0  ;;  %v4789_v43 = vrot.slane %v10099_v28, %v8330_v7  ;;  %v4660_v22 = vadd.f32 %v4644_v62, %v4564_v48  ;;  %v2478_v31 = vmax.f32 %v2446_v59, 0.0 }
 0x762   :  { %v2482_v13 = vmax.f32 %v2450_v53, 0.0  ;;  %v10190_v37 = vadd.f32 %v5026_v10, %v4946_v34  ;;  %v4563_v57 = vadd.f32 %v4547_v54, %v4467_v11  ;;  %v4643_v56 = vmul.f32 %v4597_v18, %v10012_v29 }
 0x763   :  { %v2486_v0 = vmax.f32 %v2454_v46, 0.0  ;;  %v4739_v15 = vmul.f32 %v4693_v40, %v10024_v1  ;;  %v4885_v33 = vrot.slane %v10099_v28, %v8333_v8  ;;  %v4740_v24 = vmul.f32 %v4697_v26, %v9924_v35  ;;  %7460 = vmatpush3.bf16.msra.mxu1 %v7832_v12 }
 0x764   :  { %11318 = vst [vmem:[#allocation68_spill] sm:$0xff] %v10190_v37  ;;  %v4793_v48 = vrot.slane %v10067_v50, %v8330_v7  ;;  %v4373_v10 = vmul.f32 %v4333_v51, %v9949_v27  ;;  %v4453_v59 = vmul.f32 %v4413_v60, %v9952_v20  ;;  %v10202_v53 = vmul.f32 0.16666667, %v2537_v14  ;;  %7461 = vmatprep.subr.bf16.mxu1 %v7833_v16  ;;  %v7835_v51 = vld [vmem:[%s11300_s21 + $0x40] sm:$0xff]  }
 0x765   :  { %v2506_v41 = vmin.f32 %v2474_v44, 6.0  ;;  %v10205_v34 = vmul.f32 %v4789_v43, %v10031_v19  ;;  %v4756_v11 = vadd.f32 %v4740_v24, %v4660_v22  ;;  %v2510_v18 = vmin.f32 %v2478_v31, 6.0 }
 0x766   :  { %v2514_v46 = vmin.f32 %v2482_v13, 6.0  ;;  %v4659_v54 = vadd.f32 %v4643_v56, %v4563_v57  ;;  %v4509_v62 = vrot.slane %v10165_v52, %v8321_v4  ;;  %v2518_v26 = vmin.f32 %v2486_v0, 6.0 }
 0x767   :  { %v10214_v60 = vmul.f32 %v4885_v33, %v10051_v39  ;;  %v4836_v14 = vmul.f32 %v4793_v48, %v9940_v3  ;;  %v4889_v13 = vrot.slane %v10067_v50, %v8333_v8  ;;  %v4985_v56 = vrot.slane %v10067_v50, %v8336_v9  ;;  %7462 = vmatpush3.bf16.msra.mxu1 %v7834_v36  ;;  %v7836_v50 = vld [vmem:[%s11300_s21] sm:$0xff]  }
 0x768   :  { %v4469_v57 = vadd.f32 %v4453_v59, %v4373_v10  ;;  %v4337_v44 = vrot.slane %v10202_v53, %v8307_v61  ;;  %v4417_v0 = vrot.slane %v10202_v53, %v8311_v63  ;;  %v2538_v16 = vmul.f32 %v2506_v41, %v10139_v58  ;;  %7463 = vmatprep.subr.bf16.mxu1 %v7835_v51  ;;  %v7837_v10 = vld [vmem:[%s11319_s8 + $0x78] sm:$0xff]  }
 0x769   :  { %v4852_v43 = vadd.f32 %v4836_v14, %v4756_v11  ;;  %v10228_v22 = vadd.f32 %v9875_v47, %v10005_v32  ;;  %v2542_v31 = vmul.f32 %v2510_v18, %v10145_v23  ;;  %v2546_v12 = vmul.f32 %v2514_v46, %v10148_v45 }
 0x76a   :  { %v10233_v33 = vadd.f32 %v4739_v15, %v4659_v54  ;;  %v4549_v24 = vmul.f32 %v4509_v62, %v9990_v30  ;;  %v4605_v48 = vrot.slane %v10165_v52, %v8324_v5  ;;  %v2550_v58 = vmul.f32 %v2518_v26, %v10154_v21 }
 0x76b   :  { %v4932_v32 = vmul.f32 %v4889_v13, %v9970_v25  ;;  %v10242_v59 = vmul.f32 %v4985_v56, %v9983_v49  ;;  %v4701_v23 = vrot.slane %v10165_v52, %v8327_v6  ;;  %v4797_v45 = vrot.slane %v10165_v52, %v8330_v7  ;;  %7464 = vmatpush3.bf16.msra.mxu1 %v7836_v50 }
 0x76c   :  { %v4565_v15 = vadd.f32 %v4549_v24, %v4469_v57  ;;  %v4374_v41 = vmul.f32 %v4337_v44, %v9890_v42  ;;  %v4454_v11 = vmul.f32 %v4417_v0, %v9893_v2  ;;  %v10250_v18 = vmul.f32 0.16666667, %v2538_v16  ;;  %7489 = vmatprep.subr.bf16.mxu1 %v7837_v10 }
 0x76d   :  { %11320 = vst [vmem:[#allocation69_spill] sm:$0xff] %v10242_v59  ;;  %v10252_v21 = vadd.f32 %v4932_v32, %v4852_v43  ;;  %v2445_v46 = vadd.f32 3.0, %v10228_v22  ;;  %v10255_v36 = vmul.f32 0.16666667, %v2542_v31  ;;  %v10257_v54 = vmul.f32 0.16666667, %v2546_v12 }
 0x76e   :  { %v4645_v62 = vmul.f32 %v4605_v48, %v10012_v29  ;;  %v4513_v51 = vrot.slane %v10202_v53, %v8321_v4  ;;  %v10264_v14 = vmul.f32 0.16666667, %v2550_v58  ;;  %v10267_v13 = vmul.f32 %v4701_v23, %v10024_v1 }
 0x76f   :  { %11321 = vst [vmem:[#allocation70_spill] sm:$0xff] %v10252_v21  ;;  %v10270_v56 = vmul.f32 %v4797_v45, %v10031_v19  ;;  %v4609_v44 = vrot.slane %v10202_v53, %v8324_v5  ;;  %v4470_v16 = vadd.f32 %v4454_v11, %v4374_v41  ;;  %v4341_v43 = vrot.slane %v10250_v18, %v8307_v61 }
 0x770   :  { %v10276_v0 = vadd.f32 %v4645_v62, %v4565_v15  ;;  %v4421_v31 = vrot.slane %v10250_v18, %v8311_v63  ;;  %v4349_v12 = vrot.slane %v10255_v36, %v8307_v61  ;;  %v4429_v50 = vrot.slane %v10255_v36, %v8311_v63 }
 0x771   :  { %v4357_v24 = vrot.slane %v10257_v54, %v8307_v61  ;;  %v4437_v48 = vrot.slane %v10257_v54, %v8311_v63  ;;  %v4550_v58 = vmul.f32 %v4513_v51, %v9904_v38  ;;  %v2477_v10 = vmax.f32 %v2445_v46, 0.0 }
 0x772   :  { %v4365_v32 = vrot.slane %v10264_v14, %v8307_v61  ;;  %v4445_v23 = vrot.slane %v10264_v14, %v8311_v63  ;;  %v4646_v45 = vmul.f32 %v4609_v44, %v9914_v55  ;;  %v4705_v15 = vrot.slane %v10202_v53, %v8327_v6 }
 0x773   :  { %v4801_v41 = vrot.slane %v10202_v53, %v8330_v7  ;;  %v4897_v11 = vrot.slane %v10202_v53, %v8333_v8  ;;  %v4566_v62 = vadd.f32 %v4550_v58, %v4470_v16  ;;  %v4993_v46 = vrot.slane %v10202_v53, %v8336_v9 }
 0x774   :  { %v4375_v51 = vmul.f32 %v4341_v43, %v9949_v27  ;;  %v4455_v57 = vmul.f32 %v4421_v31, %v9952_v20  ;;  %v4377_v40 = vmul.f32 %v4349_v12, %v9949_v27  ;;  %v4457_v44 = vmul.f32 %v4429_v50, %v9952_v20 }
 0x775   :  { %v4379_v26 = vmul.f32 %v4357_v24, %v9949_v27  ;;  %v4459_v37 = vmul.f32 %v4437_v48, %v9952_v20  ;;  %v4517_v59 = vrot.slane %v10250_v18, %v8321_v4  ;;  %v10314_v16 = vadd.f32 %v9875_v47, %v10054_v17 }
 0x776   :  { %v4381_v53 = vmul.f32 %v4365_v32, %v9949_v27  ;;  %v4461_v43 = vmul.f32 %v4445_v23, %v9952_v20  ;;  %v4742_v31 = vmul.f32 %v4705_v15, %v9924_v35  ;;  %v4838_v12 = vmul.f32 %v4801_v41, %v9940_v3 }
 0x777   :  { %v4525_v50 = vrot.slane %v10255_v36, %v8321_v4  ;;  %v4533_v24 = vrot.slane %v10257_v54, %v8321_v4  ;;  %v4662_v48 = vadd.f32 %v4646_v45, %v4566_v62  ;;  %v4934_v58 = vmul.f32 %v4897_v11, %v9970_v25 }
 0x778   :  { %v2509_v21 = vmin.f32 %v2477_v10, 6.0  ;;  %v4541_v17 = vrot.slane %v10264_v14, %v8321_v4  ;;  %v10328_v27 = vmul.f32 %v4993_v46, %v9983_v49  ;;  %v4471_v20 = vadd.f32 %v4455_v57, %v4375_v51  ;;  %v11323_v51 = vld [vmem:[#allocation63_spill] sm:$0xff] }
 0x779   :  { %v4473_v32 = vadd.f32 %v4457_v44, %v4377_v40  ;;  %v4475_v23 = vadd.f32 %v4459_v37, %v4379_v26  ;;  %v4551_v15 = vmul.f32 %v4517_v59, %v9990_v30  ;;  %v4613_v41 = vrot.slane %v10250_v18, %v8324_v5 }
 0x77a   :  { %11322 = vst [vmem:[#allocation71_spill] sm:$0xff] %v10328_v27  ;;  %v2449_v3 = vadd.f32 3.0, %v10314_v16  ;;  %v4477_v45 = vadd.f32 %v4461_v43, %v4381_v53  ;;  %v4553_v11 = vmul.f32 %v4525_v50, %v9990_v30  ;;  %v4621_v10 = vrot.slane %v10255_v36, %v8324_v5 }
 0x77b   :  { %v4555_v62 = vmul.f32 %v4533_v24, %v9990_v30  ;;  %v4629_v57 = vrot.slane %v10257_v54, %v8324_v5  ;;  %v4758_v40 = vadd.f32 %v4742_v31, %v4662_v48  ;;  %v4709_v37 = vrot.slane %v10250_v18, %v8327_v6 }
 0x77c   :  { %v4637_v59 = vrot.slane %v10264_v14, %v8324_v5  ;;  %v4557_v26 = vmul.f32 %v4541_v17, %v9990_v30  ;;  %v4567_v46 = vadd.f32 %v4551_v15, %v4471_v20  ;;  %v10347_v44 = vadd.f32 %v9875_v47, %v11323_v51 }
 0x77d   :  { %v4569_v53 = vadd.f32 %v4553_v11, %v4473_v32  ;;  %v4571_v43 = vadd.f32 %v4555_v62, %v4475_v23  ;;  %v4647_v50 = vmul.f32 %v4613_v41, %v10012_v29  ;;  %v4805_v31 = vrot.slane %v10250_v18, %v8330_v7 }
 0x77e   :  { %v2481_v24 = vmax.f32 %v2449_v3, 0.0  ;;  %v4573_v48 = vadd.f32 %v4557_v26, %v4477_v45  ;;  %v4649_v27 = vmul.f32 %v4621_v10, %v10012_v29  ;;  %v4717_v49 = vrot.slane %v10255_v36, %v8327_v6 }
 0x77f   :  { %v4725_v30 = vrot.slane %v10257_v54, %v8327_v6  ;;  %v4651_v47 = vmul.f32 %v4629_v57, %v10012_v29  ;;  %v4854_v17 = vadd.f32 %v4838_v12, %v4758_v40  ;;  %v4743_v20 = vmul.f32 %v4709_v37, %v10024_v1 }
 0x780   :  { %v4653_v32 = vmul.f32 %v4637_v59, %v10012_v29  ;;  %v4733_v23 = vrot.slane %v10264_v14, %v8327_v6  ;;  %v2453_v3 = vadd.f32 3.0, %v10347_v44  ;;  %v4663_v15 = vadd.f32 %v4647_v50, %v4567_v46 }
 0x781   :  { %v4665_v41 = vadd.f32 %v4649_v27, %v4569_v53  ;;  %v4667_v45 = vadd.f32 %v4651_v47, %v4571_v43  ;;  %v4901_v11 = vrot.slane %v10250_v18, %v8333_v8  ;;  %v2541_v10 = vmul.f32 %v2509_v21, %v10228_v22 }
 0x782   :  { %v2513_v62 = vmin.f32 %v2481_v24, 6.0  ;;  %v4669_v57 = vadd.f32 %v4653_v32, %v4573_v48  ;;  %v4813_v12 = vrot.slane %v10255_v36, %v8330_v7  ;;  %v4745_v29 = vmul.f32 %v4717_v49, %v10024_v1 }
 0x783   :  { %v4747_v40 = vmul.f32 %v4725_v30, %v10024_v1  ;;  %v4821_v37 = vrot.slane %v10257_v54, %v8330_v7  ;;  %v10372_v59 = vadd.f32 %v4934_v58, %v4854_v17  ;;  %v4749_v27 = vmul.f32 %v4733_v23, %v10024_v1 }
 0x784   :  { %v4757_v26 = vadd.f32 %v10267_v13, %v10276_v0  ;;  %v4829_v22 = vrot.slane %v10264_v14, %v8330_v7  ;;  %v2485_v21 = vmax.f32 %v2453_v3, 0.0  ;;  %v4759_v46 = vadd.f32 %v4743_v20, %v4663_v15 }
 0x785   :  { %v4761_v51 = vadd.f32 %v4745_v29, %v4665_v41  ;;  %v4763_v53 = vadd.f32 %v4747_v40, %v4667_v45  ;;  %v10379_v49 = vmul.f32 0.16666667, %v2541_v10  ;;  %v2545_v43 = vmul.f32 %v2513_v62, %v10314_v16  ;;  %v11325_v41 = vld [vmem:[#allocation62_spill] sm:$0xff]  ;;  %v11326_v45 = vld [vmem:[#allocation59_spill] sm:$0xff]  ;;  %v11328_v62 = vld [vmem:[#allocation65_spill] sm:$0xff] }
 0x786   :  { %v4765_v50 = vadd.f32 %v4749_v27, %v4669_v57  ;;  %v4839_v58 = vmul.f32 %v4805_v31, %v10031_v19  ;;  %v4841_v24 = vmul.f32 %v4813_v12, %v10031_v19  ;;  %v4843_v1 = vmul.f32 %v4821_v37, %v10031_v19  ;;  %v11327_v10 = vld [vmem:[#allocation67_spill] sm:$0xff] }
 0x787   :  { %v4909_v13 = vrot.slane %v10255_v36, %v8333_v8  ;;  %v4917_v0 = vrot.slane %v10257_v54, %v8333_v8  ;;  %v4845_v48 = vmul.f32 %v4829_v22, %v10031_v19  ;;  %v4851_v30 = vadd.f32 %v10205_v34, %v10233_v33 }
 0x788   :  { %v4853_v16 = vadd.f32 %v10270_v56, %v4757_v26  ;;  %v4925_v31 = vrot.slane %v10264_v14, %v8333_v8  ;;  %v2517_v47 = vmin.f32 %v2485_v21, 6.0  ;;  %v4855_v17 = vadd.f32 %v4839_v58, %v4759_v46  ;;  %v11329_v46 = vld [vmem:[#allocation60_spill] sm:$0xff] }
 0x789   :  { %v4857_v20 = vadd.f32 %v4841_v24, %v4761_v51  ;;  %v4859_v32 = vadd.f32 %v4843_v1, %v4763_v53  ;;  %v4861_v23 = vadd.f32 %v4845_v48, %v4765_v50  ;;  %v11324_v3 = vrot.slane %v10165_v52, %v8333_v8  ;;  %v11332_v53 = vld [vmem:[#allocation61_spill] sm:$0xff]  ;;  %v11333_v50 = vld [vmem:[#allocation48_spill] sm:$0xff]  ;;  %v11334_v1 = vld [vmem:[#allocation66_spill] sm:$0xff] }
 0x78a   :  { %v4935_v19 = vmul.f32 %v4901_v11, %v10051_v39  ;;  %v4943_v34 = vadd.f32 %v11326_v45, %v11325_v41  ;;  %v4937_v33 = vmul.f32 %v4909_v13, %v10051_v39  ;;  %v4939_v56 = vmul.f32 %v4917_v0, %v10051_v39 }
 0x78b   :  { %v4933_v15 = vmul.f32 %v11324_v3, %v10051_v39  ;;  %v4945_v57 = vadd.f32 %v11328_v62, %v11327_v10  ;;  %v4997_v12 = vrot.slane %v10250_v18, %v8336_v9  ;;  %v4941_v29 = vmul.f32 %v4925_v31, %v10051_v39 }
 0x78c   :  { %v4947_v40 = vadd.f32 %v10214_v60, %v4851_v30  ;;  %v5005_v11 = vrot.slane %v10255_v36, %v8336_v9  ;;  %v4951_v27 = vadd.f32 %v4935_v19, %v4855_v17  ;;  %v4953_v26 = vadd.f32 %v4937_v33, %v4857_v20 }
 0x78d   :  { %v4949_v37 = vadd.f32 %v4933_v15, %v4853_v16  ;;  %v5013_v22 = vrot.slane %v10257_v54, %v8336_v9  ;;  %v5021_v21 = vrot.slane %v10264_v14, %v8336_v9  ;;  %v11330_v18 = vrot.slane %v10099_v28, %v8336_v9 }
 0x78e   :  { %v11331_v39 = vrot.slane %v10165_v52, %v8336_v9  ;;  %v5039_v36 = vadd.f32 %v11332_v53, %v4943_v34  ;;  %v5063_v58 = vrot.slane %v11333_v50, %v8311_v63  ;;  %v2549_v54 = vmul.f32 %v2517_v47, %v10347_v44 }
 0x78f   :  { %v5027_v51 = vmul.f32 %v11330_v18, %v11329_v46  ;;  %v4955_v24 = vadd.f32 %v4939_v56, %v4859_v32  ;;  %v5031_v14 = vmul.f32 %v4997_v12, %v11329_v46  ;;  %v5041_v13 = vadd.f32 %v11334_v1, %v4945_v57 }
 0x790   :  { %v5029_v60 = vmul.f32 %v11331_v39, %v11329_v46  ;;  %v4957_v0 = vadd.f32 %v4941_v29, %v4861_v23  ;;  %v5033_v28 = vmul.f32 %v5005_v11, %v11329_v46  ;;  %v4345_v52 = vrot.slane %v10379_v49, %v8307_v61 }
 0x791   :  { %v5043_v48 = vadd.f32 %v5027_v51, %v4947_v40  ;;  %v4425_v16 = vrot.slane %v10379_v49, %v8311_v63  ;;  %v10435_v31 = vmul.f32 0.16666667, %v2545_v43  ;;  %v5047_v17 = vadd.f32 %v5031_v14, %v4951_v27 }
 0x792   :  { %v5045_v30 = vadd.f32 %v5029_v60, %v4949_v37  ;;  %v5035_v44 = vmul.f32 %v5013_v22, %v11329_v46  ;;  %v5037_v47 = vmul.f32 %v5021_v21, %v11329_v46  ;;  %v5049_v20 = vadd.f32 %v5033_v28, %v4953_v26 }
 0x793   :  { %v10439_v32 = vadd.f32 %v5063_v58, %v5039_v36  ;;  %v4521_v23 = vrot.slane %v10379_v49, %v8321_v4  ;;  %v4617_v3 = vrot.slane %v10379_v49, %v8324_v5  ;;  %v10445_v15 = vmul.f32 0.16666667, %v2549_v54 }
 0x794   :  { %v10447_v19 = vadd.f32 %v5063_v58, %v5041_v13  ;;  %v5051_v43 = vadd.f32 %v5035_v44, %v4955_v24  ;;  %v5053_v41 = vadd.f32 %v5037_v47, %v4957_v0  ;;  %v10449_v45 = vadd.f32 %v5063_v58, %v5043_v48 }
 0x795   :  { %v10451_v34 = vadd.f32 %v5063_v58, %v5045_v30  ;;  %v4713_v33 = vrot.slane %v10379_v49, %v8327_v6  ;;  %v4353_v56 = vrot.slane %v10435_v31, %v8307_v61  ;;  %v4433_v10 = vrot.slane %v10435_v31, %v8311_v63 }
 0x796   :  { %v10459_v62 = vadd.f32 %v5063_v58, %v5047_v17  ;;  %v4376_v57 = vmul.f32 %v4345_v52, %v9890_v42  ;;  %v4456_v12 = vmul.f32 %v4425_v16, %v9893_v2  ;;  %v10463_v29 = vadd.f32 %v5063_v58, %v5049_v20 }
 0x797   :  { %v5083_v40 = vadd.f32 3.0, %v10439_v32  ;;  %v4809_v37 = vrot.slane %v10379_v49, %v8330_v7  ;;  %v4361_v11 = vrot.slane %v10445_v15, %v8307_v61  ;;  %v4441_v27 = vrot.slane %v10445_v15, %v8311_v63 }
 0x798   :  { %v5085_v26 = vadd.f32 3.0, %v10447_v19  ;;  %v10473_v22 = vadd.f32 %v5063_v58, %v5051_v43  ;;  %v10475_v21 = vadd.f32 %v5063_v58, %v5053_v41  ;;  %v5087_v46 = vadd.f32 3.0, %v10449_v45 }
 0x799   :  { %v5089_v18 = vadd.f32 3.0, %v10451_v34  ;;  %v4905_v51 = vrot.slane %v10379_v49, %v8333_v8  ;;  %v4378_v39 = vmul.f32 %v4353_v56, %v9890_v42  ;;  %v4458_v60 = vmul.f32 %v4433_v10, %v9893_v2 }
 0x79a   :  { %v5091_v53 = vadd.f32 3.0, %v10459_v62  ;;  %v4472_v36 = vadd.f32 %v4456_v12, %v4376_v57  ;;  %v4552_v50 = vmul.f32 %v4521_v23, %v9904_v38  ;;  %v5093_v54 = vadd.f32 3.0, %v10463_v29 }
 0x79b   :  { %v5099_v58 = vmax.f32 %v5083_v40, 0.0  ;;  %v4529_v24 = vrot.slane %v10435_v31, %v8321_v4  ;;  %v4380_v14 = vmul.f32 %v4361_v11, %v9890_v42  ;;  %v4460_v1 = vmul.f32 %v4441_v27, %v9893_v2 }
 0x79c   :  { %v5101_v13 = vmax.f32 %v5085_v26, 0.0  ;;  %v5095_v0 = vadd.f32 3.0, %v10473_v22  ;;  %v5097_v28 = vadd.f32 3.0, %v10475_v21  ;;  %v5103_v48 = vmax.f32 %v5087_v46, 0.0  ;;  %v11335_v26 = vld [vmem:[#allocation28_spill] sm:$0xff] }
 0x79d   :  { %v5105_v30 = vmax.f32 %v5089_v18, 0.0  ;;  %v4648_v52 = vmul.f32 %v4617_v3, %v9914_v55  ;;  %v4474_v16 = vadd.f32 %v4458_v60, %v4378_v39  ;;  %v4537_v17 = vrot.slane %v10445_v15, %v8321_v4 }
 0x79e   :  { %v5107_v44 = vmax.f32 %v5091_v53, 0.0  ;;  %v4568_v47 = vadd.f32 %v4552_v50, %v4472_v36  ;;  %v4744_v20 = vmul.f32 %v4713_v33, %v9924_v35  ;;  %v5109_v42 = vmax.f32 %v5093_v54, 0.0 }
 0x79f   :  { %v5115_v23 = vmin.f32 %v5099_v58, 6.0  ;;  %v4554_v2 = vmul.f32 %v4529_v24, %v9904_v38  ;;  %v4625_v43 = vrot.slane %v10435_v31, %v8324_v5  ;;  %v4476_v41 = vadd.f32 %v4460_v1, %v4380_v14 }
 0x7a0   :  { %v5117_v56 = vmin.f32 %v5101_v13, 6.0  ;;  %v5111_v10 = vmax.f32 %v5095_v0, 0.0  ;;  %v5113_v57 = vmax.f32 %v5097_v28, 0.0  ;;  %v5119_v3 = vmin.f32 %v5103_v48, 6.0 }
 0x7a1   :  { %v5121_v12 = vmin.f32 %v5105_v30, 6.0  ;;  %v4570_v40 = vadd.f32 %v4554_v2, %v4474_v16  ;;  %v4556_v4 = vmul.f32 %v4537_v17, %v9904_v38  ;;  %v4633_v11 = vrot.slane %v10445_v15, %v8324_v5 }
 0x7a2   :  { %v5123_v33 = vmin.f32 %v5107_v44, 6.0  ;;  %v4664_v27 = vadd.f32 %v4648_v52, %v4568_v47  ;;  %v4840_v46 = vmul.f32 %v4809_v37, %v11335_v26  ;;  %v5125_v18 = vmin.f32 %v5109_v42, 6.0 }
 0x7a3   :  { %v5131_v39 = vmul.f32 %v5115_v23, %v10439_v32  ;;  %v4650_v60 = vmul.f32 %v4625_v43, %v9914_v55  ;;  %v4721_v53 = vrot.slane %v10435_v31, %v8327_v6  ;;  %v4572_v36 = vadd.f32 %v4556_v4, %v4476_v41 }
 0x7a4   :  { %v5133_v50 = vmul.f32 %v5117_v56, %v10447_v19  ;;  %v5127_v54 = vmin.f32 %v5111_v10, 6.0  ;;  %v5129_v38 = vmin.f32 %v5113_v57, 6.0  ;;  %v5135_v58 = vmul.f32 %v5119_v3, %v10449_v45  ;;  %v11337_v57 = vld [vmem:[#allocation42_spill] sm:$0xff] }
 0x7a5   :  { %v5137_v5 = vmul.f32 %v5121_v12, %v10451_v34  ;;  %v4666_v24 = vadd.f32 %v4650_v60, %v4570_v40  ;;  %v4652_v37 = vmul.f32 %v4633_v11, %v9914_v55  ;;  %v4729_v32 = vrot.slane %v10445_v15, %v8327_v6 }
 0x7a6   :  { %v5139_v14 = vmul.f32 %v5123_v33, %v10459_v62  ;;  %v4760_v1 = vadd.f32 %v4744_v20, %v4664_v27  ;;  %v4936_v13 = vmul.f32 %v4905_v51, %v9970_v25  ;;  %v5141_v0 = vmul.f32 %v5125_v18, %v10463_v29 }
 0x7a7   :  { %v10516_v19 = vmul.f32 0.16666667, %v5131_v39  ;;  %v4746_v28 = vmul.f32 %v4721_v53, %v9924_v35  ;;  %v4817_v45 = vrot.slane %v10435_v31, %v8330_v7  ;;  %v4668_v34 = vadd.f32 %v4652_v37, %v4572_v36 }
 0x7a8   :  { %v10521_v48 = vmul.f32 0.16666667, %v5133_v50  ;;  %v5143_v55 = vmul.f32 %v5127_v54, %v10473_v22  ;;  %v5145_v6 = vmul.f32 %v5129_v38, %v10475_v21  ;;  %v10525_v62 = vmul.f32 0.16666667, %v5135_v58  ;;  %v11338_v50 = vld [vmem:[#allocation70_spill] sm:$0xff]  ;;  %v11339_v54 = vld [vmem:[#allocation69_spill] sm:$0xff] }
 0x7a9   :  { %v10527_v30 = vmul.f32 0.16666667, %v5137_v5  ;;  %v4762_v51 = vadd.f32 %v4746_v28, %v4666_v24  ;;  %v4748_v29 = vmul.f32 %v4729_v32, %v9924_v35  ;;  %v4825_v52 = vrot.slane %v10445_v15, %v8330_v7  ;;  %v11340_v24 = vld [vmem:[#allocation71_spill] sm:$0xff] }
 0x7aa   :  { %v10532_v16 = vmul.f32 0.16666667, %v5139_v14  ;;  %v5001_v17 = vrot.slane %v10379_v49, %v8336_v9  ;;  %v4913_v22 = vrot.slane %v10435_v31, %v8333_v8  ;;  %v10538_v44 = vmul.f32 0.16666667, %v5141_v0 }
 0x7ab   :  { %v5168_v21 = vrot.slane %v10516_v19, 4  ;;  %v4856_v47 = vadd.f32 %v4840_v46, %v4760_v1  ;;  %v4842_v20 = vmul.f32 %v4817_v45, %v11335_v26  ;;  %v5180_v35 = vrot.slane %v10521_v48, 4 }
 0x7ac   :  { %v4764_v42 = vadd.f32 %v4748_v29, %v4668_v34  ;;  %v10543_v23 = vmul.f32 0.16666667, %v5143_v55  ;;  %v10545_v7 = vmul.f32 0.16666667, %v5145_v6  ;;  %v5192_v2 = vrot.slane %v10525_v62, 4  ;;  %v11341_v55 = vld [vmem:[#allocation68_spill] sm:$0xff] }
 0x7ad   :  { %v5204_v49 = vrot.slane %v10527_v30, 4  ;;  %v4844_v43 = vmul.f32 %v4825_v52, %v11335_v26  ;;  %v4921_v41 = vrot.slane %v10445_v15, %v8333_v8  ;;  %v5216_v56 = vrot.slane %v10532_v16, 4  ;;  %v11342_v6 = vld [vmem:[#allocation57_spill] sm:$0xff] }
 0x7ae   :  { %11336 = vst [vmem:[#allocation63_spill] sm:$0xff] %v10543_v23  ;;  %v4858_v10 = vadd.f32 %v4842_v20, %v4762_v51  ;;  %v5032_v3 = vmul.f32 %v5001_v17, %v11337_v57  ;;  %v4938_v12 = vmul.f32 %v4913_v22, %v9970_v25  ;;  %v5169_v40 = vadd.f32 %v5168_v21, %v10516_v19 }
 0x7af   :  { %v5228_v4 = vrot.slane %v10538_v44, 4  ;;  %v5009_v11 = vrot.slane %v10435_v31, %v8336_v9  ;;  %v5181_v33 = vadd.f32 %v5180_v35, %v10521_v48  ;;  %v4860_v27 = vadd.f32 %v4844_v43, %v4764_v42 }
 0x7b0   :  { %v4952_v26 = vadd.f32 %v4936_v13, %v4856_v47  ;;  %v5193_v8 = vadd.f32 %v5192_v2, %v10525_v62  ;;  %v5205_v46 = vadd.f32 %v5204_v49, %v10527_v30  ;;  %v5240_v18 = vrot.slane %v10543_v23, 4 }
 0x7b1   :  { %v5252_v39 = vrot.slane %v10545_v7, 4  ;;  %v5017_v60 = vrot.slane %v10445_v15, %v8336_v9  ;;  %v5217_v53 = vadd.f32 %v5216_v56, %v10532_v16  ;;  %v4940_v36 = vmul.f32 %v4921_v41, %v9970_v25  ;;  %v11345_v41 = vld [vmem:[#allocation64_spill] sm:$0xff] }
 0x7b2   :  { %v4954_v31 = vadd.f32 %v4938_v12, %v4858_v10  ;;  %v5044_v38 = vadd.f32 %v11339_v54, %v11338_v50  ;;  %v5170_v58 = vrot.slane %v5169_v40, 2  ;;  %v5229_v5 = vadd.f32 %v5228_v4, %v10538_v44 }
 0x7b3   :  { %v5046_v37 = vadd.f32 %v11340_v24, %v10372_v59  ;;  %v5182_v32 = vrot.slane %v5181_v33, 2  ;;  %v4956_v14 = vadd.f32 %v4940_v36, %v4860_v27  ;;  %v5034_v1 = vmul.f32 %v5009_v11, %v11337_v57  ;;  %v11343_v59 = vld [vmem:[#allocation58_spill] sm:$0xff] }
 0x7b4   :  { %v5048_v13 = vadd.f32 %v5032_v3, %v4952_v26  ;;  %v5194_v9 = vrot.slane %v5193_v8, 2  ;;  %v5206_v15 = vrot.slane %v5205_v46, 2  ;;  %v5241_v0 = vadd.f32 %v5240_v18, %v10543_v23  ;;  %v11353_v23 = vld [vmem:[#allocation52_spill] sm:$0xff] }
 0x7b5   :  { %v5253_v25 = vadd.f32 %v5252_v39, %v10545_v7  ;;  %v5218_v28 = vrot.slane %v5217_v53, 2  ;;  %v5036_v45 = vmul.f32 %v5017_v60, %v11337_v57  ;;  %v5050_v34 = vadd.f32 %v5034_v1, %v4954_v31 }
 0x7b6   :  { %v10579_v51 = vadd.f32 %v11342_v6, %v11341_v55  ;;  %v5082_v29 = vadd.f32 3.0, %v11343_v59  ;;  %v5230_v52 = vrot.slane %v5229_v5, 2  ;;  %v10583_v17 = vadd.f32 %v11342_v6, %v5044_v38 }
 0x7b7   :  { %v10586_v22 = vadd.f32 %v11342_v6, %v5046_v37  ;;  %v5171_v21 = vadd.f32 %v5170_v58, %v5169_v40  ;;  %v5183_v47 = vadd.f32 %v5182_v32, %v5181_v33  ;;  %v5052_v20 = vadd.f32 %v5036_v45, %v4956_v14  ;;  %v3820_v33 = vld [vmem:[%s11344_s14] sm:$0x3] }
 0x7b8   :  { %v10589_v35 = vadd.f32 %v11342_v6, %v5048_v13  ;;  %v5195_v42 = vadd.f32 %v5194_v9, %v5193_v8  ;;  %v5207_v2 = vadd.f32 %v5206_v15, %v5205_v46  ;;  %v5242_v49 = vrot.slane %v5241_v0, 2 }
 0x7b9   :  { %v5254_v43 = vrot.slane %v5253_v25, 2  ;;  %v5084_v56 = vadd.f32 3.0, %v11345_v41  ;;  %v5219_v10 = vadd.f32 %v5218_v28, %v5217_v53  ;;  %v10593_v57 = vadd.f32 %v11342_v6, %v5050_v34 }
 0x7ba   :  { %v5086_v3 = vadd.f32 3.0, %v10579_v51  ;;  %v5231_v12 = vadd.f32 %v5230_v52, %v5229_v5  ;;  %v5088_v40 = vadd.f32 3.0, %v10583_v17  ;;  %v5090_v4 = vadd.f32 3.0, %v10586_v22 }
 0x7bb   :  { %v5098_v11 = vmax.f32 %v5082_v29, 0.0  ;;  %v5172_v27 = vrot.slane %v5171_v21, 1  ;;  %v5184_v26 = vrot.slane %v5183_v47, 1  ;;  %v10600_v8 = vadd.f32 %v11342_v6, %v5052_v20 }
 0x7bc   :  { %v5092_v46 = vadd.f32 3.0, %v10589_v35  ;;  %v5196_v18 = vrot.slane %v5195_v42, 1  ;;  %v5208_v39 = vrot.slane %v5207_v2, 1  ;;  %v5243_v60 = vadd.f32 %v5242_v49, %v5241_v0 }
 0x7bd   :  { %v5255_v53 = vadd.f32 %v5254_v43, %v5253_v25  ;;  %v5220_v36 = vrot.slane %v5219_v10, 1  ;;  %v5094_v31 = vadd.f32 3.0, %v10593_v57  ;;  %v5100_v50 = vmax.f32 %v5084_v56, 0.0 }
 0x7be   :  { %v5102_v54 = vmax.f32 %v5086_v3, 0.0  ;;  %v3825_v38 = vrot.slane %v3820_v33, %v8307_v61  ;;  %v5232_v58 = vrot.slane %v5231_v12, 1  ;;  %v5104_v5 = vmax.f32 %v5088_v40, 0.0 }
 0x7bf   :  { %v5106_v24 = vmax.f32 %v5090_v4, 0.0  ;;  %v5173_v37 = vadd.f32 %v5172_v27, %v5171_v21  ;;  %v5185_v32 = vadd.f32 %v5184_v26, %v5183_v47  ;;  %v5096_v14 = vadd.f32 3.0, %v10600_v8 }
 0x7c0   :  { %v5108_v1 = vmax.f32 %v5092_v46, 0.0  ;;  %v3829_v13 = vrot.slane %v3820_v33, %v8311_v63  ;;  %v5244_v9 = vrot.slane %v5243_v60, 1  ;;  %v5256_v15 = vrot.slane %v5255_v53, 1 }
 0x7c1   :  { %v5114_v0 = vmin.f32 %v5098_v11, 6.0  ;;  %v5197_v28 = vadd.f32 %v5196_v18, %v5195_v42  ;;  %v5110_v45 = vmax.f32 %v5094_v31, 0.0  ;;  %v5116_v34 = vmin.f32 %v5100_v50, 6.0 }
 0x7c2   :  { %v5118_v55 = vmin.f32 %v5102_v54, 6.0  ;;  %v5209_v29 = vadd.f32 %v5208_v39, %v5207_v2  ;;  %v5120_v52 = vmin.f32 %v5104_v5, 6.0  ;;  %v5122_v20 = vmin.f32 %v5106_v24, 6.0 }
 0x7c3   :  { %v5221_v21 = vadd.f32 %v5220_v36, %v5219_v10  ;;  %v5233_v47 = vadd.f32 %v5232_v58, %v5231_v12  ;;  %v5112_v43 = vmax.f32 %v5096_v14, 0.0  ;;  %v5124_v56 = vmin.f32 %v5108_v1, 6.0 }
 0x7c4   :  { %v5245_v4 = vadd.f32 %v5244_v9, %v5243_v60  ;;  %v5130_v33 = vmul.f32 %v5114_v0, %v11343_v59  ;;  %v5257_v27 = vadd.f32 %v5256_v15, %v5255_v53  ;;  %v5126_v42 = vmin.f32 %v5110_v45, 6.0 }
 0x7c5   :  { %v5132_v26 = vmul.f32 %v5116_v34, %v11345_v41  ;;  %v5134_v46 = vmul.f32 %v5118_v55, %v10579_v51  ;;  %v5136_v39 = vmul.f32 %v5120_v52, %v10583_v17  ;;  %v5138_v10 = vmul.f32 %v5122_v20, %v10586_v22 }
 0x7c6   :  { %v10612_v36 = vmul.f32 0.125, %v5173_v37  ;;  %v10614_v31 = vmul.f32 0.125, %v5185_v32  ;;  %v5128_v60 = vmin.f32 %v5112_v43, 6.0  ;;  %v5140_v59 = vmul.f32 %v5124_v56, %v10589_v35 }
 0x7c7   :  { %v10617_v54 = vmul.f32 0.125, %v5197_v28  ;;  %v10619_v41 = vmul.f32 0.16666667, %v5130_v33  ;;  %v10621_v51 = vmul.f32 0.125, %v5209_v29  ;;  %v5142_v17 = vmul.f32 %v5126_v42, %v10593_v57 }
 0x7c8   :  { %v10626_v22 = vmul.f32 0.16666667, %v5134_v46  ;;  %v10628_v5 = vmul.f32 0.125, %v5221_v21  ;;  %v10630_v24 = vmul.f32 0.16666667, %v5136_v39  ;;  %v10634_v37 = vmul.f32 0.125, %v5233_v47 }
 0x7c9   :  { %v10632_v35 = vmul.f32 0.16666667, %v5138_v10  ;;  %v10636_v32 = vmul.f32 0.125, %v5245_v4  ;;  %v5144_v14 = vmul.f32 %v5128_v60, %v10600_v8  ;;  %v10639_v1 = vmul.f32 0.16666667, %v5140_v59  ;;  %v11348_v21 = vld [vmem:[#allocation40_spill] sm:$0xff] }
 0x7ca   :  { %v10641_v9 = vmul.f32 0.125, %v5257_v27  ;;  %v5162_v15 = vrot.slane %v10619_v41, 4  ;;  %v5186_v45 = vrot.slane %v10626_v22, 4  ;;  %v5198_v8 = vrot.slane %v10630_v24, 4 }
 0x7cb   :  { %v10656_v20 = vmul.f32 0.16666667, %v5144_v14 }
 0x7cc   :  { %v5187_v33 = vadd.f32 %v5186_v45, %v10626_v22 }
 0x7cd   :  { %11347 = vst [vmem:[#allocation59_spill] sm:$0xff] %v10656_v20  ;;  %v5246_v10 = vrot.slane %v10656_v20, 4 }
 0x7fb   :  { %v3899_v25 = vpop.f32.mrf.mxu0 }
 0x7fc   :  { %v3900_v6 = vadd.f32 %v3899_v25, %v3825_v38  ;;  %v10624_v38 = vmul.f32 0.16666667, %v5132_v26  ;;  %v10646_v25 = vmul.f32 0.16666667, %v5142_v17  ;;  %v5199_v26 = vadd.f32 %v5198_v8, %v10630_v24 }
 0x7fd   :  { %v3901_v49 = vpop.f32.mrf.mxu0  ;;  %v5247_v8 = vadd.f32 %v5246_v10, %v10656_v20  ;;  %v7838_v10 = vld [vmem:[%s11319_s8 + $0x38] sm:$0xff]  }
 0x7fe   :  { %v3906_v3 = vadd.f32 3.0, %v3900_v6  ;;  %v3902_v40 = vadd.f32 %v3901_v49, %v3829_v13  ;;  %11346 = vst [vmem:[#allocation62_spill] sm:$0xff] %v10646_v25  ;;  %v5174_v28 = vrot.slane %v10624_v38, 4  ;;  %v5210_v6 = vrot.slane %v10632_v35, 4 }
 0x7ff   :  { %v3903_v11 = vpop.f32.mrf.mxu0  ;;  %v5222_v49 = vrot.slane %v10639_v1, 4 }
 0x800   :  { %v3908_v2 = vmax.f32 %v3906_v3, 0.0  ;;  %v3907_v18 = vadd.f32 3.0, %v3902_v40  ;;  %v5163_v3 = vadd.f32 %v5162_v15, %v10619_v41  ;;  %v5175_v4 = vadd.f32 %v5174_v28, %v10624_v38 }
 0x801   :  { %v3904_v12 = vpop.f32.mrf.mxu0  ;;  %v5234_v11 = vrot.slane %v10646_v25, 4  ;;  %v5211_v46 = vadd.f32 %v5210_v6, %v10632_v35  ;;  %v5223_v39 = vadd.f32 %v5222_v49, %v10639_v1  ;;  %v5200_v15 = vrot.slane %v5199_v26, 2  ;;  %v11349_v6 = vld [vmem:[#allocation45_spill] sm:$0xff] }
 0x802   :  { %v3910_v53 = vmin.f32 %v3908_v2, 6.0  ;;  %v3909_v50 = vmax.f32 %v3907_v18, 0.0  ;;  %v5176_v17 = vrot.slane %v5175_v4, 2  ;;  %v11352_v18 = vld [vmem:[#allocation34_spill] sm:$0xff] }
 0x803   :  { %v5235_v14 = vadd.f32 %v5234_v11, %v10646_v25  ;;  %v5212_v28 = vrot.slane %v5211_v46, 2 }
 0x804   :  { %v3911_v58 = vmin.f32 %v3909_v50, 6.0  ;;  %v3912_v57 = vmul.f32 0.16666667, %v3910_v53  ;;  %v5164_v53 = vrot.slane %v5163_v3, 2  ;;  %v5177_v29 = vadd.f32 %v5176_v17, %v5175_v4  ;;  %v7840_v17 = vld [vmem:[%s11319_s8 + $0x30] sm:$0xff]  }
 0x805   :  { %v5248_v4 = vrot.slane %v5247_v8, 2 }
 0x806   :  { %v3913_v13 = vmul.f32 0.16666667, %v3911_v58  ;;  %v5188_v58 = vrot.slane %v5187_v33, 2  ;;  %v5165_v52 = vadd.f32 %v5164_v53, %v5163_v3  ;;  %v5213_v53 = vadd.f32 %v5212_v28, %v5211_v46 }
 0x807   :  { %v11356_v46 = vpack.c.bf16 %v10612_v36, %v10612_v36 }
 0x808   :  { %v3916_v34 = vcombine.low %v3912_v57, %v3913_v13  ;;  %v3917_v55 = vcombine.high %v3912_v57, %v3913_v13  ;;  %v5189_v20 = vadd.f32 %v5188_v58, %v5187_v33  ;;  %v5321_v58 = vpack.c.bf16 %v10641_v9, %v10641_v9 }
 0x80a   :  { %v3924_v47 = vrot.slane %v3916_v34, %v11348_v21  ;;  %v3931_v43 = vrot.slane %v3917_v55, %v11348_v21 }
 0x80c   :  { %v3932_v27 = vcombine.high %v3924_v47, %v3924_v47  ;;  %v3940_v42 = vrot.slane %v3924_v47, %v11348_v21  ;;  %v3933_v2 = vcombine.high %v3931_v43, %v3931_v43  ;;  %v11350_v47 = vld [vmem:[#allocation30_spill] sm:$0xff] }
 0x80e   :  { %v3954_v12 = vrot.slane %v3932_v27, %v11348_v21  ;;  %v3969_v60 = vrot.slane %v3940_v42, %v8307_v61  ;;  %v3973_v59 = vrot.slane %v3940_v42, %v8311_v63  ;;  %v3962_v50 = vcombine.high %v3940_v42, %v3940_v42  ;;  %v11351_v27 = vld [vmem:[#allocation35_spill] sm:$0xff] }
 0x80f   :  { %v10683_v45 = vrot.slane %v3933_v2, %v11348_v21  ;;  %v5224_v2 = vrot.slane %v5223_v39, 2 }
 0x810   :  { %v3977_v57 = vrot.slane %v3954_v12, %v8307_v61  ;;  %v3981_v13 = vrot.slane %v3954_v12, %v8311_v63  ;;  %v3964_v34 = vcombine.high %v3954_v12, %v3954_v12  ;;  %v3989_v55 = vrot.slane %v3962_v50, %v8311_v63 }
 0x811   :  { %v4047_v49 = vmul.f32 %v3973_v59, %v11349_v6  ;;  %v4046_v42 = vmul.f32 %v3969_v60, %v11351_v27  ;;  %v10693_v12 = vrot.slane %v3931_v43, %v11348_v21  ;;  %v11354_v6 = vld [vmem:[#allocation47_spill] sm:$0xff]  ;;  %v7839_v60 = vld [vmem:[%s11319_s8 + $0x70] sm:$0xff]   ;;  %v4013_v3 = vrot.slane %v10683_v45, %v8311_v63 }
 0x812   :  { %v4049_v11 = vmul.f32 %v3981_v13, %v11350_v47  ;;  %v4048_v40 = vmul.f32 %v3977_v57, %v11352_v18  ;;  %v3997_v56 = vrot.slane %v3964_v34, %v8311_v63  ;;  %v4051_v59 = vmul.f32 %v3989_v55, %v11353_v23 }
 0x813   :  { %v3993_v18 = vrot.slane %v3964_v34, %v8307_v61  ;;  %v5236_v57 = vrot.slane %v5235_v14, 2  ;;  %v5319_v43 = vpack.c.bf16 %v10636_v32, %v10636_v32  ;;  %v3985_v23 = vrot.slane %v3962_v50, %v8307_v61 }
 0x814   :  { %v4095_v0 = vpack.c.bf16 %v4049_v11, %v4047_v49  ;;  %v4094_v25 = vpack.c.bf16 %v4048_v40, %v4046_v42  ;;  %v4053_v13 = vmul.f32 %v3997_v56, %v11354_v6  ;;  %v5201_v40 = vadd.f32 %v5200_v15, %v5199_v26  ;;  %v7841_v26 = vld [vmem:[%s11319_s8 + $0x68] sm:$0xff]   ;;  %v11357_v49 = vld [vmem:[#allocation29_spill] sm:$0xff] }
 0x815   :  { %v5225_v56 = vadd.f32 %v5224_v2, %v5223_v39  ;;  %v5166_v34 = vrot.slane %v5165_v52, 1  ;;  %v5178_v55 = vrot.slane %v5177_v29, 1  ;;  %v5346_v39 = vunpack.c.l.b16 %v11356_v46  ;;  %v11358_v2 = vld [vmem:[#allocation33_spill] sm:$0xff] }
 0x816   :  { %4230 = vmatprep.mubr.bf16.mxu1 %v4095_v0  ;;  %v4097_v33 = vpack.c.bf16 %v4053_v13, %v4051_v59  ;;  %v4005_v0 = vrot.slane %v10693_v12, %v8311_v63  ;;  %v5190_v50 = vrot.slane %v5189_v20, 1  ;;  %v5237_v28 = vadd.f32 %v5236_v57, %v5235_v14  ;;  %v11360_v14 = vld [vmem:[#allocation46_spill] sm:$0xff] }
 0x817   :  { %4231 = vmatmul.mubr.bf16.vlgmr.msra.gmra.mxu1 %v4094_v25  ;;  %v11355_v25 = vld [vmem:[#allocation55_spill] sm:$0xff]  ;;  %v4057_v47 = vmul.f32 %v4013_v3, %v11357_v49  ;;  %v10718_v11 = vcombine.high %v10683_v45, %v10683_v45  ;;  %v5202_v27 = vrot.slane %v5201_v40, 1  ;;  %v5249_v42 = vadd.f32 %v5248_v4, %v5247_v8 }
 0x818   :  { %7490 = vmatpush3.bf16.msra.mxu1 %v7838_v10  ;;  %4238 = vmatprep.mubr.bf16.mxu1 %v4097_v33  ;;  %v4052_v15 = vmul.f32 %v3993_v18, %v11355_v25  ;;  %v4050_v10 = vmul.f32 %v3985_v23, %v11358_v2  ;;  %v11359_v59 = vpack.c.bf16 %v10614_v31, %v10614_v31  ;;  %v5214_v13 = vrot.slane %v5213_v53, 1  ;;  %v7843_v4 = vld [vmem:[%s11319_s8 + $0x60] sm:$0xff]  }
 0x819   :  { %7491 = vmatprep.subr.bf16.mxu1 %v7839_v60  ;;  %v5226_v36 = vrot.slane %v5225_v56, 1  ;;  %v7842_v60 = vld [vmem:[%s11319_s8 + $0x28] sm:$0xff]   ;;  %v4055_v18 = vmul.f32 %v4005_v0, %v11360_v14  ;;  %v10728_v57 = vcombine.high %v10693_v12, %v10693_v12  ;;  %v5167_v3 = vadd.f32 %v5166_v34, %v5165_v52 }
 0x81a   :  { %v5348_v6 = vunpack.c.l.b16 %v11359_v59  ;;  %v5179_v33 = vadd.f32 %v5178_v55, %v5177_v29  ;;  %v4096_v8 = vpack.c.bf16 %v4052_v15, %v4050_v10  ;;  %v4009_v31 = vrot.slane %v10683_v45, %v8307_v61 }
 0x81b   :  { %v5191_v23 = vadd.f32 %v5190_v50, %v5189_v20  ;;  %v5238_v25 = vrot.slane %v5237_v28, 1  ;;  %v4099_v46 = vpack.c.bf16 %v4057_v47, %v4055_v18  ;;  %v5203_v0 = vadd.f32 %v5202_v27, %v5201_v40  ;;  %v11364_v27 = vld [vmem:[#allocation50_spill] sm:$0xff] }
 0x81c   :  { %7492 = vmatpush3.bf16.msra.mxu1 %v7840_v17  ;;  %v4029_v17 = vrot.slane %v10718_v11, %v8311_v63  ;;  %v5250_v49 = vrot.slane %v5249_v42, 1  ;;  %v4001_v29 = vrot.slane %v10693_v12, %v8307_v61  ;;  %v11361_v52 = vpack.c.bf16 %v10617_v54, %v10617_v54  ;;  %v7845_v54 = vld [vmem:[%s11319_s8 + $0x58] sm:$0xff]  }
 0x81d   :  { %7493 = vmatprep.subr.bf16.mxu1 %v7841_v26  ;;  %v11362_v45 = vpack.c.bf16 %v10621_v51, %v10621_v51  ;;  %v5215_v55 = vadd.f32 %v5214_v13, %v5213_v53  ;;  %v7844_v26 = vld [vmem:[%s11319_s8 + $0x20] sm:$0xff]   ;;  %v4021_v40 = vrot.slane %v10728_v57, %v8311_v63  ;;  %v11363_v15 = vpack.c.bf16 %v10628_v5, %v10628_v5  ;;  %v11366_v13 = vld [vmem:[#allocation56_spill] sm:$0xff] }
 0x81e   :  { %v5350_v34 = vunpack.c.l.b16 %v11361_v52  ;;  %v5227_v12 = vadd.f32 %v5226_v36, %v5225_v56  ;;  %v5260_v47 = vmul.f32 0.125, %v5179_v33  ;;  %v4056_v2 = vmul.f32 %v4009_v31, %v11364_v27  ;;  %v11368_v31 = vld [vmem:[#allocation54_spill] sm:$0xff] }
 0x81f   :  { %4239 = vmatmul.mubr.bf16.gmra.mxu1 %v4096_v8  ;;  %v5352_v20 = vunpack.c.l.b16 %v11362_v45  ;;  %v5354_v50 = vunpack.c.l.b16 %v11363_v15  ;;  %v11365_v51 = vpack.c.bf16 %v10634_v37, %v10634_v37  ;;  %v5239_v10 = vadd.f32 %v5238_v25, %v5237_v28  ;;  %v11367_v8 = vld [vmem:[#allocation31_spill] sm:$0xff]  ;;  %v7846_v37 = vld [vmem:[%s11319_s8 + $0x18] sm:$0xff]   ;;  %v7849_v15 = vld [vmem:[%s11319_s8 + $0x48] sm:$0xff]  }
 0x820   :  { %7494 = vmatpush3.bf16.msra.mxu1 %v7842_v60  ;;  %4246 = vmatprep.mubr.bf16.mxu1 %v4099_v46  ;;  %v5262_v59 = vmul.f32 0.125, %v5191_v23  ;;  %v4061_v60 = vmul.f32 %v4029_v17, %v11366_v13  ;;  %v5251_v14 = vadd.f32 %v5250_v49, %v5249_v42  ;;  %v5258_v18 = vmul.f32 0.125, %v5167_v3  ;;  %v7847_v3 = vld [vmem:[%s11319_s8 + $0x50] sm:$0xff]   ;;  %v7850_v13 = vld [vmem:[%s11319_s8 + $0x8] sm:$0xff]  }
 0x821   :  { %7495 = vmatprep.subr.bf16.mxu1 %v7843_v4  ;;  %v5356_v53 = vunpack.c.l.b16 %v11365_v51  ;;  %v5264_v5 = vmul.f32 0.125, %v5203_v0  ;;  %v4054_v56 = vmul.f32 %v4001_v29, %v11367_v8  ;;  %v5358_v36 = vunpack.c.l.b16 %v5319_v43  ;;  %v11370_v51 = vld [vmem:[#allocation32_spill] sm:$0xff] }
 0x822   :  { %v5368_v33 = vsel %vm1475_vm2, %v5348_v6, %v5346_v39  ;;  %v5266_v4 = vmul.f32 0.125, %v5215_v55  ;;  %v4059_v28 = vmul.f32 %v4021_v40, %v11368_v31  ;;  %v5268_v25 = vmul.f32 0.125, %v5227_v12  ;;  %v11369_v12 = vld [vmem:[#allocation38_spill] sm:$0xff] }
 0x823   :  { %v5369_v23 = vsel %vm1477_vm3, %v5350_v34, %v5368_v33  ;;  %v5308_v46 = vpack.c.bf16 %v5260_v47, %v5260_v47  ;;  %v4098_v42 = vpack.c.bf16 %v4056_v2, %v4054_v56  ;;  %v4025_v17 = vrot.slane %v10718_v11, %v8307_v61  ;;  %v7848_v11 = vld [vmem:[%s11319_s8 + $0x10] sm:$0xff]  }
 0x824   :  { %7496 = vmatpush3.bf16.msra.mxu1 %v7844_v26  ;;  %v5270_v32 = vmul.f32 0.125, %v5239_v10  ;;  %v5310_v43 = vpack.c.bf16 %v5262_v59, %v5262_v59  ;;  %v4101_v0 = vpack.c.bf16 %v4061_v60, %v4059_v28  ;;  %v5272_v39 = vmul.f32 0.125, %v5251_v14 }
 0x825   :  { %7497 = vmatprep.subr.bf16.mxu1 %v7845_v54  ;;  %v5306_v6 = vpack.c.bf16 %v5258_v18, %v5258_v18  ;;  %v5312_v49 = vpack.c.bf16 %v5264_v5, %v5264_v5  ;;  %v4017_v29 = vrot.slane %v10728_v57, %v8307_v61  ;;  %v5360_v52 = vunpack.c.l.b16 %v5321_v58  ;;  %v7851_v18 = vld [vmem:[%s11319_s8 + $0x40] sm:$0xff]  }
 0x826   :  { %v5370_v34 = vsel %vm1479_vm4, %v5352_v20, %v5369_v23  ;;  %v5314_v45 = vpack.c.bf16 %v5266_v4, %v5266_v4  ;;  %v5316_v26 = vpack.c.bf16 %v5268_v25, %v5268_v25  ;;  %v5347_v40 = vunpack.c.l.b16 %v5308_v46  ;;  %v7853_v46 = vld [vmem:[%s11371_s19 + $0x20] ss:$8 sps:$4 sm:$0xff]  }
 0x827   :  { %4247 = vmatmul.mubr.bf16.gmra.mxu1 %v4098_v42  ;;  %v5371_v55 = vsel %vm1481_vm5, %v5354_v50, %v5370_v34  ;;  %v4060_v47 = vmul.f32 %v4025_v17, %v11369_v12  ;;  %v5318_v9 = vpack.c.bf16 %v5270_v32, %v5270_v32  ;;  %v5349_v58 = vunpack.c.l.b16 %v5310_v43  ;;  %v7855_v42 = vld [vmem:[%s11371_s19 + $0x24] ss:$8 sps:$4 sm:$0xff]   ;;  %v7856_v17 = vld [vmem:[%s11371_s19 + $0x10] ss:$8 sps:$4 sm:$0xff]   ;;  %v7859_v43 = vld [vmem:[%s11371_s19] ss:$8 sps:$4 sm:$0xff]  }
 0x828   :  { %7498 = vmatpush3.bf16.msra.mxu1 %v7846_v37  ;;  %4254 = vmatprep.mubr.bf16.mxu1 %v4101_v0  ;;  %v5372_v57 = vsel %vm1483_vm6, %v5356_v53, %v5371_v55  ;;  %v5320_v54 = vpack.c.bf16 %v5272_v39, %v5272_v39  ;;  %v5345_v27 = vunpack.c.l.b16 %v5306_v6  ;;  %v5351_v2 = vunpack.c.l.b16 %v5312_v49  ;;  %v7852_v37 = vld [vmem:[%s11319_s8] sm:$0xff]   ;;  %v7862_v0 = vld [vmem:[%s11372_s24 + $0x78] sm:$0xff]   ;;  %v7864_v6 = vld [vmem:[%s11372_s24 + $0x70] sm:$0xff]  }
 0x829   :  { %7499 = vmatprep.subr.bf16.mxu1 %v7847_v3  ;;  %v5373_v20 = vsel %vm1485_vm7, %v5358_v36, %v5372_v57  ;;  %v4058_v10 = vmul.f32 %v4017_v29, %v11370_v51  ;;  %v5353_v59 = vunpack.c.l.b16 %v5314_v45  ;;  %v5355_v60 = vunpack.c.l.b16 %v5316_v26  ;;  %v7858_v3 = vld [vmem:[%s11371_s19 + $0x14] ss:$8 sps:$4 sm:$0xff]   ;;  %5578 = vmatprep.subr.bf16.mxu0 %v7855_v42  ;;  %v7861_v32 = vld [vmem:[%s11371_s19 + $0x4] ss:$8 sps:$4 sm:$0xff]  }
 0x82a   :  { %v5374_v50 = vsel %vm1487_vm8, %v5360_v52, %v5373_v20  ;;  %v5361_v14 = vsel %vm1475_vm2, %v5347_v40, %v5345_v27  ;;  %v5357_v5 = vunpack.c.l.b16 %v5318_v9  ;;  %v5359_v36 = vunpack.c.l.b16 %v5320_v54  ;;  %5579 = vmatpush1.bf16.msra.mxu0 %v7853_v46  ;;  %v7863_v39 = vld [vmem:[%s11372_s24 + $0x38] sm:$0xff]   ;;  %v7865_v49 = vld [vmem:[%s11372_s24 + $0x30] sm:$0xff]   ;;  %v7866_v29 = vld [vmem:[%s11372_s24 + $0x68] sm:$0xff]  }
 0x82b   :  { %v4100_v53 = vpack.c.bf16 %v4060_v47, %v4058_v10  ;;  %v5362_v8 = vsel %vm1477_vm3, %v5349_v58, %v5361_v14  ;;  %v5376_v56 = vpack.c.b16 %v5374_v50, %v5374_v50  ;;  %5580 = vmatprep.subr.bf16.mxu0 %v7858_v3  ;;  %v7867_v52 = vld [vmem:[%s11372_s24 + $0x28] sm:$0xff]   ;;  %v7868_v34 = vld [vmem:[%s11372_s24 + $0x60] sm:$0xff]   ;;  %v7871_v55 = vld [vmem:[%s11372_s24 + $0x18] sm:$0xff]   ;;  %v8015_v14 = vmov 1983009808  }
 0x82c   :  { %7500 = vmatpush3.bf16.msra.mxu1 %v7848_v11  ;;  %v5363_v33 = vsel %vm1479_vm4, %v5351_v2, %v5362_v8  ;;  %v7869_v45 = vld [vmem:[%s11372_s24 + $0x20] sm:$0xff]   ;;  %v7870_v11 = vld [vmem:[%s11372_s24 + $0x58] sm:$0xff]   ;;  %v7872_v26 = vld [vmem:[%s11372_s24 + $0x50] sm:$0xff]  }
 0x82d   :  { %7501 = vmatprep.subr.bf16.mxu1 %v7849_v15  ;;  %v5364_v4 = vsel %vm1481_vm5, %v5353_v59, %v5363_v33  ;;  %v7873_v40 = vld [vmem:[%s11372_s24 + $0x10] sm:$0xff]   ;;  %v7874_v15 = vld [vmem:[%s11372_s24 + $0x48] sm:$0xff]  }
 0x82e   :  { %v5365_v31 = vsel %vm1483_vm6, %v5355_v60, %v5364_v4  ;;  %5581 = vmatpush1.bf16.msra.mxu0 %v7856_v17  ;;  %v7875_v12 = vld [vmem:[%s11372_s24 + $0x8] sm:$0xff]   ;;  %v7241_v60 = vld [vmem:[%s11373_s6] ss:$0 sm:$0xff]  ;;  %v11374_v3 = vld [vmem:[#allocation53_spill] sm:$0xff] }
 0x82f   :  { %4255 = vmatmul.mubr.bf16.gmra.mxu1 %v4100_v53  ;;  %v5366_v28 = vsel %vm1485_vm7, %v5357_v5, %v5365_v31  ;;  %5582 = vmatprep.subr.bf16.mxu0 %v7861_v32  ;;  %v6064_v53 = vunpack.c.l.s4 %v8015_v14 }
 0x830   :  { %7502 = vmatpush3.bf16.msra.mxu1 %v7850_v13  ;;  %5507 = vmatprep.mubr.bf16.mxu1 %v5376_v56  ;;  %v5367_v23 = vsel %vm1487_vm8, %v5359_v36, %v5366_v28 }
 0x831   :  { %7503 = vmatprep.subr.bf16.mxu1 %v7851_v18  ;;  %v5375_v25 = vpack.c.b16 %v5367_v23, %v5367_v23  ;;  %v6065_v31 = vunpack.c.0.s8 %v6064_v53 }
 0x832   :  { %5583 = vmatpush1.bf16.msra.mxu0 %v7859_v43 }
 0x834   :  { %7504 = vmatpush3.bf16.msra.mxu1 %v7852_v37 }
 0x835   :  { %7551 = vmatprep.subr.bf16.mxu1 %v7862_v0 }
 0x837   :  { %5508 = vmatmul.mubr.bf16.vlgmr.msra.gmra.mxu1 %v5375_v25  ;;  %v8016_v25 = vmov 1934713408  }
 0x838   :  { %7552 = vmatpush3.bf16.msra.mxu1 %v7863_v39  ;;  %v6081_v46 = vunpack.c.l.s4 %v8016_v25  ;;  %v11375_v39 = vld [vmem:[#allocation44_spill] sm:$0xff] }
 0x839   :  { %7553 = vmatprep.subr.bf16.mxu1 %v7864_v6 }
 0x83c   :  { %7554 = vmatpush3.bf16.msra.mxu1 %v7865_v49 }
 0x83d   :  { %7555 = vmatprep.subr.bf16.mxu1 %v7866_v29 }
 0x840   :  { %7556 = vmatpush3.bf16.msra.mxu1 %v7867_v52  ;;  %v11377_v52 = vld [vmem:[#allocation36_spill] sm:$0xff] }
 0x841   :  { %7557 = vmatprep.subr.bf16.mxu1 %v7868_v34  ;;  %v10814_v34 = vsub.s32 %v6065_v31, %v11377_v52  ;;  %v7876_v31 = vld [vmem:[%s11372_s24 + $0x40] sm:$0xff]  }
 0x844   :  { %7558 = vmatpush3.bf16.msra.mxu1 %v7869_v45  ;;  %v11378_v45 = vld [vmem:[#allocation51_spill] sm:$0xff] }
 0x845   :  { %7559 = vmatprep.subr.bf16.mxu1 %v7870_v11 }
 0x848   :  { %7560 = vmatpush3.bf16.msra.mxu1 %v7871_v55 }
 0x849   :  { %7561 = vmatprep.subr.bf16.mxu1 %v7872_v26  ;;  %v6082_v26 = vunpack.c.0.s8 %v6081_v46 }
 0x84b   :  { %v10823_v14 = vsub.s32 %v6082_v26, %v11377_v52  ;;  %v7878_v26 = vld [vmem:[%s11384_s20 + $0x78] sm:$0xff]  }
 0x84c   :  { %7562 = vmatpush3.bf16.msra.mxu1 %v7873_v40  ;;  %v11379_v40 = vld [vmem:[#allocation43_spill] sm:$0xff]  ;;  %7511 = vmatprep.subr.bf16.mxu0 %v7878_v26  ;;  %v7894_v26 = vld [vmem:[%s11372_s24 + $0xf8] sm:$0xff]  }
 0x84d   :  { %7563 = vmatprep.subr.bf16.mxu1 %v7874_v15 }
 0x850   :  { %7564 = vmatpush3.bf16.msra.mxu1 %v7875_v12 }
 0x851   :  { %7565 = vmatprep.subr.bf16.mxu1 %v7876_v31  ;;  %v7882_v31 = vld [vmem:[%s11384_s20 + $0x68] sm:$0xff]  }
 0x8d7   :  { %v7465_v47 = vpop.f32.mrf.mxu1 }
 0x8d9   :  { %v7466_v57 = vpop.f32.mrf.mxu1 }
 0x8da   :  { %v7467_v13 = vadd.f32 %v7466_v57, %v7465_v47  ;;  %v11380_v47 = vld [vmem:[#allocation37_spill] sm:$0xff] }
 0x8db   :  { %v7468_v9 = vpop.f32.mrf.mxu1 }
 0x8dc   :  { %v4270_v4 = vadd.f32 %v7467_v13, %v7241_v60 }
 0x8dd   :  { %v7469_v58 = vpop.f32.mrf.mxu1 }
 0x8de   :  { %v7470_v36 = vadd.f32 %v7469_v58, %v7468_v9  ;;  %v4278_v6 = vadd.f32 %v4270_v4, %v11375_v39  ;;  %v11381_v58 = vld [vmem:[#allocation41_spill] sm:$0xff] }
 0x8df   :  { %v7471_v20 = vpop.f32.mrf.mxu1 }
 0x8e0   :  { %v4271_v43 = vadd.f32 %v7470_v36, %v7241_v60 }
 0x8e1   :  { %v7472_v54 = vpop.f32.mrf.mxu1 }
 0x8e2   :  { %v7473_v5 = vadd.f32 %v7472_v54, %v7471_v20  ;;  %v4279_v20 = vadd.f32 %v4271_v43, %v11381_v58 }
 0x8e3   :  { %v7474_v27 = vpop.f32.mrf.mxu1 }
 0x8e4   :  { %v4272_v42 = vadd.f32 %v7473_v5, %v7241_v60  ;;  %v11383_v5 = vld [vmem:[#allocation49_spill] sm:$0xff] }
 0x8e5   :  { %v7475_v2 = vpop.f32.mrf.mxu1 }
 0x8e6   :  { %v7476_v37 = vadd.f32 %v7475_v2, %v7474_v27  ;;  %v4280_v15 = vadd.f32 %v4272_v42, %v11379_v40 }
 0x8e7   :  { %v7477_v51 = vpop.f32.mrf.mxu1 }
 0x8e8   :  { %v4273_v29 = vadd.f32 %v7476_v37, %v7241_v60 }
 0x8e9   :  { %v7478_v10 = vpop.f32.mrf.mxu1 }
 0x8ea   :  { %v7479_v50 = vadd.f32 %v7478_v10, %v7477_v51  ;;  %v11382_v51 = vld [vmem:[#allocation39_spill] sm:$0xff] }
 0x8eb   :  { %v7480_v59 = vpop.f32.mrf.mxu1  ;;  %v4281_v10 = vadd.f32 %v4273_v29, %v11382_v51 }
 0x8ec   :  { %v4274_v8 = vadd.f32 %v7479_v50, %v7241_v60 }
 0x8ed   :  { %v7481_v18 = vpop.f32.mrf.mxu1 }
 0x8ee   :  { %v7482_v56 = vadd.f32 %v7481_v18, %v7480_v59  ;;  %v4282_v17 = vadd.f32 %v4274_v8, %v11374_v3  ;;  %v7242_v59 = vld [vmem:[%s11376_s12] ss:$0 sm:$0xff] }
 0x8ef   :  { %v7483_v33 = vpop.f32.mrf.mxu1 }
 0x8f0   :  { %v4275_v28 = vadd.f32 %v7482_v56, %v7241_v60  ;;  %v7283_v12 = vpack.c.bf16 %v4282_v17, %v4278_v6 }
 0x8f1   :  { %v7484_v23 = vpop.f32.mrf.mxu1 }
 0x8f2   :  { %v7485_v32 = vadd.f32 %v7484_v23, %v7483_v33  ;;  %v4283_v11 = vadd.f32 %v4275_v28, %v11378_v45  ;;  %v6069_v53 = vrot.slane %v7283_v12, %v10814_v34 }
 0x8f3   :  { %v7486_v0 = vpop.f32.mrf.mxu1 }
 0x8f4   :  { %v4276_v49 = vadd.f32 %v7485_v32, %v7241_v60  ;;  %v7285_v50 = vpack.c.bf16 %v4283_v11, %v4279_v20  ;;  %v7877_v32 = vld [vmem:[%s11372_s24] sm:$0xff]  }
 0x8f5   :  { %v7487_v55 = vpop.f32.mrf.mxu1  ;;  %7566 = vmatpush3.bf16.msra.mxu1 %v7877_v32  ;;  %v7888_v32 = vld [vmem:[%s11384_s20 + $0x50] sm:$0xff]  }
 0x8f6   :  { %v4284_v57 = vadd.f32 %v4276_v49, %v11380_v47  ;;  %v7488_v9 = vadd.f32 %v7487_v55, %v7486_v0  ;;  %v6103_v28 = vrot.slane %v7285_v50, %v10814_v34  ;;  %v11385_v49 = vmov 0  }
 0x8f7   :  { %v7505_v54 = vpop.f32.mrf.mxu1 }
 0x8f8   :  { %v7284_v27 = vpack.c.bf16 %v4284_v57, %v4280_v15  ;;  %v4277_v2 = vadd.f32 %v7488_v9, %v7241_v60  ;;  %v7879_v15 = vld [vmem:[%s11384_s20 + $0x38] sm:$0xff]  }
 0x8f9   :  { %v7506_v13 = vpop.f32.mrf.mxu1 }
 0x8fa   :  { %v6077_v18 = vrot.slane %v7284_v27, %v10814_v34  ;;  %v4285_v8 = vadd.f32 %v4277_v2, %v11383_v5  ;;  %v7507_v56 = vadd.f32 %v7506_v13, %v7505_v54 }
 0x8fb   :  { %v7508_v36 = vpop.f32.mrf.mxu1 }
 0x8fc   :  { %v6078_v33 = vcombine.low %v6069_v53, %v6077_v18  ;;  %v6079_v4 = vcombine.high %v6069_v53, %v6077_v18  ;;  %v7286_v60 = vpack.c.bf16 %v4285_v8, %v4281_v10  ;;  %v5510_v37 = vadd.f32 %v7507_v56, %v7242_v59 }
 0x8fd   :  { %v7509_v23 = vpop.f32.mrf.mxu1 }
 0x8fe   :  { %v6111_v25 = vrot.slane %v7286_v60, %v10814_v34  ;;  %v5515_v46 = vmax.f32 %v5510_v37, 0.0  ;;  %v10832_v42 = vrot.slane %v6079_v4, %v10823_v14  ;;  %v10835_v17 = vrot.slane %v6078_v33, %v10823_v14  ;;  %v7880_v60 = vld [vmem:[%s11384_s20 + $0x70] sm:$0xff]   ;;  %v7884_v23 = vld [vmem:[%s11384_s20 + $0x60] sm:$0xff]  }
 0x8ff   :  { %v7881_v37 = vld [vmem:[%s11384_s20 + $0x30] sm:$0xff]  }
 0x900   :  { %v6112_v43 = vcombine.low %v6103_v28, %v6111_v25  ;;  %v6113_v0 = vcombine.high %v6103_v28, %v6111_v25  ;;  %v5522_v6 = vpack.c.bf16 %v5515_v46, %v5515_v46  ;;  %v10841_v29 = vcombine.high %v10832_v42, %v11385_v49  ;;  %v7883_v28 = vld [vmem:[%s11384_s20 + $0x28] sm:$0xff]   ;;  %v7885_v25 = vld [vmem:[%s11384_s20 + $0x20] sm:$0xff]   ;;  %v7886_v46 = vld [vmem:[%s11384_s20 + $0x58] sm:$0xff]  }
 0x901   :  { %v6094_v11 = vcombine.high %v10835_v17, %v11385_v49  ;;  %v6145_v56 = vshrl.u32 %v10832_v42, 16  ;;  %v6133_v36 = vshrl.u32 %v10835_v17, 16 }
 0x902   :  { %7265 = vmatmul.mubr.msk.bf16.vlgmr.msra.gmra.mxu0 %vm1686_vm9, %v5522_v6  ;;  %v10844_v52 = vrot.slane %v6113_v0, %v10823_v14  ;;  %v10849_v55 = vrot.slane %v6112_v43, %v10823_v14  ;;  %v6151_v54 = vshrl.u32 %v10841_v29, 16  ;;  %v7889_v43 = vld [vmem:[%s11384_s20 + $0x10] sm:$0xff]   ;;  %v7890_v0 = vld [vmem:[%s11384_s20 + $0x48] sm:$0xff]  }
 0x903   :  { %7512 = vmatpush3.bf16.msra.mxu0 %v7879_v15  ;;  %v6139_v2 = vshrl.u32 %v6094_v11, 16  ;;  %v7891_v6 = vld [vmem:[%s11384_s20 + $0x8] sm:$0xff]  }
 0x904   :  { %v10855_v12 = vcombine.high %v10844_v52, %v11385_v49  ;;  %v6128_v57 = vcombine.high %v10849_v55, %v11385_v49  ;;  %v6144_v9 = vpack.i.b16 %v10844_v52, %v10832_v42  ;;  %v6132_v20 = vpack.i.b16 %v10849_v55, %v10835_v17  ;;  %7513 = vmatprep.subr.bf16.mxu0 %v7880_v60  ;;  %v7887_v17 = vld [vmem:[%s11384_s20 + $0x18] sm:$0xff]  }
 0x905   :  { %v6146_v18 = vshrl.u32 %v10844_v52, 16  ;;  %v6134_v8 = vshrl.u32 %v10849_v55, 16  ;;  %v7893_v55 = vld [vmem:[%s11384_s20] sm:$0xff]  }
 0x906   :  { %v6152_v27 = vshrl.u32 %v10855_v12, 16  ;;  %v6140_v10 = vshrl.u32 %v6128_v57, 16  ;;  %v6138_v50 = vpack.i.b16 %v6128_v57, %v6094_v11  ;;  %v6150_v59 = vpack.i.b16 %v10855_v12, %v10841_v29  ;;  %v7892_v11 = vld [vmem:[%s11384_s20 + $0x40] sm:$0xff]  }
 0x907   :  { %v6147_v33 = vpack.i.b16 %v6146_v18, %v6145_v56  ;;  %v6135_v4 = vpack.i.b16 %v6134_v8, %v6133_v36  ;;  %7514 = vmatpush3.bf16.msra.mxu0 %v7881_v37 }
 0x908   :  { %v6153_v13 = vpack.i.b16 %v6152_v27, %v6151_v54  ;;  %v6141_v53 = vpack.i.b16 %v6140_v10, %v6139_v2  ;;  %7515 = vmatprep.subr.bf16.mxu0 %v7882_v31  ;;  %v5523_v2 = vld [vmem:[%s8216_s30] sm:$0x3]  ;;  %s11389_s30 = sld [smem:[#allocation9_spill]] }
 0x909   :  { %v5528_v10 = vrot.slane %v5523_v2, %v8307_v61 }
 0x90a   :  { %6160 = vrot.lane.b32.xlu1 %v6153_v13, %s8017_s4  ;;  %6156 = vrot.lane.b32.xlu0 %v6141_v53, %s8017_s4  ;;  %v5532_v13 = vrot.slane %v5523_v2, %v8311_v63 }
 0x90b   :  { %7516 = vmatpush3.bf16.msra.mxu0 %v7883_v28 }
 0x90c   :  { %7517 = vmatprep.subr.bf16.mxu0 %v7884_v23 }
 0x90e   :  { %6158 = vrot.lane.b32.xlu1 %v6147_v33, %s8017_s4  ;;  %6154 = vrot.lane.b32.xlu0 %v6135_v4, %s8017_s4  ;;  %v6458_v42 = vld [vmem:[%s11389_s30 + $0x8] sm:$0xff]  ;;  %v6457_v52 = vld [vmem:[%s11389_s30] sm:$0xff] }
 0x90f   :  { %7518 = vmatpush3.bf16.msra.mxu0 %v7885_v25 }
 0x910   :  { %7519 = vmatprep.subr.bf16.mxu0 %v7886_v46 }
 0x913   :  { %7520 = vmatpush3.bf16.msra.mxu0 %v7887_v17 }
 0x914   :  { %7521 = vmatprep.subr.bf16.mxu0 %v7888_v32 }
 0x917   :  { %7522 = vmatpush3.bf16.msra.mxu0 %v7889_v43 }
 0x918   :  { %7523 = vmatprep.subr.bf16.mxu0 %v7890_v0 }
 0x91b   :  { %7524 = vmatpush3.bf16.msra.mxu0 %v7891_v6 }
 0x91c   :  { %7525 = vmatprep.subr.bf16.mxu0 %v7892_v11 }
 0x91f   :  { %7526 = vmatpush3.bf16.msra.mxu0 %v7893_v55 }
 0x920   :  { %7573 = vmatprep.subr.bf16.mxu0 %v7894_v26 }
 0x97c   :  { %v6157_v15 = vpop.permute.xlu0 %6156 }
 0x97d   :  { %v6168_v57 = vsel %vm333_vm1, %v6138_v50, %v6157_v15 }
 0x97e   :  { %6408 = vmatprep.mubr.bf16.mxu1 %v6168_v57 }
 0x980   :  { %v6155_v54 = vpop.permute.xlu0 %6154 }
 0x981   :  { %v6164_v27 = vsel %vm333_vm1, %v6132_v20, %v6155_v54 }
 0x982   :  { %6409 = vmatmul.mubr.bf16.vlgmr.msra.gmra.mxu1 %v6164_v27 }
 0x9c2   :  { %v5602_v53 = vpop.f32.mrf.mxu0 }
 0x9c3   :  { %v5603_v18 = vadd.f32 %v5602_v53, %v5528_v10 }
 0x9c4   :  { %v5604_v8 = vpop.f32.mrf.mxu0 }
 0x9c5   :  { %v5609_v56 = vadd.f32 3.0, %v5603_v18  ;;  %v5605_v36 = vadd.f32 %v5604_v8, %v5532_v13 }
 0x9c6   :  { %v5606_v33 = vpop.f32.mrf.mxu0 }
 0x9c7   :  { %v5611_v4 = vmax.f32 %v5609_v56, 0.0  ;;  %v5610_v60 = vadd.f32 3.0, %v5605_v36 }
 0x9c8   :  { %v5607_v37 = vpop.f32.mrf.mxu0 }
 0x9c9   :  { %v5613_v50 = vmin.f32 %v5611_v4, 6.0  ;;  %v5612_v31 = vmax.f32 %v5610_v60, 0.0  ;;  %v7895_v60 = vld [vmem:[%s11372_s24 + $0xb8] sm:$0xff]  }
 0x9cb   :  { %v5614_v28 = vmin.f32 %v5612_v31, 6.0  ;;  %v5615_v23 = vmul.f32 0.16666667, %v5613_v50 }
 0x9cd   :  { %v5616_v20 = vmul.f32 0.16666667, %v5614_v28 }
 0x9cf   :  { %v5619_v25 = vcombine.low %v5615_v23, %v5616_v20  ;;  %v5620_v46 = vcombine.high %v5615_v23, %v5616_v20 }
 0x9d1   :  { %v5627_v17 = vrot.slane %v5619_v25, %v11348_v21  ;;  %v5634_v32 = vrot.slane %v5620_v46, %v11348_v21 }
 0x9d3   :  { %v5635_v43 = vcombine.high %v5627_v17, %v5627_v17  ;;  %v5643_v0 = vrot.slane %v5627_v17, %v11348_v21  ;;  %v5636_v6 = vcombine.high %v5634_v32, %v5634_v32  ;;  %v5650_v36 = vrot.slane %v5634_v32, %v11348_v21  ;;  %v7899_v17 = vld [vmem:[%s11372_s24 + $0xa8] sm:$0xff]  }
 0x9d5   :  { %v5657_v11 = vrot.slane %v5635_v43, %v11348_v21  ;;  %v5676_v55 = vrot.slane %v5643_v0, %v8311_v63  ;;  %v5672_v26 = vrot.slane %v5643_v0, %v8307_v61  ;;  %v5665_v15 = vcombine.high %v5643_v0, %v5643_v0  ;;  %v7900_v0 = vld [vmem:[%s11372_s24 + $0xe0] sm:$0xff]  }
 0x9d6   :  { %v5664_v27 = vrot.slane %v5636_v6, %v11348_v21  ;;  %v7897_v21 = vld [vmem:[%s11372_s24 + $0xb0] sm:$0xff]   ;;  %v5708_v28 = vrot.slane %v5650_v36, %v8311_v63  ;;  %v5666_v32 = vcombine.high %v5650_v36, %v5650_v36 }
 0x9d7   :  { %v5684_v57 = vrot.slane %v5657_v11, %v8311_v63  ;;  %v5680_v54 = vrot.slane %v5657_v11, %v8307_v61  ;;  %v5667_v2 = vcombine.high %v5657_v11, %v5657_v11  ;;  %v5692_v10 = vrot.slane %v5665_v15, %v8311_v63 }
 0x9d8   :  { %v5750_v13 = vmul.f32 %v5676_v55, %v10516_v19  ;;  %v5749_v18 = vmul.f32 %v5672_v26, %v10619_v41  ;;  %v7896_v19 = vld [vmem:[%s11372_s24 + $0xf0] sm:$0xff]   ;;  %v5716_v41 = vrot.slane %v5664_v27, %v8311_v63  ;;  %v5688_v31 = vrot.slane %v5665_v15, %v8307_v61  ;;  %v7902_v26 = vld [vmem:[%s11372_s24 + $0xd8] sm:$0xff]  }
 0x9d9   :  { %v5752_v53 = vmul.f32 %v5684_v57, %v10521_v48  ;;  %v5751_v8 = vmul.f32 %v5680_v54, %v10624_v38  ;;  %v5700_v56 = vrot.slane %v5667_v2, %v8311_v63  ;;  %v5754_v37 = vmul.f32 %v5692_v10, %v10525_v62  ;;  %v11386_v54 = vld [vmem:[#allocation63_spill] sm:$0xff] }
 0x9da   :  { %v5696_v48 = vrot.slane %v5667_v2, %v8307_v61  ;;  %v5760_v23 = vmul.f32 %v5716_v41, %v10538_v44  ;;  %v5668_v20 = vcombine.high %v5664_v27, %v5664_v27  ;;  %v5753_v25 = vmul.f32 %v5688_v31, %v10626_v22  ;;  %v7901_v22 = vld [vmem:[%s11372_s24 + $0xa0] sm:$0xff]   ;;  %v7903_v2 = vld [vmem:[%s11372_s24 + $0x98] sm:$0xff]  }
 0x9db   :  { %v5798_v33 = vpack.c.bf16 %v5752_v53, %v5750_v13  ;;  %v5797_v4 = vpack.c.bf16 %v5751_v8, %v5749_v18  ;;  %v5756_v50 = vmul.f32 %v5700_v56, %v10527_v30  ;;  %v7898_v30 = vld [vmem:[%s11372_s24 + $0xe8] sm:$0xff]   ;;  %v5758_v46 = vmul.f32 %v5708_v28, %v10532_v16  ;;  %v7904_v13 = vld [vmem:[%s11372_s24 + $0xd0] sm:$0xff]  }
 0x9dc   :  { %v5755_v62 = vmul.f32 %v5696_v48, %v10630_v24  ;;  %v5712_v6 = vrot.slane %v5664_v27, %v8307_v61  ;;  %v5732_v11 = vrot.slane %v5668_v20, %v8311_v63  ;;  %v5704_v44 = vrot.slane %v5650_v36, %v8307_v61  ;;  %v7906_v56 = vld [vmem:[%s11372_s24 + $0xc8] sm:$0xff]   ;;  %v11388_v36 = vld [vmem:[#allocation62_spill] sm:$0xff]  ;;  %v7909_v48 = vld [vmem:[%s11372_s24 + $0x80] sm:$0xff]  }
 0x9dd   :  { %5933 = vmatprep.mubr.bf16.mxu0 %v5798_v33  ;;  %v5800_v38 = vpack.c.bf16 %v5756_v50, %v5754_v37  ;;  %v5802_v24 = vpack.c.bf16 %v5760_v23, %v5758_v46  ;;  %v5724_v16 = vrot.slane %v5666_v32, %v8311_v63  ;;  %v5728_v53 = vrot.slane %v5668_v20, %v8307_v61  ;;  %v7908_v50 = vld [vmem:[%s11372_s24 + $0xc0] sm:$0xff]   ;;  %v7913_v23 = vld [vmem:[%s11390_s28 + $0xf8] sm:$0xff]   ;;  %v7919_v46 = vld [vmem:[%s11390_s28 + $0xb0] sm:$0xff]  }
 0x9de   :  { %5934 = vmatmul.mubr.bf16.vlgmr.msra.gmra.mxu0 %v5797_v4  ;;  %v5799_v43 = vpack.c.bf16 %v5755_v62, %v5753_v25  ;;  %v5759_v55 = vmul.f32 %v5712_v6, %v10639_v1  ;;  %v5764_v15 = vmul.f32 %v5732_v11, %v10545_v7  ;;  %v5757_v57 = vmul.f32 %v5704_v44, %v10632_v35  ;;  %v7905_v7 = vld [vmem:[%s11372_s24 + $0x90] sm:$0xff]   ;;  %v11387_v35 = vld [vmem:[#allocation59_spill] sm:$0xff]  ;;  %v6161_v4 = vpop.permute.xlu1 %6160  ;;  %v7915_v20 = vld [vmem:[%s11390_s28 + $0xb8] sm:$0xff]  }
 0x9df   :  { %7574 = vmatpush3.bf16.msra.mxu0 %v7895_v60  ;;  %5941 = vmatprep.mubr.bf16.mxu0 %v5800_v38  ;;  %v5762_v27 = vmul.f32 %v5724_v16, %v11386_v54  ;;  %v5720_v1 = vrot.slane %v5666_v32, %v8307_v61  ;;  %v5763_v8 = vmul.f32 %v5728_v53, %v11387_v35  ;;  %v7907_v60 = vld [vmem:[%s11372_s24 + $0x88] sm:$0xff]   ;;  %v8018_v62 = vmov 0.0   ;;  %v7917_v25 = vld [vmem:[%s11390_s28 + $0xf0] sm:$0xff]   ;;  %v7929_v6 = vld [vmem:[%s11390_s28 + $0xd8] sm:$0xff]  }
 0x9e0   :  { %7575 = vmatprep.subr.bf16.mxu0 %v7896_v19  ;;  %v5801_v10 = vpack.c.bf16 %v5759_v55, %v5757_v57  ;;  %v6176_v19 = vsel %vm333_vm1, %v6150_v59, %v6161_v4  ;;  %v6460_v59 = vld [vmem:[%s11389_s30 + $0x18] sm:$0xff]  ;;  %7654 = vmatprep.subr.mxu1 %v8018_v62  ;;  %v7923_v32 = vld [vmem:[%s11390_s28 + $0xa8] sm:$0xff]   ;;  %v7933_v11 = vld [vmem:[%s11390_s28 + $0xd0] sm:$0xff]  }
 0x9e1   :  { %v5804_v18 = vpack.c.bf16 %v5764_v15, %v5762_v27  ;;  %v5761_v33 = vmul.f32 %v5720_v1, %v11388_v36  ;;  %7662 = vmatprep.mubr.msk.f32.mxu1 %vm8019_vm10, %v8018_v62  ;;  %7655 = vmatpush3.msra.mxu1 %v6460_v59  ;;  %v7935_v44 = vld [vmem:[%s11390_s28 + $0x90] sm:$0xff]   ;;  %v7282_v1 = vld [vmem:[%s8226_s25] ss:$0 sm:$0xff]  ;;  %s11392_s25 = sld [smem:[#allocation5_spill]] }
 0x9e2   :  { %v6159_v41 = vpop.permute.xlu1 %6158  ;;  %7656 = vmatprep.subr.mxu1 %v8018_v62 }
 0x9e3   :  { %7576 = vmatpush3.bf16.msra.mxu0 %v7897_v21  ;;  %v5803_v37 = vpack.c.bf16 %v5763_v8, %v5761_v33  ;;  %v6172_v38 = vsel %vm333_vm1, %v6144_v9, %v6159_v41  ;;  %v7910_v9 = vld [vmem:[%s11390_s28 + $0x78] sm:$0xff]  }
 0x9e4   :  { %7577 = vmatprep.subr.bf16.mxu0 %v7898_v30  ;;  %v6459_v30 = vld [vmem:[%s11389_s30 + $0x10] sm:$0xff] }
 0x9e5   :  { %7657 = vmatpush3.msra.mxu1 %v6459_v30  ;;  %v7287_v30 = vld [vmem:[%s11391_s1] ss:$0 sm:$0xff] }
 0x9e6   :  { %5942 = vmatmul.mubr.bf16.gmra.mxu0 %v5799_v43  ;;  %7658 = vmatprep.subr.mxu1 %v8018_v62  ;;  %v7925_v43 = vld [vmem:[%s11390_s28 + $0xe0] sm:$0xff]  }
 0x9e7   :  { %5949 = vmatprep.mubr.bf16.mxu0 %v5802_v24  ;;  %7578 = vmatpush3.bf16.msra.mxu0 %v7899_v17  ;;  %v7921_v17 = vld [vmem:[%s11390_s28 + $0xe8] sm:$0xff]   ;;  %v7931_v24 = vld [vmem:[%s11390_s28 + $0x98] sm:$0xff]  }
 0x9e8   :  { %7579 = vmatprep.subr.bf16.mxu0 %v7900_v0  ;;  %7659 = vmatpush3.msra.mxu1 %v6458_v42  ;;  %v7927_v0 = vld [vmem:[%s11390_s28 + $0xa0] sm:$0xff]  }
 0x9e9   :  { %7660 = vmatprep.subr.mxu1 %v8018_v62 }
 0x9ea   :  { %7661 = vmatpush3.msra.mxu1 %v6457_v52 }
 0x9eb   :  { %7580 = vmatpush3.bf16.msra.mxu0 %v7901_v22  ;;  %7600 = vmatprep.subr.bf16.mxu1 %v7910_v9 }
 0x9ec   :  { %7581 = vmatprep.subr.bf16.mxu0 %v7902_v26 }
 0x9ee   :  { %5950 = vmatmul.mubr.bf16.gmra.mxu0 %v5801_v10 }
 0x9ef   :  { %5957 = vmatprep.mubr.bf16.mxu0 %v5804_v18  ;;  %7582 = vmatpush3.bf16.msra.mxu0 %v7903_v2 }
 0x9f0   :  { %7583 = vmatprep.subr.bf16.mxu0 %v7904_v13 }
 0x9f3   :  { %7584 = vmatpush3.bf16.msra.mxu0 %v7905_v7 }
 0x9f4   :  { %7585 = vmatprep.subr.bf16.mxu0 %v7906_v56 }
 0x9f6   :  { %5958 = vmatmul.mubr.bf16.gmra.mxu0 %v5803_v37 }
 0x9f7   :  { %7586 = vmatpush3.bf16.msra.mxu0 %v7907_v60  ;;  %6448 = vmatprep.mubr.bf16.mxu0 %v6176_v19 }
 0x9f8   :  { %7587 = vmatprep.subr.bf16.mxu0 %v7908_v50 }
 0x9fb   :  { %7588 = vmatpush3.bf16.msra.mxu0 %v7909_v48 }
 0x9fc   :  { %7622 = vmatprep.subr.bf16.mxu0 %v7913_v23 }
 0x9fe   :  { %6449 = vmatmul.mubr.bf16.vlgmr.msra.gmra.mxu0 %v6172_v38 }
 0x9ff   :  { %7623 = vmatpush3.bf16.msra.mxu0 %v7915_v20 }
 0xa00   :  { %7624 = vmatprep.subr.bf16.mxu0 %v7917_v25 }
 0xa03   :  { %7625 = vmatpush3.bf16.msra.mxu0 %v7919_v46 }
 0xa04   :  { %7626 = vmatprep.subr.bf16.mxu0 %v7921_v17 }
 0xa07   :  { %7627 = vmatpush3.bf16.msra.mxu0 %v7923_v32 }
 0xa08   :  { %7628 = vmatprep.subr.bf16.mxu0 %v7925_v43 }
 0xa0b   :  { %7629 = vmatpush3.bf16.msra.mxu0 %v7927_v0 }
 0xa0c   :  { %7630 = vmatprep.subr.bf16.mxu0 %v7929_v6 }
 0xa0f   :  { %7631 = vmatpush3.bf16.msra.mxu0 %v7931_v24  ;;  %v7937_v24 = vld [vmem:[%s11390_s28 + $0xc8] sm:$0xff]  }
 0xa10   :  { %7632 = vmatprep.subr.bf16.mxu0 %v7933_v11 }
 0xa13   :  { %7633 = vmatpush3.bf16.msra.mxu0 %v7935_v44 }
 0xa14   :  { %7634 = vmatprep.subr.bf16.mxu0 %v7937_v24  ;;  %v7320_v24 = vld [vmem:[%s11393_s2] ss:$0 sm:$0xff] }
 0xa42   :  { %v7567_v31 = vpop.f32.mrf.mxu1 }
 0xa44   :  { %v7568_v21 = vpop.f32.mrf.mxu1 }
 0xa45   :  { %v10956_v29 = vadd.f32 %v7568_v21, %v7567_v31 }
 0xa46   :  { %v7570_v12 = vpop.f32.mrf.mxu1 }
 0xa47   :  { %v6411_v46 = vadd.f32 %v10956_v29, %v7287_v30  ;;  %v7924_v30 = vld [vmem:[%s11390_s28 + $0x58] sm:$0xff]  }
 0xa48   :  { %v7571_v28 = vpop.f32.mrf.mxu1 }
 0xa9e   :  { %v7527_v22 = vpop.f32.mrf.mxu0 }
 0xaa0   :  { %v7528_v16 = vpop.f32.mrf.mxu0 }
 0xaa1   :  { %v7529_v53 = vadd.f32 %v7528_v16, %v7527_v22  ;;  %v7911_v16 = vld [vmem:[%s11390_s28 + $0x38] sm:$0xff]  }
 0xaa2   :  { %v7530_v55 = vpop.f32.mrf.mxu0 }
 0xaa3   :  { %v5973_v36 = vadd.f32 %v7529_v53, %v7282_v1  ;;  %v7914_v53 = vld [vmem:[%s11390_s28 + $0x30] sm:$0xff]  }
 0xaa4   :  { %v7531_v26 = vpop.f32.mrf.mxu0 }
 0xaa5   :  { %v7532_v4 = vadd.f32 %v7531_v26, %v7530_v55  ;;  %v5981_v38 = vadd.f32 %v5973_v36, %v11375_v39 }
 0xaa6   :  { %v7533_v15 = vpop.f32.mrf.mxu0 }
 0xaa7   :  { %v5974_v21 = vadd.f32 %v7532_v4, %v7282_v1  ;;  %v7918_v4 = vld [vmem:[%s11390_s28 + $0x28] sm:$0xff]  }
 0xaa8   :  { %v7534_v57 = vpop.f32.mrf.mxu0 }
 0xaa9   :  { %v7535_v8 = vadd.f32 %v7534_v57, %v7533_v15  ;;  %v5982_v20 = vadd.f32 %v5974_v21, %v11381_v58  ;;  %v7938_v58 = vld [vmem:[%s11390_s28 + $0x88] sm:$0xff]   ;;  %v7912_v57 = vld [vmem:[%s11390_s28 + $0x70] sm:$0xff]  }
 0xaaa   :  { %v7536_v54 = vpop.f32.mrf.mxu0  ;;  %7635 = vmatpush3.bf16.msra.mxu0 %v7938_v58 }
 0xaab   :  { %v5975_v19 = vadd.f32 %v7535_v8, %v7282_v1 }
 0xaac   :  { %v7537_v27 = vpop.f32.mrf.mxu0 }
 0xaad   :  { %v7538_v60 = vadd.f32 %v7537_v27, %v7536_v54  ;;  %v5983_v42 = vadd.f32 %v5975_v19, %v11379_v40  ;;  %v7940_v54 = vld [vmem:[%s11390_s28 + $0xc0] sm:$0xff]  }
 0xaae   :  { %v7539_v2 = vpop.f32.mrf.mxu0  ;;  %v7941_v27 = vld [vmem:[%s11390_s28 + $0x80] sm:$0xff]   ;;  %7636 = vmatprep.subr.bf16.mxu0 %v7940_v54 }
 0xaaf   :  { %v5976_v59 = vadd.f32 %v7538_v60, %v7282_v1  ;;  %7637 = vmatpush3.bf16.msra.mxu0 %v7941_v27 }
 0xab0   :  { %v7540_v10 = vpop.f32.mrf.mxu0 }
 0xab1   :  { %v7541_v13 = vadd.f32 %v7540_v10, %v7539_v2  ;;  %v5984_v17 = vadd.f32 %v5976_v59, %v11382_v51  ;;  %v7922_v59 = vld [vmem:[%s11390_s28 + $0x20] sm:$0xff]  }
 0xab2   :  { %v7542_v18 = vpop.f32.mrf.mxu0 }
 0xab3   :  { %v5977_v7 = vadd.f32 %v7541_v13, %v7282_v1 }
 0xab4   :  { %v7543_v35 = vpop.f32.mrf.mxu0 }
 0xab5   :  { %v7544_v56 = vadd.f32 %v7543_v35, %v7542_v18  ;;  %v5985_v37 = vadd.f32 %v5977_v7, %v11374_v3  ;;  %v7916_v7 = vld [vmem:[%s11390_s28 + $0x68] sm:$0xff]  }
 0xab6   :  { %v7545_v33 = vpop.f32.mrf.mxu0 }
 0xab7   :  { %v5978_v48 = vadd.f32 %v7544_v56, %v7282_v1  ;;  %v7322_v28 = vpack.c.bf16 %v5985_v37, %v5981_v38 }
 0xab8   :  { %v7546_v50 = vpop.f32.mrf.mxu0 }
 0xab9   :  { %v7547_v41 = vadd.f32 %v7546_v50, %v7545_v33  ;;  %v5986_v52 = vadd.f32 %v5978_v48, %v11378_v45  ;;  %v6622_v32 = vrot.slane %v7322_v28, %v10814_v34 }
 0xaba   :  { %v7548_v31 = vpop.f32.mrf.mxu0 }
 0xabb   :  { %v5979_v12 = vadd.f32 %v7547_v41, %v7282_v1  ;;  %v7324_v43 = vpack.c.bf16 %v5986_v52, %v5982_v20  ;;  %v7920_v41 = vld [vmem:[%s11390_s28 + $0x60] sm:$0xff]   ;;  %v7926_v52 = vld [vmem:[%s11390_s28 + $0x18] sm:$0xff]   ;;  %v7934_v20 = vld [vmem:[%s11390_s28 + $0x8] sm:$0xff]  }
 0xabc   :  { %v7549_v62 = vpop.f32.mrf.mxu0 }
 0xabd   :  { %v5987_v3 = vadd.f32 %v5979_v12, %v11380_v47  ;;  %v7550_v9 = vadd.f32 %v7549_v62, %v7548_v31  ;;  %v6656_v55 = vrot.slane %v7324_v43, %v10814_v34 }
 0xabe   :  { %v7589_v23 = vpop.f32.mrf.mxu0 }
 0xabf   :  { %v7323_v39 = vpack.c.bf16 %v5987_v3, %v5983_v42  ;;  %v5980_v25 = vadd.f32 %v7550_v9, %v7282_v1  ;;  %v7928_v3 = vld [vmem:[%s11390_s28 + $0x50] sm:$0xff]  }
 0xac0   :  { %v7590_v40 = vpop.f32.mrf.mxu0  ;;  %v7930_v9 = vld [vmem:[%s11390_s28 + $0x10] sm:$0xff]  }
 0xac1   :  { %v6630_v45 = vrot.slane %v7323_v39, %v10814_v34  ;;  %v5988_v47 = vadd.f32 %v5980_v25, %v11383_v5  ;;  %v7591_v0 = vadd.f32 %v7590_v40, %v7589_v23  ;;  %v7932_v23 = vld [vmem:[%s11390_s28 + $0x48] sm:$0xff]   ;;  %v7936_v39 = vld [vmem:[%s11390_s28 + $0x40] sm:$0xff]  }
 0xac2   :  { %v7592_v6 = vpop.f32.mrf.mxu0  ;;  %v7939_v25 = vld [vmem:[%s11390_s28] sm:$0xff]  }
 0xac3   :  { %v6631_v11 = vcombine.low %v6622_v32, %v6630_v45  ;;  %v7325_v29 = vpack.c.bf16 %v5988_v47, %v5984_v17  ;;  %v6451_v44 = vadd.f32 %v7591_v0, %v6411_v46  ;;  %v6632_v51 = vcombine.high %v6622_v32, %v6630_v45  ;;  %v7039_v6 = vld [vmem:[%s11392_s25] sm:$0xff] }
 0xac4   :  { %v7593_v22 = vpop.f32.mrf.mxu0  ;;  %vm7040_vm12 = vcmp.ne.s32.totalorder %v7039_v6, 0 }
 0xac5   :  { %v6664_v5 = vrot.slane %v7325_v29, %v10814_v34  ;;  %v6456_v26 = vmax.f32 %v6451_v44, 0.0  ;;  %v10994_v15 = vrot.slane %v6631_v11, %v10823_v14  ;;  %v11001_v13 = vrot.slane %v6632_v51, %v10823_v14 }
 0xac6   :  { %v8020_v22 = vmov 1  }
 0xac7   :  { %v6665_v2 = vcombine.low %v6656_v55, %v6664_v5  ;;  %v6666_v10 = vcombine.high %v6656_v55, %v6664_v5  ;;  %7663 = vmatmul.mubr.msk.f32.vlgmr.msra.gmra.mxu1 %vm6468_vm11, %v6456_v26  ;;  %v6647_v18 = vcombine.high %v10994_v15, %v11385_v49  ;;  %v6686_v35 = vshrl.u32 %v10994_v15, 16  ;;  %7717 = vset.pattern.permute.xlu0 %v8020_v22  ;;  %v7326_v26 = vld [vmem:[%s11394_s7] ss:$0 sm:$0xff] }
 0xac8   :  { %7601 = vmatpush3.bf16.msra.mxu1 %v7911_v16  ;;  %v6648_v33 = vcombine.high %v11001_v13, %v11385_v49  ;;  %v6698_v21 = vshrl.u32 %v11001_v13, 16 }
 0xac9   :  { %v6673_v34 = vrot.slane %v6665_v2, %v10823_v14  ;;  %v6680_v1 = vrot.slane %v6666_v10, %v10823_v14  ;;  %7602 = vmatprep.subr.bf16.mxu1 %v7912_v57  ;;  %v6692_v50 = vshrl.u32 %v6647_v18, 16 }
 0xaca   :  { %v6704_v62 = vshrl.u32 %v6648_v33, 16 }
 0xacb   :  { %v6687_v8 = vshrl.u32 %v6673_v34, 16  ;;  %v6681_v56 = vcombine.high %v6673_v34, %v11385_v49  ;;  %v6682_v36 = vcombine.high %v6680_v1, %v11385_v49  ;;  %v6685_v60 = vpack.i.b16 %v6673_v34, %v10994_v15 }
 0xacc   :  { %7603 = vmatpush3.bf16.msra.mxu1 %v7914_v53  ;;  %v6697_v14 = vpack.i.b16 %v6680_v1, %v11001_v13  ;;  %v6699_v48 = vshrl.u32 %v6680_v1, 16 }
 0xacd   :  { %v6688_v37 = vpack.i.b16 %v6687_v8, %v6686_v35  ;;  %v6693_v19 = vshrl.u32 %v6681_v56, 16  ;;  %7604 = vmatprep.subr.bf16.mxu1 %v7916_v7  ;;  %v6691_v38 = vpack.i.b16 %v6681_v56, %v6647_v18  ;;  %v6703_v31 = vpack.i.b16 %v6682_v36, %v6648_v33 }
 0xace   :  { %v6705_v12 = vshrl.u32 %v6682_v36, 16  ;;  %v6700_v28 = vpack.i.b16 %v6699_v48, %v6698_v21  ;;  %v7010_v36 = vld [vmem:[%s11395_s10] sm:$0x3] }
 0xacf   :  { %6707 = vrot.lane.b32.xlu1 %v6688_v37, %s8017_s4  ;;  %v6694_v49 = vpack.i.b16 %v6693_v19, %v6692_v50  ;;  %v7020_v33 = vrot.slane %v7010_v36, %v8307_v61  ;;  %v7359_v37 = vld [vmem:[%s11396_s11] ss:$0 sm:$0xff] }
 0xad0   :  { %7605 = vmatpush3.bf16.msra.mxu1 %v7918_v4  ;;  %v6706_v42 = vpack.i.b16 %v6705_v12, %v6704_v62 }
 0xad1   :  { %6709 = vrot.lane.b32.xlu0 %v6694_v49, %s8017_s4  ;;  %7606 = vmatprep.subr.bf16.mxu1 %v7920_v41 }
 0xad3   :  { %6711 = vrot.lane.b32.xlu1 %v6700_v28, %s8017_s4 }
 0xad4   :  { %7607 = vmatpush3.bf16.msra.mxu1 %v7922_v59 }
 0xad5   :  { %6713 = vrot.lane.b32.xlu0 %v6706_v42, %s8017_s4  ;;  %7608 = vmatprep.subr.bf16.mxu1 %v7924_v30 }
 0xad8   :  { %7609 = vmatpush3.bf16.msra.mxu1 %v7926_v52 }
 0xad9   :  { %7610 = vmatprep.subr.bf16.mxu1 %v7928_v3 }
 0xadc   :  { %7611 = vmatpush3.bf16.msra.mxu1 %v7930_v9 }
 0xadd   :  { %7612 = vmatprep.subr.bf16.mxu1 %v7932_v23 }
 0xae0   :  { %7613 = vmatpush3.bf16.msra.mxu1 %v7934_v20 }
 0xae1   :  { %7614 = vmatprep.subr.bf16.mxu1 %v7936_v39 }
 0xae4   :  { %7615 = vmatpush3.bf16.msra.mxu1 %v7939_v25 }
 0xb41   :  { %v6708_v46 = vpop.permute.xlu1 %6707 }
 0xb42   :  { %v6717_v40 = vsel %vm333_vm1, %v6685_v60, %v6708_v46 }
 0xb43   :  { %v6710_v17 = vpop.permute.xlu0 %6709 }
 0xb44   :  { %v6721_v32 = vsel %vm333_vm1, %v6691_v38, %v6710_v17 }
 0xb45   :  { %6961 = vmatprep.mubr.bf16.mxu1 %v6721_v32  ;;  %v6712_v43 = vpop.permute.xlu1 %6711 }
 0xb46   :  { %6962 = vmatmul.mubr.bf16.vlgmr.msra.gmra.mxu1 %v6717_v40  ;;  %v6725_v0 = vsel %vm333_vm1, %v6697_v14, %v6712_v43  ;;  %v7036_v14 = vrot.slane %v7010_v36, %v8311_v63 }
 0xb47   :  { %v6714_v45 = vpop.permute.xlu0 %6713 }
 0xb48   :  { %v6729_v47 = vsel %vm333_vm1, %v6703_v31, %v6714_v45 }
 0xb49   :  { %7001 = vmatprep.mubr.bf16.mxu0 %v6729_v47 }
 0xb4a   :  { %7002 = vmatmul.mubr.bf16.vlgmr.msra.gmra.mxu0 %v6725_v0 }
 0xb87   :  { %v6538_v58 = vpop.f32.mrf.mxu1 }
 0xb88   :  { %v6539_v11 = vadd.f32 %v7320_v24, %v6538_v58 }
 0xb89   :  { %v7664_v29 = vpop.f32.mrf.mxu1 }
 0xb8a   :  { %v7041_v44 = vsel %vm7040_vm12, %v6539_v11, -1e+08 }
 0xb8b   :  { %v7042_v51 = vsel %vm6468_vm11, %v7041_v44, -inf }
 0xb8c   :  { %7043 = vmax.xlane.f32.xlu0 %v7042_v51 }
 0xc06   :  { %v7616_v16 = vpop.f32.mrf.mxu1 }
 0xc08   :  { %v7617_v55 = vpop.f32.mrf.mxu1 }
 0xc09   :  { %v7618_v5 = vadd.f32 %v7617_v55, %v7616_v16 }
 0xc0a   :  { %v7619_v15 = vpop.f32.mrf.mxu1  ;;  %v7638_v57 = vpop.f32.mrf.mxu0 }
 0xc0b   :  { %v6964_v2 = vadd.f32 %v7618_v5, %v7326_v26 }
 0xc0c   :  { %v7620_v54 = vpop.f32.mrf.mxu1  ;;  %v7639_v27 = vpop.f32.mrf.mxu0 }
 0xc0d   :  { %v7640_v10 = vadd.f32 %v7639_v27, %v7638_v57 }
 0xc0e   :  { %v7641_v13 = vpop.f32.mrf.mxu0 }
 0xc0f   :  { %v7004_v53 = vadd.f32 %v7640_v10, %v6964_v2 }
 0xc10   :  { %v7642_v34 = vpop.f32.mrf.mxu0 }
 0xc11   :  { %v7009_v18 = vmax.f32 %v7004_v53, 0.0 }
 0xc13   :  { %7014 = vperm.xlu1 %7715, %v7009_v18  }
 0xc15   :  { %v7044_v1 = vpop.xlane.xlu0 %7043 }
 0xc16   :  { %v7045_v7 = vsub.f32 %v7041_v44, %v7044_v1 }
 0xc17   :  { %7716 = vset.pattern.permute.xlu1 %v8020_v22 }
 0xc18   :  { %7030 = vperm.xlu1 %7716, %v7009_v18   ;;  %v7046_v35 = vmul.f32 1.442695, %v7045_v7 }
 0xc1a   :  { %7942 = vpow2.f32 %v7046_v35 }
 0xc27   :  { %v7943_v8 = vpop.eup %7942 }
 0xc28   :  { %v7048_v56 = vsel %vm6468_vm11, %v7943_v8, 0.0 }
 0xc3c   :  { %7049 = vadd.xlane.f32.xlu1 %v7048_v56 }
 0xc8e   :  { %v7015_v4 = vpop.permute.xlu1 %7014 }
 0xc8f   :  { %v7021_v60 = vmul.f32 %v7020_v33, %v7015_v4 }
 0xc91   :  { %v7028_v19 = vadd.f32 %v7359_v37, %v7021_v60 }
 0xc93   :  { %v7031_v50 = vpop.permute.xlu1 %7030 }
 0xc94   :  { %v7037_v48 = vmul.f32 %v7036_v14, %v7031_v50 }
 0xc96   :  { %v7038_v41 = vadd.f32 %v7037_v48, %v7028_v19 }
 0xc98   :  { %7944 = vtanh.f32 %v7038_v41 }
 0xca5   :  { %v7945_v38 = vpop.eup %7944 }
 0xca6   :  { %7057 = vrot.lane.b32.xlu0 %v7945_v38, %s8021_s15 }
 0xcc5   :  { %v7050_v31 = vpop.xlane.xlu1 %7049 }
 0xcc6   :  { %7946 = vlog2.f32 %v7050_v31 }
 0xcd3   :  { %v7947_v49 = vpop.eup %7946 }
 0xcd4   :  { %v7052_v21 = vmul.f32 0.6931472, %v7947_v49 }
 0xcd6   :  { %v7053_v12 = vadd.f32 %v7052_v21, %v7044_v1 }
 0xcd8   :  { %v7054_v61 = vsub.f32 %v7041_v44, %v7053_v12 }
 0xd18   :  { %v7058_v59 = vpop.permute.xlu0 %7057 }
 0xd19   :  { %v7060_v63 = vsel %vm6468_vm11, %v7054_v61, %v7058_v59 }
 0xd1a   :  { %v7062_v28 = vsel %vm7061_vm13, %v7060_v63, 0.0 }
 0xd1b   :  { %7063 = vst [vmem:[#allocation2] sm:$0xff] %v7062_v28 }
 0xd1c   :  { %7962 = shalt.err (!%p7959_p4)
}
 0xd1d   :  { %7073 = dma.vmem_to_hbm [thread:$0]  %s7071_s18, 128, %s8231_s27, [#allocation3]  }
 0xd1e   :  { %7971 = dma.done.wait [#allocation3], 128  }
 0xd1f   :  { %7972 = vsyncadd [#allocation3], 4294967168 }
 0xd20   :  { %7077 = vsyncpa [#allocation3], 1 }

</bundles_post_ra>
